<compile_context>
chip_gen: v7x
topology: tpu7x:2x2x1
jax: 0.10.0
libtpu: 0.0.40
codegen_flags: <defaults>
</compile_context>

<pallas_src>
import jax
import jax.numpy as jnp
import numpy as np
from jax import lax
from jax.experimental import pallas as pl
from jax.experimental.pallas import tpu as pltpu

# ------------------------- static problem sizes -------------------------
B = 2                      # batch
H = W = 16                 # input spatial (small shape per instructions)
C1 = 32                    # conv1 out channels
C2 = 64                    # conv2 out channels
C2P = 128                  # conv2 channels zero-padded to a full lane width
K = 3                      # kernel size, stride 1, VALID padding
H1, W1 = H - (K - 1), W - (K - 1)        # 14 x 14 after conv1
H2, W2 = H1 - (K - 1), W1 - (K - 1)      # 12 x 12 after conv2
HP, WP = H2 // 2, W2 // 2                # 6 x 6 after 2x2 maxpool
NP1 = B * H1 * W1                        # 392 conv1 output rows
NP2 = B * H2 * W2                        # 288 conv2 output rows
NOUT = B * HP * WP                       # 72  pooled rows


# ------------------------------ kernel ----------------------------------
def net1_kernel(x_ref, w1_ref, b1_ref, w2_ref, b2_ref, o_ref, patch_ref):
    # x_ref    : (B, H, W)            f32 input (Cin = 1, squeezed in wrapper)
    # w1_ref   : (K*K, C1)            f32 conv1 weights, tap order (kh, kw)
    # b1_ref   : (1, C1)              f32
    # w2_ref   : (K*K*C1, C2P)        bf16 conv2 weights, rows (kh, kw, cin), lane-padded
    # b2_ref   : (1, C2P)             f32
    # o_ref    : (NOUT, C2P)          f32 pooled activations, dense (72, 128) slab
    # patch_ref: (NP2, K*K*C1)        bf16 VMEM scratch for conv2 im2col

    x = x_ref[...]

    # ---- conv1: in-kernel im2col (tiny ~2 KB) + one MXU matmul + bias + ReLU ----
    xcol = jnp.stack(
        [x[:, kh:kh + H1, kw:kw + W1] for kh in range(K) for kw in range(K)],
        axis=-1).reshape(NP1, K * K)                          # (392, 9)
    a1 = jnp.dot(xcol, w1_ref[...], preferred_element_type=jnp.float32)
    a1 = jnp.maximum(a1 + b1_ref[...], 0.0)                   # bias+ReLU in f32 (v5e VPU)
    a1 = a1.astype(jnp.bfloat16).reshape(B, H1, W1, C1)       # cast once; shuffles run in bf16

    # ---- conv2 im2col: 9 lane-aligned bf16 stores into the VMEM scratch ----
    for t in range(K * K):
        kh, kw = t // K, t % K
        win = a1[:, kh:kh + H2, kw:kw + W2, :].reshape(NP2, C1)   # (288, 32) bf16
        patch_ref[:, t * C1:(t + 1) * C1] = win

    # ---- conv2: single K=288 matmul, bf16 operands, f32 accumulation ----
    a2 = jnp.dot(patch_ref[...], w2_ref[...],
                 preferred_element_type=jnp.float32)          # (288, C2P)
    a2 = jnp.maximum(a2 + b2_ref[...], 0.0)

    # ---- 2x2 max pool, stride 2 (rows ordered (b, h2, w2)) ----
    a2 = a2.reshape(B * H2 * WP, 2, C2P).max(axis=1)          # pool along W -> (144, 128)
    pooled = a2.reshape(B * HP, 2, WP, C2P).max(axis=1)       # pool along H -> (12, 6, 128)

    # dropout(p=0.25): identity in inference mode.
    # TODO(synk): train-mode dropout (pltpu.prng_seed + prng_random_bits mask, 1/(1-p) scale) not implemented.

    o_ref[...] = pooled.reshape(NOUT, C2P)                    # dense, unmasked store


# -------------------- one-time parameter re-layout -----------------------
def prepare_params(w1_oihw, b1, w2_oihw, b2):
    """Hoisted out of the per-call path: run once, reuse the results every forward."""
    w1_k = w1_oihw[:, 0].reshape(C1, K * K).T                         # (9, C1), taps (kh, kw)
    b1_k = b1.reshape(1, C1)
    w2_k = jnp.transpose(w2_oihw, (2, 3, 1, 0)).reshape(K * K * C1, C2)   # (288, 64)
    w2_k = jnp.pad(w2_k, ((0, 0), (0, C2P - C2))).astype(jnp.bfloat16)    # lane-pad to 128
    b2_k = jnp.pad(b2.reshape(1, C2), ((0, 0), (0, C2P - C2)))
    return w1_k, b1_k, w2_k, b2_k


_FLOPS = 2 * (NP1 * K * K * C1 + NP2 * K * K * C1 * C2P)
_BYTES = (B * H * W * 4            # x
          + K * K * C1 * 4 + C1 * 4          # w1, b1
          + K * K * C1 * C2P * 2 + C2P * 4   # w2 (bf16), b2
          + NOUT * C2P * 4)                  # output slab


# ------------------------------ wrapper ----------------------------------
@jax.jit
def net1_forward(x_nchw, w1_k, b1_k, w2_k, b2_k):
    """x_nchw: (B, 1, H, W) f32 -> (B, C2*HP*WP) f32, matching torch.flatten(NCHW, 1)."""
    x = x_nchw.reshape(B, H, W)                                       # Cin == 1
    out = pl.pallas_call(
        net1_kernel,
        out_shape=jax.ShapeDtypeStruct((NOUT, C2P), jnp.float32),
        scratch_shapes=[pltpu.VMEM((NP2, K * K * C1), jnp.bfloat16)],
        cost_estimate=pl.CostEstimate(flops=_FLOPS, transcendentals=0,
                                      bytes_accessed=_BYTES),
    )(x, w1_k, b1_k, w2_k, b2_k)
    out = out[:, :C2].reshape(B, HP, WP, C2)                          # strip channel padding
    # restore PyTorch NCHW flatten ordering: (B, C2, HP, WP) -> (B, C2*HP*WP)
    return jnp.transpose(out, (0, 3, 1, 2)).reshape(B, -1)


# ------------------------------ reference --------------------------------
def net1_reference(x_nchw, w1_oihw, b1, w2_oihw, b2):
    dn = ("NCHW", "OIHW", "NCHW")
    y = lax.conv_general_dilated(x_nchw, w1_oihw, (1, 1), "VALID",
                                 dimension_numbers=dn)
    y = jax.nn.relu(y + b1.reshape(1, C1, 1, 1))
    y = lax.conv_general_dilated(y, w2_oihw, (1, 1), "VALID",
                                 dimension_numbers=dn)
    y = jax.nn.relu(y + b2.reshape(1, C2, 1, 1))
    y = lax.reduce_window(y, -jnp.inf, lax.max,
                          (1, 1, 2, 2), (1, 1, 2, 2), "VALID")
    return y.reshape(B, -1)


if __name__ == "__main__":
    key = jax.random.PRNGKey(0)
    kx, k1, k2, k3, k4 = jax.random.split(key, 5)

    x = jax.random.normal(kx, (B, 1, H, W), jnp.float32)
    w1 = jax.random.normal(k1, (C1, 1, K, K), jnp.float32) * 0.1
    b1 = jax.random.normal(k2, (C1,), jnp.float32) * 0.1
    w2 = jax.random.normal(k3, (C2, C1, K, K), jnp.float32) * 0.05
    b2 = jax.random.normal(k4, (C2,), jnp.float32) * 0.1

    params = prepare_params(w1, b1, w2, b2)          # one-time weight re-layout
    out = jax.block_until_ready(net1_forward(x, *params))
    ref = jax.block_until_ready(net1_reference(x, w1, b1, w2, b2))

    assert out.shape == (B, C2 * HP * WP), out.shape
    # tolerance relaxed vs f32-only math: conv2 uses bf16 MXU operands (f32 accumulation)
    np.testing.assert_allclose(np.asarray(out), np.asarray(ref),
                               rtol=1e-2, atol=1e-2)
    print("KERNEL_OK")
</pallas_src>

<mosaic_0001>
module attributes {stable_mosaic.version = 11 : i64} {
  func.func @net1_kernel(%arg0: memref<2x16x16xf32, #tpu.memory_space<vmem>>, %arg1: memref<9x32xf32, #tpu.memory_space<vmem>>, %arg2: memref<1x32xf32, #tpu.memory_space<vmem>>, %arg3: memref<288x128xbf16, #tpu.memory_space<vmem>>, %arg4: memref<1x128xf32, #tpu.memory_space<vmem>>, %arg5: memref<72x128xf32, #tpu.memory_space<vmem>>, %arg6: memref<288x288xbf16, #tpu.memory_space<vmem>>) attributes {dimension_semantics = [], scalar_prefetch = 0 : i64, scratch_operands = 1 : i64, tpu.core_type = #tpu.core_type<tc>} {
    %c0 = arith.constant 0 : index
    %c0_0 = arith.constant 0 : index
    %c0_1 = arith.constant 0 : index
    %0 = vector.load %arg0[%c0, %c0_0, %c0_1] : memref<2x16x16xf32, #tpu.memory_space<vmem>>, vector<2x16x16xf32>
    %1 = vector.extract_strided_slice %0 {offsets = [0, 0, 0], sizes = [2, 14, 14], strides = [1, 1, 1]} : vector<2x16x16xf32> to vector<2x14x14xf32>
    %2 = vector.extract_strided_slice %0 {offsets = [0, 0, 1], sizes = [2, 14, 14], strides = [1, 1, 1]} : vector<2x16x16xf32> to vector<2x14x14xf32>
    %3 = vector.extract_strided_slice %0 {offsets = [0, 0, 2], sizes = [2, 14, 14], strides = [1, 1, 1]} : vector<2x16x16xf32> to vector<2x14x14xf32>
    %4 = vector.extract_strided_slice %0 {offsets = [0, 1, 0], sizes = [2, 14, 14], strides = [1, 1, 1]} : vector<2x16x16xf32> to vector<2x14x14xf32>
    %5 = vector.extract_strided_slice %0 {offsets = [0, 1, 1], sizes = [2, 14, 14], strides = [1, 1, 1]} : vector<2x16x16xf32> to vector<2x14x14xf32>
    %6 = vector.extract_strided_slice %0 {offsets = [0, 1, 2], sizes = [2, 14, 14], strides = [1, 1, 1]} : vector<2x16x16xf32> to vector<2x14x14xf32>
    %7 = vector.extract_strided_slice %0 {offsets = [0, 2, 0], sizes = [2, 14, 14], strides = [1, 1, 1]} : vector<2x16x16xf32> to vector<2x14x14xf32>
    %8 = vector.extract_strided_slice %0 {offsets = [0, 2, 1], sizes = [2, 14, 14], strides = [1, 1, 1]} : vector<2x16x16xf32> to vector<2x14x14xf32>
    %9 = vector.extract_strided_slice %0 {offsets = [0, 2, 2], sizes = [2, 14, 14], strides = [1, 1, 1]} : vector<2x16x16xf32> to vector<2x14x14xf32>
    %10 = vector.shape_cast %1 : vector<2x14x14xf32> to vector<2x14x14x1xf32>
    %11 = vector.shape_cast %2 : vector<2x14x14xf32> to vector<2x14x14x1xf32>
    %12 = vector.shape_cast %3 : vector<2x14x14xf32> to vector<2x14x14x1xf32>
    %13 = vector.shape_cast %4 : vector<2x14x14xf32> to vector<2x14x14x1xf32>
    %14 = vector.shape_cast %5 : vector<2x14x14xf32> to vector<2x14x14x1xf32>
    %15 = vector.shape_cast %6 : vector<2x14x14xf32> to vector<2x14x14x1xf32>
    %16 = vector.shape_cast %7 : vector<2x14x14xf32> to vector<2x14x14x1xf32>
    %17 = vector.shape_cast %8 : vector<2x14x14xf32> to vector<2x14x14x1xf32>
    %18 = vector.shape_cast %9 : vector<2x14x14xf32> to vector<2x14x14x1xf32>
    %19 = tpu.concatenate %10, %11, %12, %13, %14, %15, %16, %17, %18 in 3 : vector<2x14x14x1xf32>, vector<2x14x14x1xf32>, vector<2x14x14x1xf32>, vector<2x14x14x1xf32>, vector<2x14x14x1xf32>, vector<2x14x14x1xf32>, vector<2x14x14x1xf32>, vector<2x14x14x1xf32>, vector<2x14x14x1xf32> -> vector<2x14x14x9xf32>
    %20 = vector.shape_cast %19 : vector<2x14x14x9xf32> to vector<392x9xf32>
    %c0_2 = arith.constant 0 : index
    %c0_3 = arith.constant 0 : index
    %21 = vector.load %arg1[%c0_2, %c0_3] : memref<9x32xf32, #tpu.memory_space<vmem>>, vector<9x32xf32>
    %cst = arith.constant dense<0.000000e+00> : vector<392x32xf32>
    %22 = tpu.matmul %20, %21, %cst {dimension_numbers = #tpu.dot_dimension_numbers<[1], [0], [0], [1], [0, 0, 1, 1], [], []>} : vector<392x9xf32>, vector<9x32xf32>, vector<392x32xf32> -> vector<392x32xf32>
    %c0_4 = arith.constant 0 : index
    %c0_5 = arith.constant 0 : index
    %23 = vector.load %arg2[%c0_4, %c0_5] : memref<1x32xf32, #tpu.memory_space<vmem>>, vector<1x32xf32>
    %24 = vector.broadcast %23 : vector<1x32xf32> to vector<392x32xf32>
    %25 = arith.addf %22, %24 : vector<392x32xf32>
    %cst_6 = arith.constant 0.000000e+00 : f32
    %26 = vector.broadcast %cst_6 : f32 to vector<392x32xf32>
    %27 = arith.maximumf %25, %26 : vector<392x32xf32>
    %28 = arith.truncf %27 : vector<392x32xf32> to vector<392x32xbf16>
    %29 = vector.shape_cast %28 : vector<392x32xbf16> to vector<2x14x14x32xbf16>
    %30 = vector.extract_strided_slice %29 {offsets = [0, 0, 0, 0], sizes = [2, 12, 12, 32], strides = [1, 1, 1, 1]} : vector<2x14x14x32xbf16> to vector<2x12x12x32xbf16>
    %31 = vector.shape_cast %30 : vector<2x12x12x32xbf16> to vector<288x32xbf16>
    %c0_7 = arith.constant 0 : index
    %c0_8 = arith.constant 0 : index
    %32 = vector.load %arg6[%c0_7, %c0_8] : memref<288x288xbf16, #tpu.memory_space<vmem>>, vector<288x32xbf16>
    tpu.vector_store %arg6[%c0_7, %c0_8], %31 {strides = array<i32>} : memref<288x288xbf16, #tpu.memory_space<vmem>>, vector<288x32xbf16>,
    %33 = vector.extract_strided_slice %29 {offsets = [0, 0, 1, 0], sizes = [2, 12, 12, 32], strides = [1, 1, 1, 1]} : vector<2x14x14x32xbf16> to vector<2x12x12x32xbf16>
    %34 = vector.shape_cast %33 : vector<2x12x12x32xbf16> to vector<288x32xbf16>
    %c0_9 = arith.constant 0 : index
    %c32 = arith.constant 32 : index
    %35 = vector.load %arg6[%c0_9, %c32] : memref<288x288xbf16, #tpu.memory_space<vmem>>, vector<288x32xbf16>
    tpu.vector_store %arg6[%c0_9, %c32], %34 {strides = array<i32>} : memref<288x288xbf16, #tpu.memory_space<vmem>>, vector<288x32xbf16>,
    %36 = vector.extract_strided_slice %29 {offsets = [0, 0, 2, 0], sizes = [2, 12, 12, 32], strides = [1, 1, 1, 1]} : vector<2x14x14x32xbf16> to vector<2x12x12x32xbf16>
    %37 = vector.shape_cast %36 : vector<2x12x12x32xbf16> to vector<288x32xbf16>
    %c0_10 = arith.constant 0 : index
    %c64 = arith.constant 64 : index
    %38 = vector.load %arg6[%c0_10, %c64] : memref<288x288xbf16, #tpu.memory_space<vmem>>, vector<288x32xbf16>
    tpu.vector_store %arg6[%c0_10, %c64], %37 {strides = array<i32>} : memref<288x288xbf16, #tpu.memory_space<vmem>>, vector<288x32xbf16>,
    %39 = vector.extract_strided_slice %29 {offsets = [0, 1, 0, 0], sizes = [2, 12, 12, 32], strides = [1, 1, 1, 1]} : vector<2x14x14x32xbf16> to vector<2x12x12x32xbf16>
    %40 = vector.shape_cast %39 : vector<2x12x12x32xbf16> to vector<288x32xbf16>
    %c0_11 = arith.constant 0 : index
    %c96 = arith.constant 96 : index
    %41 = vector.load %arg6[%c0_11, %c96] : memref<288x288xbf16, #tpu.memory_space<vmem>>, vector<288x32xbf16>
    tpu.vector_store %arg6[%c0_11, %c96], %40 {strides = array<i32>} : memref<288x288xbf16, #tpu.memory_space<vmem>>, vector<288x32xbf16>,
    %42 = vector.extract_strided_slice %29 {offsets = [0, 1, 1, 0], sizes = [2, 12, 12, 32], strides = [1, 1, 1, 1]} : vector<2x14x14x32xbf16> to vector<2x12x12x32xbf16>
    %43 = vector.shape_cast %42 : vector<2x12x12x32xbf16> to vector<288x32xbf16>
    %c0_12 = arith.constant 0 : index
    %c128 = arith.constant 128 : index
    %44 = vector.load %arg6[%c0_12, %c128] : memref<288x288xbf16, #tpu.memory_space<vmem>>, vector<288x32xbf16>
    tpu.vector_store %arg6[%c0_12, %c128], %43 {strides = array<i32>} : memref<288x288xbf16, #tpu.memory_space<vmem>>, vector<288x32xbf16>,
    %45 = vector.extract_strided_slice %29 {offsets = [0, 1, 2, 0], sizes = [2, 12, 12, 32], strides = [1, 1, 1, 1]} : vector<2x14x14x32xbf16> to vector<2x12x12x32xbf16>
    %46 = vector.shape_cast %45 : vector<2x12x12x32xbf16> to vector<288x32xbf16>
    %c0_13 = arith.constant 0 : index
    %c160 = arith.constant 160 : index
    %47 = vector.load %arg6[%c0_13, %c160] : memref<288x288xbf16, #tpu.memory_space<vmem>>, vector<288x32xbf16>
    tpu.vector_store %arg6[%c0_13, %c160], %46 {strides = array<i32>} : memref<288x288xbf16, #tpu.memory_space<vmem>>, vector<288x32xbf16>,
    %48 = vector.extract_strided_slice %29 {offsets = [0, 2, 0, 0], sizes = [2, 12, 12, 32], strides = [1, 1, 1, 1]} : vector<2x14x14x32xbf16> to vector<2x12x12x32xbf16>
    %49 = vector.shape_cast %48 : vector<2x12x12x32xbf16> to vector<288x32xbf16>
    %c0_14 = arith.constant 0 : index
    %c192 = arith.constant 192 : index
    %50 = vector.load %arg6[%c0_14, %c192] : memref<288x288xbf16, #tpu.memory_space<vmem>>, vector<288x32xbf16>
    tpu.vector_store %arg6[%c0_14, %c192], %49 {strides = array<i32>} : memref<288x288xbf16, #tpu.memory_space<vmem>>, vector<288x32xbf16>,
    %51 = vector.extract_strided_slice %29 {offsets = [0, 2, 1, 0], sizes = [2, 12, 12, 32], strides = [1, 1, 1, 1]} : vector<2x14x14x32xbf16> to vector<2x12x12x32xbf16>
    %52 = vector.shape_cast %51 : vector<2x12x12x32xbf16> to vector<288x32xbf16>
    %c0_15 = arith.constant 0 : index
    %c224 = arith.constant 224 : index
    %53 = vector.load %arg6[%c0_15, %c224] : memref<288x288xbf16, #tpu.memory_space<vmem>>, vector<288x32xbf16>
    tpu.vector_store %arg6[%c0_15, %c224], %52 {strides = array<i32>} : memref<288x288xbf16, #tpu.memory_space<vmem>>, vector<288x32xbf16>,
    %54 = vector.extract_strided_slice %29 {offsets = [0, 2, 2, 0], sizes = [2, 12, 12, 32], strides = [1, 1, 1, 1]} : vector<2x14x14x32xbf16> to vector<2x12x12x32xbf16>
    %55 = vector.shape_cast %54 : vector<2x12x12x32xbf16> to vector<288x32xbf16>
    %c0_16 = arith.constant 0 : index
    %c256 = arith.constant 256 : index
    %56 = vector.load %arg6[%c0_16, %c256] : memref<288x288xbf16, #tpu.memory_space<vmem>>, vector<288x32xbf16>
    tpu.vector_store %arg6[%c0_16, %c256], %55 {strides = array<i32>} : memref<288x288xbf16, #tpu.memory_space<vmem>>, vector<288x32xbf16>,
    %c0_17 = arith.constant 0 : index
    %c0_18 = arith.constant 0 : index
    %57 = vector.load %arg6[%c0_17, %c0_18] : memref<288x288xbf16, #tpu.memory_space<vmem>>, vector<288x288xbf16>
    %c0_19 = arith.constant 0 : index
    %c0_20 = arith.constant 0 : index
    %58 = vector.load %arg3[%c0_19, %c0_20] : memref<288x128xbf16, #tpu.memory_space<vmem>>, vector<288x128xbf16>
    %cst_21 = arith.constant dense<0.000000e+00> : vector<288x128xf32>
    %59 = tpu.matmul %57, %58, %cst_21 {dimension_numbers = #tpu.dot_dimension_numbers<[1], [0], [0], [1], [0, 0, 1, 1], [], []>} : vector<288x288xbf16>, vector<288x128xbf16>, vector<288x128xf32> -> vector<288x128xf32>
    %c0_22 = arith.constant 0 : index
    %c0_23 = arith.constant 0 : index
    %60 = vector.load %arg4[%c0_22, %c0_23] : memref<1x128xf32, #tpu.memory_space<vmem>>, vector<1x128xf32>
    %61 = vector.broadcast %60 : vector<1x128xf32> to vector<288x128xf32>
    %62 = arith.addf %59, %61 : vector<288x128xf32>
    %cst_24 = arith.constant 0.000000e+00 : f32
    %63 = vector.broadcast %cst_24 : f32 to vector<288x128xf32>
    %64 = arith.maximumf %62, %63 : vector<288x128xf32>
    %65 = vector.shape_cast %64 : vector<288x128xf32> to vector<144x2x128xf32>
    %cst_25 = arith.constant dense<0xFF800000> : vector<144x128xf32>
    %66 = vector.multi_reduction <maximumf>, %65, %cst_25 [1] : vector<144x2x128xf32> to vector<144x128xf32>
    %67 = vector.shape_cast %66 : vector<144x128xf32> to vector<12x2x6x128xf32>
    %cst_26 = arith.constant dense<0xFF800000> : vector<12x6x128xf32>
    %68 = vector.multi_reduction <maximumf>, %67, %cst_26 [1] : vector<12x2x6x128xf32> to vector<12x6x128xf32>
    %69 = vector.shape_cast %68 : vector<12x6x128xf32> to vector<72x128xf32>
    %c0_27 = arith.constant 0 : index
    %c0_28 = arith.constant 0 : index
    %70 = vector.load %arg5[%c0_27, %c0_28] : memref<72x128xf32, #tpu.memory_space<vmem>>, vector<72x128xf32>
    tpu.vector_store %arg5[%c0_27, %c0_28], %69 {strides = array<i32>} : memref<72x128xf32, #tpu.memory_space<vmem>>, vector<72x128xf32>,
    return
  }
}

</mosaic_0001>

<bundles_post_ra>
// kernel: net1_forward.1
= control target key start
LH: loop header
LB: loop body
LE: loop exit
PB: predicated region body
PF: predicated region fallthrough
CT: control target
= control target key end

     0   :  { %10 = vsyncpa [#allocation4], 0  ;;  %s21027_s0 = inlined_call_operand.hbm [shape: f32[2,16,16], index: 0, kind: input, shape index: {}]   ;;  %s21028_s1 = inlined_call_operand.hbm [shape: f32[9,32], index: 1, kind: input, shape index: {}]   ;;  %s21029_s2 = inlined_call_operand.vmem [shape: f32[1,32], index: 2, kind: input, shape index: {}]   ;;  %s21030_s3 = inlined_call_operand.hbm [shape: bf16[288,128], index: 3, kind: input, shape index: {}]   ;;  %s21031_s4 = inlined_call_operand.vmem [shape: f32[1,128], index: 4, kind: input, shape index: {}]   ;;  %s21032_s5 = inlined_call_operand.vmem [shape: f32[72,128], index: 5, kind: output, shape index: {}]  }
   0x1   :  { %11 = vsyncpa [#allocation6], 0  ;;  %s14294_s18 = smov [#allocation5]   ;;  %s14295_s20 = smov [#allocation3]  }
   0x2   :  { %s29_s19 = sshll.u32 %s14294_s18, 4  ;;  %s17_s21 = sshll.u32 %s14295_s20, 4  ;;  %s30_s19 = int_to_ptr.vmem [resolvable:$true] %s29_s19  ;;  %s14340_s21 = int_to_ptr.vmem [resolvable:$true] %s17_s21 }
   0x3   :  { %s14224_s24 = scalar_lea.hbm %s21028_s1, 256 }
   0x4   :  { %p14225_p0 = scmp.ne.s32.totalorder %s21028_s1, %s14224_s24  ;;  %p14228_p1 = scmp.lt.u32.totalorder %s14224_s24, %s21028_s1 }
   0x6   :  { %p14230_p2 = pnand %p14228_p1, %p14225_p0 }
   0x8   :  { %14233 = shalt.err (!%p14230_p2)
}
   0x9   :  { %s14234_s29 = scalar_lea.vmem %s30_s19, 256  ;;  %p14239_p4 = scmp.lt.s32.totalorder %s30_s19, %s30_s19 }
   0xa   :  { %p14235_p3 = scmp.ne.s32.totalorder %s30_s19, %s14234_s29  ;;  %p14240_p5 = scmp.lt.s32.totalorder %s14234_s29, %s14234_s29 }
   0xc   :  { %p14241_p6 = por %p14240_p5, %p14239_p4 }
   0xe   :  { %p14242_p7 = pnand %p14241_p6, %p14235_p3 }
  0x10   :  { %14245 = shalt.err (!%p14242_p7)
}
  0x11   :  { %s14296_s30 = smov 128   ;;  %s14297_s6 = smov 8  }
  0x12   :  { %35 = dma.hbm_to_vmem [thread:$0]  %s21028_s1, 256, %s30_s19, [#allocation6], %s14296_s30, %s14296_s30, %s14297_s6  }
  0x13   :  { %s14246_s11 = scalar_lea.hbm %s21027_s0, 512 }
  0x14   :  { %p14247_p8 = scmp.ne.s32.totalorder %s21027_s0, %s14246_s11  ;;  %p14250_p9 = scmp.lt.u32.totalorder %s14246_s11, %s21027_s0 }
  0x16   :  { %p14252_p10 = pnand %p14250_p9, %p14247_p8 }
  0x18   :  { %14255 = shalt.err (!%p14252_p10)
}
  0x19   :  { %s14256_s16 = scalar_lea.vmem %s14340_s21, 512  ;;  %p14261_p12 = scmp.lt.s32.totalorder %s14340_s21, %s14340_s21 }
  0x1a   :  { %p14257_p11 = scmp.ne.s32.totalorder %s14340_s21, %s14256_s16  ;;  %p14262_p13 = scmp.lt.s32.totalorder %s14256_s16, %s14256_s16 }
  0x1c   :  { %p14263_p0 = por %p14262_p13, %p14261_p12 }
  0x1e   :  { %p14264_p1 = pnand %p14263_p0, %p14257_p11 }
  0x20   :  { %14267 = shalt.err (!%p14264_p1)
}
  0x21   :  { %23 = dma.hbm_to_vmem [thread:$0]  %s21027_s0, 512, %s14340_s21, [#allocation4], %s14296_s30, %s14296_s30, %s14297_s6  }
  0x22   :  { %s14298_s18 = smov [#allocation7]   ;;  %s14268_s23 = scalar_lea.hbm %s21030_s3, 2304 }
  0x23   :  { %s43_s19 = sshll.u32 %s14298_s18, 4  ;;  %p14269_p2 = scmp.ne.s32.totalorder %s21030_s3, %s14268_s23  ;;  %s44_s19 = int_to_ptr.vmem [resolvable:$true] %s43_s19 }
  0x24   :  { %p14272_p3 = scmp.lt.u32.totalorder %s14268_s23, %s21030_s3 }
  0x26   :  { %p14274_p4 = pnand %p14272_p3, %p14269_p2 }
  0x28   :  { %14277 = shalt.err (!%p14274_p4)
}
  0x29   :  { %s14278_s28 = scalar_lea.vmem %s44_s19, 2304  ;;  %p14283_p6 = scmp.lt.s32.totalorder %s44_s19, %s44_s19 }
  0x2a   :  { %p14279_p5 = scmp.ne.s32.totalorder %s44_s19, %s14278_s28  ;;  %p14284_p7 = scmp.lt.s32.totalorder %s14278_s28, %s14278_s28 }
  0x2c   :  { %p14285_p8 = por %p14284_p7, %p14283_p6 }
  0x2e   :  { %p14286_p9 = pnand %p14285_p8, %p14279_p5 }
  0x30   :  { %14289 = shalt.err (!%p14286_p9)
}
  0x31   :  { %s14299_s0 = smov 64   ;;  %s14300_s21 = smov 4  }
  0x32   :  { %49 = dma.hbm_to_vmem [thread:$0]  %s21030_s3, 2304, %s44_s19, [#allocation6], %s14299_s0, %s14299_s0, %s14300_s21  }
  0x33   :  { %14290 = dma.done.wait [#allocation4], 512  }
  0x34   :  { %14291 = vsyncadd [#allocation4], 4294966784 }
  0x35   :  { %14292 = dma.done.wait [#allocation6], 2560  }
  0x36   :  { %14293 = vsyncadd [#allocation6], 4294964736  ;;  %v66_v0 = vlaneseq  ;;  %v14393_v4 = vld [vmem:[#allocation3] sm:$0xff]  ;;  %v2367_v10 = vld [vmem:[#allocation5 + $0x8] sm:$0x1]  ;;  %vm3307_vm0 = vcmask 1040384  }
  0x37   :  { %v2366_v9 = vld [vmem:[#allocation5] sm:$0xff]  ;;  %vm14301_vm1 = vmmov 1   ;;  %v14302_v12 = vmov 0.0|0.0   ;;  %vm14303_vm3 = vmmov 0   ;;  %v21034_v13 = vmov 0.0   ;;  %v14431_v24 = vld [vmem:[#allocation3 + $0x8] sm:$0xff] }
  0x38   :  { %v14385_v1 = vshrl.u32 %v66_v0, 7  ;;  %v14174_v11 = vpack.c.bf16 %v2367_v10, %v2366_v9  ;;  %vm14175_vm2 = vmpackc.low %vm3307_vm0, %vm14301_vm1  ;;  %14173 = vmatprep.subr.bf16.mxu0 %v14302_v12  ;;  %13986 = vmatprep.mubr.msk.f32.mxu0 %vm14303_vm3, %v21034_v13  ;;  %vm930_vm4 = vcmask 7168   ;;  %vm987_vm5 = vcmask 15360   ;;  %s14307_s7 = smov 96   ;;  %s14308_s8 = smov 32  }
  0x39   :  { %vm21033_vm6 = vcmask 23552   ;;  %v14305_v36 = vmov 1983009808   ;;  %vm1101_vm7 = vcmask 31744   ;;  %vm1158_vm8 = vcmask 39936  }
  0x3a   :  { %v14388_v2 = vsub.s32 0, %v14385_v1  ;;  %v14391_v3 = vsub.s32 1, %v14385_v1  ;;  %v14400_v7 = vsub.s32 2, %v14385_v1  ;;  %14176 = vmatpush3.bf16.msk.msra.mxu0 %vm14175_vm2, %v14174_v11  ;;  %v14407_v14 = vsub.s32 3, %v14385_v1 }
  0x3b   :  { %v14412_v16 = vsub.s32 4, %v14385_v1  ;;  %v14417_v18 = vsub.s32 5, %v14385_v1  ;;  %v14422_v20 = vsub.s32 6, %v14385_v1  ;;  %v14427_v22 = vsub.s32 7, %v14385_v1 }
  0x3c   :  { %v69_v5 = vrot.slane %v14393_v4, %v14388_v2  ;;  %v80_v6 = vrot.slane %v14393_v4, %v14391_v3  ;;  %v91_v8 = vrot.slane %v14393_v4, %v14400_v7  ;;  %v102_v15 = vrot.slane %v14393_v4, %v14407_v14 }
  0x3d   :  { %v113_v17 = vrot.slane %v14393_v4, %v14412_v16  ;;  %v124_v19 = vrot.slane %v14393_v4, %v14417_v18  ;;  %v135_v21 = vrot.slane %v14393_v4, %v14422_v20  ;;  %v146_v23 = vrot.slane %v14393_v4, %v14427_v22 }
  0x3e   :  { %600 = vbcast.lane.b32.xlu1 %v69_v5, 258  ;;  %71 = vbcast.lane.b32.xlu0 %v69_v5, 256  ;;  %v157_v25 = vrot.slane %v14431_v24, %v14388_v2  ;;  %v168_v26 = vrot.slane %v14431_v24, %v14391_v3  ;;  %v179_v27 = vrot.slane %v14431_v24, %v14400_v7  ;;  %v1444_v37 = vunpack.c.l.s4 %v14305_v36 }
  0x3f   :  { %v190_v38 = vrot.slane %v14431_v24, %v14407_v14  ;;  %vm1215_vm9 = vcmask 48128   ;;  %vm1272_vm10 = vcmask 56320   ;;  %vm1329_vm11 = vcmask 64512  }
  0x40   :  { %v1445_v42 = vunpack.c.0.s8 %v1444_v37  ;;  %v201_v55 = vrot.slane %v14431_v24, %v14412_v16  ;;  %vm3208_vm12 = vcmask 72704   ;;  %vm5839_vm13 = vsmask.f32 256 }
  0x41   :  { %vm5840_vm14 = vsmask.f32 1284  ;;  %vm5842_vm15 = vsmask.f32 2312  ;;  %vm5844_vm0 = vsmask.f32 3340 }
  0x42   :  { %82 = vbcast.lane.b32.xlu1 %v80_v6, 256  ;;  %376 = vbcast.lane.b32.xlu0 %v69_v5, 257  ;;  %v14455_v46 = vsub.s32 %v1445_v42, %v14385_v1  ;;  %vm5846_vm1 = vsmask.f32 4368  ;;  %vm15777_vm2 = vmor %vm5839_vm13, %vm5840_vm14  ;;  %vm5850_vm14 = vsmask.f32 6424 }
  0x43   :  { %vm5843_vm13 = vmor %vm15777_vm2, %vm5842_vm15  ;;  %vm5852_vm2 = vsmask.f32 7452 }
  0x44   :  { %21095 = vst [vmem:[#allocation10_spill] sm:$0xff] %v14455_v46  ;;  %vm15834_vm15 = vmor %vm5843_vm13, %vm5844_vm0  ;;  %vm21107_vm13 = vcmask 23552  }
  0x45   :  { %vm5847_vm0 = vmor %vm15834_vm15, %vm5846_vm1 }
  0x46   :  { %608 = vbcast.lane.b32.xlu1 %v80_v6, 258  ;;  %384 = vbcast.lane.b32.xlu0 %v80_v6, 257  ;;  %vm21116_vm15 = vmmov %vm21107_vm13 }
  0x4a   :  { %75 = vbcast.lane.b32.xlu1 %v69_v5, 264  ;;  %93 = vbcast.lane.b32.xlu0 %v91_v8, 256 }
  0x4e   :  { %392 = vbcast.lane.b32.xlu1 %v91_v8, 257  ;;  %380 = vbcast.lane.b32.xlu0 %v69_v5, 265 }
  0x52   :  { %616 = vbcast.lane.b32.xlu1 %v91_v8, 258  ;;  %604 = vbcast.lane.b32.xlu0 %v69_v5, 266 }
  0x56   :  { %388 = vbcast.lane.b32.xlu1 %v80_v6, 265  ;;  %86 = vbcast.lane.b32.xlu0 %v80_v6, 264 }
  0x5a   :  { %97 = vbcast.lane.b32.xlu1 %v91_v8, 264  ;;  %612 = vbcast.lane.b32.xlu0 %v80_v6, 266 }
  0x5e   :  { %104 = vbcast.lane.b32.xlu1 %v102_v15, 256  ;;  %396 = vbcast.lane.b32.xlu0 %v91_v8, 265 }
  0x62   :  { %400 = vbcast.lane.b32.xlu1 %v102_v15, 257  ;;  %620 = vbcast.lane.b32.xlu0 %v91_v8, 266 }
  0x66   :  { %108 = vbcast.lane.b32.xlu1 %v102_v15, 264  ;;  %624 = vbcast.lane.b32.xlu0 %v102_v15, 258 }
  0x6a   :  { %115 = vbcast.lane.b32.xlu1 %v113_v17, 256  ;;  %404 = vbcast.lane.b32.xlu0 %v102_v15, 265 }
  0x6e   :  { %408 = vbcast.lane.b32.xlu1 %v113_v17, 257  ;;  %628 = vbcast.lane.b32.xlu0 %v102_v15, 266 }
  0x72   :  { %119 = vbcast.lane.b32.xlu1 %v113_v17, 264  ;;  %632 = vbcast.lane.b32.xlu0 %v113_v17, 258 }
  0x76   :  { %636 = vbcast.lane.b32.xlu1 %v113_v17, 266  ;;  %412 = vbcast.lane.b32.xlu0 %v113_v17, 265 }
  0x7a   :  { %416 = vbcast.lane.b32.xlu1 %v124_v19, 257  ;;  %126 = vbcast.lane.b32.xlu0 %v124_v19, 256 }
  0x7e   :  { %130 = vbcast.lane.b32.xlu1 %v124_v19, 264  ;;  %640 = vbcast.lane.b32.xlu0 %v124_v19, 258 }
  0x82   :  { %137 = vbcast.lane.b32.xlu1 %v135_v21, 256  ;;  %420 = vbcast.lane.b32.xlu0 %v124_v19, 265 }
  0x86   :  { %424 = vbcast.lane.b32.xlu1 %v135_v21, 257  ;;  %644 = vbcast.lane.b32.xlu0 %v124_v19, 266 }
  0x8a   :  { %141 = vbcast.lane.b32.xlu1 %v135_v21, 264  ;;  %648 = vbcast.lane.b32.xlu0 %v135_v21, 258 }
  0x8e   :  { %148 = vbcast.lane.b32.xlu1 %v146_v23, 256  ;;  %428 = vbcast.lane.b32.xlu0 %v135_v21, 265 }
  0x92   :  { %432 = vbcast.lane.b32.xlu1 %v146_v23, 257  ;;  %652 = vbcast.lane.b32.xlu0 %v135_v21, 266 }
  0x96   :  { %152 = vbcast.lane.b32.xlu1 %v146_v23, 264  ;;  %656 = vbcast.lane.b32.xlu0 %v146_v23, 258 }
  0x9a   :  { %159 = vbcast.lane.b32.xlu1 %v157_v25, 256  ;;  %436 = vbcast.lane.b32.xlu0 %v146_v23, 265 }
  0x9e   :  { %440 = vbcast.lane.b32.xlu1 %v157_v25, 257  ;;  %660 = vbcast.lane.b32.xlu0 %v146_v23, 266 }
  0xa2   :  { %163 = vbcast.lane.b32.xlu1 %v157_v25, 264  ;;  %664 = vbcast.lane.b32.xlu0 %v157_v25, 258 }
  0xa6   :  { %668 = vbcast.lane.b32.xlu1 %v157_v25, 266  ;;  %444 = vbcast.lane.b32.xlu0 %v157_v25, 265 }
  0xaa   :  { %448 = vbcast.lane.b32.xlu1 %v168_v26, 257  ;;  %170 = vbcast.lane.b32.xlu0 %v168_v26, 256 }
  0xae   :  { %174 = vbcast.lane.b32.xlu1 %v168_v26, 264  ;;  %672 = vbcast.lane.b32.xlu0 %v168_v26, 258 }
  0xb0   :  { %v601_v28 = vpop.permute.xlu1 %600  ;;  %v72_v29 = vpop.permute.xlu0 %71 }
  0xb2   :  { %181 = vbcast.lane.b32.xlu1 %v179_v27, 256  ;;  %452 = vbcast.lane.b32.xlu0 %v168_v26, 265 }
  0xb4   :  { %v14439_v30 = vpop.permute.xlu1 %82  ;;  %v377_v31 = vpop.permute.xlu0 %376 }
  0xb5   :  { %v931_v32 = vsel %vm930_vm4, %v72_v29, %v377_v31  ;;  %v212_v31 = vrot.slane %v14431_v24, %v14417_v18 }
  0xb6   :  { %456 = vbcast.lane.b32.xlu1 %v179_v27, 257  ;;  %676 = vbcast.lane.b32.xlu0 %v168_v26, 266  ;;  %v988_v35 = vsel %vm987_vm5, %v931_v32, %v601_v28 }
  0xb7   :  { %v1045_v39 = vsel %vm21033_vm6, %v988_v35, %v14439_v30 }
  0xb8   :  { %v14442_v33 = vpop.permute.xlu1 %608  ;;  %v385_v34 = vpop.permute.xlu0 %384 }
  0xb9   :  { %v1102_v43 = vsel %vm1101_vm7, %v1045_v39, %v385_v34  ;;  %v933_v17 = vsel %vm930_vm4, %v14439_v30, %v385_v34 }
  0xba   :  { %185 = vbcast.lane.b32.xlu1 %v179_v27, 264  ;;  %680 = vbcast.lane.b32.xlu0 %v179_v27, 258  ;;  %v1159_v47 = vsel %vm1158_vm8, %v1102_v43, %v14442_v33  ;;  %v990_v21 = vsel %vm987_vm5, %v933_v17, %v14442_v33 }
  0xbc   :  { %v76_v40 = vpop.permute.xlu1 %75  ;;  %v14449_v41 = vpop.permute.xlu0 %93 }
  0xbd   :  { %v1216_v48 = vsel %vm1215_vm9, %v1159_v47, %v14449_v41 }
  0xbe   :  { %192 = vbcast.lane.b32.xlu1 %v190_v38, 256  ;;  %460 = vbcast.lane.b32.xlu0 %v179_v27, 265 }
  0xc0   :  { %v14452_v44 = vpop.permute.xlu1 %392  ;;  %v381_v45 = vpop.permute.xlu0 %380 }
  0xc1   :  { %v1273_v49 = vsel %vm1272_vm10, %v1216_v48, %v14452_v44  ;;  %v932_v62 = vsel %vm930_vm4, %v76_v40, %v381_v45 }
  0xc2   :  { %464 = vbcast.lane.b32.xlu1 %v190_v38, 257  ;;  %684 = vbcast.lane.b32.xlu0 %v179_v27, 266  ;;  %v1047_v27 = vsel %vm21033_vm6, %v990_v21, %v14449_v41 }
  0xc3   :  { %v1104_v29 = vsel %vm1101_vm7, %v1047_v27, %v14452_v44 }
  0xc4   :  { %v14463_v50 = vpop.permute.xlu1 %616  ;;  %v605_v51 = vpop.permute.xlu0 %604 }
  0xc5   :  { %v1330_v52 = vsel %vm1329_vm11, %v1273_v49, %v14463_v50  ;;  %v989_v0 = vsel %vm987_vm5, %v932_v62, %v605_v51  ;;  %v1161_v32 = vsel %vm1158_vm8, %v1104_v29, %v14463_v50 }
  0xc6   :  { %v1442_v53 = vcombine.high %v1330_v52, %v1330_v52  ;;  %v1449_v54 = vrot.slane %v1330_v52, %v14455_v46  ;;  %196 = vbcast.lane.b32.xlu1 %v190_v38, 264  ;;  %688 = vbcast.lane.b32.xlu0 %v190_v38, 258 }
  0xc8   :  { %v1456_v56 = vrot.slane %v1442_v53, %v14455_v46  ;;  %v1457_v57 = vcombine.high %v1449_v54, %v1449_v54  ;;  %v389_v58 = vpop.permute.xlu1 %388  ;;  %v87_v59 = vpop.permute.xlu0 %86 }
  0xc9   :  { %v1046_v6 = vsel %vm21033_vm6, %v989_v0, %v87_v59 }
  0xca   :  { %v1458_v60 = vcombine.high %v1456_v56, %v1456_v56  ;;  %v2375_v61 = vcombine.low %v1449_v54, %v1457_v57  ;;  %203 = vbcast.lane.b32.xlu1 %v201_v55, 256  ;;  %468 = vbcast.lane.b32.xlu0 %v190_v38, 265  ;;  %v1103_v10 = vsel %vm1101_vm7, %v1046_v6, %v389_v58 }
  0xcb   :  { %v14546_v6 = vrot.slane %v14431_v24, %v14422_v20 }
  0xcc   :  { %v2376_v63 = vcombine.low %v1456_v56, %v1458_v60  ;;  %v14473_v4 = vpop.permute.xlu1 %97  ;;  %v613_v5 = vpop.permute.xlu0 %612  ;;  %v2383_v8 = vrot.slane %v2375_v61, %v14455_v46  ;;  %v935_v56 = vsel %vm930_vm4, %v14449_v41, %v14452_v44 }
  0xcd   :  { %v1160_v19 = vsel %vm1158_vm8, %v1103_v10, %v613_v5  ;;  %v992_v60 = vsel %vm987_vm5, %v935_v56, %v14463_v50  ;;  %v14598_v56 = vld [vmem:[#allocation3 + $0x10] sm:$0xff] }
  0xce   :  { %472 = vbcast.lane.b32.xlu1 %v201_v55, 257  ;;  %692 = vbcast.lane.b32.xlu0 %v190_v38, 266  ;;  %v2390_v9 = vrot.slane %v2376_v63, %v14455_v46  ;;  %v1217_v23 = vsel %vm1215_vm9, %v1160_v19, %v14473_v4  ;;  %v934_v38 = vsel %vm930_vm4, %v87_v59, %v389_v58 }
  0xcf   :  { %v991_v42 = vsel %vm987_vm5, %v934_v38, %v613_v5 }
  0xd0   :  { %v14479_v11 = vpop.permute.xlu1 %104  ;;  %v397_v12 = vpop.permute.xlu0 %396  ;;  %v2391_v15 = vcombine.low %v2383_v8, %v2390_v9  ;;  %v1048_v53 = vsel %vm21033_vm6, %v991_v42, %v14473_v4 }
  0xd1   :  { %v1274_v28 = vsel %vm1272_vm10, %v1217_v23, %v397_v12  ;;  %v1218_v35 = vsel %vm1215_vm9, %v1161_v32, %v14479_v11  ;;  %v1049_v44 = vsel %vm21033_vm6, %v992_v60, %v14479_v11  ;;  %v936_v50 = vsel %vm930_vm4, %v14473_v4, %v397_v12 }
  0xd2   :  { %207 = vbcast.lane.b32.xlu1 %v201_v55, 264  ;;  %696 = vbcast.lane.b32.xlu0 %v201_v55, 258 }
  0xd3   :  { %13987 = vmatmul.mubr.msk.f32.vlgmr.msra.gmra.mrb[0].mxu0 %vm3208_vm12, %v2391_v15 }
  0xd4   :  { %v14489_v25 = vpop.permute.xlu1 %400  ;;  %v621_v26 = vpop.permute.xlu0 %620  ;;  %13989 = vmatprep.mubr.msk.f32.mxu0 %vm14303_vm3, %v21034_v13 }
  0xd5   :  { %v1331_v30 = vsel %vm1329_vm11, %v1274_v28, %v621_v26  ;;  %v1275_v39 = vsel %vm1272_vm10, %v1218_v35, %v14489_v25  ;;  %v1106_v8 = vsel %vm1101_vm7, %v1049_v44, %v14489_v25  ;;  %v993_v23 = vsel %vm987_vm5, %v936_v50, %v621_v26 }
  0xd6   :  { %700 = vbcast.lane.b32.xlu1 %v201_v55, 266  ;;  %476 = vbcast.lane.b32.xlu0 %v201_v55, 265  ;;  %v1459_v33 = vcombine.high %v1331_v30, %v1331_v30  ;;  %v1466_v34 = vrot.slane %v1331_v30, %v14455_v46  ;;  %v1105_v55 = vsel %vm1101_vm7, %v1048_v53, %v397_v12 }
  0xd7   :  { %v1162_v57 = vsel %vm1158_vm8, %v1105_v55, %v621_v26  ;;  %v14620_v50 = vrot.slane %v14598_v56, %v14388_v2 }
  0xd8   :  { %v14506_v36 = vpop.permute.xlu1 %108  ;;  %v14508_v37 = vpop.permute.xlu0 %624  ;;  %v1474_v40 = vcombine.high %v1466_v34, %v1466_v34  ;;  %v1473_v45 = vrot.slane %v1459_v33, %v14455_v46 }
  0xd9   :  { %v1332_v43 = vsel %vm1329_vm11, %v1275_v39, %v14508_v37  ;;  %v1219_v61 = vsel %vm1215_vm9, %v1162_v57, %v14506_v36  ;;  %v1163_v15 = vsel %vm1158_vm8, %v1106_v8, %v14508_v37  ;;  %v1050_v26 = vsel %vm21033_vm6, %v993_v23, %v14506_v36 }
  0xda   :  { %480 = vbcast.lane.b32.xlu1 %v212_v31, 257  ;;  %214 = vbcast.lane.b32.xlu0 %v212_v31, 256  ;;  %v1475_v47 = vcombine.high %v1332_v43, %v1332_v43  ;;  %v1482_v48 = vrot.slane %v1332_v43, %v14455_v46  ;;  %v2392_v49 = vcombine.low %v1466_v34, %v1474_v40 }
  0xdb   :  { %v937_v40 = vsel %vm930_vm4, %v14479_v11, %v14489_v25 }
  0xdc   :  { %v14518_v51 = vpop.permute.xlu1 %115  ;;  %v14520_v52 = vpop.permute.xlu0 %404  ;;  %v2393_v54 = vcombine.low %v1473_v45, %v1482_v48  ;;  %v1489_v58 = vrot.slane %v1475_v47, %v14455_v46  ;;  %v1490_v62 = vcombine.high %v1482_v48, %v1482_v48  ;;  %v2400_v41 = vrot.slane %v2392_v49, %v14455_v46 }
  0xdd   :  { %v1276_v5 = vsel %vm1272_vm10, %v1219_v61, %v14520_v52  ;;  %v1220_v4 = vsel %vm1215_vm9, %v1163_v15, %v14518_v51  ;;  %v1107_v34 = vsel %vm1101_vm7, %v1050_v26, %v14520_v52  ;;  %v994_v55 = vsel %vm987_vm5, %v937_v40, %v14508_v37 }
  0xde   :  { %218 = vbcast.lane.b32.xlu1 %v212_v31, 264  ;;  %704 = vbcast.lane.b32.xlu0 %v212_v31, 258  ;;  %v2407_v59 = vrot.slane %v2393_v54, %v14455_v46  ;;  %v1491_v17 = vcombine.high %v1489_v58, %v1489_v58  ;;  %v2409_v27 = vcombine.low %v1490_v62, %v1489_v58 }
  0xdf   :  { %v1051_v57 = vsel %vm21033_vm6, %v994_v55, %v14518_v51 }
  0xe0   :  { %v14535_v63 = vpop.permute.xlu1 %408  ;;  %v14537_v0 = vpop.permute.xlu0 %628  ;;  %v2408_v10 = vcombine.low %v2400_v41, %v2407_v59  ;;  %v2417_v47 = vrot.slane %v2409_v27, %v14455_v46 }
  0xe1   :  { %v1333_v9 = vsel %vm1329_vm11, %v1276_v5, %v14537_v0  ;;  %v1277_v29 = vsel %vm1272_vm10, %v1220_v4, %v14535_v63  ;;  %v1164_v42 = vsel %vm1158_vm8, %v1107_v34, %v14537_v0  ;;  %v1108_v37 = vsel %vm1101_vm7, %v1051_v57, %v14535_v63 }
  0xe2   :  { %708 = vbcast.lane.b32.xlu1 %v212_v31, 266  ;;  %v1492_v19 = vcombine.high %v1333_v9, %v1333_v9  ;;  %v1499_v21 = vrot.slane %v1333_v9, %v14455_v46  ;;  %484 = vbcast.lane.b32.xlu0 %v212_v31, 265 }
  0xe3   :  { %13990 = vmatmul.mubr.msk.f32.gmra.mrb[2].mxu0 %vm3208_vm12, %v2408_v10 }
  0xe4   :  { %v14561_v12 = vpop.permute.xlu1 %119  ;;  %v14563_v28 = vpop.permute.xlu0 %632  ;;  %v1506_v30 = vrot.slane %v1492_v19, %v14455_v46  ;;  %v1507_v32 = vcombine.high %v1499_v21, %v1499_v21  ;;  %v2410_v33 = vcombine.low %v1491_v17, %v1499_v21  ;;  %13992 = vmatprep.mubr.msk.f32.mxu0 %vm14303_vm3, %v21034_v13  ;;  %v14629_v17 = vrot.slane %v14431_v24, %v14427_v22 }
  0xe5   :  { %v1334_v31 = vsel %vm1329_vm11, %v1277_v29, %v14563_v28  ;;  %v1221_v49 = vsel %vm1215_vm9, %v1164_v42, %v14561_v12  ;;  %v1165_v44 = vsel %vm1158_vm8, %v1108_v37, %v14563_v28  ;;  %v938_v19 = vsel %vm930_vm4, %v14506_v36, %v14520_v52 }
  0xe6   :  { %846 = vbcast.lane.b32.xlu1 %v14546_v6, 257  ;;  %v1508_v35 = vcombine.high %v1334_v31, %v1334_v31  ;;  %v1515_v38 = vrot.slane %v1334_v31, %v14455_v46  ;;  %827 = vbcast.lane.b32.xlu0 %v14546_v6, 256  ;;  %v2424_v39 = vrot.slane %v2410_v33, %v14455_v46 }
  0xe7   :  { %v2426_v48 = vcombine.low %v1507_v32, %v1506_v30  ;;  %v995_v30 = vsel %vm987_vm5, %v938_v19, %v14537_v0 }
  0xe8   :  { %v14585_v43 = vpop.permute.xlu1 %636  ;;  %v14587_v45 = vpop.permute.xlu0 %412  ;;  %v1522_v53 = vrot.slane %v1508_v35, %v14455_v46  ;;  %v1523_v54 = vcombine.high %v1515_v38, %v1515_v38  ;;  %v2425_v25 = vcombine.low %v2417_v47, %v2424_v39  ;;  %v1052_v32 = vsel %vm21033_vm6, %v995_v30, %v14561_v12 }
  0xe9   :  { %v1278_v11 = vsel %vm1272_vm10, %v1221_v49, %v14587_v45  ;;  %v2434_v5 = vrot.slane %v2426_v48, %v14455_v46  ;;  %v1109_v26 = vsel %vm1101_vm7, %v1052_v32, %v14587_v45  ;;  %v939_v39 = vsel %vm930_vm4, %v14518_v51, %v14535_v63 }
  0xea   :  { %831 = vbcast.lane.b32.xlu1 %v14546_v6, 264  ;;  %v1524_v58 = vcombine.high %v1522_v53, %v1522_v53  ;;  %v2427_v59 = vcombine.low %v1515_v38, %v1523_v54  ;;  %v1335_v60 = vsel %vm1329_vm11, %v1278_v11, %v14585_v43  ;;  %862 = vbcast.lane.b32.xlu0 %v14546_v6, 258 }
  0xeb   :  { %v1532_v61 = vrot.slane %v1335_v60, %v14455_v46  ;;  %13993 = vmatmul.mubr.msk.f32.gmra.mrb[4].mxu0 %vm3208_vm12, %v2425_v25  ;;  %v1525_v21 = vcombine.high %v1335_v60, %v1335_v60  ;;  %v996_v47 = vsel %vm987_vm5, %v939_v39, %v14563_v28  ;;  %v14686_v11 = vrot.slane %v14598_v56, %v14391_v3 }
  0xec   :  { %v14609_v62 = vpop.permute.xlu1 %416  ;;  %v14611_v41 = vpop.permute.xlu0 %126  ;;  %13995 = vmatprep.mubr.msk.f32.mxu0 %vm14303_vm3, %v21034_v13  ;;  %v2443_v8 = vcombine.low %v1522_v53, %v1524_v58  ;;  %v2441_v15 = vrot.slane %v2427_v59, %v14455_v46  ;;  %v1166_v53 = vsel %vm1158_vm8, %v1109_v26, %v14585_v43 }
  0xed   :  { %v1540_v9 = vcombine.high %v1532_v61, %v1532_v61  ;;  %v1222_v10 = vsel %vm1215_vm9, %v1165_v44, %v14611_v41  ;;  %v1539_v31 = vrot.slane %v1525_v21, %v14455_v46  ;;  %v1053_v49 = vsel %vm21033_vm6, %v996_v47, %v14611_v41 }
  0xee   :  { %866 = vbcast.lane.b32.xlu1 %v14546_v6, 266  ;;  %850 = vbcast.lane.b32.xlu0 %v14546_v6, 265  ;;  %v2442_v4 = vcombine.low %v2434_v5, %v2441_v15  ;;  %v1279_v6 = vsel %vm1272_vm10, %v1222_v10, %v14609_v62  ;;  %v2451_v36 = vrot.slane %v2443_v8, %v14455_v46 }
  0xef   :  { %v2444_v23 = vcombine.low %v1532_v61, %v1540_v9  ;;  %v1110_v25 = vsel %vm1101_vm7, %v1053_v49, %v14609_v62  ;;  %v940_v15 = vsel %vm930_vm4, %v14561_v12, %v14587_v45  ;;  %v941_v26 = vsel %vm930_vm4, %v14611_v41, %v14609_v62 }
  0xf0   :  { %v14634_v27 = vpop.permute.xlu1 %130  ;;  %v14636_v29 = vpop.permute.xlu0 %640  ;;  %13996 = vmatmul.mubr.msk.f32.gmra.mrb[6].mxu0 %vm3208_vm12, %v2442_v4  ;;  %v997_v12 = vsel %vm987_vm5, %v940_v15, %v14585_v43 }
  0xf1   :  { %v1336_v24 = vsel %vm1329_vm11, %v1279_v6, %v14636_v29  ;;  %v2458_v52 = vrot.slane %v2444_v23, %v14455_v46  ;;  %13998 = vmatprep.mubr.msk.f32.mxu0 %vm14303_vm3, %v21034_v13  ;;  %v1223_v51 = vsel %vm1215_vm9, %v1166_v53, %v14634_v27  ;;  %v1167_v60 = vsel %vm1158_vm8, %v1110_v25, %v14636_v29 }
  0xf2   :  { %225 = vbcast.lane.b32.xlu1 %v14620_v50, 256  ;;  %v1541_v33 = vcombine.high %v1336_v24, %v1336_v24  ;;  %v1548_v0 = vrot.slane %v1336_v24, %v14455_v46  ;;  %881 = vbcast.lane.b32.xlu0 %v14629_v17, 256  ;;  %v1054_v32 = vsel %vm21033_vm6, %v997_v12, %v14634_v27 }
  0xf3   :  { %v2459_v38 = vcombine.low %v2451_v36, %v2458_v52  ;;  %v998_v39 = vsel %vm987_vm5, %v941_v26, %v14636_v29 }
  0xf4   :  { %v14657_v34 = vpop.permute.xlu1 %137  ;;  %v14659_v35 = vpop.permute.xlu0 %420  ;;  %v1555_v40 = vrot.slane %v1541_v33, %v14455_v46  ;;  %v1556_v42 = vcombine.high %v1548_v0, %v1548_v0  ;;  %v2460_v48 = vcombine.low %v1539_v31, %v1548_v0 }
  0xf5   :  { %13999 = vmatmul.mubr.msk.f32.gmra.mrb[8].mxu0 %vm3208_vm12, %v2459_v38  ;;  %v1280_v55 = vsel %vm1272_vm10, %v1223_v51, %v14659_v35  ;;  %v1224_v44 = vsel %vm1215_vm9, %v1167_v60, %v14657_v34  ;;  %v1111_v43 = vsel %vm1101_vm7, %v1054_v32, %v14659_v35  ;;  %v1055_v62 = vsel %vm21033_vm6, %v998_v39, %v14657_v34 }
  0xf6   :  { %v2461_v54 = vcombine.low %v1556_v42, %v1555_v40  ;;  %900 = vbcast.lane.b32.xlu1 %v14629_v17, 257  ;;  %488 = vbcast.lane.b32.xlu0 %v14620_v50, 257  ;;  %v2468_v58 = vrot.slane %v2460_v48, %v14455_v46  ;;  %v1557_v5 = vcombine.high %v1555_v40, %v1555_v40 }
  0xf7   :  { %14001 = vmatprep.mubr.msk.f32.mxu0 %vm14303_vm3, %v21034_v13 }
  0xf8   :  { %v14676_v63 = vpop.permute.xlu1 %424  ;;  %v14678_v28 = vpop.permute.xlu0 %644  ;;  %v2475_v59 = vrot.slane %v2461_v54, %v14455_v46 }
  0xf9   :  { %v1337_v57 = vsel %vm1329_vm11, %v1280_v55, %v14678_v28  ;;  %v1281_v19 = vsel %vm1272_vm10, %v1224_v44, %v14676_v63  ;;  %v1168_v40 = vsel %vm1158_vm8, %v1111_v43, %v14678_v28  ;;  %v1112_v29 = vsel %vm1101_vm7, %v1055_v62, %v14676_v63 }
  0xfa   :  { %v1558_v37 = vcombine.high %v1337_v57, %v1337_v57  ;;  %v1565_v61 = vrot.slane %v1337_v57, %v14455_v46  ;;  %916 = vbcast.lane.b32.xlu1 %v14629_v17, 258  ;;  %712 = vbcast.lane.b32.xlu0 %v14620_v50, 258  ;;  %v2476_v9 = vcombine.low %v2468_v58, %v2475_v59 }
  0xfb   :  { %v14757_v57 = vrot.slane %v14598_v56, %v14400_v7  ;;  %v943_v12 = vsel %vm930_vm4, %v14657_v34, %v14676_v63 }
  0xfc   :  { %v14701_v8 = vpop.permute.xlu1 %141  ;;  %v14703_v10 = vpop.permute.xlu0 %648  ;;  %v1572_v21 = vrot.slane %v1558_v37, %v14455_v46  ;;  %v1573_v23 = vcombine.high %v1565_v61, %v1565_v61  ;;  %v2477_v4 = vcombine.low %v1557_v5, %v1565_v61  ;;  %14002 = vmatmul.mubr.msk.f32.gmra.mrb[10].mxu0 %vm3208_vm12, %v2476_v9 }
  0xfd   :  { %v1338_v30 = vsel %vm1329_vm11, %v1281_v19, %v14703_v10  ;;  %14004 = vmatprep.mubr.msk.f32.mxu0 %vm14303_vm3, %v21034_v13  ;;  %v1225_v41 = vsel %vm1215_vm9, %v1168_v40, %v14701_v8  ;;  %v1169_v55 = vsel %vm1158_vm8, %v1112_v29, %v14703_v10  ;;  %v942_v19 = vsel %vm930_vm4, %v14634_v27, %v14659_v35 }
  0xfe   :  { %v2478_v6 = vcombine.low %v1573_v23, %v1572_v21  ;;  %v1574_v24 = vcombine.high %v1338_v30, %v1338_v30  ;;  %v1581_v36 = vrot.slane %v1338_v30, %v14455_v46  ;;  %496 = vbcast.lane.b32.xlu1 %v14686_v11, 257  ;;  %236 = vbcast.lane.b32.xlu0 %v14686_v11, 256 }
  0xff   :  { %v2485_v31 = vrot.slane %v2477_v4, %v14455_v46 }
 0x100   :  { %v14719_v45 = vpop.permute.xlu1 %148  ;;  %v14721_v52 = vpop.permute.xlu0 %428  ;;  %v1588_v33 = vrot.slane %v1574_v24, %v14455_v46  ;;  %v1589_v0 = vcombine.high %v1581_v36, %v1581_v36  ;;  %v2492_v38 = vrot.slane %v2478_v6, %v14455_v46  ;;  %v999_v24 = vsel %vm987_vm5, %v942_v19, %v14678_v28 }
 0x101   :  { %v1282_v51 = vsel %vm1272_vm10, %v1225_v41, %v14721_v52  ;;  %v1226_v37 = vsel %vm1215_vm9, %v1169_v55, %v14719_v45  ;;  %v1056_v32 = vsel %vm21033_vm6, %v999_v24, %v14701_v8  ;;  %v1000_v28 = vsel %vm987_vm5, %v943_v12, %v14703_v10 }
 0x102   :  { %v1590_v42 = vcombine.high %v1588_v33, %v1588_v33  ;;  %229 = vbcast.lane.b32.xlu1 %v14620_v50, 264  ;;  %885 = vbcast.lane.b32.xlu0 %v14629_v17, 264  ;;  %v2494_v47 = vcombine.low %v1581_v36, %v1589_v0  ;;  %v2493_v49 = vcombine.low %v2485_v31, %v2492_v38 }
 0x103   :  { %v1113_v0 = vsel %vm1101_vm7, %v1056_v32, %v14721_v52  ;;  %v1057_v26 = vsel %vm21033_vm6, %v1000_v28, %v14719_v45 }
 0x104   :  { %v14745_v48 = vpop.permute.xlu1 %432  ;;  %v653_v53 = vpop.permute.xlu0 %652  ;;  %v2495_v54 = vcombine.low %v1588_v33, %v1590_v42  ;;  %14005 = vmatmul.mubr.msk.f32.gmra.mrb[12].mxu0 %vm3208_vm12, %v2493_v49  ;;  %v2502_v5 = vrot.slane %v2494_v47, %v14455_v46 }
 0x105   :  { %v1339_v25 = vsel %vm1329_vm11, %v1282_v51, %v653_v53  ;;  %14007 = vmatprep.mubr.msk.f32.mxu0 %vm14303_vm3, %v21034_v13  ;;  %v1283_v9 = vsel %vm1272_vm10, %v1226_v37, %v14745_v48  ;;  %v1170_v43 = vsel %vm1158_vm8, %v1113_v0, %v653_v53  ;;  %v1114_v42 = vsel %vm1101_vm7, %v1057_v26, %v14745_v48 }
 0x106   :  { %v1591_v58 = vcombine.high %v1339_v25, %v1339_v25  ;;  %v1598_v59 = vrot.slane %v1339_v25, %v14455_v46  ;;  %720 = vbcast.lane.b32.xlu1 %v14686_v11, 258  ;;  %492 = vbcast.lane.b32.xlu0 %v14620_v50, 265  ;;  %v2509_v60 = vrot.slane %v2495_v54, %v14455_v46 }
 0x108   :  { %v14765_v61 = vpop.permute.xlu1 %152  ;;  %v14767_v44 = vpop.permute.xlu0 %656  ;;  %v1606_v15 = vcombine.high %v1598_v59, %v1598_v59  ;;  %v2510_v23 = vcombine.low %v2502_v5, %v2509_v60  ;;  %v1605_v4 = vrot.slane %v1591_v58, %v14455_v46 }
 0x109   :  { %v1340_v21 = vsel %vm1329_vm11, %v1283_v9, %v14767_v44  ;;  %v1227_v63 = vsel %vm1215_vm9, %v1170_v43, %v14765_v61  ;;  %v1171_v62 = vsel %vm1158_vm8, %v1114_v42, %v14767_v44 }
 0x10a   :  { %v1607_v30 = vcombine.high %v1340_v21, %v1340_v21  ;;  %v1614_v6 = vrot.slane %v1340_v21, %v14455_v46  ;;  %247 = vbcast.lane.b32.xlu1 %v14757_v57, 256  ;;  %904 = vbcast.lane.b32.xlu0 %v14629_v17, 265  ;;  %v2511_v36 = vcombine.low %v1598_v59, %v1606_v15 }
 0x10b   :  { %14008 = vmatmul.mubr.msk.f32.gmra.mrb[14].mxu0 %vm3208_vm12, %v2510_v23 }
 0x10c   :  { %v14786_v27 = vpop.permute.xlu1 %159  ;;  %v14788_v35 = vpop.permute.xlu0 %436  ;;  %v2512_v33 = vcombine.low %v1605_v4, %v1614_v6  ;;  %14010 = vmatprep.mubr.msk.f32.mxu0 %vm14303_vm3, %v21034_v13  ;;  %v1621_v34 = vrot.slane %v1607_v30, %v14455_v46  ;;  %v1622_v31 = vcombine.high %v1614_v6, %v1614_v6  ;;  %v2519_v39 = vrot.slane %v2511_v36, %v14455_v46 }
 0x10e   :  { %920 = vbcast.lane.b32.xlu1 %v14629_v17, 266  ;;  %716 = vbcast.lane.b32.xlu0 %v14620_v50, 266  ;;  %v2526_v40 = vrot.slane %v2512_v33, %v14455_v46  ;;  %v1284_v17 = vsel %vm1272_vm10, %v1227_v63, %v14788_v35  ;;  %v944_v50 = vsel %vm930_vm4, %v14701_v8, %v14721_v52 }
 0x10f   :  { %v1623_v49 = vcombine.high %v1621_v34, %v1621_v34  ;;  %v1001_v51 = vsel %vm987_vm5, %v944_v50, %v653_v53  ;;  %v2528_v55 = vcombine.low %v1622_v31, %v1621_v34  ;;  %v1228_v8 = vsel %vm1215_vm9, %v1171_v62, %v14786_v27 }
 0x110   :  { %v14809_v38 = vpop.permute.xlu1 %440  ;;  %v14811_v10 = vpop.permute.xlu0 %660  ;;  %v2527_v47 = vcombine.low %v2519_v39, %v2526_v40  ;;  %v945_v53 = vsel %vm930_vm4, %v14719_v45, %v14745_v48  ;;  %v1058_v5 = vsel %vm21033_vm6, %v1001_v51, %v14765_v61 }
 0x111   :  { %v1341_v41 = vsel %vm1329_vm11, %v1284_v17, %v14811_v10  ;;  %v1285_v58 = vsel %vm1272_vm10, %v1228_v8, %v14809_v38  ;;  %v1115_v15 = vsel %vm1101_vm7, %v1058_v5, %v14788_v35  ;;  %v1002_v23 = vsel %vm987_vm5, %v945_v53, %v14767_v44 }
 0x112   :  { %v1624_v29 = vcombine.high %v1341_v41, %v1341_v41  ;;  %v1631_v54 = vrot.slane %v1341_v41, %v14455_v46  ;;  %504 = vbcast.lane.b32.xlu1 %v14757_v57, 257  ;;  %240 = vbcast.lane.b32.xlu0 %v14686_v11, 264  ;;  %v1172_v45 = vsel %vm1158_vm8, %v1115_v15, %v14811_v10 }
 0x113   :  { %14011 = vmatmul.mubr.msk.f32.gmra.mrb[16].mxu0 %vm3208_vm12, %v2527_v47  ;;  %v2536_v30 = vrot.slane %v2528_v55, %v14455_v46  ;;  %v1059_v44 = vsel %vm21033_vm6, %v1002_v23, %v14786_v27  ;;  %v14895_v41 = vrot.slane %v14598_v56, %v14407_v14  ;;  %v946_v55 = vsel %vm930_vm4, %v14765_v61, %v14788_v35 }
 0x114   :  { %v14833_v52 = vpop.permute.xlu1 %163  ;;  %v14835_v25 = vpop.permute.xlu0 %664  ;;  %v1638_v59 = vrot.slane %v1624_v29, %v14455_v46  ;;  %v1639_v60 = vcombine.high %v1631_v54, %v1631_v54  ;;  %v2529_v37 = vcombine.low %v1623_v49, %v1631_v54  ;;  %14013 = vmatprep.mubr.msk.f32.mxu0 %vm14303_vm3, %v21034_v13  ;;  %v1116_v34 = vsel %vm1101_vm7, %v1059_v44, %v14809_v38 }
 0x115   :  { %v1342_v9 = vsel %vm1329_vm11, %v1285_v58, %v14835_v25  ;;  %v1229_v36 = vsel %vm1215_vm9, %v1172_v45, %v14833_v52  ;;  %v1173_v40 = vsel %vm1158_vm8, %v1116_v34, %v14835_v25 }
 0x116   :  { %v1640_v19 = vcombine.high %v1342_v9, %v1342_v9  ;;  %v1647_v21 = vrot.slane %v1342_v9, %v14455_v46  ;;  %728 = vbcast.lane.b32.xlu1 %v14757_v57, 258  ;;  %500 = vbcast.lane.b32.xlu0 %v14686_v11, 265  ;;  %v2543_v6 = vrot.slane %v2529_v37, %v14455_v46 }
 0x117   :  { %v2545_v24 = vcombine.low %v1639_v60, %v1638_v59 }
 0x118   :  { %v14858_v48 = vpop.permute.xlu1 %668  ;;  %v14860_v4 = vpop.permute.xlu0 %444  ;;  %v1654_v12 = vrot.slane %v1640_v19, %v14455_v46  ;;  %v1655_v32 = vcombine.high %v1647_v21, %v1647_v21  ;;  %v2544_v28 = vcombine.low %v2536_v30, %v2543_v6  ;;  %v947_v19 = vsel %vm930_vm4, %v14786_v27, %v14809_v38 }
 0x119   :  { %v1286_v33 = vsel %vm1272_vm10, %v1229_v36, %v14860_v4  ;;  %v2553_v42 = vrot.slane %v2545_v24, %v14455_v46  ;;  %v1004_v45 = vsel %vm987_vm5, %v947_v19, %v14835_v25  ;;  %v14936_v6 = vrot.slane %v14598_v56, %v14412_v16 }
 0x11a   :  { %v1656_v0 = vcombine.high %v1654_v12, %v1654_v12  ;;  %v2546_v26 = vcombine.low %v1647_v21, %v1655_v32  ;;  %v1343_v43 = vsel %vm1329_vm11, %v1286_v33, %v14858_v48  ;;  %251 = vbcast.lane.b32.xlu1 %v14757_v57, 264  ;;  %724 = vbcast.lane.b32.xlu0 %v14686_v11, 266 }
 0x11b   :  { %v1664_v63 = vrot.slane %v1343_v43, %v14455_v46  ;;  %14014 = vmatmul.mubr.msk.f32.gmra.mrb[18].mxu0 %vm3208_vm12, %v2544_v28  ;;  %v1657_v47 = vcombine.high %v1343_v43, %v1343_v43 }
 0x11c   :  { %v14879_v31 = vpop.permute.xlu1 %448  ;;  %v14881_v39 = vpop.permute.xlu0 %170  ;;  %14016 = vmatprep.mubr.msk.f32.mxu0 %vm14303_vm3, %v21034_v13  ;;  %v2562_v11 = vcombine.low %v1654_v12, %v1656_v0  ;;  %v2560_v62 = vrot.slane %v2546_v26, %v14455_v46 }
 0x11d   :  { %v1672_v17 = vcombine.high %v1664_v63, %v1664_v63  ;;  %v1230_v50 = vsel %vm1215_vm9, %v1173_v40, %v14881_v39  ;;  %v1061_v24 = vsel %vm21033_vm6, %v1004_v45, %v14881_v39 }
 0x11e   :  { %732 = vbcast.lane.b32.xlu1 %v14757_v57, 266  ;;  %508 = vbcast.lane.b32.xlu0 %v14757_v57, 265  ;;  %v2561_v54 = vcombine.low %v2553_v42, %v2560_v62  ;;  %v1287_v8 = vsel %vm1272_vm10, %v1230_v50, %v14879_v31  ;;  %v1003_v57 = vsel %vm987_vm5, %v946_v55, %v14811_v10 }
 0x11f   :  { %v2563_v49 = vcombine.low %v1664_v63, %v1672_v17  ;;  %v2570_v59 = vrot.slane %v2562_v11, %v14455_v46  ;;  %v1060_v37 = vsel %vm21033_vm6, %v1003_v57, %v14833_v52  ;;  %v1671_v10 = vrot.slane %v1657_v47, %v14455_v46 }
 0x120   :  { %v14897_v29 = vpop.permute.xlu1 %174  ;;  %v14899_v51 = vpop.permute.xlu0 %672  ;;  %14017 = vmatmul.mubr.msk.f32.gmra.mrb[20].mxu0 %vm3208_vm12, %v2561_v54  ;;  %v1117_v35 = vsel %vm1101_vm7, %v1060_v37, %v14860_v4  ;;  %v1118_v44 = vsel %vm1101_vm7, %v1061_v24, %v14879_v31  ;;  %v948_v50 = vsel %vm930_vm4, %v14833_v52, %v14860_v4 }
 0x121   :  { %v1344_v58 = vsel %vm1329_vm11, %v1287_v8, %v14899_v51  ;;  %v2577_v60 = vrot.slane %v2563_v49, %v14455_v46  ;;  %14019 = vmatprep.mubr.msk.f32.mxu0 %vm14303_vm3, %v21034_v13  ;;  %v1174_v36 = vsel %vm1158_vm8, %v1117_v35, %v14858_v48  ;;  %v1175_v26 = vsel %vm1158_vm8, %v1118_v44, %v14899_v51 }
 0x122   :  { %v1673_v53 = vcombine.high %v1344_v58, %v1344_v58  ;;  %v1680_v61 = vrot.slane %v1344_v58, %v14455_v46  ;;  %512 = vbcast.lane.b32.xlu1 %v14895_v41, 257  ;;  %258 = vbcast.lane.b32.xlu0 %v14895_v41, 256  ;;  %v1231_v38 = vsel %vm1215_vm9, %v1174_v36, %v14897_v29 }
 0x123   :  { %v2578_v15 = vcombine.low %v2570_v59, %v2577_v60  ;;  %v1005_v52 = vsel %vm987_vm5, %v948_v50, %v14858_v48  ;;  %v949_v48 = vsel %vm930_vm4, %v14881_v39, %v14879_v31 }
 0x124   :  { %v14921_v5 = vpop.permute.xlu1 %181  ;;  %v14925_v9 = vpop.permute.xlu0 %452  ;;  %v1687_v21 = vrot.slane %v1673_v53, %v14455_v46  ;;  %v1688_v23 = vcombine.high %v1680_v61, %v1680_v61  ;;  %v2579_v30 = vcombine.low %v1671_v10, %v1680_v61  ;;  %v1062_v60 = vsel %vm21033_vm6, %v1005_v52, %v14897_v29 }
 0x125   :  { %14020 = vmatmul.mubr.msk.f32.gmra.mrb[22].mxu0 %vm3208_vm12, %v2578_v15  ;;  %v1288_v32 = vsel %vm1272_vm10, %v1231_v38, %v14925_v9  ;;  %v1232_v63 = vsel %vm1215_vm9, %v1175_v26, %v14921_v5  ;;  %v14996_v61 = vrot.slane %v14598_v56, %v14417_v18  ;;  %v1006_v15 = vsel %vm987_vm5, %v949_v48, %v14899_v51 }
 0x126   :  { %v2580_v27 = vcombine.low %v1688_v23, %v1687_v21  ;;  %262 = vbcast.lane.b32.xlu1 %v14895_v41, 264  ;;  %736 = vbcast.lane.b32.xlu0 %v14895_v41, 258  ;;  %v2587_v28 = vrot.slane %v2579_v30, %v14455_v46  ;;  %v1689_v40 = vcombine.high %v1687_v21, %v1687_v21 }
 0x127   :  { %14022 = vmatprep.mubr.msk.f32.mxu0 %vm14303_vm3, %v21034_v13  ;;  %v1063_v31 = vsel %vm21033_vm6, %v1006_v15, %v14921_v5 }
 0x128   :  { %v14946_v25 = vpop.permute.xlu1 %456  ;;  %v14948_v12 = vpop.permute.xlu0 %676  ;;  %v2594_v0 = vrot.slane %v2580_v27, %v14455_v46 }
 0x129   :  { %v1345_v33 = vsel %vm1329_vm11, %v1288_v32, %v14948_v12  ;;  %v1289_v62 = vsel %vm1272_vm10, %v1232_v63, %v14946_v25  ;;  %v1120_v51 = vsel %vm1101_vm7, %v1063_v31, %v14946_v25 }
 0x12a   :  { %v1690_v43 = vcombine.high %v1345_v33, %v1345_v33  ;;  %v1697_v34 = vrot.slane %v1345_v33, %v14455_v46  ;;  %269 = vbcast.lane.b32.xlu1 %v14936_v6, 256  ;;  %516 = vbcast.lane.b32.xlu0 %v14895_v41, 265  ;;  %v2595_v11 = vcombine.low %v2587_v28, %v2594_v0 }
 0x12c   :  { %v14967_v42 = vpop.permute.xlu1 %185  ;;  %v14969_v17 = vpop.permute.xlu0 %680  ;;  %v1704_v47 = vrot.slane %v1690_v43, %v14455_v46  ;;  %v1705_v49 = vcombine.high %v1697_v34, %v1697_v34  ;;  %v2596_v54 = vcombine.low %v1689_v40, %v1697_v34  ;;  %14023 = vmatmul.mubr.msk.f32.gmra.mrb[24].mxu0 %vm3208_vm12, %v2595_v11  ;;  %v950_v11 = vsel %vm930_vm4, %v14897_v29, %v14925_v9 }
 0x12d   :  { %v1346_v55 = vsel %vm1329_vm11, %v1289_v62, %v14969_v17  ;;  %14025 = vmatprep.mubr.msk.f32.mxu0 %vm14303_vm3, %v21034_v13  ;;  %v1177_v38 = vsel %vm1158_vm8, %v1120_v51, %v14969_v17 }
 0x12e   :  { %v2597_v8 = vcombine.low %v1705_v49, %v1704_v47  ;;  %v1706_v57 = vcombine.high %v1346_v55, %v1346_v55  ;;  %v1713_v58 = vrot.slane %v1346_v55, %v14455_v46  ;;  %520 = vbcast.lane.b32.xlu1 %v14936_v6, 257  ;;  %740 = vbcast.lane.b32.xlu0 %v14895_v41, 266 }
 0x12f   :  { %v1119_v41 = vsel %vm1101_vm7, %v1062_v60, %v14925_v9  ;;  %v2604_v35 = vrot.slane %v2596_v54, %v14455_v46  ;;  %v1007_v55 = vsel %vm987_vm5, %v950_v11, %v14948_v12  ;;  %v15069_v60 = vrot.slane %v14598_v56, %v14422_v20 }
 0x130   :  { %v14985_v4 = vpop.permute.xlu1 %192  ;;  %v14987_v59 = vpop.permute.xlu0 %460  ;;  %v1720_v37 = vrot.slane %v1706_v57, %v14455_v46  ;;  %v1721_v53 = vcombine.high %v1713_v58, %v1713_v58  ;;  %v2611_v10 = vrot.slane %v2597_v8, %v14455_v46  ;;  %v1176_v19 = vsel %vm1158_vm8, %v1119_v41, %v14948_v12 }
 0x131   :  { %v1233_v39 = vsel %vm1215_vm9, %v1176_v19, %v14967_v42  ;;  %v1234_v0 = vsel %vm1215_vm9, %v1177_v38, %v14985_v4  ;;  %v951_v57 = vsel %vm930_vm4, %v14921_v5, %v14946_v25 }
 0x132   :  { %v1722_v21 = vcombine.high %v1720_v37, %v1720_v37  ;;  %273 = vbcast.lane.b32.xlu1 %v14936_v6, 264  ;;  %744 = vbcast.lane.b32.xlu0 %v14936_v6, 258  ;;  %v2613_v23 = vcombine.low %v1713_v58, %v1721_v53  ;;  %v2612_v30 = vcombine.low %v2604_v35, %v2611_v10 }
 0x133   :  { %v1290_v27 = vsel %vm1272_vm10, %v1233_v39, %v14987_v59  ;;  %v1064_v58 = vsel %vm21033_vm6, %v1007_v55, %v14967_v42 }
 0x134   :  { %v15015_v45 = vpop.permute.xlu1 %464  ;;  %v685_v24 = vpop.permute.xlu0 %684  ;;  %v2614_v36 = vcombine.low %v1720_v37, %v1722_v21  ;;  %14026 = vmatmul.mubr.msk.f32.gmra.mrb[26].mxu0 %vm3208_vm12, %v2612_v30  ;;  %v2621_v34 = vrot.slane %v2613_v23, %v14455_v46  ;;  %v1121_v12 = vsel %vm1101_vm7, %v1064_v58, %v14987_v59  ;;  %v952_v21 = vsel %vm930_vm4, %v14967_v42, %v14987_v59 }
 0x135   :  { %v1347_v32 = vsel %vm1329_vm11, %v1290_v27, %v685_v24  ;;  %14028 = vmatprep.mubr.msk.f32.mxu0 %vm14303_vm3, %v21034_v13  ;;  %v1291_v63 = vsel %vm1272_vm10, %v1234_v0, %v15015_v45  ;;  %v1178_v25 = vsel %vm1158_vm8, %v1121_v12, %v685_v24  ;;  %v1009_v27 = vsel %vm987_vm5, %v952_v21, %v685_v24 }
 0x136   :  { %v1723_v44 = vcombine.high %v1347_v32, %v1347_v32  ;;  %v1730_v33 = vrot.slane %v1347_v32, %v14455_v46  ;;  %280 = vbcast.lane.b32.xlu1 %v14996_v61, 256  ;;  %524 = vbcast.lane.b32.xlu0 %v14936_v6, 265  ;;  %v2628_v28 = vrot.slane %v2614_v36, %v14455_v46 }
 0x137   :  { %v953_v24 = vsel %vm930_vm4, %v14985_v4, %v15015_v45 }
 0x138   :  { %v15031_v26 = vpop.permute.xlu1 %196  ;;  %v15033_v43 = vpop.permute.xlu0 %688  ;;  %v1738_v40 = vcombine.high %v1730_v33, %v1730_v33  ;;  %v2629_v62 = vcombine.low %v2621_v34, %v2628_v28  ;;  %v1737_v47 = vrot.slane %v1723_v44, %v14455_v46 }
 0x139   :  { %v1348_v50 = vsel %vm1329_vm11, %v1291_v63, %v15033_v43  ;;  %v1066_v34 = vsel %vm21033_vm6, %v1009_v27, %v15031_v26 }
 0x13a   :  { %v1739_v49 = vcombine.high %v1348_v50, %v1348_v50  ;;  %v1746_v54 = vrot.slane %v1348_v50, %v14455_v46  ;;  %528 = vbcast.lane.b32.xlu1 %v14996_v61, 257  ;;  %748 = vbcast.lane.b32.xlu0 %v14936_v6, 266  ;;  %v2630_v8 = vcombine.low %v1730_v33, %v1738_v40 }
 0x13b   :  { %14029 = vmatmul.mubr.msk.f32.gmra.mrb[28].mxu0 %vm3208_vm12, %v2629_v62  ;;  %v1008_v6 = vsel %vm987_vm5, %v951_v57, %v14969_v17  ;;  %v1235_v17 = vsel %vm1215_vm9, %v1178_v25, %v15031_v26  ;;  %v1010_v62 = vsel %vm987_vm5, %v953_v24, %v15033_v43 }
 0x13c   :  { %v15052_v29 = vpop.permute.xlu1 %203  ;;  %v15054_v9 = vpop.permute.xlu0 %468  ;;  %v2631_v52 = vcombine.low %v1737_v47, %v1746_v54  ;;  %14031 = vmatprep.mubr.msk.f32.mxu0 %vm14303_vm3, %v21034_v13  ;;  %v1065_v5 = vsel %vm21033_vm6, %v1008_v6, %v14985_v4  ;;  %v1753_v37 = vrot.slane %v1739_v49, %v14455_v46  ;;  %v1754_v53 = vcombine.high %v1746_v54, %v1746_v54 }
 0x13d   :  { %v2638_v35 = vrot.slane %v2630_v8, %v14455_v46  ;;  %v1122_v15 = vsel %vm1101_vm7, %v1065_v5, %v15015_v45  ;;  %v1292_v19 = vsel %vm1272_vm10, %v1235_v17, %v15054_v9  ;;  %v1123_v40 = vsel %vm1101_vm7, %v1066_v34, %v15054_v9  ;;  %v15194_v34 = vld [vmem:[#allocation3 + $0x18] sm:$0xff] }
 0x13e   :  { %284 = vbcast.lane.b32.xlu1 %v14996_v61, 264  ;;  %752 = vbcast.lane.b32.xlu0 %v14996_v61, 258  ;;  %v2645_v10 = vrot.slane %v2631_v52, %v14455_v46  ;;  %v1179_v31 = vsel %vm1158_vm8, %v1122_v15, %v15033_v43  ;;  %v1755_v30 = vcombine.high %v1753_v37, %v1753_v37 }
 0x13f   :  { %v2647_v38 = vcombine.low %v1754_v53, %v1753_v37  ;;  %v1236_v42 = vsel %vm1215_vm9, %v1179_v31, %v15052_v29  ;;  %v1067_v43 = vsel %vm21033_vm6, %v1010_v62, %v15052_v29 }
 0x140   :  { %v15079_v48 = vpop.permute.xlu1 %472  ;;  %v15081_v41 = vpop.permute.xlu0 %692  ;;  %v2646_v23 = vcombine.low %v2638_v35, %v2645_v10  ;;  %v954_v35 = vsel %vm930_vm4, %v15031_v26, %v15054_v9  ;;  %v15170_v26 = vrot.slane %v14598_v56, %v14427_v22 }
 0x141   :  { %v1349_v39 = vsel %vm1329_vm11, %v1292_v19, %v15081_v41  ;;  %v1293_v44 = vsel %vm1272_vm10, %v1236_v42, %v15079_v48  ;;  %v1180_v4 = vsel %vm1158_vm8, %v1123_v40, %v15081_v41  ;;  %v2655_v49 = vrot.slane %v2647_v38, %v14455_v46 }
 0x142   :  { %v1756_v51 = vcombine.high %v1349_v39, %v1349_v39  ;;  %v1763_v36 = vrot.slane %v1349_v39, %v14455_v46  ;;  %291 = vbcast.lane.b32.xlu1 %v15069_v60, 256  ;;  %532 = vbcast.lane.b32.xlu0 %v14996_v61, 265  ;;  %v1124_v25 = vsel %vm1101_vm7, %v1067_v43, %v15079_v48 }
 0x143   :  { %14032 = vmatmul.mubr.msk.f32.gmra.mrb[30].mxu0 %vm3208_vm12, %v2646_v23  ;;  %v1011_v23 = vsel %vm987_vm5, %v954_v35, %v15081_v41  ;;  %v955_v56 = vsel %vm930_vm4, %v15052_v29, %v15079_v48 }
 0x144   :  { %v15103_v59 = vpop.permute.xlu1 %207  ;;  %v15105_v32 = vpop.permute.xlu0 %696  ;;  %v1770_v33 = vrot.slane %v1756_v51, %v14455_v46  ;;  %v1771_v28 = vcombine.high %v1763_v36, %v1763_v36  ;;  %v2648_v0 = vcombine.low %v1755_v30, %v1763_v36  ;;  %14034 = vmatprep.mubr.msk.f32.mxu0 %vm14303_vm3, %v21034_v13 }
 0x145   :  { %v1350_v63 = vsel %vm1329_vm11, %v1293_v44, %v15105_v32  ;;  %v1237_v8 = vsel %vm1215_vm9, %v1180_v4, %v15103_v59  ;;  %v1181_v10 = vsel %vm1158_vm8, %v1124_v25, %v15105_v32  ;;  %v1068_v9 = vsel %vm21033_vm6, %v1011_v23, %v15103_v59 }
 0x146   :  { %v1772_v11 = vcombine.high %v1350_v63, %v1350_v63  ;;  %v1779_v50 = vrot.slane %v1350_v63, %v14455_v46  ;;  %536 = vbcast.lane.b32.xlu1 %v15069_v60, 257  ;;  %756 = vbcast.lane.b32.xlu0 %v14996_v61, 266  ;;  %v2662_v54 = vrot.slane %v2648_v0, %v14455_v46 }
 0x147   :  { %v2664_v55 = vcombine.low %v1771_v28, %v1770_v33  ;;  %v1012_v29 = vsel %vm987_vm5, %v955_v56, %v15105_v32 }
 0x148   :  { %v15128_v45 = vpop.permute.xlu1 %700  ;;  %v15130_v47 = vpop.permute.xlu0 %476  ;;  %v1786_v61 = vrot.slane %v1772_v11, %v14455_v46  ;;  %v1787_v57 = vcombine.high %v1779_v50, %v1779_v50  ;;  %v2663_v52 = vcombine.low %v2655_v49, %v2662_v54 }
 0x149   :  { %v1294_v58 = vsel %vm1272_vm10, %v1237_v8, %v15130_v47  ;;  %v2672_v15 = vrot.slane %v2664_v55, %v14455_v46  ;;  %v1125_v38 = vsel %vm1101_vm7, %v1068_v9, %v15130_v47  ;;  %v15216_v55 = vrot.slane %v15194_v34, %v14388_v2 }
 0x14a   :  { %v1788_v6 = vcombine.high %v1786_v61, %v1786_v61  ;;  %v2665_v12 = vcombine.low %v1779_v50, %v1787_v57  ;;  %v1351_v5 = vsel %vm1329_vm11, %v1294_v58, %v15128_v45  ;;  %295 = vbcast.lane.b32.xlu1 %v15069_v60, 264  ;;  %760 = vbcast.lane.b32.xlu0 %v15069_v60, 258 }
 0x14b   :  { %v1796_v37 = vrot.slane %v1351_v5, %v14455_v46  ;;  %14035 = vmatmul.mubr.msk.f32.gmra.mrb[32].mxu0 %vm3208_vm12, %v2663_v52  ;;  %v1789_v30 = vcombine.high %v1351_v5, %v1351_v5  ;;  %v1182_v48 = vsel %vm1158_vm8, %v1125_v38, %v15128_v45  ;;  %v956_v43 = vsel %vm930_vm4, %v15103_v59, %v15130_v47 }
 0x14c   :  { %v15149_v17 = vpop.permute.xlu1 %480  ;;  %v15151_v53 = vpop.permute.xlu0 %214  ;;  %14037 = vmatprep.mubr.msk.f32.mxu0 %vm14303_vm3, %v21034_v13  ;;  %v2681_v19 = vcombine.low %v1786_v61, %v1788_v6  ;;  %v2679_v39 = vrot.slane %v2665_v12, %v14455_v46  ;;  %v1013_v47 = vsel %vm987_vm5, %v956_v43, %v15128_v45 }
 0x14d   :  { %v1804_v21 = vcombine.high %v1796_v37, %v1796_v37  ;;  %v1238_v31 = vsel %vm1215_vm9, %v1181_v10, %v15151_v53  ;;  %v1803_v28 = vrot.slane %v1789_v30, %v14455_v46  ;;  %v1069_v32 = vsel %vm21033_vm6, %v1012_v29, %v15151_v53 }
 0x14e   :  { %764 = vbcast.lane.b32.xlu1 %v15069_v60, 266  ;;  %540 = vbcast.lane.b32.xlu0 %v15069_v60, 265  ;;  %v2680_v27 = vcombine.low %v2672_v15, %v2679_v39  ;;  %v1295_v41 = vsel %vm1272_vm10, %v1238_v31, %v15149_v17  ;;  %v2689_v44 = vrot.slane %v2681_v19, %v14455_v46 }
 0x14f   :  { %v2682_v51 = vcombine.low %v1796_v37, %v1804_v21  ;;  %v1126_v2 = vsel %vm1101_vm7, %v1069_v32, %v15149_v17 }
 0x150   :  { %v15174_v36 = vpop.permute.xlu1 %218  ;;  %v15180_v42 = vpop.permute.xlu0 %704  ;;  %14038 = vmatmul.mubr.msk.f32.gmra.mrb[34].mxu0 %vm3208_vm12, %v2680_v27 }
 0x151   :  { %v1352_v60 = vsel %vm1329_vm11, %v1295_v41, %v15180_v42  ;;  %v2696_v33 = vrot.slane %v2682_v51, %v14455_v46  ;;  %14040 = vmatprep.mubr.msk.f32.mxu0 %vm14303_vm3, %v21034_v13  ;;  %v1239_v11 = vsel %vm1215_vm9, %v1182_v48, %v15174_v36  ;;  %v1183_v59 = vsel %vm1158_vm8, %v1126_v2, %v15180_v42 }
 0x152   :  { %v1805_v0 = vcombine.high %v1352_v60, %v1352_v60  ;;  %v1812_v24 = vrot.slane %v1352_v60, %v14455_v46  ;;  %544 = vbcast.lane.b32.xlu1 %v15170_v26, 257  ;;  %302 = vbcast.lane.b32.xlu0 %v15170_v26, 256  ;;  %v1070_v21 = vsel %vm21033_vm6, %v1013_v47, %v15174_v36 }
 0x153   :  { %v2697_v40 = vcombine.low %v2689_v44, %v2696_v33 }
 0x154   :  { %v15200_v63 = vpop.permute.xlu1 %708  ;;  %v1819_v50 = vrot.slane %v1805_v0, %v14455_v46  ;;  %v1820_v62 = vcombine.high %v1812_v24, %v1812_v24  ;;  %v2698_v4 = vcombine.low %v1803_v28, %v1812_v24  ;;  %v15207_v49 = vpop.permute.xlu0 %484 }
 0x155   :  { %v1296_v54 = vsel %vm1272_vm10, %v1239_v11, %v15207_v49  ;;  %14041 = vmatmul.mubr.msk.f32.gmra.mrb[36].mxu0 %vm3208_vm12, %v2697_v40  ;;  %v1127_v23 = vsel %vm1101_vm7, %v1070_v21, %v15207_v49  ;;  %v322_v40 = vrot.slane %v15194_v34, %v14391_v3  ;;  %v957_v11 = vsel %vm930_vm4, %v15151_v53, %v15149_v17 }
 0x156   :  { %v1821_v8 = vcombine.high %v1819_v50, %v1819_v50  ;;  %v2699_v61 = vcombine.low %v1820_v62, %v1819_v50  ;;  %v1353_v57 = vsel %vm1329_vm11, %v1296_v54, %v15200_v63  ;;  %306 = vbcast.lane.b32.xlu1 %v15170_v26, 264  ;;  %768 = vbcast.lane.b32.xlu0 %v15170_v26, 258 }
 0x157   :  { %v1822_v58 = vcombine.high %v1353_v57, %v1353_v57  ;;  %v1829_v52 = vrot.slane %v1353_v57, %v14455_v46  ;;  %14043 = vmatprep.mubr.msk.f32.mxu0 %vm14303_vm3, %v21034_v13  ;;  %v2706_v5 = vrot.slane %v2698_v4, %v14455_v46  ;;  %v1184_v56 = vsel %vm1158_vm8, %v1127_v23, %v15200_v63 }
 0x158   :  { %v847_v6 = vpop.permute.xlu1 %846  ;;  %v828_v12 = vpop.permute.xlu0 %827  ;;  %v2713_v25 = vrot.slane %v2699_v61, %v14455_v46  ;;  %v1014_v4 = vsel %vm987_vm5, %v957_v11, %v15180_v42 }
 0x159   :  { %v1836_v37 = vrot.slane %v1822_v58, %v14455_v46  ;;  %v1837_v35 = vcombine.high %v1829_v52, %v1829_v52  ;;  %v2715_v10 = vcombine.low %v1821_v8, %v1829_v52  ;;  %v1240_v15 = vsel %vm1215_vm9, %v1183_v59, %v828_v12 }
 0x15a   :  { %313 = vbcast.lane.b32.xlu1 %v15216_v55, 256  ;;  %548 = vbcast.lane.b32.xlu0 %v15170_v26, 265  ;;  %v2714_v19 = vcombine.low %v2706_v5, %v2713_v25  ;;  %v1297_v45 = vsel %vm1272_vm10, %v1240_v15, %v847_v6  ;;  %v1071_v8 = vsel %vm21033_vm6, %v1014_v4, %v828_v12 }
 0x15b   :  { %v2716_v39 = vcombine.low %v1837_v35, %v1836_v37  ;;  %v2723_v51 = vrot.slane %v2715_v10, %v14455_v46  ;;  %v1128_v58 = vsel %vm1101_vm7, %v1071_v8, %v847_v6  ;;  %v333_v35 = vrot.slane %v15194_v34, %v14400_v7 }
 0x15c   :  { %v15242_v31 = vpop.permute.xlu1 %831  ;;  %14044 = vmatmul.mubr.msk.f32.gmra.mrb[38].mxu0 %vm3208_vm12, %v2714_v19  ;;  %v863_v30 = vpop.permute.xlu0 %862 }
 0x15d   :  { %v1354_v9 = vsel %vm1329_vm11, %v1297_v45, %v863_v30  ;;  %14046 = vmatprep.mubr.msk.f32.mxu0 %vm14303_vm3, %v21034_v13  ;;  %v2730_v27 = vrot.slane %v2716_v39, %v14455_v46  ;;  %v1241_v33 = vsel %vm1215_vm9, %v1184_v56, %v15242_v31  ;;  %v1185_v42 = vsel %vm1158_vm8, %v1128_v58, %v863_v30 }
 0x15e   :  { %v1838_v38 = vcombine.high %v1354_v9, %v1354_v9  ;;  %v1845_v41 = vrot.slane %v1354_v9, %v14455_v46  ;;  %552 = vbcast.lane.b32.xlu1 %v15216_v55, 257  ;;  %772 = vbcast.lane.b32.xlu0 %v15170_v26, 266  ;;  %v958_v30 = vsel %vm930_vm4, %v15174_v36, %v15207_v49 }
 0x15f   :  { %v2731_v44 = vcombine.low %v2723_v51, %v2730_v27  ;;  %v1015_v27 = vsel %vm987_vm5, %v958_v30, %v15200_v63 }
 0x160   :  { %v15258_v60 = vpop.permute.xlu1 %866  ;;  %v1852_v28 = vrot.slane %v1838_v38, %v14455_v46  ;;  %v1853_v0 = vcombine.high %v1845_v41, %v1845_v41  ;;  %v15263_v24 = vpop.permute.xlu0 %850  ;;  %v1072_v38 = vsel %vm21033_vm6, %v1015_v27, %v15242_v31 }
 0x161   :  { %v1298_v29 = vsel %vm1272_vm10, %v1241_v33, %v15263_v24  ;;  %14047 = vmatmul.mubr.msk.f32.gmra.mrb[40].mxu0 %vm3208_vm12, %v2731_v44  ;;  %v1129_v36 = vsel %vm1101_vm7, %v1072_v38, %v15263_v24  ;;  %v344_v44 = vrot.slane %v15194_v34, %v14407_v14 }
 0x162   :  { %v1854_v26 = vcombine.high %v1852_v28, %v1852_v28  ;;  %v2732_v48 = vcombine.low %v1845_v41, %v1853_v0  ;;  %317 = vbcast.lane.b32.xlu1 %v15216_v55, 264  ;;  %776 = vbcast.lane.b32.xlu0 %v15216_v55, 258  ;;  %v1355_v50 = vsel %vm1329_vm11, %v1298_v29, %v15258_v60 }
 0x163   :  { %14049 = vmatprep.mubr.msk.f32.mxu0 %vm14303_vm3, %v21034_v13  ;;  %v1862_v61 = vrot.slane %v1355_v50, %v14455_v46  ;;  %v1855_v52 = vcombine.high %v1355_v50, %v1355_v50  ;;  %v1186_v63 = vsel %vm1158_vm8, %v1129_v36, %v15258_v60 }
 0x164   :  { %v15277_v62 = vpop.permute.xlu1 %225  ;;  %v2733_v32 = vcombine.low %v1852_v28, %v1854_v26  ;;  %v882_v54 = vpop.permute.xlu0 %881  ;;  %v2740_v3 = vrot.slane %v2732_v48, %v14455_v46 }
 0x165   :  { %v1870_v2 = vcombine.high %v1862_v61, %v1862_v61  ;;  %v1242_v12 = vsel %vm1215_vm9, %v1185_v42, %v882_v54  ;;  %v1869_v59 = vrot.slane %v1855_v52, %v14455_v46 }
 0x166   :  { %324 = vbcast.lane.b32.xlu1 %v322_v40, 256  ;;  %556 = vbcast.lane.b32.xlu0 %v15216_v55, 265  ;;  %v2747_v17 = vrot.slane %v2733_v32, %v14455_v46 }
 0x167   :  { %v2749_v10 = vcombine.low %v1862_v61, %v1870_v2 }
 0x168   :  { %v901_v53 = vpop.permute.xlu1 %900  ;;  %v489_v57 = vpop.permute.xlu0 %488  ;;  %v2748_v43 = vcombine.low %v2740_v3, %v2747_v17  ;;  %v15343_v3 = vrot.slane %v15194_v34, %v14412_v16 }
 0x169   :  { %v1299_v5 = vsel %vm1272_vm10, %v1242_v12, %v901_v53  ;;  %v2757_v39 = vrot.slane %v2749_v10, %v14455_v46  ;;  %v959_v31 = vsel %vm930_vm4, %v15277_v62, %v489_v57 }
 0x16a   :  { %560 = vbcast.lane.b32.xlu1 %v322_v40, 257  ;;  %780 = vbcast.lane.b32.xlu0 %v15216_v55, 266 }
 0x16b   :  { %14050 = vmatmul.mubr.msk.f32.gmra.mrb[42].mxu0 %vm3208_vm12, %v2748_v43 }
 0x16c   :  { %v917_v25 = vpop.permute.xlu1 %916  ;;  %v713_v37 = vpop.permute.xlu0 %712  ;;  %14052 = vmatprep.mubr.msk.f32.mxu0 %vm14303_vm3, %v21034_v13 }
 0x16d   :  { %v1356_v6 = vsel %vm1329_vm11, %v1299_v5, %v917_v25  ;;  %v1016_v24 = vsel %vm987_vm5, %v959_v31, %v713_v37 }
 0x16e   :  { %v1878_v55 = vrot.slane %v1356_v6, %v14455_v46  ;;  %328 = vbcast.lane.b32.xlu1 %v322_v40, 264  ;;  %784 = vbcast.lane.b32.xlu0 %v322_v40, 258  ;;  %v1871_v41 = vcombine.high %v1356_v6, %v1356_v6 }
 0x170   :  { %v2750_v47 = vcombine.low %v1869_v59, %v1878_v55  ;;  %v15301_v15 = vpop.permute.xlu1 %496  ;;  %v15303_v19 = vpop.permute.xlu0 %236  ;;  %v1885_v33 = vrot.slane %v1871_v41, %v14455_v46  ;;  %v1886_v28 = vcombine.high %v1878_v55, %v1878_v55 }
 0x171   :  { %v1073_v14 = vsel %vm21033_vm6, %v1016_v24, %v15303_v19  ;;  %v961_v41 = vsel %vm930_vm4, %v15303_v19, %v15301_v15 }
 0x172   :  { %v2764_v21 = vrot.slane %v2750_v47, %v14455_v46  ;;  %335 = vbcast.lane.b32.xlu1 %v333_v35, 256  ;;  %564 = vbcast.lane.b32.xlu0 %v322_v40, 265  ;;  %v2766_v11 = vcombine.low %v1886_v28, %v1885_v33  ;;  %v1887_v60 = vcombine.high %v1885_v33, %v1885_v33 }
 0x173   :  { %v1130_v8 = vsel %vm1101_vm7, %v1073_v14, %v15301_v15 }
 0x174   :  { %v230_v23 = vpop.permute.xlu1 %229  ;;  %v886_v7 = vpop.permute.xlu0 %885  ;;  %v2765_v45 = vcombine.low %v2757_v39, %v2764_v21  ;;  %v2774_v61 = vrot.slane %v2766_v11, %v14455_v46 }
 0x175   :  { %v1243_v0 = vsel %vm1215_vm9, %v1186_v63, %v886_v7 }
 0x176   :  { %568 = vbcast.lane.b32.xlu1 %v333_v35, 257  ;;  %788 = vbcast.lane.b32.xlu0 %v322_v40, 266 }
 0x177   :  { %14053 = vmatmul.mubr.msk.f32.gmra.mrb[44].mxu0 %vm3208_vm12, %v2765_v45 }
 0x178   :  { %v15311_v9 = vpop.permute.xlu1 %720  ;;  %v493_v51 = vpop.permute.xlu0 %492  ;;  %14055 = vmatprep.mubr.msk.f32.mxu0 %vm14303_vm3, %v21034_v13 }
 0x179   :  { %v1187_v17 = vsel %vm1158_vm8, %v1130_v8, %v15311_v9  ;;  %v960_v12 = vsel %vm930_vm4, %v230_v23, %v493_v51 }
 0x17a   :  { %339 = vbcast.lane.b32.xlu1 %v333_v35, 264  ;;  %792 = vbcast.lane.b32.xlu0 %v333_v35, 258 }
 0x17c   :  { %v15321_v49 = vpop.permute.xlu1 %247  ;;  %v905_v56 = vpop.permute.xlu0 %904 }
 0x17d   :  { %v1300_v29 = vsel %vm1272_vm10, %v1243_v0, %v905_v56  ;;  %v1244_v57 = vsel %vm1215_vm9, %v1187_v17, %v15321_v49  ;;  %v15387_v56 = vrot.slane %v15194_v34, %v14417_v18 }
 0x17e   :  { %796 = vbcast.lane.b32.xlu1 %v333_v35, 266  ;;  %572 = vbcast.lane.b32.xlu0 %v333_v35, 265 }
 0x180   :  { %v921_v26 = vpop.permute.xlu1 %920  ;;  %v717_v48 = vpop.permute.xlu0 %716 }
 0x181   :  { %v1357_v40 = vsel %vm1329_vm11, %v1300_v29, %v921_v26  ;;  %v1017_v25 = vsel %vm987_vm5, %v960_v12, %v717_v48 }
 0x182   :  { %v1895_v50 = vrot.slane %v1357_v40, %v14455_v46  ;;  %576 = vbcast.lane.b32.xlu1 %v344_v44, 257  ;;  %346 = vbcast.lane.b32.xlu0 %v344_v44, 256  ;;  %v1888_v62 = vcombine.high %v1357_v40, %v1357_v40 }
 0x184   :  { %v2767_v4 = vcombine.low %v1887_v60, %v1895_v50  ;;  %v15337_v32 = vpop.permute.xlu1 %504  ;;  %v241_v54 = vpop.permute.xlu0 %240  ;;  %v1902_v43 = vrot.slane %v1888_v62, %v14455_v46  ;;  %v1903_v58 = vcombine.high %v1895_v50, %v1895_v50 }
 0x185   :  { %v1301_v42 = vsel %vm1272_vm10, %v1244_v57, %v15337_v32  ;;  %v1074_v35 = vsel %vm21033_vm6, %v1017_v25, %v241_v54 }
 0x186   :  { %v2781_v53 = vrot.slane %v2767_v4, %v14455_v46  ;;  %350 = vbcast.lane.b32.xlu1 %v344_v44, 264  ;;  %800 = vbcast.lane.b32.xlu0 %v344_v44, 258  ;;  %v2783_v10 = vcombine.low %v1903_v58, %v1902_v43 }
 0x188   :  { %v15354_v16 = vpop.permute.xlu1 %728  ;;  %v501_v52 = vpop.permute.xlu0 %500  ;;  %v2782_v2 = vcombine.low %v2774_v61, %v2781_v53  ;;  %v2791_v45 = vrot.slane %v2783_v10, %v14455_v46 }
 0x189   :  { %v1358_v5 = vsel %vm1329_vm11, %v1301_v42, %v15354_v16  ;;  %v1131_v55 = vsel %vm1101_vm7, %v1074_v35, %v501_v52  ;;  %v962_v48 = vsel %vm930_vm4, %v241_v54, %v501_v52 }
 0x18a   :  { %v1904_v37 = vcombine.high %v1358_v5, %v1358_v5  ;;  %v1911_v6 = vrot.slane %v1358_v5, %v14455_v46  ;;  %357 = vbcast.lane.b32.xlu1 %v15343_v3, 256  ;;  %580 = vbcast.lane.b32.xlu0 %v344_v44, 265 }
 0x18b   :  { %14056 = vmatmul.mubr.msk.f32.gmra.mrb[46].mxu0 %vm3208_vm12, %v2782_v2  ;;  %v963_v2 = vsel %vm930_vm4, %v15321_v49, %v15337_v32 }
 0x18c   :  { %v1919_v59 = vcombine.high %v1911_v6, %v1911_v6  ;;  %v15365_v47 = vpop.permute.xlu1 %251  ;;  %v725_v21 = vpop.permute.xlu0 %724  ;;  %14058 = vmatprep.mubr.msk.f32.mxu0 %vm14303_vm3, %v21034_v13  ;;  %v1918_v23 = vrot.slane %v1904_v37, %v14455_v46 }
 0x18d   :  { %v1188_v39 = vsel %vm1158_vm8, %v1131_v55, %v725_v21  ;;  %v1019_v40 = vsel %vm987_vm5, %v962_v48, %v725_v21  ;;  %v15460_v21 = vrot.slane %v15194_v34, %v14422_v20 }
 0x18e   :  { %v2784_v7 = vcombine.low %v1911_v6, %v1919_v59  ;;  %584 = vbcast.lane.b32.xlu1 %v15343_v3, 257  ;;  %804 = vbcast.lane.b32.xlu0 %v344_v44, 266  ;;  %v1245_v30 = vsel %vm1215_vm9, %v1188_v39, %v15365_v47  ;;  %v1018_v44 = vsel %vm987_vm5, %v961_v41, %v15311_v9 }
 0x18f   :  { %v1920_v33 = vcombine.high %v1918_v23, %v1918_v23  ;;  %v1075_v15 = vsel %vm21033_vm6, %v1018_v44, %v15321_v49  ;;  %v1076_v61 = vsel %vm21033_vm6, %v1019_v40, %v15365_v47 }
 0x190   :  { %v15375_v51 = vpop.permute.xlu1 %732  ;;  %v15377_v27 = vpop.permute.xlu0 %508  ;;  %v2798_v38 = vrot.slane %v2784_v7, %v14455_v46  ;;  %v1132_v18 = vsel %vm1101_vm7, %v1075_v15, %v15337_v32 }
 0x191   :  { %v1302_v36 = vsel %vm1272_vm10, %v1245_v30, %v15377_v27  ;;  %v1189_v0 = vsel %vm1158_vm8, %v1132_v18, %v15354_v16  ;;  %v2800_v29 = vcombine.low %v1918_v23, %v1920_v33  ;;  %v1133_v57 = vsel %vm1101_vm7, %v1076_v61, %v15377_v27 }
 0x192   :  { %v1359_v28 = vsel %vm1329_vm11, %v1302_v36, %v15375_v51  ;;  %361 = vbcast.lane.b32.xlu1 %v15343_v3, 264  ;;  %v2799_v63 = vcombine.low %v2791_v45, %v2798_v38  ;;  %808 = vbcast.lane.b32.xlu0 %v15343_v3, 258  ;;  %v1190_v6 = vsel %vm1158_vm8, %v1133_v57, %v15375_v51 }
 0x193   :  { %v1928_v19 = vrot.slane %v1359_v28, %v14455_v46  ;;  %v1921_v11 = vcombine.high %v1359_v28, %v1359_v28  ;;  %v2808_v54 = vrot.slane %v2800_v29, %v14455_v46  ;;  %v964_v28 = vsel %vm930_vm4, %v15365_v47, %v15377_v27 }
 0x194   :  { %v15400_v31 = vpop.permute.xlu1 %512  ;;  %14059 = vmatmul.mubr.msk.f32.gmra.mrb[48].mxu0 %vm3208_vm12, %v2799_v63  ;;  %v15403_v9 = vpop.permute.xlu0 %258  ;;  %v1021_v47 = vsel %vm987_vm5, %v964_v28, %v15375_v51 }
 0x195   :  { %v1936_v24 = vcombine.high %v1928_v19, %v1928_v19  ;;  %14061 = vmatprep.mubr.msk.f32.mxu0 %vm14303_vm3, %v21034_v13  ;;  %v1246_v26 = vsel %vm1215_vm9, %v1189_v0, %v15403_v9  ;;  %v1935_v43 = vrot.slane %v1921_v11, %v14455_v46 }
 0x196   :  { %368 = vbcast.lane.b32.xlu1 %v15387_v56, 256  ;;  %588 = vbcast.lane.b32.xlu0 %v15343_v3, 265  ;;  %v1303_v62 = vsel %vm1272_vm10, %v1246_v26, %v15400_v31 }
 0x197   :  { %v2801_v14 = vcombine.low %v1928_v19, %v1936_v24 }
 0x198   :  { %v15415_v60 = vpop.permute.xlu1 %262  ;;  %v15417_v50 = vpop.permute.xlu0 %736 }
 0x199   :  { %v1360_v4 = vsel %vm1329_vm11, %v1303_v62, %v15417_v50  ;;  %v2815_v8 = vrot.slane %v2801_v14, %v14455_v46  ;;  %v1247_v49 = vsel %vm1215_vm9, %v1190_v6, %v15415_v60  ;;  %v965_v62 = vsel %vm930_vm4, %v15403_v9, %v15400_v31 }
 0x19a   :  { %592 = vbcast.lane.b32.xlu1 %v15387_v56, 257  ;;  %v1937_v17 = vcombine.high %v1360_v4, %v1360_v4  ;;  %v1944_v53 = vrot.slane %v1360_v4, %v14455_v46  ;;  %812 = vbcast.lane.b32.xlu0 %v15343_v3, 266  ;;  %v1020_v3 = vsel %vm987_vm5, %v963_v2, %v15354_v16  ;;  %v14306_v16 = vmov 1966171168  }
 0x19b   :  { %v2816_v52 = vcombine.low %v2808_v54, %v2815_v8  ;;  %v1077_v37 = vsel %vm21033_vm6, %v1020_v3, %v15403_v9  ;;  %v3722_v59 = vunpack.c.l.s4 %v14306_v16  ;;  %v1078_v4 = vsel %vm21033_vm6, %v1021_v47, %v15415_v60 }
 0x19c   :  { %v15433_v58 = vpop.permute.xlu1 %269  ;;  %v15435_v42 = vpop.permute.xlu0 %516  ;;  %v1951_v12 = vrot.slane %v1937_v17, %v14455_v46  ;;  %v1952_v5 = vcombine.high %v1944_v53, %v1944_v53  ;;  %v2817_v25 = vcombine.low %v1935_v43, %v1944_v53  ;;  %v1134_v39 = vsel %vm1101_vm7, %v1077_v37, %v15400_v31 }
 0x19d   :  { %14062 = vmatmul.mubr.msk.f32.gmra.mrb[50].mxu0 %vm3208_vm12, %v2816_v52  ;;  %v1304_v55 = vsel %vm1272_vm10, %v1247_v49, %v15435_v42  ;;  %v1191_v30 = vsel %vm1158_vm8, %v1134_v39, %v15417_v50  ;;  %v3723_v0 = vunpack.c.0.s8 %v3722_v59  ;;  %v1022_v61 = vsel %vm987_vm5, %v965_v62, %v15417_v50 }
 0x19e   :  { %v2818_v35 = vcombine.low %v1952_v5, %v1951_v12  ;;  %372 = vbcast.lane.b32.xlu1 %v15387_v56, 264  ;;  %816 = vbcast.lane.b32.xlu0 %v15387_v56, 258  ;;  %v2825_v7 = vrot.slane %v2817_v25, %v14455_v46  ;;  %v1248_v20 = vsel %vm1215_vm9, %v1191_v30, %v15433_v58 }
 0x19f   :  { %14064 = vmatprep.mubr.msk.f32.mxu0 %vm14303_vm3, %v21034_v13  ;;  %v1953_v24 = vcombine.high %v1951_v12, %v1951_v12  ;;  %v15498_v51 = vsub.s32 %v3723_v0, %v14385_v1  ;;  %v1135_v17 = vsel %vm1101_vm7, %v1078_v4, %v15435_v42  ;;  %v15506_v53 = vrot.slane %v15194_v34, %v14427_v22 }
 0x1a0   :  { %v521_v32 = vpop.permute.xlu1 %520  ;;  %v15452_v10 = vpop.permute.xlu0 %740  ;;  %v2832_v45 = vrot.slane %v2818_v35, %v14455_v46  ;;  %v1079_v31 = vsel %vm21033_vm6, %v1022_v61, %v15433_v58  ;;  %v966_v50 = vsel %vm930_vm4, %v15415_v60, %v15435_v42  ;;  %v15527_v60 = vld [vmem:[%s21029_s2] ss:$0 sm:$0xff] }
 0x1a1   :  { %v1361_v23 = vsel %vm1329_vm11, %v1304_v55, %v15452_v10  ;;  %v1305_v63 = vsel %vm1272_vm10, %v1248_v20, %v521_v32  ;;  %v1192_v9 = vsel %vm1158_vm8, %v1135_v17, %v15452_v10  ;;  %v967_v12 = vsel %vm930_vm4, %v15433_v58, %v521_v32 }
 0x1a2   :  { %v1954_v38 = vcombine.high %v1361_v23, %v1361_v23  ;;  %v1961_v41 = vrot.slane %v1361_v23, %v14455_v46  ;;  %820 = vbcast.lane.b32.xlu1 %v15387_v56, 266  ;;  %596 = vbcast.lane.b32.xlu0 %v15387_v56, 265  ;;  %v2833_v44 = vcombine.low %v2825_v7, %v2832_v45 }
 0x1a3   :  { %v1136_v5 = vsel %vm1101_vm7, %v1079_v31, %v521_v32  ;;  %v1023_v25 = vsel %vm987_vm5, %v966_v50, %v15452_v10 }
 0x1a4   :  { %v15475_v36 = vpop.permute.xlu1 %273  ;;  %v745_v33 = vpop.permute.xlu0 %744  ;;  %v1968_v15 = vrot.slane %v1954_v38, %v14455_v46  ;;  %v1969_v19 = vcombine.high %v1961_v41, %v1961_v41  ;;  %14065 = vmatmul.mubr.msk.f32.gmra.mrb[52].mxu0 %vm3208_vm12, %v2833_v44  ;;  %v2834_v27 = vcombine.low %v1953_v24, %v1961_v41 }
 0x1a5   :  { %v1362_v56 = vsel %vm1329_vm11, %v1305_v63, %v745_v33  ;;  %14067 = vmatprep.mubr.msk.f32.mxu0 %vm14303_vm3, %v21034_v13  ;;  %v1249_v43 = vsel %vm1215_vm9, %v1192_v9, %v15475_v36  ;;  %v1024_v37 = vsel %vm987_vm5, %v967_v12, %v745_v33  ;;  %v1193_v58 = vsel %vm1158_vm8, %v1136_v5, %v745_v33 }
 0x1a6   :  { %v3377_v18 = vpop.f32.mrb[0].mxu0  ;;  %v2835_v26 = vcombine.low %v1969_v19, %v1968_v15  ;;  %v1970_v48 = vcombine.high %v1362_v56, %v1362_v56  ;;  %v1977_v14 = vrot.slane %v1362_v56, %v14455_v46  ;;  %854 = vbcast.lane.b32.xlu1 %v15460_v21, 257  ;;  %838 = vbcast.lane.b32.xlu0 %v15460_v21, 256 }
 0x1a7   :  { %v13988_v29 = vpop.f32.mrb[1].mxu0  ;;  %v2842_v52 = vrot.slane %v2834_v27, %v14455_v46  ;;  %v3378_v59 = vadd.f32 %v15527_v60, %v3377_v18  ;;  %v1080_v7 = vsel %vm21033_vm6, %v1023_v25, %v15475_v36 }
 0x1a8   :  { %v281_v40 = vpop.permute.xlu1 %280  ;;  %v525_v11 = vpop.permute.xlu0 %524  ;;  %v1984_v54 = vrot.slane %v1970_v48, %v14455_v46  ;;  %v1985_v8 = vcombine.high %v1977_v14, %v1977_v14  ;;  %v2849_v1 = vrot.slane %v2835_v26, %v14455_v46 }
 0x1a9   :  { %v1306_v42 = vsel %vm1272_vm10, %v1249_v43, %v525_v11  ;;  %v1250_v55 = vsel %vm1215_vm9, %v1193_v58, %v281_v40  ;;  %v1081_v45 = vsel %vm21033_vm6, %v1024_v37, %v281_v40  ;;  %v968_v41 = vsel %vm930_vm4, %v15475_v36, %v525_v11 }
 0x1aa   :  { %v1986_v57 = vcombine.high %v1984_v54, %v1984_v54  ;;  %842 = vbcast.lane.b32.xlu1 %v15460_v21, 264  ;;  %v2851_v22 = vcombine.low %v1977_v14, %v1985_v8  ;;  %870 = vbcast.lane.b32.xlu0 %v15460_v21, 258  ;;  %v2850_v6 = vcombine.low %v2842_v52, %v2849_v1  ;;  %v3621_v19 = vmax.f32 %v3378_v59, 0.0 }
 0x1ac   :  { %v529_v34 = vpop.permute.xlu1 %528  ;;  %v749_v2 = vpop.permute.xlu0 %748  ;;  %v2852_v3 = vcombine.low %v1984_v54, %v1986_v57  ;;  %14068 = vmatmul.mubr.msk.f32.gmra.mrb[54].mxu0 %vm3208_vm12, %v2850_v6  ;;  %v2859_v23 = vrot.slane %v2851_v22, %v14455_v46 }
 0x1ad   :  { %v1363_v35 = vsel %vm1329_vm11, %v1306_v42, %v749_v2  ;;  %v1307_v30 = vsel %vm1272_vm10, %v1250_v55, %v529_v34  ;;  %14070 = vmatprep.mubr.msk.f32.mxu0 %vm14303_vm3, %v21034_v13  ;;  %v969_v33 = vsel %vm930_vm4, %v281_v40, %v529_v34  ;;  %v1138_v18 = vsel %vm1101_vm7, %v1081_v45, %v529_v34 }
 0x1ae   :  { %v1987_v49 = vcombine.high %v1363_v35, %v1363_v35  ;;  %v1994_v32 = vrot.slane %v1363_v35, %v14455_v46  ;;  %874 = vbcast.lane.b32.xlu1 %v15460_v21, 266  ;;  %v2866_v16 = vrot.slane %v2852_v3, %v14455_v46  ;;  %858 = vbcast.lane.b32.xlu0 %v15460_v21, 265 }
 0x1af   :  { %v1137_v21 = vsel %vm1101_vm7, %v1080_v7, %v525_v11  ;;  %v1025_v0 = vsel %vm987_vm5, %v968_v41, %v749_v2 }
 0x1b0   :  { %v285_v10 = vpop.permute.xlu1 %284  ;;  %v753_v39 = vpop.permute.xlu0 %752  ;;  %v2002_v38 = vcombine.high %v1994_v32, %v1994_v32  ;;  %v2867_v44 = vcombine.low %v2859_v23, %v2866_v16  ;;  %v2001_v28 = vrot.slane %v1987_v49, %v14455_v46  ;;  %v1194_v29 = vsel %vm1158_vm8, %v1137_v21, %v749_v2 }
 0x1b1   :  { %v1364_v20 = vsel %vm1329_vm11, %v1307_v30, %v753_v39  ;;  %v1082_v47 = vsel %vm21033_vm6, %v1025_v0, %v285_v10  ;;  %v1251_v27 = vsel %vm1215_vm9, %v1194_v29, %v285_v10  ;;  %v1026_v40 = vsel %vm987_vm5, %v969_v33, %v753_v39 }
 0x1b2   :  { %v2003_v63 = vcombine.high %v1364_v20, %v1364_v20  ;;  %v2010_v15 = vrot.slane %v1364_v20, %v14455_v46  ;;  %908 = vbcast.lane.b32.xlu1 %v15506_v53, 257  ;;  %v2868_v36 = vcombine.low %v1994_v32, %v2002_v38  ;;  %892 = vbcast.lane.b32.xlu0 %v15506_v53, 256 }
 0x1b3   :  { %14071 = vmatmul.mubr.msk.f32.gmra.mrb[56].mxu0 %vm3208_vm12, %v2867_v44  ;;  %v1195_v11 = vsel %vm1158_vm8, %v1138_v18, %v753_v39 }
 0x1b4   :  { %v292_v24 = vpop.permute.xlu1 %291  ;;  %v533_v56 = vpop.permute.xlu0 %532  ;;  %v2017_v26 = vrot.slane %v2003_v63, %v14455_v46  ;;  %v2018_v48 = vcombine.high %v2010_v15, %v2010_v15  ;;  %v2869_v14 = vcombine.low %v2001_v28, %v2010_v15  ;;  %14073 = vmatprep.mubr.msk.f32.mxu0 %vm14303_vm3, %v21034_v13  ;;  %v2876_v50 = vrot.slane %v2868_v36, %v14455_v46 }
 0x1b5   :  { %v1083_v4 = vsel %vm21033_vm6, %v1026_v40, %v292_v24  ;;  %v1252_v54 = vsel %vm1215_vm9, %v1195_v11, %v292_v24  ;;  %v970_v8 = vsel %vm930_vm4, %v285_v10, %v533_v56  ;;  %v1139_v9 = vsel %vm1101_vm7, %v1082_v47, %v533_v56 }
 0x1b6   :  { %v3382_v62 = vpop.f32.mrb[2].mxu0  ;;  %896 = vbcast.lane.b32.xlu1 %v15506_v53, 264  ;;  %v15574_v31 = vcombine.low %v2018_v48, %v2017_v26  ;;  %924 = vbcast.lane.b32.xlu0 %v15506_v53, 258  ;;  %v2883_v43 = vrot.slane %v2869_v14, %v14455_v46  ;;  %v1308_v22 = vsel %vm1272_vm10, %v1251_v27, %v533_v56 }
 0x1b7   :  { %v3383_v61 = vadd.f32 %v15527_v60, %v3382_v62  ;;  %v13991_v17 = vpop.f32.mrb[3].mxu0  ;;  %v2019_v2 = vcombine.high %v2017_v26, %v2017_v26 }
 0x1b8   :  { %v537_v57 = vpop.permute.xlu1 %536  ;;  %v757_v1 = vpop.permute.xlu0 %756  ;;  %v2884_v42 = vcombine.low %v2876_v50, %v2883_v43  ;;  %v2893_v59 = vrot.slane %v15574_v31, %v14455_v46 }
 0x1b9   :  { %v3622_v34 = vmax.f32 %v3383_v61, 0.0  ;;  %v971_v52 = vsel %vm930_vm4, %v292_v24, %v537_v57  ;;  %v1140_v12 = vsel %vm1101_vm7, %v1083_v4, %v537_v57  ;;  %v1309_v5 = vsel %vm1272_vm10, %v1252_v54, %v537_v57 }
 0x1ba   :  { %v1365_v3 = vsel %vm1329_vm11, %v1308_v22, %v757_v1  ;;  %928 = vbcast.lane.b32.xlu1 %v15506_v53, 266  ;;  %v1027_v58 = vsel %vm987_vm5, %v970_v8, %v757_v1  ;;  %v1196_v49 = vsel %vm1158_vm8, %v1139_v9, %v757_v1  ;;  %912 = vbcast.lane.b32.xlu0 %v15506_v53, 265 }
 0x1bb   :  { %v3670_v25 = vpack.c.bf16 %v3622_v34, %v3621_v19  ;;  %v13640_v37 = vpack.c.bf16 %v3622_v34, %v3622_v34  ;;  %v2020_v6 = vcombine.high %v1365_v3, %v1365_v3  ;;  %v2027_v35 = vrot.slane %v1365_v3, %v14455_v46  ;;  %14074 = vmatmul.mubr.msk.f32.gmra.mrb[58].mxu0 %vm3208_vm12, %v2884_v42 }
 0x1bc   :  { %v296_v32 = vpop.permute.xlu1 %295  ;;  %v761_v16 = vpop.permute.xlu0 %760  ;;  %14076 = vmatprep.mubr.msk.f32.mxu0 %vm14303_vm3, %v21034_v13 }
 0x1bd   :  { %v3727_v55 = vrot.slane %v3670_v25, %v15498_v51  ;;  %v3734_v10 = vrot.slane %v13640_v37, %v15498_v51  ;;  %v2034_v39 = vrot.slane %v2020_v6, %v14455_v46  ;;  %v2035_v23 = vcombine.high %v2027_v35, %v2027_v35 }
 0x1be   :  { %v2886_v7 = vcombine.low %v2019_v2, %v2027_v35  ;;  %v1084_v53 = vsel %vm21033_vm6, %v1027_v58, %v296_v32  ;;  %v1253_v45 = vsel %vm1215_vm9, %v1196_v49, %v296_v32  ;;  %v1028_v30 = vsel %vm987_vm5, %v971_v52, %v761_v16  ;;  %v3387_v38 = vpop.f32.mrb[4].mxu0 }
 0x1bf   :  { %v3735_v41 = vcombine.high %v3727_v55, %v3727_v55  ;;  %v3736_v21 = vcombine.high %v3734_v10, %v3734_v10  ;;  %v15602_v20 = vrot.slane %v3727_v55, %v15498_v51  ;;  %v15605_v44 = vrot.slane %v3734_v10, %v15498_v51  ;;  %v13994_v33 = vpop.f32.mrb[5].mxu0 }
 0x1c0   :  { %v15607_v28 = vcombine.low %v2035_v23, %v2034_v39  ;;  %v1197_v63 = vsel %vm1158_vm8, %v1140_v12, %v761_v16  ;;  %v1366_v15 = vsel %vm1329_vm11, %v1309_v5, %v761_v16  ;;  %v3388_v19 = vadd.f32 %v15527_v60, %v3387_v38  ;;  %v765_v18 = vpop.permute.xlu1 %764  ;;  %v541_v0 = vpop.permute.xlu0 %540 }
 0x1c1   :  { %v15613_v36 = vrot.slane %v3735_v41, %v15498_v51  ;;  %v15616_v24 = vrot.slane %v3736_v21, %v15498_v51  ;;  %v15620_v56 = vcombine.high %v15602_v20, %v15602_v20  ;;  %v2036_v14 = vcombine.high %v1366_v15, %v1366_v15 }
 0x1c2   :  { %v2043_v47 = vrot.slane %v1366_v15, %v14455_v46  ;;  %v3623_v8 = vmax.f32 %v3388_v19, 0.0  ;;  %v972_v61 = vsel %vm930_vm4, %v296_v32, %v541_v0  ;;  %v1141_v1 = vsel %vm1101_vm7, %v1084_v53, %v541_v0 }
 0x1c3   :  { %v4920_v27 = vcombine.low %v15602_v20, %v15613_v36  ;;  %v13664_v40 = vcombine.high %v15602_v20, %v15613_v36  ;;  %v2050_v4 = vrot.slane %v2036_v14, %v14455_v46  ;;  %v3392_v17 = vpop.f32.mrb[6].mxu0  ;;  %v1310_v50 = vsel %vm1272_vm10, %v1253_v45, %v541_v0 }
 0x1c4   :  { %v2051_v54 = vcombine.high %v2043_v47, %v2043_v47  ;;  %v545_v31 = vpop.permute.xlu1 %544  ;;  %v13997_v43 = vpop.f32.mrb[7].mxu0  ;;  %v1367_v2 = vsel %vm1329_vm11, %v1310_v50, %v765_v18  ;;  %v2900_v12 = vrot.slane %v2886_v7, %v14455_v46  ;;  %v3393_v42 = vadd.f32 %v15527_v60, %v3392_v17 }
 0x1c5   :  { %v15635_v9 = vrot.slane %v4920_v27, %v15498_v51  ;;  %v15638_v57 = vrot.slane %v13664_v40, %v15498_v51  ;;  %v303_v22 = vpop.permute.xlu0 %302  ;;  %v2052_v34 = vcombine.high %v2050_v4, %v2050_v4  ;;  %v2053_v5 = vcombine.high %v1367_v2, %v1367_v2 }
 0x1c6   :  { %v2903_v52 = vcombine.low %v2043_v47, %v2051_v54  ;;  %v2060_v3 = vrot.slane %v1367_v2, %v14455_v46  ;;  %v973_v25 = vsel %vm930_vm4, %v303_v22, %v545_v31  ;;  %v2901_v6 = vcombine.low %v2893_v59, %v2900_v12 }
 0x1c7   :  { %21096 = vst [vmem:[#allocation11_spill] sm:$0xff] %v15635_v9  ;;  %21097 = vst [vmem:[#allocation12_spill] sm:$0xff] %v15638_v57  ;;  %v15647_v37 = vcombine.low %v2050_v4, %v2052_v34  ;;  %v1085_v35 = vsel %vm21033_vm6, %v1028_v30, %v303_v22  ;;  %v1254_v58 = vsel %vm1215_vm9, %v1197_v63, %v303_v22  ;;  %v3624_v55 = vmax.f32 %v3393_v42, 0.0 }
 0x1c8   :  { %v307_v49 = vpop.permute.xlu1 %306  ;;  %v3397_v32 = vpop.f32.mrb[8].mxu0  ;;  %v2068_v16 = vcombine.high %v2060_v3, %v2060_v3  ;;  %v1029_v10 = vsel %vm987_vm5, %v972_v61, %v765_v18  ;;  %v1198_v39 = vsel %vm1158_vm8, %v1141_v1, %v765_v18  ;;  %14077 = vmatmul.mubr.msk.f32.gmra.mrb[60].mxu0 %vm3208_vm12, %v2901_v6  ;;  %v2910_v30 = vrot.slane %v15607_v28, %v14455_v46 }
 0x1c9   :  { %v769_v23 = vpop.permute.xlu0 %768  ;;  %v14000_v7 = vpop.f32.mrb[9].mxu0  ;;  %v1086_v53 = vsel %vm21033_vm6, %v1029_v10, %v307_v49  ;;  %v1255_v59 = vsel %vm1215_vm9, %v1198_v39, %v307_v49  ;;  %v15657_v45 = vadd.f32 %v15527_v60, %v3397_v32  ;;  %v3671_v41 = vpack.c.bf16 %v3624_v55, %v3623_v8  ;;  %14079 = vmatprep.mubr.msk.f32.mxu0 %vm14303_vm3, %v21034_v13 }
 0x1ca   :  { %v2920_v38 = vcombine.low %v2060_v3, %v2068_v16  ;;  %v13641_v21 = vpack.c.bf16 %v3624_v55, %v3624_v55  ;;  %v2917_v33 = vrot.slane %v2903_v52, %v14455_v46  ;;  %v1142_v15 = vsel %vm1101_vm7, %v1085_v35, %v545_v31 }
 0x1cb   :  { %v3625_v63 = vmax.f32 %v15657_v45, 0.0  ;;  %v1311_v19 = vsel %vm1272_vm10, %v1254_v58, %v545_v31  ;;  %v2067_v18 = vrot.slane %v2053_v5, %v14455_v46  ;;  %v3776_v14 = vrot.slane %v3671_v41, %v15498_v51 }
 0x1cc   :  { %v314_v0 = vpop.permute.xlu1 %313  ;;  %v3783_v28 = vrot.slane %v13641_v21, %v15498_v51  ;;  %v2918_v47 = vcombine.low %v2910_v30, %v2917_v33  ;;  %v1030_v27 = vsel %vm987_vm5, %v973_v25, %v769_v23  ;;  %v1199_v4 = vsel %vm1158_vm8, %v1142_v15, %v769_v23 }
 0x1cd   :  { %v549_v40 = vpop.permute.xlu0 %548  ;;  %v1368_v54 = vsel %vm1329_vm11, %v1311_v19, %v769_v23  ;;  %v1087_v8 = vsel %vm21033_vm6, %v1030_v27, %v314_v0  ;;  %v3784_v17 = vcombine.high %v3776_v14, %v3776_v14  ;;  %v15676_v1 = vrot.slane %v3776_v14, %v15498_v51 }
 0x1ce   :  { %v974_v61 = vsel %vm930_vm4, %v307_v49, %v549_v40  ;;  %v3785_v31 = vcombine.high %v3783_v28, %v3783_v28  ;;  %v15679_v50 = vrot.slane %v3783_v28, %v15498_v51  ;;  %14080 = vmatmul.mubr.msk.f32.gmra.mrb[62].mxu0 %vm3208_vm12, %v2918_v47  ;;  %v2069_v43 = vcombine.high %v1368_v54, %v1368_v54 }
 0x1cf   :  { %v2076_v22 = vrot.slane %v1368_v54, %v14455_v46  ;;  %v1256_v34 = vsel %vm1215_vm9, %v1199_v4, %v314_v0  ;;  %14082 = vmatprep.mubr.msk.f32.mxu0 %vm14303_vm3, %v21034_v13  ;;  %v1143_v52 = vsel %vm1101_vm7, %v1086_v53, %v549_v40  ;;  %v3402_v2 = vpop.f32.mrb[10].mxu0  ;;  %v15688_v5 = vrot.slane %v3784_v17, %v15498_v51 }
 0x1d0   :  { %v553_v12 = vpop.permute.xlu1 %552  ;;  %v15691_v3 = vrot.slane %v3785_v31, %v15498_v51  ;;  %v1312_v42 = vsel %vm1272_vm10, %v1255_v59, %v549_v40  ;;  %v2927_v25 = vrot.slane %v15647_v37, %v14455_v46  ;;  %v14003_v6 = vpop.f32.mrb[11].mxu0  ;;  %v2083_v58 = vrot.slane %v2069_v43, %v14455_v46 }
 0x1d1   :  { %v773_v35 = vpop.permute.xlu0 %772  ;;  %v2084_v49 = vcombine.high %v2076_v22, %v2076_v22  ;;  %v2936_v32 = vcombine.low %v2067_v18, %v2076_v22  ;;  %v2934_v16 = vrot.slane %v2920_v38, %v14455_v46  ;;  %v3403_v39 = vadd.f32 %v15527_v60, %v3402_v2 }
 0x1d2   :  { %v15700_v55 = vcombine.high %v15691_v3, %v15691_v3  ;;  %v975_v23 = vsel %vm930_vm4, %v314_v0, %v553_v12  ;;  %v1144_v53 = vsel %vm1101_vm7, %v1087_v8, %v553_v12  ;;  %v1313_v59 = vsel %vm1272_vm10, %v1256_v34, %v553_v12 }
 0x1d3   :  { %v2937_v7 = vcombine.low %v2084_v49, %v2083_v58  ;;  %v2935_v37 = vcombine.low %v2927_v25, %v2934_v16  ;;  %v3626_v30 = vmax.f32 %v3403_v39, 0.0  ;;  %v2085_v38 = vcombine.high %v2083_v58, %v2083_v58 }
 0x1d4   :  { %v15707_v45 = vpop.permute.xlu1 %317  ;;  %v1031_v41 = vsel %vm987_vm5, %v974_v61, %v773_v35  ;;  %v1200_v21 = vsel %vm1158_vm8, %v1143_v52, %v773_v35  ;;  %v1369_v15 = vsel %vm1329_vm11, %v1312_v42, %v773_v35  ;;  %v2944_v0 = vrot.slane %v2936_v32, %v14455_v46 }
 0x1d5   :  { %v777_v33 = vpop.permute.xlu0 %776  ;;  %14083 = vmatmul.mubr.msk.f32.gmra.mrb[64].mxu0 %vm3208_vm12, %v2935_v37  ;;  %v1088_v19 = vsel %vm21033_vm6, %v1031_v41, %v15707_v45  ;;  %v1257_v18 = vsel %vm1215_vm9, %v1200_v21, %v15707_v45  ;;  %v3672_v14 = vpack.c.bf16 %v3626_v30, %v3625_v63  ;;  %v13642_v28 = vpack.c.bf16 %v3626_v30, %v3626_v30 }
 0x1d6   :  { %v2086_v47 = vcombine.high %v1369_v15, %v1369_v15  ;;  %v2093_v27 = vrot.slane %v1369_v15, %v14455_v46  ;;  %14085 = vmatprep.mubr.msk.f32.mxu0 %vm14303_vm3, %v21034_v13  ;;  %v2951_v40 = vrot.slane %v2937_v7, %v14455_v46  ;;  %v1032_v4 = vsel %vm987_vm5, %v975_v23, %v777_v33 }
 0x1d7   :  { %v1201_v54 = vsel %vm1158_vm8, %v1144_v53, %v777_v33  ;;  %v1370_v8 = vsel %vm1329_vm11, %v1313_v59, %v777_v33  ;;  %v3407_v61 = vpop.f32.mrb[12].mxu0  ;;  %v3825_v17 = vrot.slane %v3672_v14, %v15498_v51  ;;  %v3832_v63 = vrot.slane %v13642_v28, %v15498_v51 }
 0x1d8   :  { %v2100_v31 = vrot.slane %v2086_v47, %v14455_v46  ;;  %v2101_v43 = vcombine.high %v2093_v27, %v2093_v27  ;;  %v14006_v22 = vpop.f32.mrb[13].mxu0  ;;  %v15728_v34 = vcombine.low %v2085_v38, %v2093_v27  ;;  %v2952_v52 = vcombine.low %v2944_v0, %v2951_v40  ;;  %v325_v42 = vpop.permute.xlu1 %324 }
 0x1d9   :  { %v2102_v2 = vcombine.high %v1370_v8, %v1370_v8  ;;  %v2109_v12 = vrot.slane %v1370_v8, %v14455_v46  ;;  %v3833_v25 = vcombine.high %v3825_v17, %v3825_v17  ;;  %v3834_v6 = vcombine.high %v3832_v63, %v3832_v63  ;;  %v557_v23 = vpop.permute.xlu0 %556 }
 0x1da   :  { %v15732_v35 = vrot.slane %v3825_v17, %v15498_v51  ;;  %v15735_v58 = vrot.slane %v3832_v63, %v15498_v51  ;;  %v2954_v49 = vcombine.low %v2101_v43, %v2100_v31  ;;  %14086 = vmatmul.mubr.msk.f32.gmra.mrb[66].mxu0 %vm3208_vm12, %v2952_v52  ;;  %v15740_v39 = vadd.f32 %v15527_v60, %v3407_v61 }
 0x1db   :  { %v2116_v32 = vrot.slane %v2102_v2, %v14455_v46  ;;  %v2117_v16 = vcombine.high %v2109_v12, %v2109_v12  ;;  %v15743_v7 = vrot.slane %v3833_v25, %v15498_v51  ;;  %v15746_v37 = vrot.slane %v3834_v6, %v15498_v51  ;;  %14088 = vmatprep.mubr.msk.f32.mxu0 %vm14303_vm3, %v21034_v13 }
 0x1dc   :  { %v15750_v53 = vcombine.high %v15735_v58, %v15735_v58  ;;  %v3627_v41 = vmax.f32 %v15740_v39, 0.0  ;;  %v1089_v21 = vsel %vm21033_vm6, %v1032_v4, %v325_v42  ;;  %v1258_v8 = vsel %vm1215_vm9, %v1201_v54, %v325_v42  ;;  %v561_v61 = vpop.permute.xlu1 %560 }
 0x1dd   :  { %v2118_v30 = vcombine.high %v2116_v32, %v2116_v32  ;;  %v15755_v38 = vcombine.low %v2109_v12, %v2117_v16  ;;  %v15761_v15 = vcombine.high %v15743_v7, %v15743_v7  ;;  %v15765_v0 = vcombine.high %v15746_v37, %v15746_v37 }
 0x1de   :  { %v3412_v33 = vpop.f32.mrb[14].mxu0  ;;  %v976_v31 = vsel %vm930_vm4, %v15707_v45, %v557_v23  ;;  %v1145_v43 = vsel %vm1101_vm7, %v1088_v19, %v557_v23  ;;  %v1314_v22 = vsel %vm1272_vm10, %v1257_v18, %v557_v23  ;;  %vm5848_vm6 = vsmask.f32 5396  ;;  %v781_v45 = vpop.permute.xlu0 %780 }
 0x1df   :  { %v14009_v47 = vpop.f32.mrb[15].mxu0  ;;  %v15772_v4 = vcombine.low %v2116_v32, %v2118_v30  ;;  %v15789_v54 = vcombine.high %v15605_v44, %v15605_v44  ;;  %v15793_v52 = vcombine.high %v15613_v36, %v15613_v36  ;;  %v7985_v2 = vcombine.low %v15613_v36, %v15620_v56  ;;  %vm15883_vm1 = vmor %vm5847_vm0, %vm5848_vm6 }
 0x1e0   :  { %v7988_v12 = vcombine.low %v15676_v1, %v15688_v5  ;;  %v15800_v19 = vsel %vm930_vm4, %v325_v42, %v561_v61  ;;  %v15803_v18 = vsel %vm1101_vm7, %v1089_v21, %v561_v61  ;;  %v15806_v25 = vsel %vm1272_vm10, %v1258_v8, %v561_v61  ;;  %vm5851_vm6 = vmor %vm15883_vm1, %vm5850_vm14 }
 0x1e1   :  { %v2961_v6 = vrot.slane %v15728_v34, %v14455_v46  ;;  %v7986_v16 = vcombine.low %v15793_v52, %v15605_v44  ;;  %v7987_v42 = vcombine.low %v15616_v24, %v15789_v54  ;;  %v7995_v23 = vrot.slane %v7985_v2, %v15498_v51  ;;  %vm15951_vm14 = vmor %vm5851_vm6, %vm5852_vm2 }
 0x1e2   :  { %v15820_v30 = vrot.slane %v7988_v12, %v15498_v51  ;;  %v2968_v34 = vrot.slane %v2954_v49, %v14455_v46  ;;  %v15824_v21 = vsel %vm987_vm5, %v976_v31, %v781_v45  ;;  %v15827_v47 = vsel %vm1158_vm8, %v1145_v43, %v781_v45  ;;  %vm21123_vm0 = vmmov %vm21107_vm13 }
 0x1e3   :  { %v8002_v8 = vrot.slane %v7986_v16, %v15498_v51  ;;  %v8009_v61 = vrot.slane %v7987_v42, %v15498_v51  ;;  %v1371_v17 = vsel %vm1329_vm11, %v1314_v22, %v781_v45  ;;  %v3413_v2 = vadd.f32 %v15527_v60, %v3412_v33  ;;  %vm21134_vm1 = vmmov %vm21123_vm0 }
 0x1e4   :  { %v2969_v31 = vcombine.low %v2961_v6, %v2968_v34  ;;  %v2119_v40 = vcombine.high %v1371_v17, %v1371_v17  ;;  %v2126_v43 = vrot.slane %v1371_v17, %v14455_v46  ;;  %v15843_v16 = vcombine.high %v15616_v24, %v15616_v24  ;;  %vm21135_vm6 = vmmov %vm21123_vm0 }
 0x1e5   :  { %v8017_v22 = vcombine.low %v7995_v23, %v8002_v8  ;;  %v8018_v33 = vcombine.low %v8009_v61, %v15820_v30  ;;  %v3628_v45 = vmax.f32 %v3413_v2, 0.0  ;;  %v15848_v63 = vcombine.high %v15676_v1, %v15676_v1 }
 0x1e6   :  { %v15838_v49 = vpop.f32.mrb[16].mxu0  ;;  %14089 = vmatmul.mubr.msk.f32.gmra.mrb[68].mxu0 %vm3208_vm12, %v2969_v31  ;;  %v15852_v6 = vrot.slane %v2119_v40, %v14455_v46  ;;  %v2134_v34 = vcombine.high %v2126_v43, %v2126_v43  ;;  %v15856_v17 = vcombine.high %v15688_v5, %v15688_v5  ;;  %v4922_v23 = vcombine.low %v15605_v44, %v15616_v24 }
 0x1e7   :  { %v14012_v42 = vpop.f32.mrb[17].mxu0  ;;  %v8025_v8 = vrot.slane %v8017_v22, %v15498_v51  ;;  %v8032_v61 = vrot.slane %v8018_v33, %v15498_v51  ;;  %v3673_v40 = vpack.c.bf16 %v3628_v45, %v3627_v41  ;;  %v13643_v2 = vpack.c.bf16 %v3628_v45, %v3628_v45  ;;  %14091 = vmatprep.mubr.msk.f32.mxu0 %vm14303_vm3, %v21034_v13 }
 0x1e8   :  { %v15869_v31 = vcombine.low %v2126_v43, %v2134_v34  ;;  %v4923_v42 = vcombine.low %v15843_v16, %v15676_v1  ;;  %v15874_v27 = vrot.slane %v4922_v23, %v15498_v51  ;;  %v4969_v12 = vcombine.low %v15688_v5, %v15848_v63 }
 0x1e9   :  { %v8033_v22 = vcombine.low %v8025_v8, %v8032_v61  ;;  %v3874_v33 = vrot.slane %v3673_v40, %v15498_v51  ;;  %v3881_v39 = vrot.slane %v13643_v2, %v15498_v51  ;;  %v4970_v41 = vcombine.low %v15856_v17, %v15679_v50 }
 0x1ea   :  { %21102 = vst [vmem:[#allocation13_spill] sm:$0xff] %v15874_v27  ;;  %v15888_v45 = vrot.slane %v4923_v42, %v15498_v51  ;;  %v13665_v34 = vcombine.high %v15679_v50, %v15691_v3  ;;  %v15893_v23 = vrot.slane %v4969_v12, %v15498_v51  ;;  %v5904_v8 = vshrl.u32 %v15843_v16, 16  ;;  %v15903_v42 = vpop.permute.xlu1 %328 }
 0x1eb   :  { %8867 = vrot.lane.b32.xlu1 %v8033_v22, %s14299_s0  ;;  %v3882_v61 = vcombine.high %v3874_v33, %v3874_v33  ;;  %v3883_v40 = vcombine.high %v3881_v39, %v3881_v39  ;;  %v15898_v2 = vrot.slane %v3874_v33, %v15498_v51  ;;  %v15901_v59 = vrot.slane %v3881_v39, %v15498_v51  ;;  %v785_v33 = vpop.permute.xlu0 %784 }
 0x1ec   :  { %21105 = vst [vmem:[#allocation14_spill] sm:$0xff] %v15888_v45  ;;  %v15910_v28 = vrot.slane %v4970_v41, %v15498_v51  ;;  %v15913_v16 = vrot.slane %v13665_v34, %v15498_v51  ;;  %v8940_v22 = vcombine.low %v15888_v45, %v15893_v23  ;;  %v15937_v43 = vsel %vm21107_vm13, %v15824_v21, %v15903_v42  ;;  %vm21139_vm13 = vmmov %vm21123_vm0 }
 0x1ed   :  { %v15921_v10 = vrot.slane %v3882_v61, %v15498_v51  ;;  %v15924_v12 = vrot.slane %v3883_v40, %v15498_v51  ;;  %v15928_v41 = vcombine.high %v15901_v59, %v15901_v59  ;;  %v15942_v61 = vsel %vm1215_vm9, %v15827_v47, %v15903_v42 }
 0x1ee   :  { %v15905_v14 = vpop.f32.mrb[18].mxu0  ;;  %v8941_v13 = vcombine.low %v15910_v28, %v15913_v16  ;;  %v8948_v32 = vrot.slane %v8940_v22, %v15498_v51  ;;  %v1034_v34 = vsel %vm987_vm5, %v15800_v19, %v785_v33  ;;  %v1203_v22 = vsel %vm1158_vm8, %v15803_v18, %v785_v33 }
 0x1ef   :  { %v14015_v39 = vpop.f32.mrb[19].mxu0  ;;  %21106 = vst [vmem:[#allocation15_spill] sm:$0xff] %v15928_v41  ;;  %v1372_v47 = vsel %vm1329_vm11, %v15806_v25, %v785_v33  ;;  %v5860_v40 = vshll.u32 %v15613_v36, 16  ;;  %v5876_v18 = vshll.u32 %v15793_v52, 16  ;;  %v5879_v62 = vshrl.u32 %v15793_v52, 16 }
 0x1f0   :  { %v8955_v21 = vrot.slane %v8941_v13, %v15498_v51  ;;  %v5863_v39 = vshrl.u32 %v15613_v36, 16  ;;  %v2135_v26 = vcombine.high %v1372_v47, %v1372_v47  ;;  %v15961_v19 = vrot.slane %v1372_v47, %v14455_v46 }
 0x1f1   :  { %v21110_v13 = vshrl.u32 %v15602_v20, 16  ;;  %v21111_v33 = vshll.u32 %v15620_v56, 16  ;;  %v5892_v47 = vshll.u32 %v15616_v24, 16  ;;  %vm5820_vm2 = vcmask 261120  }
 0x1f2   :  { %v8956_v29 = vcombine.low %v8948_v32, %v8955_v21  ;;  %v15977_v27 = vrot.slane %v2135_v26, %v14455_v46  ;;  %v2150_v52 = vcombine.high %v15961_v19, %v15961_v19  ;;  %v21112_v32 = vshrl.u32 %v15620_v56, 16 }
 0x1f3   :  { %v15965_v11 = vpop.f32.mrb[20].mxu0  ;;  %v5862_v25 = vsel %vm15951_vm14, %v21110_v13, %v5860_v40  ;;  %v5870_v36 = vsel %vm15951_vm14, %v5863_v39, %v21111_v33  ;;  %v21113_v39 = vshll.u32 %v15605_v44, 16  ;;  %v5895_v13 = vshrl.u32 %v15616_v24, 16  ;;  %v336_v33 = vpop.permute.xlu1 %335 }
 0x1f4   :  { %v14018_v45 = vpop.f32.mrb[21].mxu0  ;;  %v5878_v40 = vsel %vm15951_vm14, %v21112_v32, %v5876_v18  ;;  %9294 = vrot.lane.b32.xlu1 %v8956_v29, %s14307_s7  ;;  %v5909_v56 = vshll.u32 %v15676_v1, 16  ;;  %v15999_v18 = vcombine.low %v2150_v52, %v15977_v27  ;;  %v5912_v29 = vshrl.u32 %v15676_v1, 16 }
 0x1f5   :  { %v5886_v26 = vsel %vm15951_vm14, %v5879_v62, %v21113_v39  ;;  %v21114_v45 = vshrl.u32 %v15605_v44, 16  ;;  %v5917_v32 = vshll.u32 %v15688_v5, 16  ;;  %v7030_v20 = vcombine.low %v5862_v25, %v5870_v36  ;;  %v565_v36 = vpop.permute.xlu0 %564 }
 0x1f6   :  { %v21115_v44 = vshll.u32 %v15789_v54, 16  ;;  %v5911_v24 = vsel %vm15951_vm14, %v5904_v8, %v5909_v56  ;;  %v2978_v52 = vrot.slane %v15755_v38, %v14455_v46  ;;  %v2985_v54 = vrot.slane %v15772_v4, %v14455_v46 }
 0x1f7   :  { %v5894_v21 = vsel %vm15951_vm14, %v21114_v45, %v5892_v47  ;;  %v7031_v47 = vcombine.low %v5878_v40, %v5886_v26  ;;  %v5919_v45 = vsel %vm15951_vm14, %v5912_v29, %v5917_v32  ;;  %v7040_v25 = vrot.slane %v7030_v20, %v15498_v51 }
 0x1f8   :  { %v16003_v9 = vpop.f32.mrb[22].mxu0  ;;  %v5902_v62 = vsel %vm15951_vm14, %v5895_v13, %v21115_v44  ;;  %v7033_v41 = vcombine.low %v5911_v24, %v5919_v45  ;;  %v1091_v8 = vsel %vm21116_vm15, %v1034_v34, %v336_v33  ;;  %v1260_v40 = vsel %vm1215_vm9, %v1203_v22, %v336_v33  ;;  %v569_v22 = vpop.permute.xlu1 %568  ;;  %vm21142_vm15 = vmmov %vm21123_vm0 }
 0x1f9   :  { %v14021_v39 = vpop.f32.mrb[23].mxu0  ;;  %v7032_v57 = vcombine.low %v5894_v21, %v5902_v62  ;;  %v7047_v13 = vrot.slane %v7031_v47, %v15498_v51  ;;  %v2986_v26 = vcombine.low %v2978_v52, %v2985_v54  ;;  %v13826_v56 = vcombine.high %v15676_v1, %v15688_v5 }
 0x1fa   :  { %v8035_v20 = vcombine.low %v15679_v50, %v15691_v3  ;;  %v16027_v21 = vrot.slane %v7033_v41, %v15498_v51  ;;  %v8036_v29 = vcombine.low %v15700_v55, %v15732_v35  ;;  %v978_v34 = vsel %vm930_vm4, %v15903_v42, %v565_v36 }
 0x1fb   :  { %v7054_v38 = vrot.slane %v7032_v57, %v15498_v51  ;;  %v7062_v4 = vcombine.low %v7040_v25, %v7047_v13  ;;  %14092 = vmatmul.mubr.msk.f32.gmra.mrb[70].mxu0 %vm3208_vm12, %v2986_v26  ;;  %v8044_v57 = vrot.slane %v13826_v56, %v15498_v51  ;;  %v1147_v32 = vsel %vm1101_vm7, %v15937_v43, %v565_v36  ;;  %v789_v26 = vpop.permute.xlu0 %788 }
 0x1fc   :  { %21117 = vst [vmem:[#allocation16_spill] sm:$0xff] %v16027_v21  ;;  %v8051_v1 = vrot.slane %v8035_v20, %v15498_v51  ;;  %v1316_v41 = vsel %vm1272_vm10, %v15942_v61, %v565_v36  ;;  %v8058_v24 = vrot.slane %v8036_v29, %v15498_v51  ;;  %v16045_v42 = vadd.f32 %v15527_v60, %v15838_v49 }
 0x1fd   :  { %v7063_v44 = vcombine.low %v7054_v38, %v16027_v21  ;;  %v7070_v62 = vrot.slane %v7062_v4, %v15498_v51  ;;  %v21118_v47 = vmov 0.0   ;;  %v9855_v52 = vcombine.low %v15820_v30, %v8044_v57 }
 0x1fe   :  { %14094 = vmatprep.mubr.msk.f32.mxu0 %vm14303_vm3, %v21118_v47  ;;  %v16052_v43 = vcombine.high %v15732_v35, %v15732_v35  ;;  %v8066_v61 = vcombine.low %v8044_v57, %v8051_v1  ;;  %v16055_v39 = vsel %vm930_vm4, %v336_v33, %v569_v22  ;;  %v9856_v54 = vcombine.low %v8051_v1, %v8058_v24 }
 0x1ff   :  { %v16057_v45 = vpop.f32.mrb[24].mxu0  ;;  %v7077_v25 = vrot.slane %v7063_v44, %v15498_v51  ;;  %v3629_v60 = vmax.f32 %v16045_v42, 0.0  ;;  %v16062_v49 = vsel %vm1101_vm7, %v1091_v8, %v569_v22  ;;  %v9863_v30 = vrot.slane %v9855_v52, %v15498_v51 }
 0x200   :  { %v14024_v36 = vpop.f32.mrb[25].mxu0  ;;  %v8037_v13 = vcombine.low %v15743_v7, %v16052_v43  ;;  %v8074_v38 = vrot.slane %v8066_v61, %v15498_v51  ;;  %v16069_v33 = vsel %vm1272_vm10, %v1260_v40, %v569_v22  ;;  %v9870_v20 = vrot.slane %v9856_v54, %v15498_v51 }
 0x201   :  { %v7078_v56 = vcombine.low %v7070_v62, %v7077_v25  ;;  %v4972_v4 = vcombine.low %v15732_v35, %v15743_v7  ;;  %v5001_v8 = vcombine.low %v15893_v23, %v15910_v28  ;;  %v13666_v57 = vcombine.high %v15732_v35, %v15743_v7 }
 0x202   :  { %v16077_v29 = vrot.slane %v8037_v13, %v15498_v51  ;;  %v5019_v40 = vcombine.low %v15746_v37, %v15750_v53  ;;  %v2151_v22 = vcombine.high %v15977_v27, %v15977_v27  ;;  %v9871_v1 = vcombine.low %v9863_v30, %v9870_v20 }
 0x203   :  { %7912 = vrot.lane.b32.xlu1 %v7078_v56, %s14308_s8  ;;  %v16087_v44 = vrot.slane %v4972_v4, %v15498_v51  ;;  %v5009_v28 = vrot.slane %v5001_v8, %v15498_v51  ;;  %v16091_v23 = vsel %vm987_vm5, %v978_v34, %v789_v26  ;;  %v16095_v52 = vrot.slane %v13666_v57, %v15498_v51 }
 0x204   :  { %v8067_v62 = vcombine.low %v8058_v24, %v16077_v29  ;;  %v16098_v27 = vrot.slane %v5019_v40, %v15498_v51  ;;  %v1204_v61 = vsel %vm1158_vm8, %v1147_v32, %v789_v26  ;;  %10209 = vrot.lane.b32.xlu0 %v9871_v1, %s14308_s8  ;;  %v1373_v54 = vsel %vm1329_vm11, %v1316_v41, %v789_v26 }
 0x205   :  { %v5002_v25 = vcombine.low %v15913_v16, %v16087_v44  ;;  %v3815_v34 = vcombine.high %v15679_v50, %v15679_v50  ;;  %v5920_v24 = vshrl.u32 %v15688_v5, 16  ;;  %v2152_v13 = vcombine.high %v1373_v54, %v1373_v54 }
 0x206   :  { %v16109_v36 = vrot.slane %v8067_v62, %v15498_v51  ;;  %v5050_v30 = vcombine.low %v16095_v52, %v16098_v27  ;;  %v2159_v32 = vrot.slane %v1373_v54, %v14455_v46  ;;  %v5925_v41 = vshll.u32 %v15848_v63, 16 }
 0x207   :  { %v16114_v56 = vpop.f32.mrb[26].mxu0  ;;  %v5016_v16 = vrot.slane %v5002_v25, %v15498_v51  ;;  %v5928_v26 = vshrl.u32 %v15848_v63, 16  ;;  %v5933_v20 = vshll.u32 %v15856_v17, 16  ;;  %v2166_v57 = vrot.slane %v2152_v13, %v14455_v46 }
 0x208   :  { %v14027_v5 = vpop.f32.mrb[27].mxu0  ;;  %v8082_v4 = vcombine.low %v8074_v38, %v16109_v36  ;;  %v16122_v8 = vrot.slane %v5050_v30, %v15498_v51  ;;  %v2167_v40 = vcombine.high %v2159_v32, %v2159_v32  ;;  %v16125_v62 = vcombine.low %v2151_v22, %v2159_v32 }
 0x209   :  { %v5017_v1 = vcombine.low %v5009_v28, %v5016_v16  ;;  %v5927_v25 = vsel %vm15951_vm14, %v5920_v24, %v5925_v41  ;;  %v5935_v63 = vsel %vm15951_vm14, %v5928_v26, %v5933_v20  ;;  %v5936_v30 = vshrl.u32 %v15856_v17, 16 }
 0x20a   :  { %8869 = vrot.lane.b32.xlu1 %v8082_v4, %s14299_s0  ;;  %v10281_v54 = vcombine.low %v5016_v16, %v16122_v8  ;;  %v16133_v38 = vcombine.low %v2167_v40, %v2166_v57  ;;  %v5941_v13 = vshll.u32 %v15679_v50, 16  ;;  %v5944_v28 = vshrl.u32 %v15679_v50, 16  ;;  %v340_v57 = vpop.permute.xlu1 %339 }
 0x20b   :  { %v5953_v22 = vshrl.u32 %v3815_v34, 16  ;;  %v5958_v32 = vshll.u32 %v15700_v55, 16  ;;  %v5961_v24 = vshrl.u32 %v15700_v55, 16  ;;  %5822 = vst.msk [vmem:[#allocation2 + $0x18] sm:$0xff] %vm5820_vm2, %v5017_v1  ;;  %v5966_v41 = vshll.u32 %v15732_v35, 16 }
 0x20c   :  { %10395 = vrot.lane.b32.xlu0 %v10281_v54, %s14299_s0  ;;  %v5943_v16 = vsel %vm15951_vm14, %v5936_v30, %v5941_v13  ;;  %v5969_v17 = vshrl.u32 %v15732_v35, 16  ;;  %v5974_v26 = vshll.u32 %v15743_v7, 16  ;;  %v21119_v50 = vshll.u32 %v15691_v3, 16  ;;  %v793_v30 = vpop.permute.xlu0 %792 }
 0x20d   :  { %v5960_v34 = vsel %vm15951_vm14, %v5953_v22, %v5958_v32  ;;  %v5977_v5 = vshrl.u32 %v15743_v7, 16  ;;  %v5982_v4 = vshll.u32 %v16052_v43, 16  ;;  %v5968_v35 = vsel %vm15951_vm14, %v5961_v24, %v5966_v41 }
 0x20e   :  { %v16147_v20 = vpop.f32.mrb[28].mxu0  ;;  %v5951_v55 = vsel %vm15951_vm14, %v5944_v28, %v21119_v50  ;;  %v5976_v1 = vsel %vm15951_vm14, %v5969_v17, %v5974_v26  ;;  %v7079_v54 = vcombine.low %v5927_v25, %v5935_v63  ;;  %v7081_v28 = vcombine.low %v5960_v34, %v5968_v35 }
 0x20f   :  { %v14030_v40 = vpop.f32.mrb[29].mxu0  ;;  %v7080_v3 = vcombine.low %v5943_v16, %v5951_v55  ;;  %v5984_v13 = vsel %vm15951_vm14, %v5977_v5, %v5982_v4  ;;  %v2995_v7 = vrot.slane %v15869_v31, %v14455_v46  ;;  %v21120_v22 = vcombine.low %v15852_v6, %v15961_v19 }
 0x210   :  { %v7082_v50 = vcombine.low %v5976_v1, %v5984_v13  ;;  %v16170_v24 = vrot.slane %v7079_v54, %v15498_v51  ;;  %v1092_v63 = vsel %vm21123_vm0, %v16091_v23, %v340_v57  ;;  %v16178_v16 = vrot.slane %v7081_v28, %v15498_v51 }
 0x211   :  { %v3002_v32 = vrot.slane %v21120_v22, %v14455_v46  ;;  %v16173_v25 = vrot.slane %v7080_v3, %v15498_v51  ;;  %v1261_v31 = vsel %vm1215_vm9, %v1204_v61, %v340_v57  ;;  %v5985_v17 = vshrl.u32 %v16052_v43, 16  ;;  %v573_v3 = vpop.permute.xlu0 %572 }
 0x212   :  { %21121 = vst [vmem:[#allocation17_spill] sm:$0xff] %v16170_v24  ;;  %21124 = vst [vmem:[#allocation19_spill] sm:$0xff] %v16178_v16  ;;  %v16183_v6 = vrot.slane %v7082_v50, %v15498_v51  ;;  %v5990_v55 = vshll.u32 %v15761_v15, 16  ;;  %v5993_v61 = vshrl.u32 %v15761_v15, 16  ;;  %v21126_v43 = vshll.u32 %v15750_v53, 16 }
 0x213   :  { %21122 = vst [vmem:[#allocation18_spill] sm:$0xff] %v16173_v25  ;;  %v3003_v41 = vcombine.low %v2995_v7, %v3002_v32  ;;  %v7111_v19 = vcombine.low %v16170_v24, %v16173_v25  ;;  %v21127_v34 = vshrl.u32 %v15746_v37, 16  ;;  %v6015_v4 = vshll.u32 %v15765_v0, 16 }
 0x214   :  { %21125 = vst [vmem:[#allocation20_spill] sm:$0xff] %v16183_v6  ;;  %v7112_v40 = vcombine.low %v16178_v16, %v16183_v6  ;;  %v5992_v1 = vsel %vm15951_vm14, %v5985_v17, %v5990_v55  ;;  %v16208_v54 = vsel %vm987_vm5, %v16055_v39, %v793_v30  ;;  %v21128_v28 = vshll.u32 %v15735_v58, 16 }
 0x215   :  { %14095 = vmatmul.mubr.msk.f32.gmra.mrb[72].mxu0 %vm3208_vm12, %v3003_v41  ;;  %v6009_v5 = vsel %vm15951_vm14, %v21127_v34, %v21126_v43  ;;  %v7119_v35 = vrot.slane %v7111_v19, %v15498_v51  ;;  %v21129_v22 = vshrl.u32 %v15750_v53, 16  ;;  %v16224_v39 = vsel %vm1158_vm8, %v16062_v49, %v793_v30  ;;  %v16233_v53 = vld [vmem:[%s21029_s2] ss:$0 sm:$0xff]  ;;  %v16237_v34 = vpop.permute.xlu1 %796 }
 0x216   :  { %14097 = vmatprep.mubr.msk.f32.mxu0 %vm14303_vm3, %v21118_v47  ;;  %v16212_v13 = vpop.f32.mrb[30].mxu0  ;;  %v6000_v7 = vsel %vm15951_vm14, %v5993_v61, %v21128_v28  ;;  %v1374_v50 = vsel %vm1329_vm11, %v16069_v33, %v793_v30  ;;  %v7126_v17 = vrot.slane %v7112_v40, %v15498_v51  ;;  %v3423_v49 = vadd.f32 %v16233_v53, %v15905_v14 }
 0x217   :  { %v6017_v32 = vsel %vm15951_vm14, %v21129_v22, %v6015_v4  ;;  %v14033_v41 = vpop.f32.mrb[31].mxu0  ;;  %v7128_v19 = vcombine.low %v5992_v1, %v6000_v7  ;;  %v2168_v43 = vcombine.high %v1374_v50, %v1374_v50  ;;  %v2175_v61 = vrot.slane %v1374_v50, %v14455_v46 }
 0x218   :  { %v7129_v55 = vcombine.low %v6009_v5, %v6017_v32  ;;  %v16240_v33 = vsel %vm930_vm4, %v340_v57, %v573_v3  ;;  %v16243_v30 = vsel %vm1101_vm7, %v1092_v63, %v573_v3  ;;  %v7127_v5 = vcombine.low %v7119_v35, %v7126_v17 }
 0x219   :  { %v16246_v4 = vrot.slane %v7128_v19, %v15498_v51  ;;  %v2182_v1 = vrot.slane %v2168_v43, %v14455_v46  ;;  %v2183_v28 = vcombine.high %v2175_v61, %v2175_v61  ;;  %v3630_v7 = vmax.f32 %v3423_v49, 0.0 }
 0x21a   :  { %v16249_v40 = vrot.slane %v7129_v55, %v15498_v51  ;;  %v1318_v14 = vsel %vm1272_vm10, %v1261_v31, %v573_v3  ;;  %v5020_v57 = vcombine.low %v15765_v0, %v15898_v2  ;;  %7914 = vrot.lane.b32.xlu1 %v7127_v5, %s14308_s8  ;;  %v8957_v5 = vcombine.low %v16087_v44, %v16095_v52 }
 0x21b   :  { %21130 = vst [vmem:[#allocation21_spill] sm:$0xff] %v16246_v4  ;;  %v2184_v22 = vcombine.high %v2182_v1, %v2182_v1  ;;  %v16262_v32 = vsel %vm1329_vm11, %v1318_v14, %v16237_v34  ;;  %v16264_v50 = vcombine.low %v2175_v61, %v2183_v28  ;;  %v3674_v31 = vpack.c.bf16 %v3630_v7, %v3629_v60 }
 0x21c   :  { %21131 = vst [vmem:[#allocation22_spill] sm:$0xff] %v16249_v40  ;;  %v7160_v63 = vcombine.low %v16246_v4, %v16249_v40  ;;  %v13644_v3 = vpack.c.bf16 %v3630_v7, %v3630_v7  ;;  %v2192_v43 = vrot.slane %v16262_v32, %v14455_v46  ;;  %v16278_v49 = vrot.slane %v5020_v57, %v15498_v51 }
 0x21d   :  { %v16273_v55 = vcombine.low %v2182_v1, %v2184_v22  ;;  %v3923_v42 = vrot.slane %v3674_v31, %v15498_v51  ;;  %v3012_v28 = vrot.slane %v15999_v18, %v14455_v46  ;;  %v16288_v1 = vpop.permute.xlu1 %576  ;;  %v3019_v22 = vrot.slane %v16125_v62, %v14455_v46 }
 0x21e   :  { %v16271_v19 = vrot.slane %v7160_v63, %v15498_v51  ;;  %v16280_v61 = vpop.f32.mrb[32].mxu0  ;;  %v3930_v60 = vrot.slane %v13644_v3, %v15498_v51  ;;  %v2200_v63 = vcombine.high %v2192_v43, %v2192_v43  ;;  %v8958_v57 = vcombine.low %v16098_v27, %v16278_v49 }
 0x21f   :  { %v14036_v7 = vpop.f32.mrb[33].mxu0  ;;  %v3931_v31 = vcombine.high %v3923_v42, %v3923_v42  ;;  %v16296_v35 = vrot.slane %v3923_v42, %v15498_v51  ;;  %v8965_v52 = vrot.slane %v8957_v5, %v15498_v51  ;;  %v3020_v27 = vcombine.low %v3012_v28, %v3019_v22 }
 0x220   :  { %v10565_v14 = vcombine.low %v7126_v17, %v16271_v19  ;;  %v3932_v3 = vcombine.high %v3930_v60, %v3930_v60  ;;  %v16299_v44 = vrot.slane %v3930_v60, %v15498_v51  ;;  %v16302_v18 = vcombine.low %v2192_v43, %v2200_v63  ;;  %v347_v7 = vpop.permute.xlu0 %346 }
 0x221   :  { %v8972_v17 = vrot.slane %v8958_v57, %v15498_v51  ;;  %v16307_v62 = vrot.slane %v3931_v31, %v15498_v51  ;;  %14098 = vmatmul.mubr.msk.f32.gmra.mrb[74].mxu0 %vm3208_vm12, %v3020_v27  ;;  %v3428_v43 = vadd.f32 %v16233_v53, %v15965_v11  ;;  %v8085_v5 = vcombine.low %v15898_v2, %v15921_v10 }
 0x222   :  { %10679 = vrot.lane.b32.xlu0 %v10565_v14, %s14307_s7  ;;  %v16310_v23 = vrot.slane %v3932_v3, %v15498_v51  ;;  %v21132_v28 = vcombine.low %v15761_v15, %v15735_v58  ;;  %v21133_v22 = vcombine.high %v15735_v58, %v15746_v37  ;;  %v981_v11 = vsel %vm930_vm4, %v347_v7, %v16288_v1  ;;  %v16339_v15 = vpop.permute.xlu1 %350 }
 0x223   :  { %v8973_v26 = vcombine.low %v8965_v52, %v8972_v17  ;;  %v16323_v63 = vpop.f32.mrb[34].mxu0  ;;  %v16327_v57 = vcombine.high %v16307_v62, %v16307_v62  ;;  %v1093_v3 = vsel %vm21134_vm1, %v16208_v54, %v347_v7  ;;  %14100 = vmatprep.mubr.msk.f32.mxu0 %vm14303_vm3, %v21118_v47  ;;  %v3631_v17 = vmax.f32 %v3428_v43, 0.0  ;;  %vm21157_vm1 = vmmov %vm21123_vm0 }
 0x224   :  { %v8093_v14 = vrot.slane %v21132_v28, %v15498_v51  ;;  %v8100_v31 = vrot.slane %v21133_v22, %v15498_v51  ;;  %v14039_v52 = vpop.f32.mrb[35].mxu0  ;;  %v8107_v27 = vrot.slane %v8085_v5, %v15498_v51  ;;  %v1262_v37 = vsel %vm1215_vm9, %v16224_v39, %v347_v7 }
 0x225   :  { %9296 = vrot.lane.b32.xlu1 %v8973_v26, %s14307_s7  ;;  %v13828_v28 = vcombine.high %v15898_v2, %v15921_v10  ;;  %v1037_v22 = vsel %vm987_vm5, %v16240_v33, %v16237_v34  ;;  %v1206_v26 = vsel %vm1158_vm8, %v16243_v30, %v16237_v34  ;;  %v3433_v34 = vadd.f32 %v16233_v53, %v16003_v9 }
 0x226   :  { %v9872_v58 = vcombine.low %v16077_v29, %v8093_v14  ;;  %v8115_v54 = vcombine.low %v8093_v14, %v8100_v31  ;;  %v9873_v43 = vcombine.low %v8100_v31, %v8107_v27  ;;  %v16357_v29 = vsel %vm21135_vm6, %v1037_v22, %v16339_v15 }
 0x227   :  { %v16361_v39 = vsel %vm1215_vm9, %v1206_v26, %v16339_v15  ;;  %v16366_v14 = vrot.slane %v13828_v28, %v15498_v51  ;;  %v16373_v30 = vcombine.high %v15898_v2, %v15898_v2  ;;  %v13667_v22 = vcombine.high %v15901_v59, %v15924_v12 }
 0x228   :  { %v9880_v5 = vrot.slane %v9872_v58, %v15498_v51  ;;  %v16363_v7 = vpop.f32.mrb[36].mxu0  ;;  %v8123_v33 = vrot.slane %v8115_v54, %v15498_v51  ;;  %v9887_v52 = vrot.slane %v9873_v43, %v15498_v51  ;;  %v5067_v58 = vcombine.low %v15901_v59, %v15924_v12 }
 0x229   :  { %v14042_v31 = vpop.f32.mrb[37].mxu0  ;;  %v3029_v28 = vrot.slane %v16133_v38, %v14455_v46  ;;  %v8116_v54 = vcombine.low %v8107_v27, %v16366_v14  ;;  %v3632_v26 = vmax.f32 %v3433_v34, 0.0  ;;  %v5021_v60 = vcombine.low %v15921_v10, %v16373_v30 }
 0x22a   :  { %v10751_v9 = vcombine.low %v16109_v36, %v8123_v33  ;;  %v9888_v31 = vcombine.low %v9880_v5, %v9887_v52  ;;  %v16387_v43 = vrot.slane %v5067_v58, %v15498_v51  ;;  %v16390_v42 = vrot.slane %v13667_v22, %v15498_v51  ;;  %v801_v5 = vpop.permute.xlu0 %800 }
 0x22b   :  { %v3036_v41 = vrot.slane %v16264_v50, %v14455_v46  ;;  %v16395_v38 = vrot.slane %v8116_v54, %v15498_v51  ;;  %v3675_v36 = vpack.c.bf16 %v3632_v26, %v3631_v17  ;;  %v13645_v27 = vpack.c.bf16 %v3632_v26, %v3632_v26  ;;  %v358_v26 = vpop.permute.xlu1 %357 }
 0x22c   :  { %10883 = vst.msk [vmem:[#allocation2 + $0x10] sm:$0xff] %vm5820_vm2, %v10751_v9  ;;  %v16399_v34 = vrot.slane %v5021_v60, %v15498_v51  ;;  %10211 = vrot.lane.b32.xlu0 %v9888_v31, %s14308_s8  ;;  %v5099_v52 = vcombine.low %v16387_v43, %v16390_v42  ;;  %v1150_v50 = vsel %vm1101_vm7, %v1093_v3, %v16288_v1  ;;  %v6026_v6 = vshrl.u32 %v15898_v2, 16 }
 0x22d   :  { %v3037_v58 = vcombine.low %v3029_v28, %v3036_v41  ;;  %v1319_v22 = vsel %vm1272_vm10, %v1262_v37, %v16288_v1  ;;  %v8131_v54 = vcombine.low %v8123_v33, %v16395_v38  ;;  %v3972_v17 = vrot.slane %v3675_v36, %v15498_v51 }
 0x22e   :  { %v3979_v60 = vrot.slane %v13645_v27, %v15498_v51  ;;  %v5051_v9 = vcombine.low %v16278_v49, %v16399_v34  ;;  %v16416_v41 = vrot.slane %v5099_v52, %v15498_v51  ;;  %v21137_v1 = vcombine.high %v16262_v32, %v16262_v32 }
 0x22f   :  { %v16413_v31 = vpop.f32.mrb[38].mxu0  ;;  %14101 = vmatmul.mubr.msk.f32.gmra.mrb[76].mxu0 %vm3208_vm12, %v3037_v58  ;;  %v1038_v37 = vsel %vm987_vm5, %v981_v11, %v801_v5  ;;  %v1207_v33 = vsel %vm1158_vm8, %v1150_v50, %v801_v5  ;;  %8871 = vrot.lane.b32.xlu1 %v8131_v54, %s14299_s0  ;;  %v3980_v49 = vcombine.high %v3972_v17, %v3972_v17  ;;  %v6018_v50 = vshrl.u32 %v15765_v0, 16  ;;  %v585_v16 = vpop.permute.xlu1 %584 }
 0x230   :  { %21136 = vst [vmem:[#allocation23_spill] sm:$0xff] %v16413_v31  ;;  %v16423_v3 = vrot.slane %v21137_v1, %v14455_v46  ;;  %v14045_v28 = vpop.f32.mrb[39].mxu0  ;;  %v3981_v36 = vcombine.high %v3979_v60, %v3979_v60  ;;  %v16429_v27 = vrot.slane %v3972_v17, %v15498_v51  ;;  %v16432_v52 = vrot.slane %v3979_v60, %v15498_v51 }
 0x231   :  { %v5065_v58 = vrot.slane %v5051_v9, %v15498_v51  ;;  %v1376_v32 = vsel %vm1329_vm11, %v1319_v22, %v801_v5  ;;  %v3914_v11 = vcombine.high %v15921_v10, %v15921_v10  ;;  %14103 = vmatprep.mubr.msk.f32.mxu0 %vm14303_vm3, %v21118_v47  ;;  %v16442_v54 = vrot.slane %v3980_v49, %v15498_v51  ;;  %v581_v28 = vpop.permute.xlu0 %580 }
 0x232   :  { %v16445_v17 = vrot.slane %v3981_v36, %v15498_v51  ;;  %v16449_v60 = vcombine.high %v16432_v52, %v16432_v52  ;;  %v2201_v9 = vcombine.high %v1376_v32, %v1376_v32  ;;  %v16454_v0 = vrot.slane %v1376_v32, %v14455_v46 }
 0x233   :  { %v5066_v5 = vcombine.low %v16122_v8, %v5065_v58  ;;  %v10282_v22 = vcombine.low %v5065_v58, %v16416_v41  ;;  %v6023_v1 = vshll.u32 %v15898_v2, 16  ;;  %v16459_v49 = vcombine.high %v16442_v54, %v16442_v54 }
 0x234   :  { %v2215_v4 = vrot.slane %v2201_v9, %v14455_v46  ;;  %v16464_v8 = vpop.f32.mrb[40].mxu0  ;;  %v2216_v58 = vcombine.high %v16454_v0, %v16454_v0  ;;  %v6031_v9 = vshll.u32 %v15921_v10, 16  ;;  %v6034_v2 = vshrl.u32 %v15921_v10, 16 }
 0x235   :  { %21138 = vst [vmem:[#allocation24_spill] sm:$0xff] %v16464_v8  ;;  %10397 = vrot.lane.b32.xlu0 %v10282_v22, %s14299_s0  ;;  %5823 = vst.msk [vmem:[#allocation2 + $0x30] sm:$0xff] %vm5820_vm2, %v5066_v5  ;;  %v6025_v36 = vsel %vm15951_vm14, %v6018_v50, %v6023_v1  ;;  %v14048_v25 = vpop.f32.mrb[41].mxu0  ;;  %v6039_v24 = vshll.u32 %v16373_v30, 16  ;;  %v6042_v22 = vshrl.u32 %v16373_v30, 16  ;;  %v6047_v21 = vshll.u32 %v3914_v11, 16 }
 0x236   :  { %v16478_v5 = vcombine.low %v2216_v58, %v2215_v4  ;;  %v6033_v8 = vsel %vm15951_vm14, %v6026_v6, %v6031_v9  ;;  %v1095_v32 = vsel %vm21139_vm13, %v1038_v37, %v358_v26  ;;  %v1264_v31 = vsel %vm1215_vm9, %v1207_v33, %v358_v26  ;;  %v805_v33 = vpop.permute.xlu0 %804 }
 0x237   :  { %v6041_v50 = vsel %vm15951_vm14, %v6034_v2, %v6039_v24  ;;  %v6049_v10 = vsel %vm15951_vm14, %v6042_v22, %v6047_v21  ;;  %v7130_v25 = vcombine.low %v6025_v36, %v6033_v8  ;;  %v982_v30 = vsel %vm930_vm4, %v16339_v15, %v581_v28 }
 0x238   :  { %v7131_v11 = vcombine.low %v6041_v50, %v6049_v10  ;;  %v1151_v1 = vsel %vm1101_vm7, %v16357_v29, %v581_v28  ;;  %v1320_v6 = vsel %vm1272_vm10, %v16361_v39, %v581_v28  ;;  %v3046_v37 = vrot.slane %v16273_v55, %v14455_v46  ;;  %v16506_v29 = vpop.permute.xlu1 %361 }
 0x239   :  { %v16497_v24 = vrot.slane %v7130_v25, %v15498_v51  ;;  %v3053_v21 = vrot.slane %v16302_v18, %v14455_v46  ;;  %v16503_v15 = vadd.f32 %v16233_v53, %v16057_v45  ;;  %v983_v36 = vsel %vm930_vm4, %v358_v26, %v585_v16  ;;  %v14203_v25 = vld [vmem:[#allocation7 + $0x88] sm:$0xff]  }
 0x23a   :  { %v16509_v39 = vrot.slane %v7131_v11, %v15498_v51  ;;  %v1152_v55 = vsel %vm1101_vm7, %v1095_v32, %v585_v16  ;;  %v1321_v28 = vsel %vm1272_vm10, %v1264_v31, %v585_v16  ;;  %v2217_v8 = vcombine.high %v2215_v4, %v2215_v4  ;;  %v14201_v16 = vld [vmem:[#allocation7 + $0x80] sm:$0xff]  }
 0x23b   :  { %21140 = vst [vmem:[#allocation25_spill] sm:$0xff] %v16497_v24  ;;  %v3054_v18 = vcombine.low %v3046_v37, %v3053_v21  ;;  %v1039_v45 = vsel %vm987_vm5, %v982_v30, %v805_v33  ;;  %v1208_v2 = vsel %vm1158_vm8, %v1151_v1, %v805_v33  ;;  %v1377_v22 = vsel %vm1329_vm11, %v1320_v6, %v805_v33 }
 0x23c   :  { %21141 = vst [vmem:[#allocation26_spill] sm:$0xff] %v16509_v39  ;;  %v7161_v26 = vcombine.low %v16497_v24, %v16509_v39  ;;  %v16523_v32 = vsel %vm21142_vm15, %v1039_v45, %v16506_v29  ;;  %v2218_v4 = vcombine.high %v1377_v22, %v1377_v22  ;;  %v2225_v31 = vrot.slane %v1377_v22, %v14455_v46  ;;  %v809_v45 = vpop.permute.xlu0 %808 }
 0x23d   :  { %14104 = vmatmul.mubr.msk.f32.gmra.mrb[78].mxu0 %vm3208_vm12, %v3054_v18  ;;  %v16529_v50 = vsel %vm1215_vm9, %v1208_v2, %v16506_v29  ;;  %v5069_v10 = vcombine.low %v16296_v35, %v16307_v62  ;;  %v8974_v11 = vcombine.low %v16399_v34, %v16387_v43  ;;  %v16542_v1 = vcombine.high %v15924_v12, %v15924_v12  ;;  %v21143_v2 = vld [vmem:[#allocation15_spill] sm:$0xff] }
 0x23e   :  { %v16534_v30 = vrot.slane %v7161_v26, %v15498_v51  ;;  %14106 = vmatprep.mubr.msk.f32.mxu0 %vm14303_vm3, %v21118_v47  ;;  %v16546_v6 = vcombine.high %v16296_v35, %v16296_v35  ;;  %v2232_v37 = vrot.slane %v2218_v4, %v14455_v46  ;;  %v2233_v33 = vcombine.high %v2225_v31, %v2225_v31  ;;  %v16587_v26 = vpop.permute.xlu1 %368 }
 0x23f   :  { %v16549_v21 = vcombine.low %v2217_v8, %v2225_v31  ;;  %v16552_v18 = vrot.slane %v5069_v10, %v15498_v51  ;;  %14133 = vmatprep.subr.bf16.mxu0 %v14201_v16  ;;  %v8982_v34 = vrot.slane %v8974_v11, %v15498_v51  ;;  %v8132_v22 = vcombine.low %v15924_v12, %v21143_v2 }
 0x240   :  { %v7176_v43 = vcombine.low %v16271_v19, %v16534_v30  ;;  %14134 = vmatpush3.bf16.msra.mxu0 %v14201_v16  ;;  %v16560_v4 = vcombine.low %v2233_v33, %v2232_v37  ;;  %v8133_v31 = vcombine.low %v16542_v1, %v16296_v35  ;;  %v8134_v10 = vcombine.low %v16307_v62, %v16546_v6 }
 0x241   :  { %v8975_v8 = vcombine.low %v16390_v42, %v16552_v18  ;;  %14135 = vmatprep.subr.bf16.mxu0 %v14203_v25  ;;  %v16570_v19 = vrot.slane %v8132_v22, %v15498_v51  ;;  %v21144_v16 = vcombine.low %v16423_v3, %v16454_v0  ;;  %v3070_v42 = vrot.slane %v16478_v5, %v14455_v46 }
 0x242   :  { %7916 = vrot.lane.b32.xlu1 %v7176_v43, %s14308_s8  ;;  %v1040_v37 = vsel %vm987_vm5, %v983_v36, %v809_v45  ;;  %v16581_v58 = vrot.slane %v8133_v31, %v15498_v51  ;;  %v16584_v43 = vrot.slane %v8134_v10, %v15498_v51  ;;  %v1209_v22 = vsel %vm1158_vm8, %v1152_v55, %v809_v45  ;;  %v16597_v55 = vpop.f32.mrb[42].mxu0 }
 0x243   :  { %v3063_v11 = vrot.slane %v21144_v16, %v14455_v46  ;;  %v8989_v33 = vrot.slane %v8975_v8, %v15498_v51  ;;  %v9889_v3 = vcombine.low %v16366_v14, %v16570_v19  ;;  %v1378_v5 = vsel %vm1329_vm11, %v1321_v28, %v809_v45  ;;  %21145 = vst [vmem:[#allocation15_spill] sm:$0xff] %v16597_v55 }
 0x244   :  { %v3443_v36 = vadd.f32 %v16233_v53, %v16114_v56  ;;  %14136 = vmatpush3.bf16.msra.mxu0 %v14203_v25  ;;  %v9890_v31 = vcombine.low %v16581_v58, %v16584_v43  ;;  %v2234_v10 = vcombine.high %v1378_v5, %v1378_v5  ;;  %v2241_v16 = vrot.slane %v1378_v5, %v14455_v46  ;;  %v14051_v25 = vpop.f32.mrb[43].mxu0 }
 0x245   :  { %v3071_v0 = vcombine.low %v3063_v11, %v3070_v42  ;;  %v8990_v8 = vcombine.low %v8982_v34, %v8989_v33  ;;  %v9897_v9 = vrot.slane %v9889_v3, %v15498_v51  ;;  %v16603_v28 = vcombine.high %v16445_v17, %v16445_v17 }
 0x246   :  { %v3634_v14 = vmax.f32 %v3443_v36, 0.0  ;;  %v16607_v56 = vsel %vm21123_vm0, %v1040_v37, %v16587_v26  ;;  %v9904_v45 = vrot.slane %v9890_v31, %v15498_v51  ;;  %v2248_v34 = vrot.slane %v2234_v10, %v14455_v46 }
 0x247   :  { %14107 = vmatmul.mubr.msk.f32.gmra.mrb[80].mxu0 %vm3208_vm12, %v3071_v0  ;;  %9298 = vrot.lane.b32.xlu1 %v8990_v8, %s14307_s7  ;;  %v2249_v11 = vcombine.high %v2241_v16, %v2241_v16  ;;  %v1266_v42 = vsel %vm1215_vm9, %v1209_v22, %v16587_v26  ;;  %v21146_v33 = vmax.f32 %v16503_v15, 0.0  ;;  %v6056_v5 = vshll.u32 %v15924_v12, 16 }
 0x248   :  { %v13646_v0 = vpack.c.bf16 %v3634_v14, %v3634_v14  ;;  %v6059_v37 = vshrl.u32 %v15924_v12, 16  ;;  %14109 = vmatprep.mubr.msk.f32.mxu0 %vm14303_vm3, %v21118_v47  ;;  %v9905_v36 = vcombine.low %v9897_v9, %v9904_v45  ;;  %v2250_v8 = vcombine.high %v2248_v34, %v2248_v34  ;;  %v589_v9 = vpop.permute.xlu0 %588 }
 0x249   :  { %v3676_v3 = vpack.c.bf16 %v3634_v14, %v21146_v33  ;;  %v16620_v31 = vcombine.low %v2241_v16, %v2249_v11  ;;  %v6072_v10 = vshll.u32 %v16542_v1, 16  ;;  %v21147_v15 = vshrl.u32 %v15901_v59, 16 }
 0x24a   :  { %v4028_v22 = vrot.slane %v13646_v0, %v15498_v51  ;;  %v21148_v12 = vshll.u32 %v21143_v2, 16  ;;  %10213 = vrot.lane.b32.xlu0 %v9905_v36, %s14308_s8  ;;  %v16634_v16 = vcombine.low %v2248_v34, %v2250_v8  ;;  %v21149_v45 = vshrl.u32 %v21143_v2, 16 }
 0x24b   :  { %v4021_v25 = vrot.slane %v3676_v3, %v15498_v51  ;;  %v6058_v14 = vsel %vm15951_vm14, %v21147_v15, %v6056_v5  ;;  %v6075_v59 = vshrl.u32 %v16542_v1, 16  ;;  %v21150_v36 = vshll.u32 %v16296_v35, 16 }
 0x24c   :  { %v6066_v33 = vsel %vm15951_vm14, %v6059_v37, %v21148_v12  ;;  %v6074_v11 = vsel %vm15951_vm14, %v21149_v45, %v6072_v10  ;;  %v4030_v5 = vcombine.high %v4028_v22, %v4028_v22  ;;  %v16645_v37 = vrot.slane %v4028_v22, %v15498_v51 }
 0x24d   :  { %v7177_v3 = vcombine.low %v6058_v14, %v6066_v33  ;;  %v4029_v0 = vcombine.high %v4021_v25, %v4021_v25  ;;  %v16642_v15 = vrot.slane %v4021_v25, %v15498_v51  ;;  %v6082_v34 = vsel %vm15951_vm14, %v6075_v59, %v21150_v36 }
 0x24e   :  { %v984_v1 = vsel %vm930_vm4, %v16506_v29, %v589_v9  ;;  %v1153_v8 = vsel %vm1101_vm7, %v16523_v32, %v589_v9  ;;  %v16662_v25 = vrot.slane %v4030_v5, %v15498_v51  ;;  %v16670_v14 = vcombine.high %v16645_v37, %v16645_v37  ;;  %v593_v5 = vpop.permute.xlu1 %592 }
 0x24f   :  { %v16652_v2 = vrot.slane %v7177_v3, %v15498_v51  ;;  %v16659_v10 = vrot.slane %v4029_v0, %v15498_v51  ;;  %v16666_v22 = vcombine.high %v16642_v15, %v16642_v15  ;;  %v7178_v32 = vcombine.low %v6074_v11, %v6082_v34 }
 0x250   :  { %v1322_v11 = vsel %vm1272_vm10, %v16529_v50, %v589_v9  ;;  %v6088_v34 = vshll.u32 %v16307_v62, 16  ;;  %v6091_v33 = vshrl.u32 %v16307_v62, 16  ;;  %v6100_v59 = vshrl.u32 %v16327_v57, 16  ;;  %v813_v62 = vpop.permute.xlu0 %812 }
 0x251   :  { %21151 = vst [vmem:[#allocation27_spill] sm:$0xff] %v16652_v2  ;;  %v16679_v45 = vcombine.high %v16659_v10, %v16659_v10  ;;  %v16687_v12 = vrot.slane %v7178_v32, %v15498_v51  ;;  %v6105_v3 = vshll.u32 %v16299_v44, 16  ;;  %v6108_v0 = vshrl.u32 %v16299_v44, 16 }
 0x252   :  { %v21153_v36 = vshrl.u32 %v16296_v35, 16  ;;  %v6113_v50 = vshll.u32 %v16310_v23, 16  ;;  %v16705_v9 = vsel %vm930_vm4, %v16587_v26, %v593_v5  ;;  %v21154_v39 = vshll.u32 %v16546_v6, 16 }
 0x253   :  { %21152 = vst [vmem:[#allocation28_spill] sm:$0xff] %v16687_v12  ;;  %v7209_v29 = vcombine.low %v16652_v2, %v16687_v12  ;;  %v6107_v2 = vsel %vm15951_vm14, %v6100_v59, %v6105_v3  ;;  %v16715_v35 = vsel %vm1101_vm7, %v16607_v56, %v593_v5  ;;  %v3080_v6 = vrot.slane %v16549_v21, %v14455_v46 }
 0x254   :  { %v6090_v32 = vsel %vm15951_vm14, %v21153_v36, %v6088_v34  ;;  %v6098_v24 = vsel %vm15951_vm14, %v6091_v33, %v21154_v39  ;;  %v1323_v36 = vsel %vm1272_vm10, %v1266_v42, %v593_v5  ;;  %v6115_v26 = vsel %vm15951_vm14, %v6108_v0, %v6113_v50 }
 0x255   :  { %v7217_v34 = vrot.slane %v7209_v29, %v15498_v51  ;;  %v7179_v40 = vcombine.low %v6090_v32, %v6098_v24  ;;  %v7180_v55 = vcombine.low %v6107_v2, %v6115_v26  ;;  %v3087_v39 = vrot.slane %v16560_v4, %v14455_v46  ;;  %v373_v32 = vpop.permute.xlu1 %372 }
 0x256   :  { %v1041_v33 = vsel %vm987_vm5, %v984_v1, %v813_v62  ;;  %v1210_v56 = vsel %vm1158_vm8, %v1153_v8, %v813_v62  ;;  %v1379_v29 = vsel %vm1329_vm11, %v1322_v11, %v813_v62  ;;  %v8135_v24 = vcombine.low %v16299_v44, %v16310_v23 }
 0x257   :  { %v10566_v59 = vcombine.low %v16534_v30, %v7217_v34  ;;  %v16729_v42 = vrot.slane %v7179_v40, %v15498_v51  ;;  %v16735_v21 = vrot.slane %v7180_v55, %v15498_v51  ;;  %v3088_v2 = vcombine.low %v3080_v6, %v3087_v39  ;;  %v16779_v39 = vpop.permute.xlu0 %816 }
 0x258   :  { %v2251_v3 = vcombine.high %v1379_v29, %v1379_v29  ;;  %v2258_v4 = vrot.slane %v1379_v29, %v14455_v46  ;;  %v16742_v40 = vrot.slane %v8135_v24, %v15498_v51  ;;  %v8164_v1 = vcombine.low %v16570_v19, %v16581_v58 }
 0x259   :  { %21155 = vst [vmem:[#allocation29_spill] sm:$0xff] %v16729_v42  ;;  %21156 = vst [vmem:[#allocation30_spill] sm:$0xff] %v16735_v21  ;;  %10681 = vrot.lane.b32.xlu0 %v10566_v59, %s14307_s7  ;;  %v16748_v8 = vadd.f32 %v16233_v53, %v16147_v20  ;;  %v7210_v55 = vcombine.low %v16729_v42, %v16735_v21  ;;  %14110 = vmatmul.mubr.msk.f32.gmra.mrb[82].mxu0 %vm3208_vm12, %v3088_v2  ;;  %vm13503_vm6 = vcmask 1045509   ;;  %vm13505_vm13 = vcmask 1046534  }
 0x25a   :  { %v16754_v0 = vrot.slane %v2251_v3, %v14455_v46  ;;  %v2266_v5 = vcombine.high %v2258_v4, %v2258_v4  ;;  %v16758_v11 = vcombine.high %v16299_v44, %v16299_v44  ;;  %v8165_v58 = vcombine.low %v16584_v43, %v16742_v40  ;;  %14112 = vmatprep.mubr.msk.f32.mxu0 %vm14303_vm3, %v21118_v47 }
 0x25b   :  { %v8172_v20 = vrot.slane %v8164_v1, %v15498_v51  ;;  %v16766_v50 = vcombine.high %v16310_v23, %v16310_v23  ;;  %v16771_v62 = vrot.slane %v7210_v55, %v15498_v51  ;;  %v5070_v6 = vcombine.low %v16327_v57, %v16299_v44  ;;  %v16792_v55 = vpop.f32.mrb[44].mxu0  ;;  %v597_v19 = vpop.permute.xlu0 %596 }
 0x25c   :  { %v16773_v26 = vcombine.low %v2258_v4, %v2266_v5  ;;  %v5116_v43 = vcombine.low %v16310_v23, %v16758_v11  ;;  %v16782_v59 = vrot.slane %v8165_v58, %v15498_v51  ;;  %v1098_v2 = vsel %vm21157_vm1, %v1041_v33, %v373_v32  ;;  %21158 = vst [vmem:[#allocation31_spill] sm:$0xff] %v16792_v55  ;;  %v14054_v33 = vpop.f32.mrb[45].mxu0  ;;  %v16841_v55 = vpop.permute.xlu1 %820 }
 0x25d   :  { %v10752_v29 = vcombine.low %v16395_v38, %v8172_v20  ;;  %v5117_v24 = vcombine.low %v16766_v50, %v16429_v27  ;;  %v7225_v3 = vcombine.low %v7217_v34, %v16771_v62  ;;  %v5098_v4 = vrot.slane %v5070_v6, %v15498_v51 }
 0x25e   :  { %v5126_v57 = vrot.slane %v5116_v43, %v15498_v51  ;;  %v1267_v1 = vsel %vm1215_vm9, %v1210_v56, %v373_v32  ;;  %v8180_v5 = vcombine.low %v8172_v20, %v16782_v59  ;;  %v1380_v58 = vsel %vm1329_vm11, %v1323_v36, %v16779_v39 }
 0x25f   :  { %10884 = vst.msk [vmem:[#allocation2 + $0x28] sm:$0xff] %vm5820_vm2, %v10752_v29  ;;  %v5133_v38 = vrot.slane %v5117_v24, %v15498_v51  ;;  %v13668_v34 = vcombine.high %v16429_v27, %v16442_v54  ;;  %7918 = vrot.lane.b32.xlu1 %v7225_v3, %s14308_s8  ;;  %v5100_v6 = vcombine.low %v16552_v18, %v5098_v4  ;;  %vm13507_vm15 = vcmask 1047559  }
 0x260   :  { %v2267_v56 = vcombine.high %v1380_v58, %v1380_v58  ;;  %v16804_v43 = vrot.slane %v1380_v58, %v14455_v46  ;;  %v8991_v20 = vcombine.low %v5098_v4, %v5126_v57  ;;  %v13829_v36 = vcombine.high %v16299_v44, %v16310_v23 }
 0x261   :  { %v5148_v30 = vcombine.low %v5126_v57, %v5133_v38  ;;  %v16807_v29 = vrot.slane %v13668_v34, %v15498_v51  ;;  %v8182_v24 = vcombine.low %v16429_v27, %v16442_v54  ;;  %v5114_v33 = vrot.slane %v5100_v6, %v15498_v51 }
 0x262   :  { %v2281_v3 = vrot.slane %v2267_v56, %v14455_v46  ;;  %v2282_v18 = vcombine.high %v16804_v43, %v16804_v43  ;;  %v8999_v44 = vrot.slane %v8991_v20, %v15498_v51  ;;  %v8183_v34 = vcombine.low %v16459_v49, %v16432_v52 }
 0x263   :  { %v16820_v57 = vrot.slane %v5148_v30, %v15498_v51  ;;  %v8992_v58 = vcombine.low %v5133_v38, %v16807_v29  ;;  %8873 = vrot.lane.b32.xlu1 %v8180_v5, %s14299_s0  ;;  %v5115_v6 = vcombine.low %v16416_v41, %v5114_v33  ;;  %v16831_v4 = vrot.slane %v13829_v36, %v15498_v51 }
 0x264   :  { %v2283_v56 = vcombine.high %v2281_v3, %v2281_v3  ;;  %v16828_v42 = vcombine.low %v2282_v18, %v2281_v3  ;;  %v16836_v20 = vrot.slane %v8182_v24, %v15498_v51  ;;  %v16839_v12 = vrot.slane %v8183_v34, %v15498_v51 }
 0x265   :  { %v10283_v30 = vcombine.low %v5114_v33, %v16820_v57  ;;  %v9006_v38 = vrot.slane %v8992_v58, %v15498_v51  ;;  %5824 = vst.msk [vmem:[#allocation2 + $0x48] sm:$0xff] %vm5820_vm2, %v5115_v6  ;;  %v9906_v41 = vcombine.low %v16742_v40, %v16831_v4  ;;  %v3097_v5 = vrot.slane %v16620_v31, %v14455_v46 }
 0x266   :  { %v3104_v36 = vrot.slane %v16634_v16, %v14455_v46  ;;  %v16851_v33 = vsel %vm930_vm4, %v373_v32, %v597_v19  ;;  %v9907_v3 = vcombine.low %v16836_v20, %v16839_v12  ;;  %v16857_v18 = vsel %vm1101_vm7, %v1098_v2, %v597_v19  ;;  %vm21163_vm4 = vmmov %vm21123_vm0 }
 0x267   :  { %10399 = vrot.lane.b32.xlu0 %v10283_v30, %s14299_s0  ;;  %v9007_v24 = vcombine.low %v8999_v44, %v9006_v38  ;;  %v1324_v40 = vsel %vm1272_vm10, %v1267_v1, %v597_v19  ;;  %v9914_v58 = vrot.slane %v9906_v41, %v15498_v51  ;;  %v4010_v32 = vcombine.high %v16429_v27, %v16429_v27 }
 0x268   :  { %v3105_v31 = vcombine.low %v3097_v5, %v3104_v36  ;;  %v1381_v16 = vsel %vm1329_vm11, %v1324_v40, %v16841_v55  ;;  %v9921_v44 = vrot.slane %v9907_v3, %v15498_v51  ;;  %v6116_v2 = vshrl.u32 %v16310_v23, 16 }
 0x269   :  { %9300 = vrot.lane.b32.xlu1 %v9007_v24, %s14307_s7  ;;  %v2284_v34 = vcombine.high %v1381_v16, %v1381_v16  ;;  %v16868_v6 = vrot.slane %v1381_v16, %v14455_v46  ;;  %v6121_v19 = vshll.u32 %v16758_v11, 16  ;;  %v6124_v1 = vshrl.u32 %v16758_v11, 16 }
 0x26a   :  { %14113 = vmatmul.mubr.msk.f32.gmra.mrb[84].mxu0 %vm3208_vm12, %v3105_v31  ;;  %v6129_v30 = vshll.u32 %v16766_v50, 16  ;;  %v6132_v38 = vshrl.u32 %v16766_v50, 16  ;;  %v9922_v41 = vcombine.low %v9914_v58, %v9921_v44  ;;  %v6137_v50 = vshll.u32 %v16429_v27, 16 }
 0x26b   :  { %v16877_v5 = vrot.slane %v2284_v34, %v14455_v46  ;;  %v16882_v24 = vcombine.low %v2283_v56, %v16868_v6  ;;  %14115 = vmatprep.mubr.msk.f32.mxu0 %vm14303_vm3, %v21118_v47  ;;  %v6123_v23 = vsel %vm15951_vm14, %v6116_v2, %v6121_v19  ;;  %v6140_v3 = vshrl.u32 %v16429_v27, 16 }
 0x26c   :  { %v6131_v11 = vsel %vm15951_vm14, %v6124_v1, %v6129_v30  ;;  %10215 = vrot.lane.b32.xlu0 %v9922_v41, %s14308_s8  ;;  %v6149_v40 = vshrl.u32 %v4010_v32, 16  ;;  %v6154_v58 = vshll.u32 %v16459_v49, 16  ;;  %v6157_v56 = vshrl.u32 %v16459_v49, 16 }
 0x26d   :  { %v6162_v31 = vshll.u32 %v16432_v52, 16  ;;  %v6139_v16 = vsel %vm15951_vm14, %v6132_v38, %v6137_v50  ;;  %v21159_v44 = vshll.u32 %v16442_v54, 16  ;;  %v6165_v2 = vshrl.u32 %v16432_v52, 16  ;;  %v839_v50 = vpop.permute.xlu0 %838 }
 0x26e   :  { %v6170_v27 = vshll.u32 %v16445_v17, 16  ;;  %v6156_v32 = vsel %vm15951_vm14, %v6149_v40, %v6154_v58  ;;  %v6173_v19 = vshrl.u32 %v16445_v17, 16  ;;  %v6178_v1 = vshll.u32 %v16449_v60, 16 }
 0x26f   :  { %v6147_v34 = vsel %vm15951_vm14, %v6140_v3, %v21159_v44  ;;  %v6164_v49 = vsel %vm15951_vm14, %v6157_v56, %v6162_v31  ;;  %v7226_v30 = vcombine.low %v6123_v23, %v6131_v11  ;;  %v3453_v40 = vadd.f32 %v16233_v53, %v16212_v13  ;;  %v855_v13 = vpop.permute.xlu1 %854 }
 0x270   :  { %v6172_v54 = vsel %vm15951_vm14, %v6165_v2, %v6170_v27  ;;  %v7227_v38 = vcombine.low %v6139_v16, %v6147_v34  ;;  %v7228_v41 = vcombine.low %v6156_v32, %v6164_v49  ;;  %v6180_v3 = vsel %vm15951_vm14, %v6173_v19, %v6178_v1 }
 0x271   :  { %v1042_v58 = vsel %vm987_vm5, %v16705_v9, %v16779_v39  ;;  %v1211_v56 = vsel %vm1158_vm8, %v16715_v35, %v16779_v39  ;;  %v7229_v31 = vcombine.low %v6172_v54, %v6180_v3  ;;  %v16923_v23 = vrot.slane %v7226_v30, %v15498_v51 }
 0x272   :  { %v16926_v11 = vrot.slane %v7227_v38, %v15498_v51  ;;  %v16929_v16 = vrot.slane %v7228_v41, %v15498_v51  ;;  %v3636_v44 = vmax.f32 %v3453_v40, 0.0  ;;  %v1099_v34 = vsel %vm21163_vm4, %v1042_v58, %v839_v50 }
 0x273   :  { %21160 = vst [vmem:[#allocation32_spill] sm:$0xff] %v16923_v23  ;;  %v1268_v9 = vsel %vm1215_vm9, %v1211_v56, %v839_v50  ;;  %v8184_v2 = vcombine.low %v16445_v17, %v16449_v60  ;;  %v16936_v35 = vrot.slane %v7229_v31, %v15498_v51  ;;  %v21164_v49 = vmax.f32 %v16748_v8, 0.0  ;;  %v16965_v56 = vpop.f32.mrb[46].mxu0 }
 0x274   :  { %21161 = vst [vmem:[#allocation33_spill] sm:$0xff] %v16926_v11  ;;  %21162 = vst [vmem:[#allocation34_spill] sm:$0xff] %v16929_v16  ;;  %v7258_v39 = vcombine.low %v16923_v23, %v16926_v11  ;;  %v13647_v1 = vpack.c.bf16 %v3636_v44, %v3636_v44  ;;  %v8213_v30 = vcombine.low %v16831_v4, %v16836_v20  ;;  %v14197_v11 = vld [vmem:[#allocation7] sm:$0xff]  }
 0x275   :  { %v3677_v19 = vpack.c.bf16 %v3636_v44, %v21164_v49  ;;  %v16947_v54 = vrot.slane %v8184_v2, %v15498_v51  ;;  %v7259_v38 = vcombine.low %v16929_v16, %v16936_v35  ;;  %v3114_v50 = vrot.slane %v16773_v26, %v14455_v46 }
 0x276   :  { %v7266_v41 = vrot.slane %v7258_v39, %v15498_v51  ;;  %v21165_v8 = vcombine.low %v16754_v0, %v16804_v43  ;;  %v4077_v58 = vrot.slane %v13647_v1, %v15498_v51  ;;  %v8221_v20 = vrot.slane %v8213_v30, %v15498_v51  ;;  %v14057_v43 = vpop.f32.mrb[47].mxu0 }
 0x277   :  { %v4070_v40 = vrot.slane %v3677_v19, %v15498_v51  ;;  %v8214_v4 = vcombine.low %v16839_v12, %v16947_v54  ;;  %v16968_v31 = vrot.slane %v7259_v38, %v15498_v51  ;;  %v1043_v0 = vsel %vm987_vm5, %v16851_v33, %v16841_v55  ;;  %v843_v19 = vpop.permute.xlu1 %842  ;;  %v16980_v1 = vpop.f32.mrb[48].mxu0  ;;  %vm21166_vm5 = vmmov %vm21123_vm0 }
 0x278   :  { %v3121_v3 = vrot.slane %v21165_v8, %v14455_v46  ;;  %v10567_v26 = vcombine.low %v16771_v62, %v7266_v41  ;;  %v4079_v39 = vcombine.high %v4077_v58, %v4077_v58  ;;  %v16978_v12 = vrot.slane %v4077_v58, %v15498_v51  ;;  %v871_v38 = vpop.permute.xlu0 %870  ;;  %v14060_v8 = vpop.f32.mrb[49].mxu0 }
 0x279   :  { %v4078_v2 = vcombine.high %v4070_v40, %v4070_v40  ;;  %v16975_v49 = vrot.slane %v4070_v40, %v15498_v51  ;;  %v7274_v30 = vcombine.low %v7266_v41, %v16968_v31  ;;  %v16985_v62 = vrot.slane %v8214_v4, %v15498_v51 }
 0x27a   :  { %v3122_v44 = vcombine.low %v3114_v50, %v3121_v3  ;;  %10683 = vrot.lane.b32.xlu0 %v10567_v26, %s14307_s7  ;;  %v10753_v33 = vcombine.low %v16782_v59, %v8221_v20  ;;  %v6181_v50 = vshrl.u32 %v16449_v60, 16  ;;  %v16994_v40 = vrot.slane %v4079_v39, %v15498_v51  ;;  %v17003_v59 = vpop.f32.mrb[50].mxu0 }
 0x27b   :  { %v16991_v3 = vrot.slane %v4078_v2, %v15498_v51  ;;  %v16998_v41 = vcombine.high %v16975_v49, %v16975_v49  ;;  %7920 = vrot.lane.b32.xlu1 %v7274_v30, %s14308_s8  ;;  %v1100_v43 = vsel %vm21166_vm5, %v1043_v0, %v843_v19  ;;  %v14063_v2 = vpop.f32.mrb[51].mxu0  ;;  %v1212_v27 = vsel %vm1158_vm8, %v16857_v18, %v16841_v55 }
 0x27c   :  { %14116 = vmatmul.mubr.msk.f32.gmra.mrb[86].mxu0 %vm3208_vm12, %v3122_v44  ;;  %v8229_v44 = vcombine.low %v8221_v20, %v16985_v62  ;;  %10885 = vst.msk [vmem:[#allocation2 + $0x40] sm:$0xff] %vm5820_vm2, %v10753_v33  ;;  %v1156_v20 = vsel %vm1101_vm7, %v1099_v34, %v855_v13  ;;  %v1325_v33 = vsel %vm1272_vm10, %v1268_v9, %v855_v13 }
 0x27d   :  { %14118 = vmatprep.mubr.msk.f32.mxu0 %vm14303_vm3, %v21118_v47  ;;  %v17024_v0 = vadd.f32 %v16233_v53, %v16280_v61  ;;  %v1269_v2 = vsel %vm1215_vm9, %v1212_v27, %v843_v19  ;;  %v17028_v26 = vsel %vm1158_vm8, %v1156_v20, %v871_v38  ;;  %v1382_v4 = vsel %vm1329_vm11, %v1325_v33, %v871_v38  ;;  %v859_v61 = vpop.permute.xlu0 %858 }
 0x27e   :  { %v5119_v30 = vcombine.low %v16432_v52, %v16445_v17  ;;  %v2300_v55 = vcombine.high %v1382_v4, %v1382_v4  ;;  %v2307_v18 = vrot.slane %v1382_v4, %v14455_v46  ;;  %v13669_v53 = vcombine.high %v16432_v52, %v16445_v17  ;;  %v17049_v17 = vpop.f32.mrb[52].mxu0 }
 0x27f   :  { %8875 = vrot.lane.b32.xlu1 %v8229_v44, %s14299_s0  ;;  %v3637_v13 = vmax.f32 %v17024_v0, 0.0  ;;  %v5166_v9 = vcombine.low %v16659_v10, %v16666_v22  ;;  %v3131_v27 = vrot.slane %v16828_v42, %v14455_v46  ;;  %v3138_v19 = vrot.slane %v16882_v24, %v14455_v46  ;;  %v14066_v0 = vpop.f32.mrb[53].mxu0 }
 0x280   :  { %v5147_v34 = vrot.slane %v5119_v30, %v15498_v51  ;;  %v2314_v38 = vrot.slane %v2300_v55, %v14455_v46  ;;  %v2315_v4 = vcombine.high %v2307_v18, %v2307_v18  ;;  %v5175_v44 = vrot.slane %v13669_v53, %v15498_v51  ;;  %v17058_v55 = vpop.permute.xlu1 %874  ;;  %v17111_v0 = vld [vmem:[%s21029_s2] ss:$0 sm:$0xff] }
 0x281   :  { %v5167_v52 = vcombine.low %v16679_v45, %v16645_v37  ;;  %v5182_v20 = vrot.slane %v5166_v9, %v15498_v51  ;;  %v3139_v33 = vcombine.low %v3131_v27, %v3138_v19  ;;  %v17054_v42 = vsel %vm1101_vm7, %v1100_v43, %v859_v61 }
 0x282   :  { %v5149_v30 = vcombine.low %v16807_v29, %v5147_v34  ;;  %v2316_v24 = vcombine.high %v2314_v38, %v2314_v38  ;;  %v17056_v32 = vcombine.low %v2307_v18, %v2315_v4  ;;  %v9008_v58 = vcombine.low %v5147_v34, %v5175_v44 }
 0x283   :  { %v17061_v53 = vrot.slane %v5167_v52, %v15498_v51  ;;  %v5197_v39 = vcombine.low %v5175_v44, %v5182_v20  ;;  %14119 = vmatmul.mubr.msk.f32.gmra.mrb[88].mxu0 %vm3208_vm12, %v3139_v33  ;;  %v1326_v29 = vsel %vm1272_vm10, %v1269_v2, %v859_v61  ;;  %v8232_v43 = vcombine.low %v16645_v37, %v16662_v25 }
 0x284   :  { %v5163_v8 = vrot.slane %v5149_v30, %v15498_v51  ;;  %v17070_v9 = vcombine.low %v2314_v38, %v2316_v24  ;;  %v9016_v19 = vrot.slane %v9008_v58, %v15498_v51  ;;  %14121 = vmatprep.mubr.msk.f32.mxu0 %vm14303_vm3, %v21118_v47  ;;  %v17082_v2 = vsel %vm1329_vm11, %v1326_v29, %v17058_v55 }
 0x285   :  { %v9009_v27 = vcombine.low %v5182_v20, %v17061_v53  ;;  %v17078_v4 = vrot.slane %v5197_v39, %v15498_v51  ;;  %v21167_v61 = vcombine.low %v16603_v28, %v16642_v15  ;;  %v21168_v39 = vcombine.high %v16642_v15, %v16659_v10 }
 0x286   :  { %v5164_v34 = vcombine.low %v16820_v57, %v5163_v8  ;;  %v2324_v57 = vrot.slane %v17082_v2, %v14455_v46  ;;  %v17104_v20 = vrot.slane %v8232_v43, %v15498_v51  ;;  %v3463_v24 = vadd.f32 %v17111_v0, %v16323_v63 }
 0x287   :  { %v17088_v38 = vrot.slane %v21167_v61, %v15498_v51  ;;  %v9023_v58 = vrot.slane %v9009_v27, %v15498_v51  ;;  %v17099_v52 = vrot.slane %v21168_v39, %v15498_v51  ;;  %v10284_v30 = vcombine.low %v5163_v8, %v17078_v4 }
 0x288   :  { %5825 = vst.msk [vmem:[#allocation2 + $0x60] sm:$0xff] %vm5820_vm2, %v5164_v34  ;;  %v2332_v27 = vcombine.high %v2324_v57, %v2324_v57  ;;  %v4062_v8 = vcombine.high %v16662_v25, %v16662_v25  ;;  %v6186_v34 = vshll.u32 %v16603_v28, 16  ;;  %v3638_v61 = vmax.f32 %v3463_v24, 0.0 }
 0x289   :  { %v9923_v33 = vcombine.low %v16947_v54, %v17088_v38  ;;  %v9024_v29 = vcombine.low %v9016_v19, %v9023_v58  ;;  %10401 = vrot.lane.b32.xlu0 %v10284_v30, %s14299_s0  ;;  %v9924_v54 = vcombine.low %v17099_v52, %v17104_v20  ;;  %v6189_v39 = vshrl.u32 %v16603_v28, 16 }
 0x28a   :  { %v17124_v63 = vcombine.low %v2324_v57, %v2332_v27  ;;  %v6188_v19 = vsel %vm15951_vm14, %v6181_v50, %v6186_v34  ;;  %v21169_v58 = vshll.u32 %v16666_v22, 16  ;;  %v21170_v30 = vshrl.u32 %v16659_v10, 16  ;;  %v909_v27 = vpop.permute.xlu1 %908 }
 0x28b   :  { %v9931_v43 = vrot.slane %v9923_v33, %v15498_v51  ;;  %9302 = vrot.lane.b32.xlu1 %v9024_v29, %s14307_s7  ;;  %v6211_v33 = vshll.u32 %v16679_v45, 16  ;;  %v9938_v28 = vrot.slane %v9924_v54, %v15498_v51  ;;  %v3678_v24 = vpack.c.bf16 %v3638_v61, %v3637_v13  ;;  %v17149_v54 = vpop.f32.mrb[54].mxu0 }
 0x28c   :  { %v6205_v18 = vsel %vm15951_vm14, %v21170_v30, %v21169_v58  ;;  %v13648_v29 = vpack.c.bf16 %v3638_v61, %v3638_v61  ;;  %v21171_v57 = vshll.u32 %v16642_v15, 16  ;;  %v21172_v50 = vshrl.u32 %v16666_v22, 16 }
 0x28d   :  { %v6214_v34 = vshrl.u32 %v16679_v45, 16  ;;  %v6219_v58 = vshll.u32 %v16645_v37, 16  ;;  %v6222_v30 = vshrl.u32 %v16645_v37, 16  ;;  %v9939_v13 = vcombine.low %v9931_v43, %v9938_v28 }
 0x28e   :  { %v6196_v60 = vsel %vm15951_vm14, %v6189_v39, %v21171_v57  ;;  %v6213_v10 = vsel %vm15951_vm14, %v21172_v50, %v6211_v33  ;;  %v4119_v15 = vrot.slane %v3678_v24, %v15498_v51  ;;  %v4126_v61 = vrot.slane %v13648_v29, %v15498_v51  ;;  %v14069_v57 = vpop.f32.mrb[55].mxu0 }
 0x28f   :  { %v6227_v39 = vshll.u32 %v16662_v25, 16  ;;  %v6221_v22 = vsel %vm15951_vm14, %v6214_v34, %v6219_v58  ;;  %v6230_v33 = vshrl.u32 %v16662_v25, 16  ;;  %v6235_v45 = vshll.u32 %v16670_v14, 16  ;;  %v17159_v44 = vpop.f32.mrb[56].mxu0  ;;  %10217 = vrot.lane.b32.xlu0 %v9939_v13, %s14308_s8  ;;  %v893_v57 = vpop.permute.xlu0 %892 }
 0x290   :  { %v6238_v50 = vshrl.u32 %v16670_v14, 16  ;;  %21173 = vst [vmem:[#allocation35_spill] sm:$0xff] %v17159_v44  ;;  %v4127_v43 = vcombine.high %v4119_v15, %v4119_v15  ;;  %v4128_v28 = vcombine.high %v4126_v61, %v4126_v61  ;;  %v17163_v24 = vrot.slane %v4119_v15, %v15498_v51  ;;  %v14072_v34 = vpop.f32.mrb[57].mxu0 }
 0x291   :  { %v17166_v29 = vrot.slane %v4126_v61, %v15498_v51  ;;  %v6229_v58 = vsel %vm15951_vm14, %v6222_v30, %v6227_v39  ;;  %v6237_v36 = vsel %vm15951_vm14, %v6230_v33, %v6235_v45  ;;  %v6243_v16 = vshll.u32 %v4062_v8, 16  ;;  %v897_v8 = vpop.permute.xlu1 %896 }
 0x292   :  { %v7275_v44 = vcombine.low %v6188_v19, %v6196_v60  ;;  %v17173_v13 = vrot.slane %v4127_v43, %v15498_v51  ;;  %v17176_v15 = vrot.slane %v4128_v28, %v15498_v51  ;;  %v7276_v23 = vcombine.low %v6205_v18, %v6213_v10 }
 0x293   :  { %v7277_v61 = vcombine.low %v6221_v22, %v6229_v58  ;;  %v6245_v34 = vsel %vm15951_vm14, %v6238_v50, %v6243_v16  ;;  %v1270_v30 = vsel %vm1215_vm9, %v17028_v26, %v893_v57  ;;  %v21056_v10 = vmov 0   ;;  %v925_v43 = vpop.permute.xlu0 %924 }
 0x294   :  { %v17181_v21 = vrot.slane %v7275_v44, %v15498_v51  ;;  %v17187_v19 = vcombine.high %v17176_v15, %v17176_v15  ;;  %v7278_v39 = vcombine.low %v6237_v36, %v6245_v34  ;;  %v17191_v18 = vrot.slane %v7276_v23, %v15498_v51  ;;  %11160 = vmatprep.subr.bf16.mxu1 %v21056_v10  ;;  %v14198_v36 = vld [vmem:[#allocation7 + $0x8] sm:$0xff]  }
 0x295   :  { %v17195_v16 = vrot.slane %v7277_v61, %v15498_v51  ;;  %v1214_v44 = vsel %vm1158_vm8, %v17054_v42, %v17058_v55  ;;  %v13831_v22 = vcombine.high %v16645_v37, %v16662_v25  ;;  %11161 = vmatpush1.bf16.msra.mxu1 %v14197_v11  ;;  %v8262_v50 = vcombine.low %v17088_v38, %v17099_v52 }
 0x296   :  { %21174 = vst [vmem:[#allocation36_spill] sm:$0xff] %v17181_v21  ;;  %21175 = vst [vmem:[#allocation37_spill] sm:$0xff] %v17191_v18  ;;  %v17205_v23 = vrot.slane %v7278_v39, %v15498_v51  ;;  %v7307_v33 = vcombine.low %v17181_v21, %v17191_v18  ;;  %v1271_v45 = vsel %vm1215_vm9, %v1214_v44, %v897_v8  ;;  %11162 = vmatprep.subr.bf16.mxu1 %v21056_v10  ;;  %v14213_v18 = vld [vmem:[#allocation7 + $0x70] sm:$0xff]   ;;  %vm8921_vm7 = vcmask 785920  }
 0x297   :  { %21176 = vst [vmem:[#allocation38_spill] sm:$0xff] %v17195_v16  ;;  %v17216_v37 = vrot.slane %v13831_v22, %v15498_v51  ;;  %v17220_v11 = vadd.f32 %v17111_v0, %v16363_v7  ;;  %v21178_v55 = vcombine.high %v16868_v6, %v16868_v6  ;;  %v8270_v57 = vrot.slane %v8262_v50, %v15498_v51  ;;  %v14199_v50 = vld [vmem:[#allocation7 + $0x10] sm:$0xff]  }
 0x298   :  { %21177 = vst [vmem:[#allocation39_spill] sm:$0xff] %v17205_v23  ;;  %v7308_v38 = vcombine.low %v17195_v16, %v17205_v23  ;;  %v7315_v52 = vrot.slane %v7307_v33, %v15498_v51  ;;  %v1327_v58 = vsel %vm1272_vm10, %v1270_v30, %v909_v27  ;;  %v21179_v6 = vcombine.high %v17082_v2, %v17082_v2  ;;  %v929_v33 = vpop.permute.xlu1 %928 }
 0x299   :  { %v3140_v28 = vcombine.low %v21178_v55, %v16877_v5  ;;  %v8263_v61 = vcombine.low %v17104_v20, %v17216_v37  ;;  %v3639_v7 = vmax.f32 %v17220_v11, 0.0  ;;  %11163 = vmatpush1.bf16.msra.mxu1 %v14198_v36  ;;  %v10754_v27 = vcombine.low %v16985_v62, %v8270_v57 }
 0x29a   :  { %v2331_v5 = vrot.slane %v21179_v6, %v14455_v46  ;;  %v17240_v8 = vrot.slane %v7308_v38, %v15498_v51  ;;  %v10568_v39 = vcombine.low %v16968_v31, %v7315_v52  ;;  %v1384_v30 = vsel %vm1329_vm11, %v1327_v58, %v925_v43  ;;  %11164 = vmatprep.subr.bf16.mxu1 %v21056_v10  ;;  %v17264_v38 = vpop.f32.mrb[58].mxu0 }
 0x29b   :  { %v3148_v34 = vrot.slane %v3140_v28, %v14455_v46  ;;  %v17247_v20 = vrot.slane %v8263_v61, %v15498_v51  ;;  %v21180_v44 = vrot.slane %v17056_v32, %v14455_v46  ;;  %v2333_v22 = vcombine.high %v1384_v30, %v1384_v30  ;;  %10886 = vst.msk [vmem:[#allocation2 + $0x58] sm:$0xff] %vm5820_vm2, %v10754_v27  ;;  %v913_v28 = vpop.permute.xlu0 %912 }
 0x29c   :  { %v2340_v36 = vrot.slane %v1384_v30, %v14455_v46  ;;  %v7323_v31 = vcombine.low %v7315_v52, %v17240_v8  ;;  %10685 = vrot.lane.b32.xlu0 %v10568_v39, %s14307_s7  ;;  %v5168_v62 = vcombine.low %v16662_v25, %v16670_v14  ;;  %v5216_v43 = vcombine.low %v16978_v12, %v16994_v40  ;;  %v14075_v25 = vpop.f32.mrb[59].mxu0 }
 0x29d   :  { %v3156_v2 = vcombine.low %v3148_v34, %v21180_v44  ;;  %v21181_v32 = vcombine.low %v16975_v49, %v16991_v3  ;;  %v8278_v52 = vcombine.low %v8270_v57, %v17247_v20  ;;  %v2347_v58 = vrot.slane %v2333_v22, %v14455_v46  ;;  %v17281_v30 = vpop.f32.mrb[60].mxu0  ;;  %11165 = vmatpush1.bf16.msra.mxu1 %v14199_v50 }
 0x29e   :  { %v2348_v61 = vcombine.high %v2340_v36, %v2340_v36  ;;  %v3174_v34 = vcombine.low %v2331_v5, %v2340_v36  ;;  %7922 = vrot.lane.b32.xlu1 %v7323_v31, %s14308_s8  ;;  %v5196_v14 = vrot.slane %v5168_v62, %v15498_v51  ;;  %v21182_v6 = vcombine.high %v16975_v49, %v16991_v3  ;;  %v14200_v36 = vld [vmem:[#allocation7 + $0x18] sm:$0xff]   ;;  %v17289_v31 = vpop.permute.xlu1 %8867  ;;  %v14078_v62 = vpop.f32.mrb[61].mxu0 }
 0x29f   :  { %v5224_v55 = vrot.slane %v21181_v32, %v15498_v51  ;;  %14122 = vmatmul.mubr.msk.f32.gmra.mrb[90].mxu0 %vm3208_vm12, %v3156_v2  ;;  %v17276_v27 = vrot.slane %v5216_v43, %v15498_v51  ;;  %v6252_v57 = vshll.u32 %v16991_v3, 16  ;;  %21183 = vst [vmem:[#allocation40_spill] sm:$0xff] %v17281_v30  ;;  %v1328_v2 = vsel %vm1272_vm10, %v1271_v45, %v913_v28 }
 0x2a0   :  { %v5231_v39 = vrot.slane %v21182_v6, %v15498_v51  ;;  %14124 = vmatprep.mubr.msk.f32.mxu0 %vm14303_vm3, %v21118_v47  ;;  %v17283_v5 = vcombine.low %v2348_v61, %v2347_v58  ;;  %v17286_v44 = vrot.slane %v3174_v34, %v14455_v46  ;;  %v2349_v22 = vcombine.high %v2347_v58, %v2347_v58 }
 0x2a1   :  { %v9025_v43 = vcombine.low %v5196_v14, %v5224_v55  ;;  %v5198_v25 = vcombine.low %v17061_v53, %v5196_v14  ;;  %11166 = vmatprep.subr.bf16.mxu1 %v21056_v10  ;;  %v1385_v34 = vsel %vm1329_vm11, %v1328_v2, %v929_v33  ;;  %v3165_v45 = vrot.slane %v17070_v9, %v14455_v46  ;;  %v21184_v2 = vld [vmem:[#allocation23_spill] sm:$0xff] }
 0x2a2   :  { %v9026_v32 = vcombine.low %v5231_v39, %v17276_v27  ;;  %v5246_v6 = vcombine.low %v5224_v55, %v5231_v39  ;;  %v3172_v50 = vrot.slane %v17124_v63, %v14455_v46  ;;  %8877 = vrot.lane.b32.xlu1 %v8278_v52, %s14299_s0  ;;  %v2350_v14 = vcombine.high %v1385_v34, %v1385_v34 }
 0x2a3   :  { %v9033_v28 = vrot.slane %v9025_v43, %v15498_v51  ;;  %v5212_v55 = vrot.slane %v5198_v25, %v15498_v51  ;;  %v2357_v33 = vrot.slane %v1385_v34, %v14455_v46  ;;  %v3473_v9 = vadd.f32 %v17111_v0, %v21184_v2  ;;  %11167 = vmatpush1.bf16.msra.mxu1 %v14200_v36 }
 0x2a4   :  { %v9040_v53 = vrot.slane %v9026_v32, %v15498_v51  ;;  %v17306_v58 = vrot.slane %v5246_v6, %v15498_v51  ;;  %v3173_v39 = vcombine.low %v3165_v45, %v3172_v50  ;;  %v17315_v43 = vcombine.high %v16978_v12, %v16978_v12  ;;  %11168 = vmatprep.subr.bf16.mxu1 %v21056_v10  ;;  %v14202_v32 = vld [vmem:[#allocation7 + $0x20] sm:$0xff]   ;;  %v17322_v45 = vpop.permute.xlu1 %9294 }
 0x2a5   :  { %v5213_v52 = vcombine.low %v17078_v4, %v5212_v55  ;;  %v2364_v25 = vrot.slane %v2350_v14, %v14455_v46  ;;  %v2365_v6 = vcombine.high %v2357_v33, %v2357_v33  ;;  %v17319_v34 = vcombine.low %v2349_v22, %v2357_v33 }
 0x2a6   :  { %v9041_v63 = vcombine.low %v9033_v28, %v9040_v53  ;;  %v10285_v62 = vcombine.low %v5212_v55, %v17306_v58  ;;  %14125 = vmatmul.mubr.msk.f32.gmra.mrb[92].mxu0 %vm3208_vm12, %v3173_v39  ;;  %v3640_v36 = vmax.f32 %v3473_v9, 0.0  ;;  %v4110_v4 = vcombine.high %v16991_v3, %v16991_v3 }
 0x2a7   :  { %5826 = vst.msk [vmem:[#allocation2 + $0x78] sm:$0xff] %vm5820_vm2, %v5213_v52  ;;  %v8279_v22 = vcombine.low %v16991_v3, %v16998_v41  ;;  %v8281_v28 = vcombine.low %v16994_v40, %v17315_v43  ;;  %v3192_v53 = vcombine.low %v2365_v6, %v2364_v25  ;;  %v3199_v55 = vrot.slane %v17319_v34, %v14455_v46 }
 0x2a8   :  { %9304 = vrot.lane.b32.xlu1 %v9041_v63, %s14307_s7  ;;  %10403 = vrot.lane.b32.xlu0 %v10285_v62, %s14299_s0  ;;  %v3679_v14 = vpack.c.bf16 %v3640_v36, %v3639_v7  ;;  %v13649_v33 = vpack.c.bf16 %v3640_v36, %v3640_v36  ;;  %v8280_v39 = vcombine.low %v4110_v4, %v16978_v12  ;;  %v21185_v63 = vld [vmem:[#allocation24_spill] sm:$0xff]  ;;  %v14204_v62 = vld [vmem:[#allocation7 + $0x28] sm:$0xff]   ;;  %v21186_v6 = vshrl.u32 %v16975_v49, 16 }
 0x2a9   :  { %14127 = vmatprep.mubr.msk.f32.mxu0 %vm14303_vm3, %v21118_v47  ;;  %v17342_v2 = vrot.slane %v8279_v22, %v15498_v51  ;;  %v17345_v9 = vrot.slane %v8281_v28, %v15498_v51  ;;  %v17349_v52 = vadd.f32 %v17111_v0, %v21185_v63  ;;  %11169 = vmatpush1.bf16.msra.mxu1 %v14202_v32  ;;  %v6255_v28 = vshrl.u32 %v16991_v3, 16  ;;  %v17376_v63 = vpop.f32.mrb[62].mxu0 }
 0x2aa   :  { %v3206_v11 = vrot.slane %v3192_v53, %v14455_v46  ;;  %v4168_v7 = vrot.slane %v3679_v14, %v15498_v51  ;;  %v4175_v25 = vrot.slane %v13649_v33, %v15498_v51  ;;  %v6254_v34 = vsel %vm15951_vm14, %v21186_v6, %v6252_v57  ;;  %11170 = vmatprep.subr.bf16.mxu1 %v21056_v10  ;;  %v17374_v57 = vpop.permute.xlu1 %7912  ;;  %v14081_v26 = vpop.f32.mrb[63].mxu0 }
 0x2ab   :  { %v17362_v36 = vrot.slane %v8280_v39, %v15498_v51  ;;  %v9940_v32 = vcombine.low %v17216_v37, %v17342_v2  ;;  %21187 = vst [vmem:[#allocation23_spill] sm:$0xff] %v17376_v63  ;;  %v21188_v6 = vshll.u32 %v16998_v41, 16  ;;  %v6268_v42 = vshll.u32 %v4110_v4, 16  ;;  %v17416_v61 = vpop.f32.mrb[64].mxu0  ;;  %v14206_v63 = vld [vmem:[#allocation7 + $0x38] sm:$0xff]  }
 0x2ac   :  { %v4176_v53 = vcombine.high %v4168_v7, %v4168_v7  ;;  %v4177_v14 = vcombine.high %v4175_v25, %v4175_v25  ;;  %v17369_v33 = vrot.slane %v4168_v7, %v15498_v51  ;;  %v17372_v49 = vrot.slane %v4175_v25, %v15498_v51  ;;  %v14205_v7 = vld [vmem:[#allocation7 + $0x30] sm:$0xff]   ;;  %21190 = vst [vmem:[#allocation24_spill] sm:$0xff] %v17416_v61  ;;  %v14084_v30 = vpop.f32.mrb[65].mxu0 }
 0x2ad   :  { %v9941_v39 = vcombine.low %v17362_v36, %v17345_v9  ;;  %v9948_v37 = vrot.slane %v9940_v32, %v15498_v51  ;;  %v6262_v3 = vsel %vm15951_vm14, %v6255_v28, %v21188_v6  ;;  %11171 = vmatpush1.bf16.msra.mxu1 %v14204_v62  ;;  %v21189_v28 = vshrl.u32 %v16998_v41, 16 }
 0x2ae   :  { %v17386_v25 = vrot.slane %v4176_v53, %v15498_v51  ;;  %v17389_v60 = vrot.slane %v4177_v14, %v15498_v51  ;;  %v17393_v22 = vcombine.high %v17369_v33, %v17369_v33  ;;  %v17397_v32 = vcombine.high %v17372_v49, %v17372_v49  ;;  %11172 = vmatprep.subr.bf16.mxu1 %v21056_v10 }
 0x2af   :  { %v9955_v26 = vrot.slane %v9941_v39, %v15498_v51  ;;  %v6270_v53 = vsel %vm15951_vm14, %v21189_v28, %v6268_v42  ;;  %v6271_v14 = vshrl.u32 %v4110_v4, 16  ;;  %v21191_v39 = vshll.u32 %v16978_v12, 16 }
 0x2b0   :  { %v17408_v6 = vcombine.high %v17386_v25, %v17386_v25  ;;  %v17412_v50 = vcombine.high %v17389_v60, %v17389_v60  ;;  %v7324_v62 = vcombine.low %v6254_v34, %v6262_v3  ;;  %v21192_v41 = vrot.slane %v17283_v5, %v14455_v46 }
 0x2b1   :  { %v9956_v4 = vcombine.low %v9948_v37, %v9955_v26  ;;  %v6278_v28 = vsel %vm15951_vm14, %v6271_v14, %v21191_v39  ;;  %11173 = vmatpush1.bf16.msra.mxu1 %v14205_v7  ;;  %v21193_v42 = vmov 0   ;;  %v17432_v37 = vpop.permute.xlu1 %8869  ;;  %v3207_v26 = vcombine.low %v3199_v55, %v3206_v11  ;;  %v14207_v39 = vld [vmem:[#allocation7 + $0x40] sm:$0xff]  }
 0x2b2   :  { %v7325_v16 = vcombine.low %v6270_v53, %v6278_v28  ;;  %v3190_v61 = vcombine.low %v17286_v44, %v21192_v41  ;;  %11174 = vmatprep.subr.bf16.mxu1 %v21193_v42  ;;  %v4111_v30 = vcombine.high %v16994_v40, %v16994_v40  ;;  %v17439_v7 = vcombine.high %v17163_v24, %v17163_v24 }
 0x2b3   :  { %10219 = vrot.lane.b32.xlu0 %v9956_v4, %s14308_s8  ;;  %v17443_v34 = vcombine.high %v17173_v13, %v17173_v13  ;;  %v17446_v5 = vrot.slane %v7324_v62, %v15498_v51  ;;  %v6284_v55 = vshll.u32 %v16994_v40, 16  ;;  %v6287_v11 = vshrl.u32 %v16994_v40, 16 }
 0x2b4   :  { %v17449_v44 = vrot.slane %v7325_v16, %v15498_v51  ;;  %14128 = vmatmul.mubr.msk.f32.gmra.mrb[94].mxu0 %vm3208_vm12, %v3190_v61  ;;  %v5217_v3 = vcombine.low %v4111_v30, %v17163_v24  ;;  %v5263_v53 = vcombine.low %v17173_v13, %v17439_v7  ;;  %v6296_v14 = vshrl.u32 %v4111_v30, 16  ;;  %v21199_v61 = vld [vmem:[#allocation15_spill] sm:$0xff] }
 0x2b5   :  { %21194 = vst [vmem:[#allocation41_spill] sm:$0xff] %v17446_v5  ;;  %14130 = vmatprep.mubr.msk.f32.mxu0 %vm14303_vm3, %v21118_v47  ;;  %v5264_v62 = vcombine.low %v17443_v34, %v17166_v29  ;;  %11175 = vmatpush1.bf16.msra.mxu1 %v14206_v63  ;;  %v21196_v40 = vshrl.u32 %v16978_v12, 16  ;;  %v21197_v41 = vshll.u32 %v17315_v43, 16  ;;  %v6301_v12 = vshll.u32 %v17163_v24, 16  ;;  %v10903_v43 = vld [vmem:[#allocation2 + $0x10] sm:$0xff] }
 0x2b6   :  { %21195 = vst [vmem:[#allocation42_spill] sm:$0xff] %v17449_v44  ;;  %v7356_v16 = vcombine.low %v17446_v5, %v17449_v44  ;;  %11176 = vmatprep.subr.bf16.mxu1 %v21193_v42  ;;  %v17475_v63 = vrot.slane %v5217_v3, %v15498_v51  ;;  %v17478_v28 = vrot.slane %v5263_v53, %v15498_v51  ;;  %v17492_v53 = vpop.f32.mrb[66].mxu0  ;;  %v6328_v44 = vshrl.u32 %v17443_v34, 16 }
 0x2b7   :  { %v6286_v47 = vsel %vm15951_vm14, %v21196_v40, %v6284_v55  ;;  %v6294_v4 = vsel %vm15951_vm14, %v6287_v11, %v21197_v41  ;;  %v17481_v30 = vrot.slane %v5264_v62, %v15498_v51  ;;  %v6304_v11 = vshrl.u32 %v17163_v24, 16  ;;  %v17490_v41 = vpop.permute.xlu1 %7914  ;;  %21198 = vst [vmem:[#allocation43_spill] sm:$0xff] %v17492_v53  ;;  %v14087_v46 = vpop.f32.mrb[67].mxu0  ;;  %v14208_v53 = vld [vmem:[#allocation7 + $0x48] sm:$0xff]  }
 0x2b8   :  { %v17485_v55 = vrot.slane %v7356_v16, %v15498_v51  ;;  %14131 = vmatmul.mubr.msk.f32.gmra.mrb[96].mxu0 %vm3208_vm12, %v3207_v26  ;;  %v6309_v40 = vshll.u32 %v17173_v13, 16  ;;  %v7326_v3 = vcombine.low %v6286_v47, %v6294_v4  ;;  %v5247_v62 = vcombine.low %v17276_v27, %v17475_v63 }
 0x2b9   :  { %14137 = vmatprep.mubr.msk.bf16.mxu0 %vm5820_vm2, %v10903_v43  ;;  %v5295_v16 = vcombine.low %v17478_v28, %v17481_v30  ;;  %v6303_v26 = vsel %vm15951_vm14, %v6296_v14, %v6301_v12  ;;  %v3483_v10 = vadd.f32 %v17111_v0, %v21199_v61  ;;  %v6312_v27 = vshrl.u32 %v17173_v13, 16  ;;  %11177 = vmatpush1.bf16.msra.mxu1 %v14207_v39  ;;  %v10906_v12 = vld [vmem:[#allocation2 + $0x28] sm:$0xff] }
 0x2ba   :  { %v10569_v47 = vcombine.low %v17240_v8, %v17485_v55  ;;  %v6311_v4 = vsel %vm15951_vm14, %v6304_v11, %v6309_v40  ;;  %v17508_v43 = vrot.slane %v7326_v3, %v15498_v51  ;;  %v5261_v5 = vrot.slane %v5247_v62, %v15498_v51  ;;  %11178 = vmatprep.subr.bf16.mxu1 %v21193_v42  ;;  %v10909_v11 = vld [vmem:[#allocation2 + $0x40] sm:$0xff] }
 0x2bb   :  { %v17513_v14 = vrot.slane %v5295_v16, %v15498_v51  ;;  %v7327_v61 = vcombine.low %v6303_v26, %v6311_v4  ;;  %v3642_v46 = vmax.f32 %v3483_v10, 0.0  ;;  %v6317_v39 = vshll.u32 %v17439_v7, 16  ;;  %v17523_v62 = vpop.permute.xlu1 %9296 }
 0x2bc   :  { %21200 = vst [vmem:[#allocation15_spill] sm:$0xff] %v17508_v43  ;;  %10687 = vrot.lane.b32.xlu0 %v10569_v47, %s14307_s7  ;;  %14138 = vmatmul.mubr.msk.bf16.vlgmr.msra.gmra.mrb[100].mxu0 %vm5820_vm2, %v10906_v12  ;;  %v6320_v40 = vshrl.u32 %v17439_v7, 16  ;;  %v6325_v3 = vshll.u32 %v17443_v34, 16  ;;  %v5262_v10 = vcombine.low %v17306_v58, %v5261_v5  ;;  %v21202_v47 = vmax.f32 %v17349_v52, 0.0  ;;  %v14209_v58 = vld [vmem:[#allocation7 + $0x50] sm:$0xff]  }
 0x2bd   :  { %v10286_v16 = vcombine.low %v5261_v5, %v17513_v14  ;;  %v17528_v26 = vrot.slane %v7327_v61, %v15498_v51  ;;  %14141 = vmatprep.mubr.msk.bf16.mxu0 %vm5820_vm2, %v10909_v11  ;;  %v13650_v12 = vpack.c.bf16 %v3642_v46, %v3642_v46  ;;  %v6319_v7 = vsel %vm15951_vm14, %v6312_v27, %v6317_v39 }
 0x2be   :  { %v3680_v4 = vpack.c.bf16 %v3642_v46, %v21202_v47  ;;  %v6327_v8 = vsel %vm15951_vm14, %v6320_v40, %v6325_v3  ;;  %11179 = vmatpush1.bf16.msra.mxu1 %v14208_v53  ;;  %5827 = vst.msk [vmem:[#allocation2 + $0x90] sm:$0xff] %vm5820_vm2, %v5262_v10  ;;  %v6333_v61 = vshll.u32 %v17166_v29, 16  ;;  %v6336_v46 = vshrl.u32 %v17166_v29, 16 }
 0x2bf   :  { %21201 = vst [vmem:[#allocation44_spill] sm:$0xff] %v17528_v26  ;;  %v7357_v5 = vcombine.low %v17508_v43, %v17528_v26  ;;  %11180 = vmatprep.subr.bf16.mxu1 %v21193_v42  ;;  %v4224_v27 = vrot.slane %v13650_v12, %v15498_v51  ;;  %v7373_v34 = vcombine.low %v6319_v7, %v6327_v8  ;;  %v21203_v8 = vshll.u32 %v17176_v15, 16  ;;  %v17569_v12 = vpop.permute.xlu1 %8871 }
 0x2c0   :  { %v4217_v52 = vrot.slane %v3680_v4, %v15498_v51  ;;  %10405 = vrot.lane.b32.xlu0 %v10286_v16, %s14299_s0  ;;  %v8282_v53 = vcombine.low %v17163_v24, %v17173_v13  ;;  %v8311_v11 = vcombine.low %v17342_v2, %v17362_v36  ;;  %v6335_v10 = vsel %vm15951_vm14, %v6328_v44, %v6333_v61  ;;  %v14210_v36 = vld [vmem:[#allocation7 + $0x58] sm:$0xff]  }
 0x2c1   :  { %v17552_v39 = vrot.slane %v7357_v5, %v15498_v51  ;;  %v4226_v16 = vcombine.high %v4224_v27, %v4224_v27  ;;  %v17560_v47 = vrot.slane %v4224_v27, %v15498_v51  ;;  %v6343_v4 = vsel %vm15951_vm14, %v6336_v46, %v21203_v8  ;;  %v10912_v61 = vld [vmem:[#allocation2 + $0x58] sm:$0xff] }
 0x2c2   :  { %v4225_v40 = vcombine.high %v4217_v52, %v4217_v52  ;;  %v17555_v3 = vrot.slane %v4217_v52, %v15498_v51  ;;  %v17567_v2 = vrot.slane %v7373_v34, %v15498_v51  ;;  %11181 = vmatpush1.bf16.msra.mxu1 %v14209_v58  ;;  %v7374_v5 = vcombine.low %v6335_v10, %v6343_v4 }
 0x2c3   :  { %v7372_v7 = vcombine.low %v17485_v55, %v17552_v39  ;;  %v8310_v52 = vrot.slane %v8282_v53, %v15498_v51  ;;  %11182 = vmatprep.subr.bf16.mxu1 %v21193_v42  ;;  %v17579_v46 = vrot.slane %v4226_v16, %v15498_v51  ;;  %v17583_v58 = vcombine.high %v17560_v47, %v17560_v47  ;;  %v17623_v8 = vpop.permute.xlu1 %7916 }
 0x2c4   :  { %21204 = vst [vmem:[#allocation45_spill] sm:$0xff] %v17567_v2  ;;  %v17574_v44 = vrot.slane %v4225_v40, %v15498_v51  ;;  %14142 = vmatmul.mubr.msk.bf16.gmra.mrb[104].mxu0 %vm5820_vm2, %v10912_v61  ;;  %v17591_v34 = vrot.slane %v7374_v5, %v15498_v51  ;;  %v8319_v40 = vrot.slane %v8311_v11, %v15498_v51  ;;  %v14211_v5 = vld [vmem:[#allocation7 + $0x60] sm:$0xff]   ;;  %v6358_v23 = vshll.u32 %v17369_v33, 16 }
 0x2c5   :  { %7924 = vrot.lane.b32.xlu1 %v7372_v7, %s14308_s8  ;;  %v8312_v53 = vcombine.low %v17345_v9, %v8310_v52  ;;  %v13832_v10 = vcombine.high %v17163_v24, %v17173_v13  ;;  %v8329_v4 = vcombine.low %v17166_v29, %v17176_v15  ;;  %v8330_v7 = vcombine.low %v17187_v19, %v17369_v33 }
 0x2c6   :  { %11183 = vmatpush1.bf16.msra.mxu1 %v14210_v36  ;;  %v7405_v9 = vcombine.low %v17567_v2, %v17591_v34  ;;  %v10755_v24 = vcombine.low %v17247_v20, %v8319_v40  ;;  %v13671_v36 = vcombine.high %v17166_v29, %v17176_v15  ;;  %v6361_v21 = vshrl.u32 %v17369_v33, 16 }
 0x2c7   :  { %v17606_v11 = vrot.slane %v8312_v53, %v15498_v51  ;;  %v17610_v13 = vrot.slane %v13832_v10, %v15498_v51  ;;  %11184 = vmatprep.subr.bf16.mxu1 %v21193_v42  ;;  %v17614_v61 = vrot.slane %v8329_v4, %v15498_v51  ;;  %v17617_v55 = vrot.slane %v8330_v7, %v15498_v51 }
 0x2c8   :  { %v9042_v53 = vcombine.low %v17475_v63, %v17478_v28  ;;  %v17626_v20 = vrot.slane %v7405_v9, %v15498_v51  ;;  %10887 = vst.msk [vmem:[#allocation2 + $0x70] sm:$0xff] %vm5820_vm2, %v10755_v24  ;;  %v5266_v7 = vcombine.low %v17369_v33, %v17386_v25  ;;  %v5287_v16 = vrot.slane %v13671_v36, %v15498_v51  ;;  %v17639_v9 = vpop.permute.xlu0 %10209 }
 0x2c9   :  { %v8327_v10 = vcombine.low %v8319_v40, %v17606_v11  ;;  %v9957_v4 = vcombine.low %v8310_v52, %v17610_v13  ;;  %v9958_v15 = vcombine.low %v17614_v61, %v17617_v55  ;;  %v13672_v28 = vcombine.high %v17369_v33, %v17386_v25  ;;  %v14212_v40 = vld [vmem:[#allocation7 + $0x68] sm:$0xff]  }
 0x2ca   :  { %v9050_v63 = vrot.slane %v9042_v53, %v15498_v51  ;;  %11185 = vmatpush1.bf16.msra.mxu1 %v14211_v5  ;;  %v10570_v52 = vcombine.low %v17552_v39, %v17626_v20  ;;  %v17646_v27 = vrot.slane %v5266_v7, %v15498_v51  ;;  %v5313_v36 = vcombine.low %v17389_v60, %v17397_v32 }
 0x2cb   :  { %8879 = vrot.lane.b32.xlu1 %v8327_v10, %s14299_s0  ;;  %v9965_v24 = vrot.slane %v9957_v4, %v15498_v51  ;;  %v9972_v53 = vrot.slane %v9958_v15, %v15498_v51  ;;  %v9043_v2 = vcombine.low %v17481_v30, %v5287_v16  ;;  %v17653_v5 = vrot.slane %v13672_v28, %v15498_v51  ;;  %v17658_v10 = vpop.permute.xlu1 %9298  ;;  %v17667_v28 = vpop.f32.mrb[68].mxu0 }
 0x2cc   :  { %v4158_v39 = vcombine.high %v17166_v29, %v17166_v29  ;;  %11186 = vmatprep.subr.bf16.mxu1 %v21193_v42  ;;  %10689 = vrot.lane.b32.xlu0 %v10570_v52, %s14307_s7  ;;  %v5296_v4 = vcombine.low %v5287_v16, %v17646_v27  ;;  %v17663_v7 = vrot.slane %v5313_v36, %v15498_v51  ;;  %v6350_v15 = vshll.u32 %v17187_v19, 16  ;;  %v14090_v52 = vpop.f32.mrb[69].mxu0 }
 0x2cd   :  { %v6353_v30 = vshrl.u32 %v17187_v19, 16  ;;  %v9973_v26 = vcombine.low %v9965_v24, %v9972_v53  ;;  %v9057_v29 = vrot.slane %v9043_v2, %v15498_v51  ;;  %v6366_v19 = vshll.u32 %v17386_v25, 16 }
 0x2ce   :  { %v6345_v43 = vshrl.u32 %v4158_v39, 16  ;;  %11187 = vmatpush1.bf16.msra.mxu1 %v14212_v40  ;;  %v5310_v16 = vrot.slane %v5296_v4, %v15498_v51  ;;  %v5344_v36 = vcombine.low %v17653_v5, %v17663_v7  ;;  %v6369_v39 = vshrl.u32 %v17386_v25, 16  ;;  %v17682_v4 = vpop.permute.xlu0 %10395 }
 0x2cf   :  { %11188 = vmatprep.subr.bf16.mxu1 %v21193_v42  ;;  %v9058_v24 = vcombine.low %v9050_v63, %v9057_v29  ;;  %v10915_v53 = vld [vmem:[#allocation2 + $0x70] sm:$0xff]  ;;  %v6360_v40 = vsel %vm15951_vm14, %v6353_v30, %v6358_v23  ;;  %v6368_v63 = vsel %vm15951_vm14, %v6361_v21, %v6366_v19  ;;  %v6382_v29 = vshll.u32 %v17408_v6, 16 }
 0x2d0   :  { %v6352_v2 = vsel %vm15951_vm14, %v6345_v43, %v6350_v15  ;;  %10221 = vrot.lane.b32.xlu0 %v9973_v26, %s14308_s8  ;;  %14145 = vmatprep.mubr.msk.bf16.mxu0 %vm5820_vm2, %v10915_v53  ;;  %v5311_v33 = vcombine.low %v17513_v14, %v5310_v16  ;;  %v17688_v52 = vrot.slane %v5344_v36, %v15498_v51  ;;  %v6374_v43 = vshll.u32 %v17393_v22, 16  ;;  %v21205_v15 = vld [vmem:[#allocation31_spill] sm:$0xff] }
 0x2d1   :  { %9306 = vrot.lane.b32.xlu1 %v9058_v24, %s14307_s7  ;;  %v7375_v23 = vcombine.low %v6352_v2, %v6360_v40  ;;  %v17696_v30 = vadd.f32 %v17111_v0, %v21205_v15  ;;  %v6377_v26 = vshrl.u32 %v17393_v22, 16  ;;  %v14214_v14 = vld [vmem:[#allocation7 + $0x78] sm:$0xff]   ;;  %v17700_v36 = vpop.permute.xlu1 %7918  ;;  %v6385_v19 = vshrl.u32 %v17408_v6, 16 }
 0x2d2   :  { %11189 = vmatpush1.bf16.msra.mxu1 %v14213_v18  ;;  %v10287_v53 = vcombine.low %v5310_v16, %v17688_v52  ;;  %5828 = vst.msk [vmem:[#allocation2 + $0xa8] sm:$0xff] %vm5820_vm2, %v5311_v33  ;;  %v6376_v21 = vsel %vm15951_vm14, %v6369_v39, %v6374_v43  ;;  %v21206_v0 = vshll.u32 %v17397_v32, 16  ;;  %v21207_v24 = vshrl.u32 %v17389_v60, 16  ;;  %v17714_v18 = vpop.f32.mrb[70].mxu0 }
 0x2d3   :  { %11190 = vmatprep.subr.bf16.mxu1 %v21193_v42  ;;  %v7376_v40 = vcombine.low %v6368_v63, %v6376_v21  ;;  %v17717_v16 = vrot.slane %v7375_v23, %v15498_v51  ;;  %v6384_v39 = vsel %vm15951_vm14, %v6377_v26, %v6382_v29  ;;  %v14093_v43 = vpop.f32.mrb[71].mxu0  ;;  %v21208_v15 = vshll.u32 %v17372_v49, 16 }
 0x2d4   :  { %v6401_v2 = vsel %vm15951_vm14, %v21207_v24, %v21206_v0  ;;  %10407 = vrot.lane.b32.xlu0 %v10287_v53, %s14299_s0  ;;  %v6407_v42 = vshll.u32 %v17412_v50, 16  ;;  %v8331_v63 = vcombine.low %v17386_v25, %v17393_v22  ;;  %v8360_v23 = vcombine.low %v17610_v13, %v17614_v61  ;;  %v17743_v24 = vpop.permute.xlu0 %10679  ;;  %v17755_v43 = vld [vmem:[#allocation7 + $0x80] sm:$0xff]  }
 0x2d5   :  { %v6392_v0 = vsel %vm15951_vm14, %v6385_v19, %v21208_v15  ;;  %v17733_v21 = vrot.slane %v7376_v40, %v15498_v51  ;;  %v21209_v53 = vcombine.high %v17372_v49, %v17389_v60  ;;  %v21210_v22 = vshrl.u32 %v17397_v32, 16  ;;  %v8874_v60 = vpop.permute.xlu1 %8873 }
 0x2d6   :  { %v7422_v29 = vcombine.low %v6384_v39, %v6392_v0  ;;  %11191 = vmatpush1.bf16.msra.mxu1 %v14214_v14  ;;  %v8359_v13 = vrot.slane %v8331_v63, %v15498_v51  ;;  %v8368_v61 = vrot.slane %v8360_v23, %v15498_v51  ;;  %v21211_v40 = vcombine.low %v17408_v6, %v17372_v49 }
 0x2d7   :  { %v17741_v19 = vrot.slane %v21209_v53, %v15498_v51  ;;  %v6409_v25 = vsel %vm15951_vm14, %v21210_v22, %v6407_v42  ;;  %14177 = vmatprep.subr.bf16.mxu1 %v17755_v43  ;;  %v7406_v32 = vcombine.low %v17717_v16, %v17733_v21  ;;  %v5314_v0 = vcombine.low %v17412_v50, %v17555_v3 }
 0x2d8   :  { %v8387_v39 = vrot.slane %v21211_v40, %v15498_v51  ;;  %v7423_v14 = vcombine.low %v6401_v2, %v6409_v25  ;;  %v17761_v15 = vrot.slane %v7422_v29, %v15498_v51  ;;  %v8361_v42 = vcombine.low %v17617_v55, %v8359_v13  ;;  %v17779_v22 = vpop.permute.xlu0 %10211  ;;  %v21213_v25 = vld [vmem:[#allocation11_spill] sm:$0xff] }
 0x2d9   :  { %v10756_v49 = vcombine.low %v17606_v11, %v8368_v61  ;;  %v9059_v63 = vcombine.low %v17646_v27, %v17653_v5  ;;  %v7420_v23 = vrot.slane %v7406_v32, %v15498_v51  ;;  %v17777_v29 = vrot.slane %v5314_v0, %v15498_v51  ;;  %v21212_v5 = vld [vmem:[#allocation12_spill] sm:$0xff] }
 0x2da   :  { %v8409_v6 = vcombine.low %v8387_v39, %v17741_v19  ;;  %v17772_v53 = vrot.slane %v7423_v14, %v15498_v51  ;;  %v8375_v55 = vrot.slane %v8361_v42, %v15498_v51  ;;  %v4952_v40 = vcombine.low %v21213_v25, %v21212_v5  ;;  %v21214_v42 = vld [vmem:[#allocation13_spill] sm:$0xff] }
 0x2db   :  { %10888 = vst.msk [vmem:[#allocation2 + $0x88] sm:$0xff] %vm5820_vm2, %v10756_v49  ;;  %v17787_v27 = vrot.slane %v9059_v63, %v15498_v51  ;;  %v7421_v32 = vcombine.low %v17626_v20, %v7420_v23  ;;  %v9060_v0 = vcombine.low %v17663_v7, %v17777_v29  ;;  %v21215_v49 = vld [vmem:[#allocation14_spill] sm:$0xff]  ;;  %vm7966_vm3 = vcmask 523520   ;;  %v9301_v5 = vpop.permute.xlu1 %9300 }
 0x2dc   :  { %v17784_v11 = vrot.slane %v8409_v6, %v15498_v51  ;;  %v7454_v14 = vcombine.low %v17761_v15, %v17772_v53  ;;  %v21216_v2 = vcombine.low %v21214_v42, %v21215_v49  ;;  %v8376_v26 = vcombine.low %v8368_v61, %v8375_v55  ;;  %7968 = vst.msk [vmem:[#allocation2 + $0x18] sm:$0xff] %vm7966_vm3, %v17490_v41 }
 0x2dd   :  { %v4960_v33 = vrot.slane %v4952_v40, %v15498_v51  ;;  %7926 = vrot.lane.b32.xlu1 %v7421_v32, %s14308_s8  ;;  %v9074_v25 = vrot.slane %v9060_v0, %v15498_v51  ;;  %vm9348_vm8 = vcmask 1048320   ;;  %7969 = vst.msk [vmem:[#allocation2 + $0x30] sm:$0xff] %vm7966_vm3, %v17623_v8  ;;  %7970 = vst.msk [vmem:[#allocation2 + $0x48] sm:$0xff] %vm7966_vm3, %v17700_v36  ;;  %v8379_v61 = vcombine.low %v17555_v3, %v17574_v44  ;;  %v21218_v40 = vld [vmem:[#allocation17_spill] sm:$0xff]  ;;  %v21220_v36 = vld [vmem:[#allocation18_spill] sm:$0xff] }
 0x2de   :  { %v4967_v6 = vrot.slane %v21216_v2, %v15498_v51  ;;  %v10757_v63 = vcombine.low %v8375_v55, %v17784_v11  ;;  %v17804_v20 = vrot.slane %v7454_v14, %v15498_v51  ;;  %v9974_v2 = vcombine.low %v8359_v13, %v8387_v39  ;;  %v21217_v55 = vld [vmem:[#allocation16_spill] sm:$0xff]  ;;  %8923 = vst.msk [vmem:[#allocation2 + $0x18] sm:$0xff] %vm8921_vm7, %v17432_v37  ;;  %v17835_v37 = vpop.permute.xlu0 %10397 }
 0x2df   :  { %v21219_v32 = vcombine.low %v21217_v55, %v21218_v40  ;;  %8924 = vst.msk [vmem:[#allocation2 + $0x30] sm:$0xff] %vm8921_vm7, %v17569_v12  ;;  %8925 = vst.msk [vmem:[#allocation2 + $0x48] sm:$0xff] %vm8921_vm7, %v8874_v60  ;;  %v9075_v8 = vcombine.low %v17787_v27, %v9074_v25  ;;  %v4255_v0 = vcombine.high %v17555_v3, %v17555_v3  ;;  %v6426_v25 = vshrl.u32 %v17574_v44, 16 }
 0x2e0   :  { %10889 = vst.msk [vmem:[#allocation2 + $0xa0] sm:$0xff] %vm5820_vm2, %v10757_v63  ;;  %v4968_v7 = vcombine.low %v4960_v33, %v4967_v6  ;;  %v10571_v41 = vcombine.low %v7420_v23, %v17804_v20  ;;  %v21221_v33 = vld [vmem:[#allocation19_spill] sm:$0xff]  ;;  %v17842_v12 = vrot.slane %v8379_v61, %v15498_v51  ;;  %v9982_v60 = vrot.slane %v9974_v2, %v15498_v51 }
 0x2e1   :  { %v9473_v14 = vrot.slane %v21219_v32, %v15498_v51  ;;  %v21222_v13 = vcombine.low %v21220_v36, %v21221_v33  ;;  %9350 = vst.msk [vmem:[#allocation2 + $0x18] sm:$0xff] %vm9348_vm8, %v17523_v62  ;;  %9351 = vst.msk [vmem:[#allocation2 + $0x30] sm:$0xff] %vm9348_vm8, %v17658_v10  ;;  %v9076_v23 = vcombine.low %v17560_v47, %v17579_v46  ;;  %8881 = vrot.lane.b32.xlu1 %v8376_v26, %s14299_s0  ;;  %vm12342_vm9 = vcmask 1041408  }
 0x2e2   :  { %9352 = vst.msk [vmem:[#allocation2 + $0x48] sm:$0xff] %vm9348_vm8, %v9301_v5  ;;  %v13844_v62 = vcombine.high %v17560_v47, %v17579_v46  ;;  %10691 = vrot.lane.b32.xlu0 %v10571_v41, %s14307_s7  ;;  %v10918_v10 = vld [vmem:[#allocation2 + $0x88] sm:$0xff]  ;;  %v5315_v42 = vcombine.low %v17574_v44, %v4255_v0  ;;  %v4257_v49 = vcombine.high %v17574_v44, %v17574_v44  ;;  %v6410_v6 = vshrl.u32 %v17412_v50, 16 }
 0x2e3   :  { %v9480_v39 = vrot.slane %v21222_v13, %v15498_v51  ;;  %5821 = vst.msk [vmem:[#allocation2] sm:$0xff] %vm5820_vm2, %v4968_v7  ;;  %14146 = vmatmul.mubr.msk.bf16.gmra.mrb[108].mxu0 %vm5820_vm2, %v10918_v10  ;;  %v9975_v26 = vcombine.low %v17741_v19, %v17842_v12  ;;  %v17863_v63 = vrot.slane %v9076_v23, %v15498_v51  ;;  %v6415_v5 = vshll.u32 %v17555_v3, 16  ;;  %v17878_v7 = vpop.permute.xlu0 %10213 }
 0x2e4   :  { %7967 = vst.msk [vmem:[#allocation2] sm:$0xff] %vm7966_vm3, %v17374_v57  ;;  %v17866_v57 = vrot.slane %v13844_v62, %v15498_v51  ;;  %v17873_v50 = vrot.slane %v5315_v42, %v15498_v51  ;;  %v6423_v19 = vshll.u32 %v17574_v44, 16  ;;  %v6431_v55 = vshll.u32 %v4255_v0, 16  ;;  %v21224_v42 = vld [vmem:[#allocation21_spill] sm:$0xff] }
 0x2e5   :  { %v9481_v27 = vcombine.low %v9473_v14, %v9480_v39  ;;  %8922 = vst.msk [vmem:[#allocation2] sm:$0xff] %vm8921_vm7, %v17289_v31  ;;  %v6418_v31 = vshrl.u32 %v17555_v3, 16  ;;  %v9989_v61 = vrot.slane %v9975_v26, %v15498_v51  ;;  %v6417_v2 = vsel %vm15951_vm14, %v6410_v6, %v6415_v5  ;;  %9308 = vrot.lane.b32.xlu1 %v9075_v8, %s14307_s7 }
 0x2e6   :  { %9349 = vst.msk [vmem:[#allocation2] sm:$0xff] %vm9348_vm8, %v17322_v45  ;;  %v10288_v45 = vcombine.low %v17863_v63, %v17866_v57  ;;  %v5345_v32 = vcombine.low %v17777_v29, %v17873_v50  ;;  %v6434_v41 = vshrl.u32 %v4255_v0, 16  ;;  %v6439_v36 = vshll.u32 %v4257_v49, 16 }
 0x2e7   :  { %9837 = vst.msk [vmem:[#allocation2 + $0x8] sm:$0xff] %vm5820_vm2, %v9481_v27  ;;  %v10921_v40 = vld [vmem:[#allocation2 + $0xa0] sm:$0xff]  ;;  %v6425_v14 = vsel %vm15951_vm14, %v6418_v31, %v6423_v19  ;;  %v9990_v33 = vcombine.low %v9982_v60, %v9989_v61  ;;  %v6433_v8 = vsel %vm15951_vm14, %v6426_v25, %v6431_v55  ;;  %v13834_v23 = vcombine.high %v17555_v3, %v17574_v44  ;;  %v21226_v3 = vld [vmem:[#allocation22_spill] sm:$0xff]  ;;  %v21227_v44 = vld [vmem:[#allocation25_spill] sm:$0xff]  ;;  %v10682_v61 = vpop.permute.xlu0 %10681 }
 0x2e8   :  { %10263 = vst.msk [vmem:[#allocation2 + $0x8] sm:$0xff] %vm7966_vm3, %v17639_v9  ;;  %v17894_v9 = vpop.f32.mrb[72].mxu0  ;;  %14149 = vmatprep.mubr.msk.bf16.mxu0 %vm5820_vm2, %v10921_v40  ;;  %v10295_v13 = vrot.slane %v10288_v45, %v15498_v51  ;;  %v7424_v39 = vcombine.low %v6417_v2, %v6425_v14  ;;  %v5359_v0 = vrot.slane %v5345_v32, %v15498_v51  ;;  %v17910_v60 = vld [vmem:[%s21029_s2] ss:$0 sm:$0xff]  ;;  %v21229_v32 = vmax.f32 %v17696_v30, 0.0 }
 0x2e9   :  { %10449 = vst.msk [vmem:[#allocation2 + $0x8] sm:$0xff] %vm8921_vm7, %v17682_v4  ;;  %v14096_v29 = vpop.f32.mrb[73].mxu0  ;;  %v6441_v4 = vsel %vm15951_vm14, %v6434_v41, %v6439_v36  ;;  %v3493_v62 = vadd.f32 %v17910_v60, %v16965_v56  ;;  %10223 = vrot.lane.b32.xlu0 %v9990_v33, %s14308_s8  ;;  %v21223_v27 = vld [vmem:[#allocation20_spill] sm:$0xff]  ;;  %v21228_v26 = vcombine.low %v21226_v3, %v21227_v44  ;;  %vm13495_vm10 = vcmask 1041409  }
 0x2ea   :  { %10733 = vst.msk [vmem:[#allocation2 + $0x8] sm:$0xff] %vm9348_vm8, %v17743_v24  ;;  %v7425_v24 = vcombine.low %v6433_v8, %v6441_v4  ;;  %v17916_v10 = vrot.slane %v7424_v39, %v15498_v51  ;;  %v21225_v49 = vcombine.low %v21223_v27, %v21224_v42  ;;  %v5360_v31 = vcombine.low %v17688_v52, %v5359_v0 }
 0x2eb   :  { %v9497_v5 = vrot.slane %v21228_v26, %v15498_v51  ;;  %v10296_v19 = vcombine.low %v5359_v0, %v10295_v13  ;;  %v17928_v56 = vrot.slane %v13834_v23, %v15498_v51  ;;  %v3644_v25 = vmax.f32 %v3493_v62, 0.0 }
 0x2ec   :  { %v9490_v6 = vrot.slane %v21225_v49, %v15498_v51  ;;  %v17931_v45 = vrot.slane %v7425_v24, %v15498_v51  ;;  %v3498_v40 = vadd.f32 %v17910_v60, %v16980_v1  ;;  %5829 = vst.msk [vmem:[#allocation2 + $0xc0] sm:$0xff] %vm5820_vm2, %v5360_v31  ;;  %v3503_v36 = vadd.f32 %v17910_v60, %v17003_v59 }
 0x2ed   :  { %v8410_v52 = vcombine.low %v17842_v12, %v17928_v56  ;;  %v3681_v14 = vpack.c.bf16 %v3644_v25, %v21229_v32  ;;  %v13651_v41 = vpack.c.bf16 %v3644_v25, %v3644_v25  ;;  %10409 = vrot.lane.b32.xlu0 %v10296_v19, %s14299_s0  ;;  %v9100_v13 = vcombine.low %v17873_v50, %v17863_v63  ;;  %v7921_v0 = vpop.permute.xlu1 %7920  ;;  %v10901_v63 = vld [vmem:[#allocation2] sm:$0xff]  ;;  %v14219_v25 = vld [vmem:[#allocation7 + $0x88] sm:$0xff]  }
 0x2ee   :  { %v9498_v55 = vcombine.low %v9490_v6, %v9497_v5  ;;  %v7455_v33 = vcombine.low %v17916_v10, %v17931_v45  ;;  %v3645_v1 = vmax.f32 %v3498_v40, 0.0  ;;  %v17952_v12 = vcombine.high %v17579_v46, %v17579_v46  ;;  %7971 = vst.msk [vmem:[#allocation2 + $0x60] sm:$0xff] %vm7966_vm3, %v7921_v0 }
 0x2ef   :  { %v17955_v30 = vrot.slane %v8410_v52, %v15498_v51  ;;  %v4266_v59 = vrot.slane %v3681_v14, %v15498_v51  ;;  %v4273_v8 = vrot.slane %v13651_v41, %v15498_v51  ;;  %v3646_v29 = vmax.f32 %v3503_v36, 0.0 }
 0x2f0   :  { %9838 = vst.msk [vmem:[#allocation2 + $0x20] sm:$0xff] %vm5820_vm2, %v9498_v55  ;;  %v17962_v4 = vrot.slane %v7455_v33, %v15498_v51  ;;  %v17967_v50 = vrot.slane %v9100_v13, %v15498_v51  ;;  %v9373_v23 = vshll.u32 %v17579_v46, 16  ;;  %v9376_v62 = vshrl.u32 %v17579_v46, 16 }
 0x2f1   :  { %10264 = vst.msk [vmem:[#allocation2 + $0x20] sm:$0xff] %vm7966_vm3, %v17779_v22  ;;  %v10902_v39 = vld [vmem:[#allocation2 + $0x8] sm:$0xff]  ;;  %v8425_v22 = vcombine.low %v17784_v11, %v17955_v30  ;;  %v4274_v24 = vcombine.high %v4266_v59, %v4266_v59  ;;  %v4275_v27 = vcombine.high %v4273_v8, %v4273_v8  ;;  %v17975_v42 = vrot.slane %v4266_v59, %v15498_v51  ;;  %v8876_v19 = vpop.permute.xlu1 %8875 }
 0x2f2   :  { %11192 = vmatprep.mubr.bf16.mxu1 %v10902_v39  ;;  %10450 = vst.msk [vmem:[#allocation2 + $0x20] sm:$0xff] %vm8921_vm7, %v17835_v37  ;;  %v17978_v37 = vpop.permute.xlu0 %10399  ;;  %v7470_v49 = vcombine.low %v17804_v20, %v17962_v4  ;;  %v17983_v6 = vrot.slane %v4273_v8, %v15498_v51  ;;  %v3682_v3 = vpack.c.bf16 %v3646_v29, %v3645_v1  ;;  %v21231_v40 = vshll.u32 %v17583_v58, 16 }
 0x2f3   :  { %11193 = vmatmul.mubr.bf16.vlgmr.msra.gmra.mrb[0].mxu1 %v10901_v63  ;;  %10734 = vst.msk [vmem:[#allocation2 + $0x20] sm:$0xff] %vm9348_vm8, %v10682_v61  ;;  %v13652_v44 = vpack.c.bf16 %v3646_v29, %v3646_v29  ;;  %v17987_v11 = vrot.slane %v4274_v24, %v15498_v51  ;;  %v17990_v26 = vrot.slane %v4275_v27, %v15498_v51  ;;  %v9397_v5 = vshll.u32 %v17975_v42, 16 }
 0x2f4   :  { %14179 = vmatpush3.bf16.msra.mxu1 %v17755_v43  ;;  %v9400_v31 = vshrl.u32 %v17975_v42, 16  ;;  %7928 = vrot.lane.b32.xlu1 %v7470_v49, %s14308_s8  ;;  %v4315_v20 = vrot.slane %v3682_v3, %v15498_v51  ;;  %v21230_v43 = vshrl.u32 %v17560_v47, 16  ;;  %v9383_v52 = vsel %vm15951_vm14, %v9376_v62, %v21231_v40  ;;  %8926 = vst.msk [vmem:[#allocation2 + $0x60] sm:$0xff] %vm8921_vm7, %v8876_v19  ;;  %v18018_v59 = vpop.f32.mrb[74].mxu0  ;;  %v21241_v40 = vld [vmem:[#allocation29_spill] sm:$0xff] }
 0x2f5   :  { %14178 = vmatprep.subr.bf16.mxu1 %v14219_v25  ;;  %v4322_v61 = vrot.slane %v13652_v44, %v15498_v51  ;;  %v13871_v32 = vcombine.high %v17983_v6, %v17990_v26  ;;  %v9078_v14 = vcombine.low %v17975_v42, %v17987_v11  ;;  %v9389_v41 = vshll.u32 %v17952_v12, 16  ;;  %v14099_v62 = vpop.f32.mrb[75].mxu0 }
 0x2f6   :  { %v9375_v55 = vsel %vm15951_vm14, %v21230_v43, %v9373_v23  ;;  %v9392_v47 = vshrl.u32 %v17952_v12, 16  ;;  %v4323_v36 = vcombine.high %v4315_v20, %v4315_v20  ;;  %v18013_v1 = vrot.slane %v4315_v20, %v15498_v51  ;;  %v18030_v23 = vpop.permute.xlu0 %10215  ;;  %v21238_v20 = vld [vmem:[#allocation27_spill] sm:$0xff]  ;;  %v21240_v43 = vld [vmem:[#allocation28_spill] sm:$0xff] }
 0x2f7   :  { %v4324_v33 = vcombine.high %v4322_v61, %v4322_v61  ;;  %v18016_v13 = vrot.slane %v4322_v61, %v15498_v51  ;;  %v10783_v8 = vrot.slane %v13871_v32, %v15498_v51  ;;  %v18022_v39 = vrot.slane %v9078_v14, %v15498_v51 }
 0x2f8   :  { %21232 = vst [vmem:[#allocation31_spill] sm:$0xff] %v18013_v1  ;;  %14180 = vmatpush3.bf16.msra.mxu1 %v14219_v25  ;;  %v21234_v29 = vshrl.u32 %v17583_v58, 16  ;;  %v9399_v63 = vsel %vm15951_vm14, %v9392_v47, %v9397_v5  ;;  %8883 = vrot.lane.b32.xlu1 %v8425_v22, %s14299_s0  ;;  %v18034_v24 = vrot.slane %v4323_v36, %v15498_v51  ;;  %v21237_v25 = vld [vmem:[#allocation26_spill] sm:$0xff]  ;;  %vm13497_vm11 = vcmask 1042434  }
 0x2f9   :  { %21233 = vst [vmem:[#allocation12_spill] sm:$0xff] %v18016_v13  ;;  %v18037_v27 = vrot.slane %v4324_v33, %v15498_v51  ;;  %v18041_v49 = vcombine.high %v18016_v13, %v18016_v13  ;;  %v9601_v3 = vcombine.low %v9375_v55, %v9383_v52  ;;  %v9101_v5 = vcombine.low %v17866_v57, %v18022_v39 }
 0x2fa   :  { %v9391_v0 = vsel %vm15951_vm14, %v21234_v29, %v9389_v41  ;;  %21235 = vst [vmem:[#allocation11_spill] sm:$0xff] %v18034_v24  ;;  %v10905_v44 = vld [vmem:[#allocation2 + $0x20] sm:$0xff]  ;;  %v21239_v22 = vcombine.low %v21237_v25, %v21238_v20  ;;  %v21242_v32 = vcombine.low %v21240_v43, %v21241_v40  ;;  %v10904_v41 = vld [vmem:[#allocation2 + $0x18] sm:$0xff]  ;;  %v18055_v55 = vcombine.high %v18034_v24, %v18034_v24  ;;  %v10684_v20 = vpop.permute.xlu0 %10683 }
 0x2fb   :  { %21236 = vst [vmem:[#allocation13_spill] sm:$0xff] %v18037_v27  ;;  %v9602_v19 = vcombine.low %v9391_v0, %v9399_v63  ;;  %11200 = vmatprep.mubr.bf16.mxu1 %v10905_v44  ;;  %v10513_v52 = vshll.u32 %v18034_v24, 16  ;;  %v10769_v47 = vcombine.low %v18013_v1, %v18034_v24  ;;  %v9115_v36 = vrot.slane %v9101_v5, %v15498_v51 }
 0x2fc   :  { %v9507_v61 = vrot.slane %v21239_v22, %v15498_v51  ;;  %v9514_v14 = vrot.slane %v21242_v32, %v15498_v51  ;;  %11201 = vmatmul.mubr.bf16.gmra.mrb[4].mxu1 %v10904_v41  ;;  %v18064_v33 = vrot.slane %v9601_v3, %v15498_v51  ;;  %v3508_v62 = vadd.f32 %v17910_v60, %v17049_v17  ;;  %v21244_v41 = vld [vmem:[#allocation30_spill] sm:$0xff]  ;;  %v21258_v3 = vld [vmem:[#allocation23_spill] sm:$0xff] }
 0x2fd   :  { %v18067_v29 = vrot.slane %v9602_v19, %v15498_v51  ;;  %v10790_v63 = vrot.slane %v10769_v47, %v15498_v51  ;;  %v18074_v44 = vcombine.high %v17975_v42, %v17975_v42  ;;  %v9991_v25 = vcombine.low %v17579_v46, %v17583_v58  ;;  %v21245_v47 = vld [vmem:[#allocation32_spill] sm:$0xff] }
 0x2fe   :  { %v9515_v0 = vcombine.low %v9507_v61, %v9514_v14  ;;  %v9116_v5 = vcombine.low %v17967_v50, %v9115_v36  ;;  %v9992_v17 = vcombine.low %v17952_v12, %v17975_v42  ;;  %v3647_v61 = vmax.f32 %v3508_v62, 0.0 }
 0x2ff   :  { %21243 = vst [vmem:[#allocation14_spill] sm:$0xff] %v18067_v29  ;;  %v10572_v19 = vcombine.low %v18064_v33, %v18067_v29  ;;  %v10792_v22 = vcombine.low %v10783_v8, %v10790_v63  ;;  %v9413_v46 = vshll.u32 %v18074_v44, 16  ;;  %v9993_v58 = vcombine.low %v17987_v11, %v18074_v44 }
 0x300   :  { %9839 = vst.msk [vmem:[#allocation2 + $0x38] sm:$0xff] %vm5820_vm2, %v9515_v0  ;;  %9310 = vrot.lane.b32.xlu1 %v9116_v5, %s14307_s7  ;;  %v10000_v43 = vrot.slane %v9991_v25, %v15498_v51  ;;  %v10007_v40 = vrot.slane %v9992_v17, %v15498_v51  ;;  %v10767_v12 = vcombine.low %v17983_v6, %v17990_v26  ;;  %v21248_v17 = vld [vmem:[#allocation34_spill] sm:$0xff]  ;;  %vm13499_vm12 = vcmask 1043459  }
 0x301   :  { %10265 = vst.msk [vmem:[#allocation2 + $0x38] sm:$0xff] %vm7966_vm3, %v17878_v7  ;;  %v10579_v50 = vrot.slane %v10572_v19, %v15498_v51  ;;  %v9303_v7 = vpop.permute.xlu1 %9302  ;;  %v10014_v8 = vrot.slane %v9993_v58, %v15498_v51  ;;  %v10806_v32 = vrot.slane %v10792_v22, %v15498_v51  ;;  %v3513_v14 = vadd.f32 %v17910_v60, %v17149_v54  ;;  %v21247_v54 = vld [vmem:[#allocation33_spill] sm:$0xff] }
 0x302   :  { %10451 = vst.msk [vmem:[#allocation2 + $0x38] sm:$0xff] %vm8921_vm7, %v17978_v37  ;;  %v21246_v36 = vcombine.low %v21244_v41, %v21245_v47  ;;  %v10015_v37 = vcombine.low %v17928_v56, %v10000_v43  ;;  %v10758_v62 = vcombine.low %v10000_v43, %v10007_v40  ;;  %v10776_v25 = vrot.slane %v10767_v12, %v15498_v51  ;;  %v21250_v41 = vld [vmem:[#allocation35_spill] sm:$0xff] }
 0x303   :  { %10735 = vst.msk [vmem:[#allocation2 + $0x38] sm:$0xff] %vm9348_vm8, %v10684_v20  ;;  %9353 = vst.msk [vmem:[#allocation2 + $0x60] sm:$0xff] %vm9348_vm8, %v9303_v7  ;;  %v10580_v63 = vcombine.low %v17962_v4, %v10579_v50  ;;  %v10016_v5 = vcombine.low %v10007_v40, %v10014_v8  ;;  %v3648_v19 = vmax.f32 %v3513_v14, 0.0  ;;  %v21249_v22 = vcombine.low %v21247_v54, %v21248_v17  ;;  %v18120_v20 = vpop.f32.mrb[76].mxu0  ;;  %v10402_v54 = vpop.permute.xlu0 %10401 }
 0x304   :  { %v9524_v0 = vrot.slane %v21246_v36, %v15498_v51  ;;  %v18118_v47 = vadd.f32 %v17910_v60, %v21250_v41  ;;  %v10023_v56 = vrot.slane %v10015_v37, %v15498_v51  ;;  %v10765_v4 = vrot.slane %v10758_v62, %v15498_v51  ;;  %v14102_v40 = vpop.f32.mrb[77].mxu0 }
 0x305   :  { %v9531_v58 = vrot.slane %v21249_v22, %v15498_v51  ;;  %10693 = vrot.lane.b32.xlu0 %v10580_v63, %s14307_s7  ;;  %v10791_v50 = vcombine.low %v10014_v8, %v10776_v25  ;;  %v18127_v43 = vcombine.high %v17983_v6, %v17983_v6  ;;  %v10030_v12 = vrot.slane %v10016_v5, %v15498_v51 }
 0x306   :  { %v3683_v7 = vpack.c.bf16 %v3648_v19, %v3647_v61  ;;  %v13653_v14 = vpack.c.bf16 %v3648_v19, %v3648_v19  ;;  %v10766_v17 = vcombine.low %v17955_v30, %v10765_v4  ;;  %v3649_v37 = vmax.f32 %v18118_v47, 0.0 }
 0x307   :  { %v9532_v36 = vcombine.low %v9524_v0, %v9531_v58  ;;  %v10799_v63 = vrot.slane %v10791_v50, %v15498_v51  ;;  %v4306_v8 = vcombine.high %v17987_v11, %v17987_v11  ;;  %v10031_v62 = vcombine.low %v10023_v56, %v10030_v12 }
 0x308   :  { %v4364_v25 = vrot.slane %v3683_v7, %v15498_v51  ;;  %v4371_v22 = vrot.slane %v13653_v14, %v15498_v51  ;;  %v18140_v61 = vcombine.high %v17990_v26, %v17990_v26  ;;  %10890 = vst.msk [vmem:[#allocation2 + $0xb8] sm:$0xff] %vm5820_vm2, %v10766_v17  ;;  %v10298_v5 = vcombine.low %v17990_v26, %v18127_v43  ;;  %v10907_v7 = vld [vmem:[#allocation2 + $0x30] sm:$0xff] }
 0x309   :  { %9840 = vst.msk [vmem:[#allocation2 + $0x50] sm:$0xff] %vm5820_vm2, %v9532_v36  ;;  %v10807_v0 = vcombine.low %v10799_v63, %v10806_v32  ;;  %v10297_v30 = vcombine.low %v4306_v8, %v17983_v6  ;;  %v10468_v19 = vshrl.u32 %v4306_v8, 16  ;;  %10225 = vrot.lane.b32.xlu0 %v10031_v62, %s14308_s8  ;;  %v9405_v12 = vshll.u32 %v17987_v11, 16  ;;  %v18173_v63 = vpop.permute.xlu0 %10217 }
 0x30a   :  { %10266 = vst.msk [vmem:[#allocation2 + $0x50] sm:$0xff] %vm7966_vm3, %v18030_v23  ;;  %v10908_v58 = vld [vmem:[#allocation2 + $0x38] sm:$0xff]  ;;  %v4372_v41 = vcombine.high %v4364_v25, %v4364_v25  ;;  %v4373_v56 = vcombine.high %v4371_v22, %v4371_v22  ;;  %v18150_v4 = vrot.slane %v4364_v25, %v15498_v51  ;;  %v18153_v32 = vrot.slane %v4371_v22, %v15498_v51 }
 0x30b   :  { %10452 = vst.msk [vmem:[#allocation2 + $0x50] sm:$0xff] %vm8921_vm7, %v10402_v54  ;;  %v10299_v23 = vcombine.low %v18140_v61, %v18013_v1  ;;  %v10306_v50 = vrot.slane %v10297_v30, %v15498_v51  ;;  %v10313_v40 = vrot.slane %v10298_v5, %v15498_v51  ;;  %11208 = vmatprep.mubr.bf16.mxu1 %v10908_v58  ;;  %v9408_v22 = vshrl.u32 %v17987_v11, 16 }
 0x30c   :  { %10891 = vst.msk [vmem:[#allocation2 + $0xd0] sm:$0xff] %vm5820_vm2, %v10807_v0  ;;  %v18163_v14 = vrot.slane %v4372_v41, %v15498_v51  ;;  %v18166_v36 = vrot.slane %v4373_v56, %v15498_v51  ;;  %v18170_v54 = vcombine.high %v18150_v4, %v18150_v4  ;;  %v6488_v17 = vshll.u32 %v18150_v4, 16  ;;  %11209 = vmatmul.mubr.bf16.gmra.mrb[8].mxu1 %v10907_v7 }
 0x30d   :  { %v10320_v8 = vrot.slane %v10299_v23, %v15498_v51  ;;  %v10321_v62 = vcombine.low %v18022_v39, %v10306_v50  ;;  %v9407_v25 = vsel %vm15951_vm14, %v9400_v31, %v9405_v12  ;;  %v9415_v42 = vsel %vm15951_vm14, %v9408_v22, %v9413_v46 }
 0x30e   :  { %v18184_v0 = vcombine.high %v18163_v14, %v18163_v14  ;;  %v6492_v30 = vshrl.u32 %v18163_v14, 16  ;;  %v6497_v5 = vshll.u32 %v18170_v54, 16  ;;  %v6500_v58 = vshrl.u32 %v18170_v54, 16  ;;  %v10686_v22 = vpop.permute.xlu0 %10685 }
 0x30f   :  { %v10322_v41 = vcombine.low %v10313_v40, %v10320_v8  ;;  %v10329_v39 = vrot.slane %v10321_v62, %v15498_v51  ;;  %v10473_v11 = vshll.u32 %v17983_v6, 16  ;;  %v10924_v31 = vld [vmem:[#allocation2 + $0xb8] sm:$0xff]  ;;  %v9603_v56 = vcombine.low %v9407_v25, %v9415_v42  ;;  %10736 = vst.msk [vmem:[#allocation2 + $0x50] sm:$0xff] %vm9348_vm8, %v10686_v22  ;;  %v21254_v22 = vld [vmem:[#allocation37_spill] sm:$0xff] }
 0x310   :  { %v10476_v23 = vshrl.u32 %v17983_v6, 16  ;;  %v10481_v50 = vshll.u32 %v17990_v26, 16  ;;  %v10484_v12 = vshrl.u32 %v17990_v26, 16  ;;  %14150 = vmatmul.mubr.msk.bf16.gmra.mrb[112].mxu0 %vm5820_vm2, %v10924_v31  ;;  %v10489_v7 = vshll.u32 %v18127_v43, 16 }
 0x311   :  { %v10336_v40 = vrot.slane %v10322_v41, %v15498_v51  ;;  %v10475_v44 = vsel %vm15951_vm14, %v10468_v19, %v10473_v11  ;;  %v10492_v46 = vshrl.u32 %v18127_v43, 16  ;;  %v18205_v8 = vrot.slane %v9603_v56, %v15498_v51  ;;  %v18217_v11 = vpop.f32.mrb[78].mxu0 }
 0x312   :  { %v10483_v6 = vsel %vm15951_vm14, %v10476_v23, %v10481_v50  ;;  %v10497_v62 = vshll.u32 %v18140_v61, 16  ;;  %v10500_v26 = vshrl.u32 %v18140_v61, 16  ;;  %v10491_v19 = vsel %vm15951_vm14, %v10484_v12, %v10489_v7  ;;  %v7923_v23 = vpop.permute.xlu1 %7922  ;;  %v14105_v50 = vpop.f32.mrb[79].mxu0 }
 0x313   :  { %21251 = vst [vmem:[#allocation16_spill] sm:$0xff] %v18205_v8  ;;  %v10927_v25 = vld [vmem:[#allocation2 + $0xd0] sm:$0xff]  ;;  %v10337_v41 = vcombine.low %v10329_v39, %v10336_v40  ;;  %v10505_v42 = vshll.u32 %v18013_v1, 16  ;;  %v10508_v43 = vshrl.u32 %v18013_v1, 16  ;;  %v10581_v39 = vcombine.low %v10475_v44, %v10483_v6  ;;  %7972 = vst.msk [vmem:[#allocation2 + $0x78] sm:$0xff] %vm7966_vm3, %v7923_v23 }
 0x314   :  { %14153 = vmatprep.mubr.msk.bf16.mxu0 %vm5820_vm2, %v10927_v25  ;;  %v10499_v61 = vsel %vm15951_vm14, %v10492_v46, %v10497_v62  ;;  %v3523_v56 = vadd.f32 %v17910_v60, %v17264_v38  ;;  %v21252_v46 = vld [vmem:[#allocation36_spill] sm:$0xff]  ;;  %v3533_v2 = vadd.f32 %v17910_v60, %v21258_v3  ;;  %v6521_v24 = vshll.u32 %v18166_v36, 16 }
 0x315   :  { %10411 = vrot.lane.b32.xlu0 %v10337_v41, %s14299_s0  ;;  %v10507_v12 = vsel %vm15951_vm14, %v10500_v26, %v10505_v42  ;;  %v10515_v40 = vsel %vm15951_vm14, %v10508_v43, %v10513_v52  ;;  %v10582_v7 = vcombine.low %v10491_v19, %v10499_v61  ;;  %v21253_v44 = vcombine.low %v16936_v35, %v21252_v46  ;;  %v21255_v26 = vld [vmem:[#allocation38_spill] sm:$0xff]  ;;  %v21257_v52 = vld [vmem:[#allocation40_spill] sm:$0xff] }
 0x316   :  { %v10583_v38 = vcombine.low %v10507_v12, %v10515_v40  ;;  %v10590_v62 = vrot.slane %v10581_v39, %v15498_v51  ;;  %v3650_v25 = vmax.f32 %v3523_v56, 0.0  ;;  %v21256_v41 = vcombine.low %v21254_v22, %v21255_v26  ;;  %v8878_v12 = vpop.permute.xlu1 %8877 }
 0x317   :  { %v9541_v6 = vrot.slane %v21253_v44, %v15498_v51  ;;  %v10597_v50 = vrot.slane %v10582_v7, %v15498_v51  ;;  %v18245_v19 = vadd.f32 %v17910_v60, %v21257_v52  ;;  %v4353_v35 = vcombine.high %v18013_v1, %v18013_v1  ;;  %8927 = vst.msk [vmem:[#allocation2 + $0x78] sm:$0xff] %vm8921_vm7, %v8878_v12 }
 0x318   :  { %v9548_v42 = vrot.slane %v21256_v41, %v15498_v51  ;;  %v18251_v43 = vcombine.high %v18037_v27, %v18037_v27  ;;  %v10604_v61 = vrot.slane %v10583_v38, %v15498_v51  ;;  %v10605_v39 = vcombine.low %v18205_v8, %v10590_v62  ;;  %v10911_v41 = vld [vmem:[#allocation2 + $0x50] sm:$0xff] }
 0x319   :  { %v3684_v56 = vpack.c.bf16 %v3650_v25, %v3649_v37  ;;  %v13654_v23 = vpack.c.bf16 %v3650_v25, %v3650_v25  ;;  %v3651_v7 = vmax.f32 %v18245_v19, 0.0  ;;  %v6443_v46 = vshrl.u32 %v4353_v35, 16  ;;  %11216 = vmatprep.mubr.bf16.mxu1 %v10911_v41 }
 0x31a   :  { %v9549_v40 = vcombine.low %v9541_v6, %v9548_v42  ;;  %v6448_v44 = vshll.u32 %v18055_v55, 16  ;;  %v10606_v22 = vcombine.low %v10597_v50, %v10604_v61  ;;  %v10613_v26 = vrot.slane %v10605_v39, %v15498_v51  ;;  %v10910_v42 = vld [vmem:[#allocation2 + $0x48] sm:$0xff]  ;;  %v9305_v39 = vpop.permute.xlu1 %9304 }
 0x31b   :  { %v4413_v38 = vrot.slane %v3684_v56, %v15498_v51  ;;  %v4420_v62 = vrot.slane %v13654_v23, %v15498_v51  ;;  %v6451_v37 = vshrl.u32 %v18055_v55, 16  ;;  %v6456_v6 = vshll.u32 %v18016_v13, 16  ;;  %v10404_v56 = vpop.permute.xlu0 %10403  ;;  %11217 = vmatmul.mubr.bf16.gmra.mrb[12].mxu1 %v10910_v42  ;;  %9354 = vst.msk [vmem:[#allocation2 + $0x78] sm:$0xff] %vm9348_vm8, %v9305_v39 }
 0x31c   :  { %9841 = vst.msk [vmem:[#allocation2 + $0x68] sm:$0xff] %vm5820_vm2, %v9549_v40  ;;  %v6450_v47 = vsel %vm15951_vm14, %v6443_v46, %v6448_v44  ;;  %v6459_v25 = vshrl.u32 %v18016_v13, 16  ;;  %v10620_v50 = vrot.slane %v10606_v22, %v15498_v51  ;;  %v6464_v40 = vshll.u32 %v18037_v27, 16  ;;  %v18284_v44 = vpop.f32.mrb[80].mxu0 }
 0x31d   :  { %v4421_v52 = vcombine.high %v4413_v38, %v4413_v38  ;;  %v4422_v35 = vcombine.high %v4420_v62, %v4420_v62  ;;  %v18271_v61 = vrot.slane %v4413_v38, %v15498_v51  ;;  %10267 = vst.msk [vmem:[#allocation2 + $0x68] sm:$0xff] %vm7966_vm3, %v18173_v63  ;;  %v18276_v23 = vrot.slane %v4420_v62, %v15498_v51  ;;  %v14108_v41 = vpop.f32.mrb[81].mxu0 }
 0x31e   :  { %v6458_v12 = vsel %vm15951_vm14, %v6451_v37, %v6456_v6  ;;  %v6467_v46 = vshrl.u32 %v18037_v27, 16  ;;  %10453 = vst.msk [vmem:[#allocation2 + $0x68] sm:$0xff] %vm8921_vm7, %v10404_v56  ;;  %v10621_v63 = vcombine.low %v10613_v26, %v10620_v50  ;;  %v6466_v26 = vsel %vm15951_vm14, %v6459_v25, %v6464_v40 }
 0x31f   :  { %v18287_v22 = vrot.slane %v4421_v52, %v15498_v51  ;;  %v18290_v38 = vrot.slane %v4422_v35, %v15498_v51  ;;  %v18294_v62 = vcombine.high %v18271_v61, %v18271_v61  ;;  %v6472_v39 = vshll.u32 %v18041_v49, 16 }
 0x320   :  { %10695 = vrot.lane.b32.xlu0 %v10621_v63, %s14307_s7  ;;  %v6475_v56 = vshrl.u32 %v18041_v49, 16  ;;  %v6480_v41 = vshll.u32 %v18251_v43, 16  ;;  %v6483_v57 = vshrl.u32 %v18251_v43, 16  ;;  %v6499_v25 = vsel %vm15951_vm14, %v6492_v30, %v6497_v5 }
 0x321   :  { %v5412_v50 = vcombine.low %v18271_v61, %v18287_v22  ;;  %v6474_v40 = vsel %vm15951_vm14, %v6467_v46, %v6472_v39  ;;  %v6505_v63 = vshll.u32 %v18184_v0, 16  ;;  %v7471_v31 = vcombine.low %v6450_v47, %v6458_v12 }
 0x322   :  { %v6482_v42 = vsel %vm15951_vm14, %v6475_v56, %v6480_v41  ;;  %v6490_v6 = vsel %vm15951_vm14, %v6483_v57, %v6488_v17  ;;  %v7472_v35 = vcombine.low %v6466_v26, %v6474_v40  ;;  %v8426_v30 = vcombine.low %v18055_v55, %v18016_v13 }
 0x323   :  { %v6507_v5 = vsel %vm15951_vm14, %v6500_v58, %v6505_v63  ;;  %v7473_v47 = vcombine.low %v6482_v42, %v6490_v6  ;;  %v7481_v3 = vrot.slane %v7471_v31, %v15498_v51  ;;  %v3652_v12 = vmax.f32 %v3533_v2, 0.0 }
 0x324   :  { %v7474_v46 = vcombine.low %v6499_v25, %v6507_v5  ;;  %v7488_v39 = vrot.slane %v7472_v35, %v15498_v51  ;;  %v8427_v56 = vcombine.low %v18037_v27, %v18041_v49  ;;  %v8428_v57 = vcombine.low %v18251_v43, %v18150_v4  ;;  %v21260_v25 = vld [vmem:[#allocation24_spill] sm:$0xff] }
 0x325   :  { %v7495_v55 = vrot.slane %v7473_v47, %v15498_v51  ;;  %v3685_v17 = vpack.c.bf16 %v3652_v12, %v3651_v7  ;;  %v13655_v26 = vpack.c.bf16 %v3652_v12, %v3652_v12  ;;  %v13835_v58 = vcombine.high %v18150_v4, %v18163_v14 }
 0x326   :  { %v18345_v2 = vrot.slane %v7474_v46, %v15498_v51  ;;  %v7503_v31 = vcombine.low %v7481_v3, %v7488_v39  ;;  %v8436_v6 = vrot.slane %v8426_v30, %v15498_v51  ;;  %v8443_v49 = vrot.slane %v8427_v56, %v15498_v51  ;;  %v10220_v56 = vpop.permute.xlu0 %10219 }
 0x327   :  { %v4462_v42 = vrot.slane %v3685_v17, %v15498_v51  ;;  %v4469_v43 = vrot.slane %v13655_v26, %v15498_v51  ;;  %v8450_v35 = vrot.slane %v8428_v57, %v15498_v51  ;;  %v18353_v19 = vrot.slane %v13835_v58, %v15498_v51  ;;  %v21261_v17 = vld [vmem:[#allocation39_spill] sm:$0xff]  ;;  %v21262_v26 = vld [vmem:[#allocation41_spill] sm:$0xff] }
 0x328   :  { %21259 = vst [vmem:[#allocation17_spill] sm:$0xff] %v18345_v2  ;;  %v7504_v7 = vcombine.low %v7495_v55, %v18345_v2  ;;  %v7511_v4 = vrot.slane %v7503_v31, %v15498_v51  ;;  %v8458_v41 = vcombine.low %v8436_v6, %v8443_v49  ;;  %v3538_v40 = vadd.f32 %v17910_v60, %v21260_v25  ;;  %v21264_v6 = vld [vmem:[#allocation42_spill] sm:$0xff]  ;;  %v21265_v49 = vld [vmem:[#allocation15_spill] sm:$0xff] }
 0x329   :  { %v4470_v63 = vcombine.high %v4462_v42, %v4462_v42  ;;  %v4471_v30 = vcombine.high %v4469_v43, %v4469_v43  ;;  %v18360_v5 = vrot.slane %v4462_v42, %v15498_v51  ;;  %v18363_v47 = vrot.slane %v4469_v43, %v15498_v51  ;;  %v10916_v2 = vld [vmem:[#allocation2 + $0x78] sm:$0xff] }
 0x32a   :  { %v7518_v3 = vrot.slane %v7504_v7, %v15498_v51  ;;  %v8459_v12 = vcombine.low %v8450_v35, %v18353_v19  ;;  %v8466_v46 = vrot.slane %v8458_v41, %v15498_v51  ;;  %v3653_v39 = vmax.f32 %v3538_v40, 0.0 }
 0x32b   :  { %v18369_v57 = vrot.slane %v4470_v63, %v15498_v51  ;;  %v18372_v55 = vrot.slane %v4471_v30, %v15498_v51  ;;  %v21263_v58 = vcombine.low %v21261_v17, %v21262_v26  ;;  %v21266_v42 = vcombine.low %v21264_v6, %v21265_v49 }
 0x32c   :  { %v7519_v35 = vcombine.low %v7511_v4, %v7518_v3  ;;  %v8473_v7 = vrot.slane %v8459_v12, %v15498_v51  ;;  %v18385_v41 = vcombine.high %v18153_v32, %v18153_v32  ;;  %v13674_v25 = vcombine.high %v18016_v13, %v18037_v27 }
 0x32d   :  { %v9558_v31 = vrot.slane %v21263_v58, %v15498_v51  ;;  %v9565_v43 = vrot.slane %v21266_v42, %v15498_v51  ;;  %v18391_v40 = vcombine.high %v18372_v55, %v18372_v55  ;;  %v5364_v17 = vcombine.low %v18163_v14, %v18170_v54 }
 0x32e   :  { %7930 = vrot.lane.b32.xlu1 %v7519_v35, %s14308_s8  ;;  %v8474_v4 = vcombine.low %v8466_v46, %v8473_v7  ;;  %v18398_v3 = vrot.slane %v13674_v25, %v15498_v51  ;;  %v5410_v12 = vcombine.low %v18184_v0, %v18153_v32  ;;  %v5411_v26 = vcombine.low %v18166_v36, %v18385_v41  ;;  %v10688_v42 = vpop.permute.xlu0 %10687 }
 0x32f   :  { %v9566_v30 = vcombine.low %v9558_v31, %v9565_v43  ;;  %v18406_v58 = vrot.slane %v5364_v17, %v15498_v51  ;;  %v18412_v14 = vrot.slane %v5412_v50, %v15498_v51  ;;  %v8475_v54 = vcombine.low %v18153_v32, %v18166_v36  ;;  %v18418_v31 = vpop.f32.mrb[82].mxu0  ;;  %v21269_v43 = vld [vmem:[#allocation43_spill] sm:$0xff]  ;;  %10737 = vst.msk [vmem:[#allocation2 + $0x68] sm:$0xff] %vm9348_vm8, %v10688_v42 }
 0x330   :  { %21267 = vst [vmem:[#allocation18_spill] sm:$0xff] %v18398_v3  ;;  %v13836_v46 = vcombine.high %v18153_v32, %v18166_v36  ;;  %v18422_v6 = vrot.slane %v5410_v12, %v15498_v51  ;;  %v18425_v49 = vrot.slane %v5411_v26, %v15498_v51  ;;  %v8477_v50 = vcombine.low %v18287_v22, %v18294_v62  ;;  %v14111_v7 = vpop.f32.mrb[83].mxu0 }
 0x331   :  { %9842 = vst.msk [vmem:[#allocation2 + $0x80] sm:$0xff] %vm5820_vm2, %v9566_v30  ;;  %21268 = vst [vmem:[#allocation19_spill] sm:$0xff] %v18406_v58  ;;  %v3543_v35 = vadd.f32 %v17910_v60, %v21269_v43  ;;  %v18434_v30 = vrot.slane %v8475_v54, %v15498_v51  ;;  %v4405_v17 = vcombine.high %v18166_v36, %v18166_v36  ;;  %v6508_v7 = vshrl.u32 %v18184_v0, 16 }
 0x332   :  { %10268 = vst.msk [vmem:[#allocation2 + $0x80] sm:$0xff] %vm7966_vm3, %v10220_v56  ;;  %v18437_v56 = vrot.slane %v13836_v46, %v15498_v51  ;;  %8885 = vrot.lane.b32.xlu1 %v8474_v4, %s14299_s0  ;;  %v9117_v12 = vcombine.low %v18406_v58, %v18422_v6  ;;  %v9118_v26 = vcombine.low %v18425_v49, %v18412_v14  ;;  %v6513_v4 = vshll.u32 %v18153_v32, 16 }
 0x333   :  { %v18448_v43 = vrot.slane %v8477_v50, %v15498_v51  ;;  %v3654_v54 = vmax.f32 %v3543_v35, 0.0  ;;  %v10032_v46 = vcombine.low %v18353_v19, %v18434_v30  ;;  %v18454_v42 = vcombine.high %v18287_v22, %v18287_v22  ;;  %v10406_v35 = vpop.permute.xlu0 %10405 }
 0x334   :  { %v9125_v25 = vrot.slane %v9117_v12, %v15498_v51  ;;  %v9132_v63 = vrot.slane %v9118_v26, %v15498_v51  ;;  %v6515_v58 = vsel %vm15951_vm14, %v6508_v7, %v6513_v4  ;;  %v6516_v3 = vshrl.u32 %v18153_v32, 16  ;;  %10454 = vst.msk [vmem:[#allocation2 + $0x80] sm:$0xff] %vm8921_vm7, %v10406_v35 }
 0x335   :  { %v10033_v50 = vcombine.low %v18437_v56, %v18448_v43  ;;  %v3686_v52 = vpack.c.bf16 %v3654_v54, %v3653_v39  ;;  %v10040_v37 = vrot.slane %v10032_v46, %v15498_v51  ;;  %v13656_v19 = vpack.c.bf16 %v3654_v54, %v3654_v54 }
 0x336   :  { %v9133_v0 = vcombine.low %v9125_v25, %v9132_v63  ;;  %v6524_v1 = vshrl.u32 %v18166_v36, 16  ;;  %v6529_v54 = vshll.u32 %v18385_v41, 16  ;;  %v6532_v46 = vshrl.u32 %v18385_v41, 16  ;;  %v10914_v25 = vld [vmem:[#allocation2 + $0x68] sm:$0xff] }
 0x337   :  { %v10047_v12 = vrot.slane %v10033_v50, %v15498_v51  ;;  %v4511_v26 = vrot.slane %v3686_v52, %v15498_v51  ;;  %v4518_v39 = vrot.slane %v13656_v19, %v15498_v51  ;;  %v6523_v52 = vsel %vm15951_vm14, %v6516_v3, %v6521_v24  ;;  %v7925_v41 = vpop.permute.xlu1 %7924  ;;  %11224 = vmatprep.mubr.bf16.mxu1 %v10914_v25  ;;  %v10913_v19 = vld [vmem:[#allocation2 + $0x60] sm:$0xff] }
 0x338   :  { %9312 = vrot.lane.b32.xlu1 %v9133_v0, %s14307_s7  ;;  %v6531_v36 = vsel %vm15951_vm14, %v6524_v1, %v6529_v54  ;;  %v6537_v35 = vshll.u32 %v4405_v17, 16  ;;  %v6546_v3 = vshll.u32 %v18287_v22, 16  ;;  %v6549_v0 = vshrl.u32 %v18287_v22, 16  ;;  %7973 = vst.msk [vmem:[#allocation2 + $0x90] sm:$0xff] %vm7966_vm3, %v7925_v41  ;;  %11225 = vmatmul.mubr.bf16.gmra.mrb[16].mxu1 %v10913_v19 }
 0x339   :  { %v10048_v32 = vcombine.low %v10040_v37, %v10047_v12  ;;  %v4519_v7 = vcombine.high %v4511_v26, %v4511_v26  ;;  %v18476_v63 = vrot.slane %v4511_v26, %v15498_v51  ;;  %v4520_v4 = vcombine.high %v4518_v39, %v4518_v39 }
 0x33a   :  { %v18481_v50 = vrot.slane %v4518_v39, %v15498_v51  ;;  %v6539_v26 = vsel %vm15951_vm14, %v6532_v46, %v6537_v35  ;;  %v21270_v54 = vshrl.u32 %v18271_v61, 16  ;;  %v7520_v12 = vcombine.low %v6515_v58, %v6523_v52 }
 0x33b   :  { %10227 = vrot.lane.b32.xlu0 %v10048_v32, %s14308_s8  ;;  %v18487_v37 = vrot.slane %v4519_v7, %v15498_v51  ;;  %v18491_v24 = vcombine.high %v18476_v63, %v18476_v63  ;;  %v18497_v1 = vrot.slane %v4520_v4, %v15498_v51  ;;  %v21271_v7 = vshll.u32 %v18294_v62, 16 }
 0x33c   :  { %v18501_v17 = vcombine.high %v18481_v50, %v18481_v50  ;;  %v6548_v32 = vsel %vm15951_vm14, %v21270_v54, %v6546_v3  ;;  %v6562_v4 = vshll.u32 %v18454_v42, 16  ;;  %v21272_v54 = vshrl.u32 %v18294_v62, 16 }
 0x33d   :  { %v18508_v39 = vcombine.high %v18487_v37, %v18487_v37  ;;  %v6556_v25 = vsel %vm15951_vm14, %v6549_v0, %v21271_v7  ;;  %v18521_v41 = vcombine.high %v18497_v1, %v18497_v1  ;;  %v6565_v7 = vshrl.u32 %v18454_v42, 16  ;;  %v8880_v35 = vpop.permute.xlu1 %8879  ;;  %v18539_v8 = vpop.f32.mrb[84].mxu0 }
 0x33e   :  { %v6564_v0 = vsel %vm15951_vm14, %v21272_v54, %v6562_v4  ;;  %v7521_v13 = vcombine.low %v6531_v36, %v6539_v26  ;;  %v7522_v27 = vcombine.low %v6548_v32, %v6556_v25  ;;  %v18535_v46 = vcombine.high %v18276_v23, %v18276_v23  ;;  %8928 = vst.msk [vmem:[#allocation2 + $0x90] sm:$0xff] %vm8921_vm7, %v8880_v35 }
 0x33f   :  { %v8478_v19 = vcombine.low %v18454_v42, %v18276_v23  ;;  %v21273_v62 = vshll.u32 %v18276_v23, 16  ;;  %v18546_v54 = vrot.slane %v7520_v12, %v15498_v51  ;;  %v8507_v58 = vcombine.low %v18434_v30, %v18437_v56  ;;  %v14114_v42 = vpop.f32.mrb[85].mxu0  ;;  %v10690_v12 = vpop.permute.xlu0 %10689 }
 0x340   :  { %v8525_v52 = vcombine.low %v18360_v5, %v18369_v57  ;;  %v18554_v26 = vrot.slane %v7521_v13, %v15498_v51  ;;  %v18557_v32 = vrot.slane %v7522_v27, %v15498_v51  ;;  %v8524_v35 = vcombine.low %v18290_v38, %v18535_v46  ;;  %10738 = vst.msk [vmem:[#allocation2 + $0x80] sm:$0xff] %vm9348_vm8, %v10690_v12 }
 0x341   :  { %v6572_v4 = vsel %vm15951_vm14, %v6565_v7, %v21273_v62  ;;  %21274 = vst [vmem:[#allocation20_spill] sm:$0xff] %v18546_v54  ;;  %v8506_v30 = vrot.slane %v8478_v19, %v15498_v51  ;;  %v8515_v56 = vrot.slane %v8507_v58, %v15498_v51  ;;  %v3548_v58 = vadd.f32 %v17910_v60, %v17667_v28 }
 0x342   :  { %v7523_v36 = vcombine.low %v6564_v0, %v6572_v4  ;;  %21275 = vst [vmem:[#allocation21_spill] sm:$0xff] %v18554_v26  ;;  %21276 = vst [vmem:[#allocation22_spill] sm:$0xff] %v18557_v32  ;;  %v7552_v27 = vcombine.low %v18546_v54, %v18554_v26  ;;  %v8541_v62 = vrot.slane %v8525_v52, %v15498_v51 }
 0x343   :  { %v8508_v19 = vcombine.low %v18448_v43, %v8506_v30  ;;  %v8534_v4 = vrot.slane %v8524_v35, %v15498_v51  ;;  %v18581_v42 = vcombine.high %v18290_v38, %v18290_v38  ;;  %v13675_v0 = vcombine.high %v18271_v61, %v18287_v22  ;;  %v9307_v3 = vpop.permute.xlu1 %9306  ;;  %v10222_v54 = vpop.permute.xlu0 %10221 }
 0x344   :  { %v18568_v13 = vrot.slane %v7523_v36, %v15498_v51  ;;  %v7560_v12 = vrot.slane %v7552_v27, %v15498_v51  ;;  %v5442_v43 = vcombine.low %v18422_v6, %v18425_v49  ;;  %v3655_v7 = vmax.f32 %v3548_v58, 0.0  ;;  %9355 = vst.msk [vmem:[#allocation2 + $0x90] sm:$0xff] %vm9348_vm8, %v9307_v3 }
 0x345   :  { %v8522_v52 = vrot.slane %v8508_v19, %v15498_v51  ;;  %v8556_v35 = vcombine.low %v8534_v4, %v8541_v62  ;;  %v5459_v28 = vcombine.low %v18276_v23, %v18290_v38  ;;  %v5460_v61 = vcombine.low %v18581_v42, %v18360_v5 }
 0x346   :  { %v7553_v36 = vcombine.low %v18557_v32, %v18568_v13  ;;  %v5441_v32 = vrot.slane %v13675_v0, %v15498_v51  ;;  %v5450_v27 = vrot.slane %v5442_v43, %v15498_v51  ;;  %v18611_v43 = vcombine.high %v18360_v5, %v18360_v5 }
 0x347   :  { %v8523_v22 = vcombine.low %v8515_v56, %v8522_v52  ;;  %v18602_v6 = vrot.slane %v8556_v35, %v15498_v51  ;;  %v5469_v49 = vrot.slane %v5459_v28, %v15498_v51  ;;  %v5476_v0 = vrot.slane %v5460_v61, %v15498_v51  ;;  %v10917_v26 = vld [vmem:[#allocation2 + $0x80] sm:$0xff] }
 0x348   :  { %v18594_v25 = vrot.slane %v7553_v36, %v15498_v51  ;;  %v5443_v36 = vcombine.low %v18412_v14, %v5441_v32  ;;  %v13837_v35 = vcombine.high %v18360_v5, %v18369_v57  ;;  %v10049_v28 = vcombine.low %v8506_v30, %v8534_v4  ;;  %11232 = vmatprep.mubr.bf16.mxu1 %v10917_v26  ;;  %v21277_v4 = vld [vmem:[#allocation44_spill] sm:$0xff] }
 0x349   :  { %v10808_v3 = vcombine.low %v8522_v52, %v18602_v6  ;;  %v9134_v56 = vcombine.low %v5441_v32, %v5469_v49  ;;  %v5461_v61 = vcombine.low %v18369_v57, %v18611_v43  ;;  %v3553_v19 = vadd.f32 %v17910_v60, %v17714_v18  ;;  %v21278_v52 = vld [vmem:[#allocation45_spill] sm:$0xff]  ;;  %11233 = vmatmul.mubr.bf16.gmra.mrb[20].mxu1 %v10916_v2 }
 0x34a   :  { %v7568_v58 = vcombine.low %v7560_v12, %v18594_v25  ;;  %v5457_v14 = vrot.slane %v5443_v36, %v15498_v51  ;;  %v5491_v12 = vcombine.low %v5469_v49, %v5476_v0  ;;  %v18625_v30 = vrot.slane %v13837_v35, %v15498_v51 }
 0x34b   :  { %10892 = vst.msk [vmem:[#allocation2 + $0xe8] sm:$0xff] %vm5820_vm2, %v10808_v3  ;;  %v9142_v32 = vrot.slane %v9134_v56, %v15498_v51  ;;  %v10057_v26 = vrot.slane %v10049_v28, %v15498_v51  ;;  %v21279_v49 = vcombine.low %v21277_v4, %v21278_v52  ;;  %v18636_v18 = vrot.slane %v5461_v61, %v15498_v51 }
 0x34c   :  { %7932 = vrot.lane.b32.xlu1 %v7568_v58, %s14308_s8  ;;  %v5458_v36 = vcombine.low %v5450_v27, %v5457_v14  ;;  %v18633_v29 = vrot.slane %v5491_v12, %v15498_v51  ;;  %v3656_v60 = vmax.f32 %v3553_v19, 0.0  ;;  %v10050_v3 = vcombine.low %v8541_v62, %v18625_v30 }
 0x34d   :  { %v9575_v58 = vrot.slane %v21279_v49, %v15498_v51  ;;  %v21280_v56 = vcombine.low %v17591_v34, %v17717_v16  ;;  %v18645_v28 = vcombine.high %v18369_v57, %v18369_v57  ;;  %v6578_v2 = vshll.u32 %v18290_v38, 16  ;;  %v10408_v49 = vpop.permute.xlu0 %10407 }
 0x34e   :  { %v10338_v27 = vcombine.low %v5457_v14, %v18633_v29  ;;  %5831 = vst.msk [vmem:[#allocation2 + $0xf0] sm:$0xff] %vm5820_vm2, %v5458_v36  ;;  %v9135_v19 = vcombine.low %v5476_v0, %v18636_v18  ;;  %v3687_v62 = vpack.c.bf16 %v3656_v60, %v3655_v7  ;;  %v13657_v12 = vpack.c.bf16 %v3656_v60, %v3656_v60 }
 0x34f   :  { %v9582_v35 = vrot.slane %v21280_v56, %v15498_v51  ;;  %v18652_v61 = vpop.f32.mrb[86].mxu0  ;;  %v10064_v34 = vrot.slane %v10050_v3, %v15498_v51  ;;  %v21281_v4 = vshrl.u32 %v18276_v23, 16  ;;  %v6595_v60 = vshll.u32 %v18360_v5, 16 }
 0x350   :  { %8887 = vrot.lane.b32.xlu1 %v8523_v22, %s14299_s0  ;;  %v6581_v22 = vshrl.u32 %v18290_v38, 16  ;;  %v14117_v14 = vpop.f32.mrb[87].mxu0  ;;  %10413 = vrot.lane.b32.xlu0 %v10338_v27, %s14299_s0  ;;  %v9149_v0 = vrot.slane %v9135_v19, %v15498_v51  ;;  %v4560_v7 = vrot.slane %v3687_v62, %v15498_v51  ;;  %v4567_v36 = vrot.slane %v13657_v12, %v15498_v51 }
 0x351   :  { %v9583_v16 = vcombine.low %v9575_v58, %v9582_v35  ;;  %v6580_v52 = vsel %vm15951_vm14, %v21281_v4, %v6578_v2  ;;  %v10065_v58 = vcombine.low %v10057_v26, %v10064_v34  ;;  %v21282_v23 = vshll.u32 %v18535_v46, 16  ;;  %v7927_v35 = vpop.permute.xlu1 %7926 }
 0x352   :  { %v6598_v3 = vshrl.u32 %v18360_v5, 16  ;;  %v6603_v56 = vshll.u32 %v18369_v57, 16  ;;  %v9150_v2 = vcombine.low %v9142_v32, %v9149_v0  ;;  %v4568_v27 = vcombine.high %v4560_v7, %v4560_v7  ;;  %v10930_v26 = vld [vmem:[#allocation2 + $0xe8] sm:$0xff]  ;;  %7974 = vst.msk [vmem:[#allocation2 + $0xa8] sm:$0xff] %vm7966_vm3, %v7927_v35 }
 0x353   :  { %9843 = vst.msk [vmem:[#allocation2 + $0x98] sm:$0xff] %vm5820_vm2, %v9583_v16  ;;  %v6588_v38 = vsel %vm15951_vm14, %v6581_v22, %v21282_v23  ;;  %v4569_v19 = vcombine.high %v4567_v36, %v4567_v36  ;;  %v18673_v62 = vrot.slane %v4560_v7, %v15498_v51  ;;  %v18678_v46 = vrot.slane %v4567_v36, %v15498_v51 }
 0x354   :  { %10269 = vst.msk [vmem:[#allocation2 + $0x98] sm:$0xff] %vm7966_vm3, %v10222_v54  ;;  %v21283_v12 = vshrl.u32 %v18581_v42, 16  ;;  %v6605_v32 = vsel %vm15951_vm14, %v6598_v3, %v6603_v56  ;;  %v6606_v34 = vshrl.u32 %v18369_v57, 16  ;;  %14154 = vmatmul.mubr.msk.bf16.gmra.mrb[116].mxu0 %vm5820_vm2, %v10930_v26  ;;  %9314 = vrot.lane.b32.xlu1 %v9150_v2, %s14307_s7  ;;  %v18692_v54 = vrot.slane %v4568_v27, %v15498_v51  ;;  %v10692_v0 = vpop.permute.xlu0 %10691 }
 0x355   :  { %10455 = vst.msk [vmem:[#allocation2 + $0x98] sm:$0xff] %vm8921_vm7, %v10408_v49  ;;  %10229 = vrot.lane.b32.xlu0 %v10065_v58, %s14308_s8  ;;  %v18695_v42 = vrot.slane %v4569_v19, %v15498_v51  ;;  %v6611_v16 = vshll.u32 %v18611_v43, 16  ;;  %v6614_v4 = vshrl.u32 %v18611_v43, 16  ;;  %v18701_v57 = vcombine.high %v18678_v46, %v18678_v46  ;;  %v8882_v7 = vpop.permute.xlu1 %8881 }
 0x356   :  { %v6597_v5 = vsel %vm15951_vm14, %v21283_v12, %v6595_v60  ;;  %v6619_v49 = vshll.u32 %v18645_v28, 16  ;;  %v6622_v14 = vshrl.u32 %v18645_v28, 16  ;;  %v6627_v43 = vshll.u32 %v18363_v47, 16  ;;  %10739 = vst.msk [vmem:[#allocation2 + $0x98] sm:$0xff] %vm9348_vm8, %v10692_v0 }
 0x357   :  { %v5559_v36 = vcombine.low %v18678_v46, %v18695_v42  ;;  %v6613_v60 = vsel %vm15951_vm14, %v6606_v34, %v6611_v16  ;;  %v6630_v58 = vshrl.u32 %v18363_v47, 16  ;;  %8929 = vst.msk [vmem:[#allocation2 + $0xa8] sm:$0xff] %vm8921_vm7, %v8882_v7  ;;  %v7569_v35 = vcombine.low %v6580_v52, %v6588_v38  ;;  %v18732_v52 = vld [vmem:[%s21029_s2] ss:$0 sm:$0xff] }
 0x358   :  { %v6621_v56 = vsel %vm15951_vm14, %v6614_v4, %v6619_v49  ;;  %v6629_v2 = vsel %vm15951_vm14, %v6622_v14, %v6627_v43  ;;  %v21284_v27 = vshll.u32 %v18372_v55, 16  ;;  %v7570_v26 = vcombine.low %v6597_v5, %v6605_v32  ;;  %v18738_v49 = vpop.f32.mrb[88].mxu0 }
 0x359   :  { %v7571_v12 = vcombine.low %v6613_v60, %v6621_v56  ;;  %v18725_v16 = vrot.slane %v7569_v35, %v15498_v51  ;;  %v8527_v0 = vcombine.low %v18363_v47, %v18372_v55  ;;  %v18736_v38 = vadd.f32 %v18732_v52, %v17894_v9  ;;  %v9309_v4 = vpop.permute.xlu1 %9308  ;;  %v14120_v60 = vpop.f32.mrb[89].mxu0 }
 0x35a   :  { %v6637_v19 = vsel %vm15951_vm14, %v6630_v58, %v21284_v27  ;;  %v18741_v5 = vrot.slane %v7570_v26, %v15498_v51  ;;  %v5462_v14 = vcombine.low %v18645_v28, %v18363_v47  ;;  %v13676_v7 = vcombine.high %v18363_v47, %v18372_v55  ;;  %9356 = vst.msk [vmem:[#allocation2 + $0xa8] sm:$0xff] %vm9348_vm8, %v9309_v4  ;;  %v10919_v55 = vld [vmem:[#allocation2 + $0x90] sm:$0xff] }
 0x35b   :  { %v7572_v34 = vcombine.low %v6629_v2, %v6637_v19  ;;  %v18744_v32 = vrot.slane %v7571_v12, %v15498_v51  ;;  %v18757_v58 = vrot.slane %v8527_v0, %v15498_v51  ;;  %v3657_v56 = vmax.f32 %v18736_v38, 0.0 }
 0x35c   :  { %v7601_v28 = vcombine.low %v18725_v16, %v18741_v5  ;;  %v5490_v35 = vrot.slane %v5462_v14, %v15498_v51  ;;  %v5509_v2 = vcombine.low %v18476_v63, %v18487_v37  ;;  %v5518_v26 = vrot.slane %v13676_v7, %v15498_v51 }
 0x35d   :  { %v18752_v9 = vrot.slane %v7572_v34, %v15498_v51  ;;  %v8557_v19 = vcombine.low %v18625_v30, %v18757_v58  ;;  %v13677_v12 = vcombine.high %v18476_v63, %v18487_v37  ;;  %v10920_v34 = vld [vmem:[#allocation2 + $0x98] sm:$0xff]  ;;  %v4501_v60 = vcombine.high %v18363_v47, %v18363_v47 }
 0x35e   :  { %v7609_v0 = vrot.slane %v7601_v28, %v15498_v51  ;;  %v5492_v4 = vcombine.low %v18636_v18, %v5490_v35  ;;  %v5525_v14 = vrot.slane %v5509_v2, %v15498_v51  ;;  %11240 = vmatprep.mubr.bf16.mxu1 %v10920_v34  ;;  %v9151_v3 = vcombine.low %v5490_v35, %v5518_v26 }
 0x35f   :  { %v7602_v27 = vcombine.low %v18744_v32, %v18752_v9  ;;  %v18783_v30 = vrot.slane %v8557_v19, %v15498_v51  ;;  %v18786_v7 = vrot.slane %v13677_v12, %v15498_v51  ;;  %11241 = vmatmul.mubr.bf16.gmra.mrb[24].mxu1 %v10919_v55  ;;  %v6639_v23 = vshrl.u32 %v4501_v60, 16 }
 0x360   :  { %v10622_v18 = vcombine.low %v18594_v25, %v7609_v0  ;;  %v5506_v28 = vrot.slane %v5492_v4, %v15498_v51  ;;  %v5540_v2 = vcombine.low %v5518_v26, %v5525_v14  ;;  %v9159_v19 = vrot.slane %v9151_v3, %v15498_v51 }
 0x361   :  { %v18780_v43 = vrot.slane %v7602_v27, %v15498_v51  ;;  %v8572_v27 = vcombine.low %v18602_v6, %v18783_v30  ;;  %v9152_v34 = vcombine.low %v5525_v14, %v18786_v7  ;;  %v6644_v25 = vshll.u32 %v18391_v40, 16 }
 0x362   :  { %10697 = vrot.lane.b32.xlu0 %v10622_v18, %s14307_s7  ;;  %v5507_v35 = vcombine.low %v18633_v29, %v5506_v28  ;;  %v18798_v55 = vrot.slane %v5540_v2, %v15498_v51  ;;  %v6647_v26 = vshrl.u32 %v18391_v40, 16  ;;  %v6652_v6 = vshll.u32 %v18476_v63, 16 }
 0x363   :  { %v7617_v47 = vcombine.low %v7609_v0, %v18780_v43  ;;  %v9166_v12 = vrot.slane %v9152_v34, %v15498_v51  ;;  %v6655_v0 = vshrl.u32 %v18476_v63, 16  ;;  %v6660_v3 = vshll.u32 %v18487_v37, 16 }
 0x364   :  { %v10339_v4 = vcombine.low %v5506_v28, %v18798_v55  ;;  %5832 = vst.msk [vmem:[#allocation2 + $0x108] sm:$0xff] %vm5820_vm2, %v5507_v35  ;;  %v6646_v29 = vsel %vm15951_vm14, %v6639_v23, %v6644_v25  ;;  %v6663_v14 = vshrl.u32 %v18487_v37, 16  ;;  %v6668_v60 = vshll.u32 %v18491_v24, 16 }
 0x365   :  { %7934 = vrot.lane.b32.xlu1 %v7617_v47, %s14308_s8  ;;  %v9167_v18 = vcombine.low %v9159_v19, %v9166_v12  ;;  %v6654_v2 = vsel %vm15951_vm14, %v6647_v26, %v6652_v6  ;;  %v6662_v47 = vsel %vm15951_vm14, %v6655_v0, %v6660_v3  ;;  %v6671_v34 = vshrl.u32 %v18491_v24, 16 }
 0x366   :  { %10415 = vrot.lane.b32.xlu0 %v10339_v4, %s14299_s0  ;;  %v6670_v28 = vsel %vm15951_vm14, %v6663_v14, %v6668_v60  ;;  %v7618_v35 = vcombine.low %v6646_v29, %v6654_v2  ;;  %v6676_v23 = vshll.u32 %v18508_v39, 16  ;;  %v6679_v25 = vshrl.u32 %v18508_v39, 16  ;;  %v7929_v22 = vpop.permute.xlu1 %7928 }
 0x367   :  { %v7619_v19 = vcombine.low %v6662_v47, %v6670_v28  ;;  %v21285_v26 = vshll.u32 %v18501_v17, 16  ;;  %v21286_v12 = vshrl.u32 %v18497_v1, 16  ;;  %v6701_v0 = vshll.u32 %v18521_v41, 16  ;;  %7975 = vst.msk [vmem:[#allocation2 + $0xc0] sm:$0xff] %vm7966_vm3, %v7929_v22 }
 0x368   :  { %v3563_v3 = vadd.f32 %v18732_v52, %v18018_v59  ;;  %v18835_v4 = vrot.slane %v7618_v35, %v15498_v51  ;;  %v21287_v29 = vshll.u32 %v18481_v50, 16  ;;  %v8573_v60 = vcombine.low %v18391_v40, %v18476_v63 }
 0x369   :  { %8889 = vrot.lane.b32.xlu1 %v8572_v27, %s14299_s0  ;;  %v6695_v6 = vsel %vm15951_vm14, %v21286_v12, %v21285_v26  ;;  %v6678_v27 = vsel %vm15951_vm14, %v6671_v34, %v6676_v23  ;;  %v18846_v2 = vrot.slane %v7619_v19, %v15498_v51  ;;  %v21288_v59 = vshrl.u32 %v18501_v17, 16 }
 0x36a   :  { %v6686_v14 = vsel %vm15951_vm14, %v6679_v25, %v21287_v29  ;;  %v3658_v28 = vmax.f32 %v3563_v3, 0.0  ;;  %v8574_v23 = vcombine.low %v18487_v37, %v18491_v24  ;;  %v8583_v25 = vrot.slane %v8573_v60, %v15498_v51  ;;  %v8884_v40 = vpop.permute.xlu1 %8883 }
 0x36b   :  { %v6703_v22 = vsel %vm15951_vm14, %v21288_v59, %v6701_v0  ;;  %v7620_v47 = vcombine.low %v6678_v27, %v6686_v14  ;;  %v7650_v63 = vcombine.low %v18835_v4, %v18846_v2  ;;  %v10224_v0 = vpop.permute.xlu0 %10223  ;;  %8930 = vst.msk [vmem:[#allocation2 + $0xc0] sm:$0xff] %vm8921_vm7, %v8884_v40 }
 0x36c   :  { %v7621_v35 = vcombine.low %v6695_v6, %v6703_v22  ;;  %v3688_v26 = vpack.c.bf16 %v3658_v28, %v3657_v56  ;;  %v13658_v12 = vpack.c.bf16 %v3658_v28, %v3658_v28  ;;  %v8590_v24 = vrot.slane %v8574_v23, %v15498_v51 }
 0x36d   :  { %9316 = vrot.lane.b32.xlu1 %v9167_v18, %s14307_s7  ;;  %v18861_v19 = vrot.slane %v7620_v47, %v15498_v51  ;;  %v21289_v18 = vcombine.low %v18508_v39, %v18481_v50  ;;  %v10066_v3 = vcombine.low %v18757_v58, %v8583_v25  ;;  %v7658_v38 = vrot.slane %v7650_v63, %v15498_v51 }
 0x36e   :  { %v18867_v37 = vrot.slane %v7621_v35, %v15498_v51  ;;  %v4609_v27 = vrot.slane %v3688_v26, %v15498_v51  ;;  %v4616_v29 = vrot.slane %v13658_v12, %v15498_v51  ;;  %v21290_v58 = vcombine.low %v17733_v21, %v17761_v15 }
 0x36f   :  { %v18874_v6 = vrot.slane %v21289_v18, %v15498_v51  ;;  %v10074_v39 = vrot.slane %v10066_v3, %v15498_v51  ;;  %v10623_v22 = vcombine.low %v18780_v43, %v7658_v38  ;;  %v21291_v21 = vcombine.low %v17772_v53, %v17916_v10  ;;  %v10410_v3 = vpop.permute.xlu0 %10409 }
 0x370   :  { %v7651_v14 = vcombine.low %v18861_v19, %v18867_v37  ;;  %v9592_v59 = vrot.slane %v21290_v58, %v15498_v51  ;;  %v4617_v47 = vcombine.high %v4609_v27, %v4609_v27  ;;  %v4618_v28 = vcombine.high %v4616_v29, %v4616_v29 }
 0x371   :  { %v10067_v60 = vcombine.low %v8590_v24, %v18874_v6  ;;  %v18892_v35 = vrot.slane %v4609_v27, %v15498_v51  ;;  %v18898_v40 = vrot.slane %v4616_v29, %v15498_v51  ;;  %v9599_v15 = vrot.slane %v21291_v21, %v15498_v51  ;;  %10699 = vrot.lane.b32.xlu0 %v10623_v22, %s14307_s7 }
 0x372   :  { %v18895_v23 = vrot.slane %v7651_v14, %v15498_v51  ;;  %v18907_v43 = vrot.slane %v4617_v47, %v15498_v51  ;;  %v18910_v26 = vrot.slane %v4618_v28, %v15498_v51  ;;  %v9311_v27 = vpop.permute.xlu1 %9310  ;;  %v13838_v58 = vcombine.high %v18481_v50, %v18497_v1 }
 0x373   :  { %v10081_v63 = vrot.slane %v10067_v60, %v15498_v51  ;;  %v18914_v12 = vcombine.high %v18892_v35, %v18892_v35  ;;  %v6766_v18 = vshll.u32 %v18892_v35, 16  ;;  %v9600_v14 = vcombine.low %v9592_v59, %v9599_v15  ;;  %9357 = vst.msk [vmem:[#allocation2 + $0xc0] sm:$0xff] %vm9348_vm8, %v9311_v27  ;;  %v18920_v60 = vpop.f32.mrb[90].mxu0 }
 0x374   :  { %v7666_v29 = vcombine.low %v7658_v38, %v18895_v23  ;;  %v8605_v22 = vcombine.low %v8583_v25, %v8590_v24  ;;  %v3568_v47 = vadd.f32 %v18732_v52, %v18120_v20  ;;  %v18928_v28 = vcombine.high %v18673_v62, %v18673_v62  ;;  %v14123_v38 = vpop.f32.mrb[91].mxu0 }
 0x375   :  { %v10082_v10 = vcombine.low %v10074_v39, %v10081_v63  ;;  %9844 = vst.msk [vmem:[#allocation2 + $0xb0] sm:$0xff] %vm5820_vm2, %v9600_v14  ;;  %v5511_v39 = vcombine.low %v18497_v1, %v18501_v17  ;;  %v5557_v59 = vcombine.low %v18521_v41, %v18673_v62  ;;  %v18940_v20 = vrot.slane %v5559_v36, %v15498_v51 }
 0x376   :  { %7936 = vrot.lane.b32.xlu1 %v7666_v29, %s14308_s8  ;;  %v3573_v50 = vadd.f32 %v18732_v52, %v18217_v11  ;;  %10270 = vst.msk [vmem:[#allocation2 + $0xb0] sm:$0xff] %vm7966_vm3, %v10224_v0  ;;  %v18947_v25 = vrot.slane %v13838_v58, %v15498_v51  ;;  %v8613_v1 = vrot.slane %v8605_v22, %v15498_v51  ;;  %v3659_v17 = vmax.f32 %v3568_v47, 0.0 }
 0x377   :  { %10231 = vrot.lane.b32.xlu0 %v10082_v10, %s14308_s8  ;;  %v5558_v24 = vcombine.low %v18692_v54, %v18928_v28  ;;  %v10694_v63 = vpop.permute.xlu0 %10693  ;;  %10456 = vst.msk [vmem:[#allocation2 + $0xb0] sm:$0xff] %vm8921_vm7, %v10410_v3  ;;  %v5539_v36 = vrot.slane %v5511_v39, %v15498_v51  ;;  %v5567_v11 = vrot.slane %v5557_v59, %v15498_v51  ;;  %v6704_v10 = vshrl.u32 %v18521_v41, 16 }
 0x378   :  { %v3660_v21 = vmax.f32 %v3573_v50, 0.0  ;;  %v4600_v0 = vcombine.high %v18692_v54, %v18692_v54  ;;  %v8606_v15 = vcombine.low %v18874_v6, %v18947_v25  ;;  %v10809_v27 = vcombine.low %v18783_v30, %v8613_v1  ;;  %10740 = vst.msk [vmem:[#allocation2 + $0xb0] sm:$0xff] %vm9348_vm8, %v10694_v63 }
 0x379   :  { %v5574_v29 = vrot.slane %v5558_v24, %v15498_v51  ;;  %v9168_v3 = vcombine.low %v5539_v36, %v5567_v11  ;;  %v5541_v14 = vcombine.low %v18786_v7, %v5539_v36  ;;  %v6709_v30 = vshll.u32 %v18673_v62, 16  ;;  %v18974_v50 = vpop.f32.mrb[92].mxu0 }
 0x37a   :  { %v3689_v58 = vpack.c.bf16 %v3660_v21, %v3659_v17  ;;  %v13659_v22 = vpack.c.bf16 %v3660_v21, %v3660_v21  ;;  %v18965_v47 = vrot.slane %v8606_v15, %v15498_v51  ;;  %10893 = vst.msk [vmem:[#allocation2 + $0x100] sm:$0xff] %vm5820_vm2, %v10809_v27  ;;  %v5606_v34 = vcombine.low %v18892_v35, %v18907_v43 }
 0x37b   :  { %v9169_v6 = vcombine.low %v5574_v29, %v18940_v20  ;;  %v5589_v38 = vcombine.low %v5567_v11, %v5574_v29  ;;  %v9176_v39 = vrot.slane %v9168_v3, %v15498_v51  ;;  %v5555_v41 = vrot.slane %v5541_v14, %v15498_v51  ;;  %v14126_v11 = vpop.f32.mrb[93].mxu0 }
 0x37c   :  { %v4658_v59 = vrot.slane %v3689_v58, %v15498_v51  ;;  %v4665_v7 = vrot.slane %v13659_v22, %v15498_v51  ;;  %v8621_v17 = vcombine.low %v8613_v1, %v18965_v47  ;;  %v6711_v36 = vsel %vm15951_vm14, %v6704_v10, %v6709_v30 }
 0x37d   :  { %v9183_v24 = vrot.slane %v9169_v6, %v15498_v51  ;;  %v18979_v63 = vrot.slane %v5589_v38, %v15498_v51  ;;  %v5556_v21 = vcombine.low %v18798_v55, %v5555_v41  ;;  %v6712_v58 = vshrl.u32 %v18673_v62, 16 }
 0x37e   :  { %v4666_v15 = vcombine.high %v4658_v59, %v4658_v59  ;;  %v4667_v27 = vcombine.high %v4665_v7, %v4665_v7  ;;  %v18985_v29 = vrot.slane %v4658_v59, %v15498_v51  ;;  %8891 = vrot.lane.b32.xlu1 %v8621_v17, %s14299_s0  ;;  %v18990_v14 = vrot.slane %v4665_v7, %v15498_v51  ;;  %v10922_v7 = vld [vmem:[#allocation2 + $0xa8] sm:$0xff] }
 0x37f   :  { %v9184_v3 = vcombine.low %v9176_v39, %v9183_v24  ;;  %v10340_v1 = vcombine.low %v5555_v41, %v18979_v63  ;;  %5833 = vst.msk [vmem:[#allocation2 + $0x120] sm:$0xff] %vm5820_vm2, %v5556_v21  ;;  %v6717_v22 = vshll.u32 %v18692_v54, 16  ;;  %v6720_v6 = vshrl.u32 %v18692_v54, 16  ;;  %v10923_v38 = vld [vmem:[#allocation2 + $0xb0] sm:$0xff] }
 0x380   :  { %v18995_v10 = vrot.slane %v4666_v15, %v15498_v51  ;;  %v18998_v55 = vrot.slane %v4667_v27, %v15498_v51  ;;  %v19005_v30 = vcombine.high %v18990_v14, %v18990_v14  ;;  %v6725_v39 = vshll.u32 %v18928_v28, 16  ;;  %11248 = vmatprep.mubr.bf16.mxu1 %v10923_v38 }
 0x381   :  { %10417 = vrot.lane.b32.xlu0 %v10340_v1, %s14299_s0  ;;  %v6728_v41 = vshrl.u32 %v18928_v28, 16  ;;  %v6733_v59 = vshll.u32 %v4600_v0, 16  ;;  %v6719_v11 = vsel %vm15951_vm14, %v6712_v58, %v6717_v22  ;;  %v8622_v21 = vcombine.low %v18673_v62, %v18692_v54  ;;  %11249 = vmatmul.mubr.bf16.gmra.mrb[28].mxu1 %v10922_v7 }
 0x382   :  { %v19011_v17 = vcombine.high %v18995_v10, %v18995_v10  ;;  %9318 = vrot.lane.b32.xlu1 %v9184_v3, %s14307_s7  ;;  %v6727_v28 = vsel %vm15951_vm14, %v6720_v6, %v6725_v39  ;;  %v7667_v15 = vcombine.low %v6711_v36, %v6719_v11  ;;  %v13839_v27 = vcombine.high %v18673_v62, %v18692_v54 }
 0x383   :  { %v6735_v0 = vsel %vm15951_vm14, %v6728_v41, %v6733_v59  ;;  %v8624_v58 = vcombine.low %v18695_v42, %v18701_v57  ;;  %v8632_v22 = vrot.slane %v8622_v21, %v15498_v51  ;;  %v3578_v38 = vadd.f32 %v18732_v52, %v18284_v44 }
 0x384   :  { %v7668_v1 = vcombine.low %v6727_v28, %v6735_v0  ;;  %v19031_v3 = vrot.slane %v7667_v15, %v15498_v51  ;;  %v8639_v6 = vrot.slane %v13839_v27, %v15498_v51  ;;  %v4601_v36 = vcombine.high %v18695_v42, %v18695_v42 }
 0x385   :  { %v6742_v39 = vshll.u32 %v18695_v42, 16  ;;  %v19041_v54 = vrot.slane %v8624_v58, %v15498_v51  ;;  %v10083_v41 = vcombine.low %v18947_v25, %v8632_v22  ;;  %v3661_v59 = vmax.f32 %v3578_v38, 0.0 }
 0x386   :  { %v19038_v62 = vrot.slane %v7668_v1, %v15498_v51  ;;  %v21293_v7 = vshrl.u32 %v18678_v46, 16  ;;  %v6745_v21 = vshrl.u32 %v18695_v42, 16  ;;  %v6758_v28 = vshll.u32 %v4601_v36, 16 }
 0x387   :  { %v10084_v15 = vcombine.low %v8639_v6, %v19041_v54  ;;  %v10091_v27 = vrot.slane %v10083_v41, %v15498_v51  ;;  %v6761_v25 = vshrl.u32 %v4601_v36, 16  ;;  %v21294_v1 = vshll.u32 %v18701_v57, 16 }
 0x388   :  { %21292 = vst [vmem:[#allocation25_spill] sm:$0xff] %v19038_v62  ;;  %v6744_v11 = vsel %vm15951_vm14, %v21293_v7, %v6742_v39  ;;  %v7699_v0 = vcombine.low %v19031_v3, %v19038_v62  ;;  %v21295_v38 = vshrl.u32 %v18701_v57, 16  ;;  %v19065_v7 = vcombine.high %v18907_v43, %v18907_v43 }
 0x389   :  { %v6752_v58 = vsel %vm15951_vm14, %v6745_v21, %v21294_v1  ;;  %v13678_v44 = vcombine.high %v18678_v46, %v18695_v42  ;;  %v10098_v56 = vrot.slane %v10084_v15, %v15498_v51  ;;  %v6768_v21 = vsel %vm15951_vm14, %v6761_v25, %v6766_v18  ;;  %v19075_v1 = vpop.f32.mrb[94].mxu0 }
 0x38a   :  { %v6760_v39 = vsel %vm15951_vm14, %v21295_v38, %v6758_v28  ;;  %v7707_v41 = vrot.slane %v7699_v0, %v15498_v51  ;;  %v7669_v57 = vcombine.low %v6744_v11, %v6752_v58  ;;  %v5607_v46 = vcombine.low %v19065_v7, %v18898_v40  ;;  %v14129_v42 = vpop.f32.mrb[95].mxu0 }
 0x38b   :  { %v7670_v28 = vcombine.low %v6760_v39, %v6768_v21  ;;  %v19078_v38 = vrot.slane %v13678_v44, %v15498_v51  ;;  %v10099_v15 = vcombine.low %v10091_v27, %v10098_v56  ;;  %v6786_v18 = vshrl.u32 %v19065_v7, 16  ;;  %v19110_v39 = vpop.f32.mrb[96].mxu0 }
 0x38c   :  { %v10624_v0 = vcombine.low %v18895_v23, %v7707_v41  ;;  %v19086_v24 = vrot.slane %v7669_v57, %v15498_v51  ;;  %v19095_v25 = vrot.slane %v5606_v34, %v15498_v51  ;;  %v19098_v58 = vrot.slane %v5607_v46, %v15498_v51 }
 0x38d   :  { %v19090_v11 = vrot.slane %v7670_v28, %v15498_v51  ;;  %v5590_v44 = vcombine.low %v18940_v20, %v19078_v38  ;;  %v3583_v23 = vadd.f32 %v18732_v52, %v18418_v31  ;;  %v19107_v27 = vcombine.high %v18998_v55, %v18998_v55  ;;  %v14132_v28 = vpop.f32.mrb[97].mxu0 }
 0x38e   :  { %21296 = vst [vmem:[#allocation26_spill] sm:$0xff] %v19086_v24  ;;  %10701 = vrot.lane.b32.xlu0 %v10624_v0, %s14307_s7  ;;  %v8625_v20 = vcombine.low %v4601_v36, %v18892_v35  ;;  %v5638_v21 = vcombine.low %v19095_v25, %v19098_v58  ;;  %v8654_v57 = vcombine.low %v8632_v22, %v8639_v6  ;;  %v6774_v42 = vshll.u32 %v18907_v43, 16 }
 0x38f   :  { %21297 = vst [vmem:[#allocation27_spill] sm:$0xff] %v19090_v11  ;;  %v7700_v34 = vcombine.low %v19086_v24, %v19090_v11  ;;  %v5604_v7 = vrot.slane %v5590_v44, %v15498_v51  ;;  %v3662_v46 = vmax.f32 %v3583_v23, 0.0  ;;  %v6777_v36 = vshrl.u32 %v18907_v43, 16  ;;  %v19137_v28 = vpop.f32.mrb[100].mxu0  ;;  %v10226_v11 = vpop.permute.xlu0 %10225 }
 0x390   :  { %v19118_v31 = vrot.slane %v8625_v20, %v15498_v51  ;;  %v19127_v44 = vrot.slane %v5638_v21, %v15498_v51  ;;  %v8662_v53 = vrot.slane %v8654_v57, %v15498_v51  ;;  %v21298_v20 = vshrl.u32 %v18892_v35, 16  ;;  %21299 = vst [vmem:[#allocation28_spill] sm:$0xff] %v19137_v28  ;;  %v19144_v57 = vpop.f32.mrb[101].mxu0 }
 0x391   :  { %v19123_v0 = vrot.slane %v7700_v34, %v15498_v51  ;;  %v5605_v56 = vcombine.low %v18979_v63, %v5604_v7  ;;  %v3690_v22 = vpack.c.bf16 %v3662_v46, %v3661_v59  ;;  %v13660_v6 = vpack.c.bf16 %v3662_v46, %v3662_v46 }
 0x392   :  { %10233 = vrot.lane.b32.xlu0 %v10099_v15, %s14308_s8  ;;  %v8655_v23 = vcombine.low %v19041_v54, %v19118_v31  ;;  %v6776_v34 = vsel %vm15951_vm14, %v21298_v20, %v6774_v42  ;;  %v10341_v21 = vcombine.low %v5604_v7, %v19127_v44  ;;  %v10810_v15 = vcombine.low %v18965_v47, %v8662_v53 }
 0x393   :  { %v7715_v63 = vcombine.low %v7707_v41, %v19123_v0  ;;  %5834 = vst.msk [vmem:[#allocation2 + $0x138] sm:$0xff] %vm5820_vm2, %v5605_v56  ;;  %v6782_v59 = vshll.u32 %v18914_v12, 16  ;;  %v4707_v54 = vrot.slane %v3690_v22, %v15498_v51  ;;  %v4714_v35 = vrot.slane %v13660_v6, %v15498_v51  ;;  %v19152_v41 = vpop.f32.mrb[102].mxu0 }
 0x394   :  { %v19149_v46 = vrot.slane %v8655_v23, %v15498_v51  ;;  %v6791_v42 = vshll.u32 %v18898_v40, 16  ;;  %21300 = vst [vmem:[#allocation29_spill] sm:$0xff] %v19152_v41  ;;  %10894 = vst.msk [vmem:[#allocation2 + $0x118] sm:$0xff] %vm5820_vm2, %v10810_v15  ;;  %v6794_v56 = vshrl.u32 %v18898_v40, 16  ;;  %v6799_v7 = vshll.u32 %v18910_v26, 16  ;;  %v19162_v6 = vpop.f32.mrb[103].mxu0 }
 0x395   :  { %7938 = vrot.lane.b32.xlu1 %v7715_v63, %s14308_s8  ;;  %v6784_v47 = vsel %vm15951_vm14, %v6777_v36, %v6782_v59  ;;  %v4648_v22 = vcombine.high %v18898_v40, %v18898_v40  ;;  %21301 = vst [vmem:[#allocation30_spill] sm:$0xff] %v19162_v6  ;;  %v4715_v23 = vcombine.high %v4707_v54, %v4707_v54  ;;  %v6826_v24 = vshrl.u32 %v18985_v29, 16 }
 0x396   :  { %10419 = vrot.lane.b32.xlu0 %v10341_v21, %s14299_s0  ;;  %v4716_v20 = vcombine.high %v4714_v35, %v4714_v35  ;;  %v19166_v63 = vrot.slane %v4707_v54, %v15498_v51  ;;  %v19169_v15 = vrot.slane %v4714_v35, %v15498_v51  ;;  %v8670_v36 = vcombine.low %v8662_v53, %v19149_v46 }
 0x397   :  { %v6793_v59 = vsel %vm15951_vm14, %v6786_v18, %v6791_v42  ;;  %v6801_v41 = vsel %vm15951_vm14, %v6794_v56, %v6799_v7  ;;  %v7716_v28 = vcombine.low %v6776_v34, %v6784_v47  ;;  %v19177_v6 = vrot.slane %v4715_v23, %v15498_v51 }
 0x398   :  { %v19180_v21 = vrot.slane %v4716_v20, %v15498_v51  ;;  %v19184_v54 = vcombine.high %v19166_v63, %v19166_v63  ;;  %v7717_v18 = vcombine.low %v6793_v59, %v6801_v41  ;;  %v5608_v42 = vcombine.low %v18910_v26, %v4648_v22  ;;  %v19199_v20 = vpop.f32.mrb[104].mxu0 }
 0x399   :  { %8893 = vrot.lane.b32.xlu1 %v8670_v36, %s14299_s0  ;;  %v19191_v34 = vrot.slane %v7716_v28, %v15498_v51  ;;  %v9185_v23 = vcombine.low %v19078_v38, %v19095_v25  ;;  %21303 = vst [vmem:[#allocation33_spill] sm:$0xff] %v19199_v20  ;;  %v19211_v36 = vadd.f32 %v18732_v52, %v18539_v8  ;;  %v19213_v59 = vpop.f32.mrb[105].mxu0  ;;  %v6802_v53 = vshrl.u32 %v18910_v26, 16 }
 0x39a   :  { %v19202_v35 = vrot.slane %v7717_v18, %v15498_v51  ;;  %v19207_v41 = vrot.slane %v5608_v42, %v15498_v51  ;;  %21305 = vst [vmem:[#allocation35_spill] sm:$0xff] %v19213_v59  ;;  %v8671_v38 = vcombine.low %v18907_v43, %v18914_v12  ;;  %v8672_v25 = vcombine.low %v18898_v40, %v18910_v26  ;;  %v19222_v28 = vpop.f32.mrb[106].mxu0 }
 0x39b   :  { %21302 = vst [vmem:[#allocation32_spill] sm:$0xff] %v19191_v34  ;;  %v9193_v7 = vrot.slane %v9185_v23, %v15498_v51  ;;  %v13840_v18 = vcombine.high %v18898_v40, %v18910_v26  ;;  %21306 = vst [vmem:[#allocation36_spill] sm:$0xff] %v19222_v28  ;;  %v3663_v47 = vmax.f32 %v19211_v36, 0.0  ;;  %v4650_v23 = vcombine.high %v18910_v26, %v18910_v26  ;;  %v19231_v43 = vpop.f32.mrb[107].mxu0 }
 0x39c   :  { %21304 = vst [vmem:[#allocation34_spill] sm:$0xff] %v19202_v35  ;;  %v7748_v42 = vcombine.low %v19191_v34, %v19202_v35  ;;  %v9186_v8 = vcombine.low %v19098_v58, %v19207_v41  ;;  %21307 = vst [vmem:[#allocation37_spill] sm:$0xff] %v19231_v43  ;;  %v8681_v12 = vrot.slane %v8671_v38, %v15498_v51  ;;  %v6807_v36 = vshll.u32 %v4648_v22, 16 }
 0x39d   :  { %v8688_v56 = vrot.slane %v8672_v25, %v15498_v51  ;;  %v19236_v40 = vrot.slane %v13840_v18, %v15498_v51  ;;  %v6810_v20 = vshrl.u32 %v4648_v22, 16  ;;  %v6815_v34 = vshll.u32 %v4650_v23, 16 }
 0x39e   :  { %v19240_v28 = vrot.slane %v7748_v42, %v15498_v51  ;;  %v9200_v58 = vrot.slane %v9186_v8, %v15498_v51  ;;  %v10100_v59 = vcombine.low %v19118_v31, %v8681_v12  ;;  %v6818_v38 = vshrl.u32 %v4650_v23, 16 }
 0x39f   :  { %v10101_v43 = vcombine.low %v8688_v56, %v19236_v40  ;;  %v6809_v26 = vsel %vm15951_vm14, %v6802_v53, %v6807_v36  ;;  %v6823_v42 = vshll.u32 %v18985_v29, 16  ;;  %v6817_v31 = vsel %vm15951_vm14, %v6810_v20, %v6815_v34 }
 0x3a0   :  { %v10625_v25 = vcombine.low %v19123_v0, %v19240_v28  ;;  %v9201_v18 = vcombine.low %v9193_v7, %v9200_v58  ;;  %v10108_v8 = vrot.slane %v10100_v59, %v15498_v51  ;;  %v7718_v7 = vcombine.low %v6809_v26, %v6817_v31  ;;  %v21312_v31 = vld [vmem:[#allocation16_spill] sm:$0xff] }
 0x3a1   :  { %v10115_v22 = vrot.slane %v10101_v43, %v15498_v51  ;;  %v6825_v0 = vsel %vm15951_vm14, %v6818_v38, %v6823_v42  ;;  %v5609_v53 = vcombine.low %v4650_v23, %v18985_v29  ;;  %v6840_v58 = vshll.u32 %v19011_v17, 16 }
 0x3a2   :  { %10703 = vrot.lane.b32.xlu0 %v10625_v25, %s14307_s7  ;;  %9320 = vrot.lane.b32.xlu1 %v9201_v18, %s14307_s7  ;;  %v21308_v43 = vshll.u32 %v18995_v10, 16  ;;  %v13679_v20 = vcombine.high %v18985_v29, %v18995_v10  ;;  %v5656_v36 = vcombine.low %v18990_v14, %v18998_v55  ;;  %v10412_v25 = vpop.permute.xlu0 %10411  ;;  %v19270_v38 = vrot.slane %v7718_v7, %v15498_v51 }
 0x3a3   :  { %v10116_v59 = vcombine.low %v10108_v8, %v10115_v22  ;;  %v19273_v23 = vrot.slane %v5609_v53, %v15498_v51  ;;  %v21310_v26 = vcombine.low %v17931_v45, %v18064_v33  ;;  %v21311_v22 = vld [vmem:[#allocation14_spill] sm:$0xff]  ;;  %v3593_v53 = vadd.f32 %v18732_v52, %v18652_v61 }
 0x3a4   :  { %v6833_v34 = vsel %vm15951_vm14, %v6826_v24, %v21308_v43  ;;  %21309 = vst [vmem:[#allocation38_spill] sm:$0xff] %v19270_v38  ;;  %v19280_v24 = vrot.slane %v13679_v20, %v15498_v51  ;;  %v19283_v8 = vrot.slane %v5656_v36, %v15498_v51  ;;  %v8703_v61 = vcombine.low %v8681_v12, %v8688_v56 }
 0x3a5   :  { %v7719_v18 = vcombine.low %v6825_v0, %v6833_v34  ;;  %v9633_v42 = vrot.slane %v21310_v26, %v15498_v51  ;;  %v21313_v0 = vcombine.low %v21311_v22, %v21312_v31  ;;  %v5639_v33 = vcombine.low %v19207_v41, %v19273_v23 }
 0x3a6   :  { %10235 = vrot.lane.b32.xlu0 %v10116_v59, %s14308_s8  ;;  %v8674_v34 = vcombine.low %v18985_v29, %v18995_v10  ;;  %v5687_v20 = vcombine.low %v19280_v24, %v19283_v8  ;;  %v3664_v26 = vmax.f32 %v3593_v53, 0.0  ;;  %v4696_v41 = vcombine.high %v18985_v29, %v18985_v29  ;;  %v10696_v12 = vpop.permute.xlu0 %10695 }
 0x3a7   :  { %v9640_v7 = vrot.slane %v21313_v0, %v15498_v51  ;;  %v19293_v43 = vrot.slane %v7719_v18, %v15498_v51  ;;  %v5653_v18 = vrot.slane %v5639_v33, %v15498_v51  ;;  %v8711_v56 = vrot.slane %v8703_v61, %v15498_v51 }
 0x3a8   :  { %v19307_v22 = vrot.slane %v8674_v34, %v15498_v51  ;;  %v19312_v31 = vrot.slane %v5687_v20, %v15498_v51  ;;  %v3691_v10 = vpack.c.bf16 %v3664_v26, %v3663_v47  ;;  %v6835_v53 = vshrl.u32 %v4696_v41, 16 }
 0x3a9   :  { %21314 = vst [vmem:[#allocation40_spill] sm:$0xff] %v19293_v43  ;;  %v9641_v36 = vcombine.low %v9633_v42, %v9640_v7  ;;  %v7749_v59 = vcombine.low %v19270_v38, %v19293_v43  ;;  %v13661_v42 = vpack.c.bf16 %v3664_v26, %v3664_v26  ;;  %v5654_v7 = vcombine.low %v19127_v44, %v5653_v18 }
 0x3aa   :  { %v8704_v29 = vcombine.low %v19236_v40, %v19307_v22  ;;  %v10342_v33 = vcombine.low %v5653_v18, %v19312_v31  ;;  %v4756_v34 = vrot.slane %v3691_v10, %v15498_v51  ;;  %v10811_v20 = vcombine.low %v19149_v46, %v8711_v56 }
 0x3ab   :  { %9845 = vst.msk [vmem:[#allocation2 + $0xc8] sm:$0xff] %vm5820_vm2, %v9641_v36  ;;  %v19317_v0 = vrot.slane %v7749_v59, %v15498_v51  ;;  %v4763_v47 = vrot.slane %v13661_v42, %v15498_v51  ;;  %v19328_v36 = vpop.permute.xlu1 %7930  ;;  %5835 = vst.msk [vmem:[#allocation2 + $0x150] sm:$0xff] %vm5820_vm2, %v5654_v7  ;;  %v6842_v40 = vsel %vm15951_vm14, %v6835_v53, %v6840_v58  ;;  %v6843_v26 = vshrl.u32 %v19011_v17, 16 }
 0x3ac   :  { %10271 = vst.msk [vmem:[#allocation2 + $0xc8] sm:$0xff] %vm7966_vm3, %v10226_v11  ;;  %v19334_v11 = vrot.slane %v8704_v29, %v15498_v51  ;;  %10421 = vrot.lane.b32.xlu0 %v10342_v33, %s14299_s0  ;;  %v4764_v46 = vcombine.high %v4756_v34, %v4756_v34  ;;  %v19342_v61 = vrot.slane %v4756_v34, %v15498_v51  ;;  %v6848_v59 = vshll.u32 %v18990_v14, 16 }
 0x3ad   :  { %10457 = vst.msk [vmem:[#allocation2 + $0xc8] sm:$0xff] %vm8921_vm7, %v10412_v25  ;;  %v7764_v44 = vcombine.low %v19240_v28, %v19317_v0  ;;  %v4765_v25 = vcombine.high %v4763_v47, %v4763_v47  ;;  %v19345_v28 = vrot.slane %v4763_v47, %v15498_v51  ;;  %v6851_v18 = vshrl.u32 %v18990_v14, 16 }
 0x3ae   :  { %10741 = vst.msk [vmem:[#allocation2 + $0xc8] sm:$0xff] %vm9348_vm8, %v10696_v12  ;;  %v8719_v58 = vcombine.low %v8711_v56, %v19334_v11  ;;  %v6856_v41 = vshll.u32 %v18998_v55, 16  ;;  %v19354_v10 = vrot.slane %v4764_v46, %v15498_v51  ;;  %v19361_v12 = vcombine.high %v19342_v61, %v19342_v61 }
 0x3af   :  { %10895 = vst.msk [vmem:[#allocation2 + $0x130] sm:$0xff] %vm5820_vm2, %v10811_v20  ;;  %7940 = vrot.lane.b32.xlu1 %v7764_v44, %s14308_s8  ;;  %v19357_v42 = vrot.slane %v4765_v25, %v15498_v51  ;;  %v19365_v7 = vcombine.high %v19345_v28, %v19345_v28  ;;  %v6850_v33 = vsel %vm15951_vm14, %v6843_v26, %v6848_v59  ;;  %v19378_v46 = vpop.permute.xlu1 %8885  ;;  %v6859_v25 = vshrl.u32 %v18998_v55, 16 }
 0x3b0   :  { %v6858_v44 = vsel %vm15951_vm14, %v6851_v18, %v6856_v41  ;;  %v6864_v45 = vshll.u32 %v19005_v30, 16  ;;  %v7765_v53 = vcombine.low %v6842_v40, %v6850_v33  ;;  %v13680_v26 = vcombine.high %v18990_v14, %v18998_v55 }
 0x3b1   :  { %v9202_v59 = vcombine.low %v19273_v23, %v19280_v24  ;;  %v19389_v29 = vadd.f32 %v18732_v52, %v18738_v49  ;;  %v8720_v18 = vcombine.low %v19011_v17, %v18990_v14  ;;  %v21316_v49 = vcombine.low %v19107_v27, %v19166_v63  ;;  %v10925_v14 = vld [vmem:[#allocation2 + $0xc0] sm:$0xff] }
 0x3b2   :  { %v6866_v40 = vsel %vm15951_vm14, %v6859_v25, %v6864_v45  ;;  %v19398_v33 = vrot.slane %v7765_v53, %v15498_v51  ;;  %v5679_v20 = vrot.slane %v13680_v26, %v15498_v51 }
 0x3b3   :  { %8895 = vrot.lane.b32.xlu1 %v8719_v58, %s14299_s0  ;;  %v8721_v58 = vcombine.low %v18998_v55, %v19005_v30  ;;  %v19405_v23 = vrot.slane %v21316_v49, %v15498_v51  ;;  %v7766_v17 = vcombine.low %v6858_v44, %v6866_v40  ;;  %v9210_v55 = vrot.slane %v9202_v59, %v15498_v51 }
 0x3b4   :  { %21315 = vst [vmem:[#allocation23_spill] sm:$0xff] %v19398_v33  ;;  %v19410_v45 = vrot.slane %v8720_v18, %v15498_v51  ;;  %v9203_v25 = vcombine.low %v19283_v8, %v5679_v20  ;;  %v4747_v18 = vcombine.high %v19177_v6, %v19177_v6  ;;  %v5658_v40 = vcombine.low %v19177_v6, %v19184_v54  ;;  %v19431_v8 = vpop.permute.xlu1 %9312 }
 0x3b5   :  { %v10926_v41 = vld [vmem:[#allocation2 + $0xc8] sm:$0xff]  ;;  %v19416_v26 = vrot.slane %v8721_v58, %v15498_v51  ;;  %v19423_v44 = vrot.slane %v7766_v17, %v15498_v51  ;;  %v6867_v17 = vshrl.u32 %v19005_v30, 16  ;;  %v6872_v30 = vshll.u32 %v19107_v27, 16 }
 0x3b6   :  { %11256 = vmatprep.mubr.bf16.mxu1 %v10926_v41  ;;  %v19420_v41 = vcombine.high %v19169_v15, %v19169_v15  ;;  %v10117_v59 = vcombine.low %v19307_v22, %v19410_v45  ;;  %v9217_v58 = vrot.slane %v9203_v25, %v15498_v51  ;;  %v19439_v53 = vpop.f32.mrb[108].mxu0  ;;  %v19445_v56 = vrot.slane %v5658_v40, %v15498_v51 }
 0x3b7   :  { %11257 = vmatmul.mubr.bf16.gmra.mrb[32].mxu1 %v10925_v14  ;;  %21317 = vst [vmem:[#allocation24_spill] sm:$0xff] %v19423_v44  ;;  %v10118_v49 = vcombine.low %v19416_v26, %v19405_v23  ;;  %21318 = vst [vmem:[#allocation39_spill] sm:$0xff] %v19439_v53  ;;  %v7797_v22 = vcombine.low %v19398_v33, %v19423_v44  ;;  %v5704_v25 = vcombine.low %v4747_v18, %v19169_v15  ;;  %v19448_v34 = vpop.f32.mrb[109].mxu0 }
 0x3b8   :  { %v5705_v14 = vcombine.low %v19180_v21, %v19420_v41  ;;  %v10125_v47 = vrot.slane %v10117_v59, %v15498_v51  ;;  %21319 = vst [vmem:[#allocation41_spill] sm:$0xff] %v19448_v34  ;;  %v9218_v24 = vcombine.low %v9210_v55, %v9217_v58  ;;  %v19455_v53 = vpop.f32.mrb[110].mxu0  ;;  %v5688_v59 = vcombine.low %v5679_v20, %v19445_v56 }
 0x3b9   :  { %v10132_v43 = vrot.slane %v10118_v49, %v15498_v51  ;;  %21320 = vst [vmem:[#allocation42_spill] sm:$0xff] %v19455_v53  ;;  %v19458_v33 = vrot.slane %v7797_v22, %v15498_v51  ;;  %v19462_v40 = vrot.slane %v5704_v25, %v15498_v51  ;;  %v6875_v34 = vshrl.u32 %v19107_v27, 16  ;;  %v19465_v55 = vpop.f32.mrb[111].mxu0 }
 0x3ba   :  { %v19452_v38 = vrot.slane %v5705_v14, %v15498_v51  ;;  %21321 = vst [vmem:[#allocation15_spill] sm:$0xff] %v19465_v55  ;;  %9322 = vrot.lane.b32.xlu1 %v9218_v24, %s14307_s7  ;;  %v6874_v49 = vsel %vm15951_vm14, %v6867_v17, %v6872_v30  ;;  %v21322_v14 = vshll.u32 %v19184_v54, 16  ;;  %v21323_v22 = vshrl.u32 %v19177_v6, 16 }
 0x3bb   :  { %v10133_v58 = vcombine.low %v10125_v47, %v10132_v43  ;;  %v6897_v53 = vshll.u32 %v4747_v18, 16  ;;  %v10626_v25 = vcombine.low %v19317_v0, %v19458_v33  ;;  %v5702_v27 = vrot.slane %v5688_v59, %v15498_v51 }
 0x3bc   :  { %v6891_v20 = vsel %vm15951_vm14, %v21323_v22, %v21322_v14  ;;  %v5736_v24 = vcombine.low %v19462_v40, %v19452_v38  ;;  %v21324_v43 = vshll.u32 %v19166_v63, 16  ;;  %v21325_v30 = vshrl.u32 %v19184_v54, 16 }
 0x3bd   :  { %v3603_v0 = vadd.f32 %v18732_v52, %v18920_v60  ;;  %v4748_v59 = vcombine.high %v19180_v21, %v19180_v21  ;;  %10705 = vrot.lane.b32.xlu0 %v10626_v25, %s14307_s7  ;;  %v5703_v55 = vcombine.low %v19312_v31, %v5702_v27  ;;  %v6905_v52 = vshll.u32 %v19169_v15, 16 }
 0x3be   :  { %v6882_v47 = vsel %vm15951_vm14, %v6875_v34, %v21324_v43  ;;  %v7933_v17 = vpop.permute.xlu1 %7932  ;;  %v6899_v14 = vsel %vm15951_vm14, %v21325_v30, %v6897_v53  ;;  %v19497_v34 = vrot.slane %v5736_v24, %v15498_v51  ;;  %v6900_v43 = vshrl.u32 %v4747_v18, 16 }
 0x3bf   :  { %v7767_v22 = vcombine.low %v6874_v49, %v6882_v47  ;;  %7977 = vst.msk [vmem:[#allocation2 + $0xf0] sm:$0xff] %vm7966_vm3, %v7933_v17  ;;  %v7768_v54 = vcombine.low %v6891_v20, %v6899_v14  ;;  %v3666_v49 = vmax.f32 %v3603_v0, 0.0  ;;  %v6908_v60 = vshrl.u32 %v19169_v15, 16 }
 0x3c0   :  { %v10343_v47 = vcombine.low %v5702_v27, %v19497_v34  ;;  %5836 = vst.msk [vmem:[#allocation2 + $0x168] sm:$0xff] %vm5820_vm2, %v5703_v55  ;;  %v6913_v31 = vshll.u32 %v19180_v21, 16  ;;  %v6916_v20 = vshrl.u32 %v19180_v21, 16  ;;  %v21328_v17 = vmax.f32 %v19389_v29, 0.0 }
 0x3c1   :  { %v19500_v53 = vrot.slane %v7767_v22, %v15498_v51  ;;  %v19507_v25 = vrot.slane %v7768_v54, %v15498_v51  ;;  %v13662_v14 = vpack.c.bf16 %v3666_v49, %v3666_v49  ;;  %v6907_v27 = vsel %vm15951_vm14, %v6900_v43, %v6905_v52  ;;  %10237 = vrot.lane.b32.xlu0 %v10133_v58, %s14308_s8 }
 0x3c2   :  { %v8888_v18 = vpop.permute.xlu1 %8887  ;;  %v3692_v30 = vpack.c.bf16 %v3666_v49, %v21328_v17  ;;  %v6915_v22 = vsel %vm15951_vm14, %v6908_v60, %v6913_v31  ;;  %v6921_v0 = vshll.u32 %v19420_v41, 16  ;;  %v6924_v54 = vshrl.u32 %v19420_v41, 16 }
 0x3c3   :  { %21326 = vst [vmem:[#allocation43_spill] sm:$0xff] %v19500_v53  ;;  %21327 = vst [vmem:[#allocation44_spill] sm:$0xff] %v19507_v25  ;;  %v7798_v55 = vcombine.low %v19500_v53, %v19507_v25  ;;  %v4812_v49 = vrot.slane %v13662_v14, %v15498_v51  ;;  %v6929_v17 = vshll.u32 %v4748_v59, 16  ;;  %v7814_v43 = vcombine.low %v6907_v27, %v6915_v22  ;;  %v21338_v53 = vld [vmem:[#allocation13_spill] sm:$0xff] }
 0x3c4   :  { %8932 = vst.msk [vmem:[#allocation2 + $0xf0] sm:$0xff] %vm8921_vm7, %v8888_v18  ;;  %v4805_v29 = vrot.slane %v3692_v30, %v15498_v51  ;;  %v6923_v58 = vsel %vm15951_vm14, %v6916_v20, %v6921_v0  ;;  %v13841_v18 = vcombine.high %v19166_v63, %v19177_v6  ;;  %v8752_v60 = vcombine.low %v19410_v45, %v19416_v26 }
 0x3c5   :  { %v19528_v52 = vrot.slane %v7798_v55, %v15498_v51  ;;  %v4814_v30 = vcombine.high %v4812_v49, %v4812_v49  ;;  %v19542_v59 = vrot.slane %v4812_v49, %v15498_v51  ;;  %10423 = vrot.lane.b32.xlu0 %v10343_v47, %s14299_s0  ;;  %v6931_v6 = vsel %vm15951_vm14, %v6924_v54, %v6929_v17  ;;  %v14221_v49 = vld [vmem:[%s21029_s2] ss:$0 sm:$0xff] }
 0x3c6   :  { %v19536_v31 = vpop.f32.mrb[0].mxu1  ;;  %v4813_v41 = vcombine.high %v4805_v29, %v4805_v29  ;;  %v19539_v14 = vrot.slane %v4805_v29, %v15498_v51  ;;  %v19550_v63 = vrot.slane %v7814_v43, %v15498_v51  ;;  %v8751_v45 = vrot.slane %v13841_v18, %v15498_v51  ;;  %v9315_v26 = vpop.permute.xlu1 %9314 }
 0x3c7   :  { %v11196_v27 = vpop.f32.mrb[1].mxu1  ;;  %v7813_v20 = vcombine.low %v19458_v33, %v19528_v52  ;;  %v19557_v22 = vrot.slane %v4814_v30, %v15498_v51  ;;  %v7815_v0 = vcombine.low %v6923_v58, %v6931_v6  ;;  %v8760_v47 = vrot.slane %v8752_v60, %v15498_v51  ;;  %9359 = vst.msk [vmem:[#allocation2 + $0xf0] sm:$0xff] %vm9348_vm8, %v9315_v26 }
 0x3c8   :  { %21329 = vst [vmem:[#allocation45_spill] sm:$0xff] %v19550_v63  ;;  %v19554_v55 = vrot.slane %v4813_v41, %v15498_v51  ;;  %v19561_v33 = vpop.f32.mrb[2].mxu1  ;;  %v8753_v29 = vcombine.low %v19405_v23, %v8751_v45  ;;  %v3608_v17 = vadd.f32 %v14221_v49, %v18974_v50  ;;  %v21330_v43 = vcombine.low %v19342_v61, %v19354_v10 }
 0x3c9   :  { %7942 = vrot.lane.b32.xlu1 %v7813_v20, %s14308_s8  ;;  %v11199_v18 = vpop.f32.mrb[3].mxu1  ;;  %v19579_v60 = vcombine.high %v19557_v22, %v19557_v22  ;;  %v19583_v23 = vrot.slane %v7815_v0, %v15498_v51  ;;  %v10812_v30 = vcombine.low %v19334_v11, %v8760_v47  ;;  %v9219_v20 = vcombine.low %v19445_v56, %v19462_v40 }
 0x3ca   :  { %v19575_v58 = vrot.slane %v21330_v43, %v15498_v51  ;;  %v19587_v50 = vrot.slane %v8753_v29, %v15498_v51  ;;  %v3667_v27 = vmax.f32 %v3608_v17, 0.0  ;;  %v8769_v0 = vcombine.low %v19169_v15, %v19180_v21 }
 0x3cb   :  { %21331 = vst [vmem:[#allocation14_spill] sm:$0xff] %v19583_v23  ;;  %v7846_v26 = vcombine.low %v19550_v63, %v19583_v23  ;;  %10896 = vst.msk [vmem:[#allocation2 + $0x148] sm:$0xff] %vm5820_vm2, %v10812_v30  ;;  %v13842_v11 = vcombine.high %v19169_v15, %v19180_v21  ;;  %v8771_v29 = vcombine.low %v19354_v10, %v19361_v12  ;;  %v6941_v54 = vshrl.u32 %v19354_v10, 16 }
 0x3cc   :  { %v9220_v6 = vcombine.low %v19452_v38, %v19575_v58  ;;  %v8768_v17 = vcombine.low %v8760_v47, %v19587_v50  ;;  %v9227_v56 = vrot.slane %v9219_v20, %v15498_v51  ;;  %v3613_v40 = vadd.f32 %v14221_v49, %v19075_v1 }
 0x3cd   :  { %v19607_v43 = vrot.slane %v7846_v26, %v15498_v51  ;;  %v19610_v18 = vrot.slane %v8769_v0, %v15498_v51  ;;  %v19613_v30 = vrot.slane %v13842_v11, %v15498_v51  ;;  %v19616_v15 = vrot.slane %v8771_v29, %v15498_v51 }
 0x3ce   :  { %v9234_v38 = vrot.slane %v9220_v6, %v15498_v51  ;;  %8897 = vrot.lane.b32.xlu1 %v8768_v17, %s14299_s0  ;;  %v3668_v20 = vmax.f32 %v3613_v40, 0.0  ;;  %v19623_v1 = vcombine.high %v19354_v10, %v19354_v10  ;;  %v6938_v6 = vshll.u32 %v19354_v10, 16 }
 0x3cf   :  { %v19618_v21 = vpop.f32.mrb[4].mxu1  ;;  %v10627_v0 = vcombine.low %v19528_v52, %v19607_v43  ;;  %v10134_v11 = vcombine.low %v8751_v45, %v19610_v18  ;;  %v10135_v29 = vcombine.low %v19613_v30, %v19616_v15  ;;  %v21334_v40 = vshrl.u32 %v19342_v61, 16 }
 0x3d0   :  { %21332 = vst [vmem:[#allocation16_spill] sm:$0xff] %v19618_v21  ;;  %v9235_v47 = vcombine.low %v9227_v56, %v9234_v38  ;;  %v11204_v26 = vpop.f32.mrb[5].mxu1  ;;  %v3693_v56 = vpack.c.bf16 %v3668_v20, %v3667_v27  ;;  %v13663_v38 = vpack.c.bf16 %v3668_v20, %v3668_v20  ;;  %v21335_v63 = vshll.u32 %v19361_v12, 16 }
 0x3d1   :  { %v19632_v17 = vpop.f32.mrb[6].mxu1  ;;  %v6940_v24 = vsel %vm15951_vm14, %v21334_v40, %v6938_v6  ;;  %v6954_v26 = vshll.u32 %v19623_v1, 16  ;;  %10707 = vrot.lane.b32.xlu0 %v10627_v0, %s14307_s7  ;;  %v10142_v52 = vrot.slane %v10134_v11, %v15498_v51  ;;  %v10149_v45 = vrot.slane %v10135_v29, %v15498_v51 }
 0x3d2   :  { %21333 = vst [vmem:[#allocation46_spill] sm:$0xff] %v19632_v17  ;;  %v11207_v41 = vpop.f32.mrb[7].mxu1  ;;  %v6948_v27 = vsel %vm15951_vm14, %v6941_v54, %v21335_v63  ;;  %v6957_v20 = vshrl.u32 %v19623_v1, 16  ;;  %9324 = vrot.lane.b32.xlu1 %v9235_v47, %s14307_s7  ;;  %v4854_v6 = vrot.slane %v3693_v56, %v15498_v51  ;;  %v4861_v40 = vrot.slane %v13663_v38, %v15498_v51  ;;  %v21339_v47 = vld [vmem:[#allocation12_spill] sm:$0xff] }
 0x3d3   :  { %v21336_v41 = vshrl.u32 %v19361_v12, 16  ;;  %v7816_v11 = vcombine.low %v6940_v24, %v6948_v27  ;;  %v10150_v29 = vcombine.low %v10142_v52, %v10149_v45  ;;  %v21337_v25 = vshll.u32 %v19345_v28, 16 }
 0x3d4   :  { %v3618_v54 = vadd.f32 %v14221_v49, %v19110_v39  ;;  %v5362_v44 = vcombine.low %v21339_v47, %v21338_v53  ;;  %v4862_v56 = vcombine.high %v4854_v6, %v4854_v6  ;;  %v4863_v17 = vcombine.high %v4861_v40, %v4861_v40  ;;  %v21341_v39 = vld [vmem:[#allocation31_spill] sm:$0xff] }
 0x3d5   :  { %v6956_v0 = vsel %vm15951_vm14, %v21336_v41, %v6954_v26  ;;  %v6964_v63 = vsel %vm15951_vm14, %v6957_v20, %v21337_v25  ;;  %v19662_v38 = vrot.slane %v4854_v6, %v15498_v51  ;;  %v19665_v12 = vrot.slane %v4861_v40, %v15498_v51  ;;  %10239 = vrot.lane.b32.xlu0 %v10150_v29, %s14308_s8  ;;  %v21342_v49 = vld [vmem:[#allocation11_spill] sm:$0xff] }
 0x3d6   :  { %v7817_v24 = vcombine.low %v6956_v0, %v6964_v63  ;;  %v19669_v26 = vrot.slane %v7816_v11, %v15498_v51  ;;  %v3669_v25 = vmax.f32 %v3618_v54, 0.0  ;;  %v21343_v52 = vcombine.high %v21341_v39, %v21342_v49  ;;  %v19715_v54 = vpop.permute.xlu0 %10227 }
 0x3d7   :  { %v7935_v45 = vpop.permute.xlu1 %7934  ;;  %v19676_v27 = vrot.slane %v4862_v56, %v15498_v51  ;;  %v19679_v20 = vrot.slane %v4863_v17, %v15498_v51  ;;  %v19683_v6 = vcombine.high %v19665_v12, %v19665_v12  ;;  %v5378_v29 = vrot.slane %v5362_v44, %v15498_v51 }
 0x3d8   :  { %21340 = vst [vmem:[#allocation13_spill] sm:$0xff] %v19669_v26  ;;  %v5371_v53 = vrot.slane %v21343_v52, %v15498_v51  ;;  %7978 = vst.msk [vmem:[#allocation2 + $0x108] sm:$0xff] %vm7966_vm3, %v7935_v45  ;;  %v19688_v41 = vrot.slane %v7817_v24, %v15498_v51  ;;  %v3694_v11 = vpack.c.bf16 %v3669_v25, %v3669_v25  ;;  %v21344_v52 = vld [vmem:[#allocation18_spill] sm:$0xff]  ;;  %v21345_v45 = vld [vmem:[#allocation19_spill] sm:$0xff] }
 0x3d9   :  { %v19695_v17 = vcombine.high %v19676_v27, %v19676_v27  ;;  %v13872_v56 = vcombine.high %v19665_v12, %v19679_v20  ;;  %v21346_v0 = vcombine.low %v21344_v52, %v21345_v45  ;;  %v8772_v47 = vcombine.low %v19623_v1, %v19345_v28 }
 0x3da   :  { %v7847_v24 = vcombine.low %v19669_v26, %v19688_v41  ;;  %v4902_v25 = vrot.slane %v3694_v11, %v15498_v51  ;;  %v5393_v39 = vcombine.low %v5371_v53, %v5378_v29  ;;  %v8801_v63 = vcombine.low %v19610_v18, %v19613_v30  ;;  %v19749_v26 = vpop.permute.xlu0 %10413 }
 0x3db   :  { %v8890_v44 = vpop.permute.xlu1 %8889  ;;  %v5408_v40 = vrot.slane %v21346_v0, %v15498_v51  ;;  %v19719_v53 = vrot.slane %v13872_v56, %v15498_v51  ;;  %v19729_v1 = vrot.slane %v8772_v47, %v15498_v51  ;;  %v4797_v30 = vcombine.high %v19357_v42, %v19357_v42 }
 0x3dc   :  { %8933 = vst.msk [vmem:[#allocation2 + $0x108] sm:$0xff] %vm8921_vm7, %v8890_v44  ;;  %v19722_v11 = vrot.slane %v7847_v24, %v15498_v51  ;;  %v4903_v29 = vcombine.high %v4902_v25, %v4902_v25  ;;  %v19725_v52 = vrot.slane %v4902_v25, %v15498_v51  ;;  %v5401_v0 = vrot.slane %v5393_v39, %v15498_v51 }
 0x3dd   :  { %v8809_v18 = vrot.slane %v8801_v63, %v15498_v51  ;;  %v13681_v25 = vcombine.high %v19342_v61, %v19354_v10  ;;  %v5753_v39 = vcombine.low %v19345_v28, %v19357_v42  ;;  %v8802_v63 = vcombine.low %v19616_v15, %v19729_v1 }
 0x3de   :  { %v7862_v56 = vcombine.low %v19607_v43, %v19722_v11  ;;  %v19737_v24 = vrot.slane %v4903_v29, %v15498_v51  ;;  %v5409_v45 = vcombine.low %v5401_v0, %v5408_v40  ;;  %v5754_v43 = vcombine.low %v4797_v30, %v19539_v14 }
 0x3df   :  { %v9317_v44 = vpop.permute.xlu1 %9316  ;;  %v19743_v47 = vpop.f32.mrb[8].mxu1  ;;  %v10813_v49 = vcombine.low %v19587_v50, %v8809_v18  ;;  %v5735_v40 = vrot.slane %v13681_v25, %v15498_v51  ;;  %v5763_v15 = vrot.slane %v5753_v39, %v15498_v51  ;;  %v19763_v0 = vrot.slane %v8802_v63, %v15498_v51 }
 0x3e0   :  { %21347 = vst [vmem:[#allocation12_spill] sm:$0xff] %v19743_v47  ;;  %9360 = vst.msk [vmem:[#allocation2 + $0x108] sm:$0xff] %vm9348_vm8, %v9317_v44  ;;  %v11212_v29 = vpop.f32.mrb[9].mxu1  ;;  %7944 = vrot.lane.b32.xlu1 %v7862_v56, %s14308_s8  ;;  %v5770_v56 = vrot.slane %v5754_v43, %v15498_v51  ;;  %v6982_v44 = vshrl.u32 %v4797_v30, 16  ;;  %v6973_v63 = vshrl.u32 %v19357_v42, 16  ;;  %v6978_v43 = vshll.u32 %v19365_v7, 16 }
 0x3e1   :  { %v19759_v50 = vpop.f32.mrb[10].mxu1  ;;  %5830 = vst.msk [vmem:[#allocation2 + $0xd8] sm:$0xff] %vm5820_vm2, %v5409_v45  ;;  %10897 = vst.msk [vmem:[#allocation2 + $0x160] sm:$0xff] %vm5820_vm2, %v10813_v49  ;;  %v4843_v29 = vcombine.high %v19539_v14, %v19539_v14  ;;  %v5737_v25 = vcombine.low %v19575_v58, %v5735_v40  ;;  %v9236_v39 = vcombine.low %v5735_v40, %v5763_v15  ;;  %v6970_v45 = vshll.u32 %v19357_v42, 16 }
 0x3e2   :  { %21348 = vst [vmem:[#allocation31_spill] sm:$0xff] %v19759_v50  ;;  %v11215_v10 = vpop.f32.mrb[11].mxu1  ;;  %7976 = vst.msk [vmem:[#allocation2 + $0xd8] sm:$0xff] %vm7966_vm3, %v19328_v36  ;;  %v8817_v61 = vcombine.low %v8809_v18, %v19763_v0  ;;  %v5785_v49 = vcombine.low %v5763_v15, %v5770_v56  ;;  %v21350_v40 = vshrl.u32 %v19345_v28, 16  ;;  %v6987_v18 = vshll.u32 %v19539_v14, 16  ;;  %v21354_v50 = vld [vmem:[#allocation20_spill] sm:$0xff] }
 0x3e3   :  { %8931 = vst.msk [vmem:[#allocation2 + $0xd8] sm:$0xff] %vm8921_vm7, %v19378_v46  ;;  %v5755_v30 = vcombine.low %v19554_v55, %v4843_v29  ;;  %v19779_v10 = vpop.f32.mrb[112].mxu0  ;;  %v5751_v36 = vrot.slane %v5737_v25, %v15498_v51  ;;  %v9244_v58 = vrot.slane %v9236_v39, %v15498_v51  ;;  %v6980_v28 = vsel %vm15951_vm14, %v6973_v63, %v6978_v43  ;;  %v21353_v43 = vld [vmem:[#allocation17_spill] sm:$0xff] }
 0x3e4   :  { %21349 = vst [vmem:[#allocation11_spill] sm:$0xff] %v19779_v10  ;;  %v6972_v23 = vsel %vm15951_vm14, %v21350_v40, %v6970_v45  ;;  %9358 = vst.msk [vmem:[#allocation2 + $0xd8] sm:$0xff] %vm9348_vm8, %v19431_v8  ;;  %v19790_v46 = vpop.f32.mrb[113].mxu0  ;;  %8899 = vrot.lane.b32.xlu1 %v8817_v61, %s14299_s0  ;;  %v19794_v15 = vrot.slane %v5785_v49, %v15498_v51  ;;  %v6990_v39 = vshrl.u32 %v19539_v14, 16  ;;  %v19802_v45 = vpop.permute.xlu0 %10229  ;;  %v6995_v49 = vshll.u32 %v19554_v55, 16 }
 0x3e5   :  { %21351 = vst [vmem:[#allocation18_spill] sm:$0xff] %v19790_v46  ;;  %v19797_v25 = vrot.slane %v5755_v30, %v15498_v51  ;;  %v19804_v40 = vpop.f32.mrb[114].mxu0  ;;  %v5752_v8 = vcombine.low %v19497_v34, %v5751_v36  ;;  %v6989_v61 = vsel %vm15951_vm14, %v6982_v44, %v6987_v18  ;;  %v7863_v10 = vcombine.low %v6972_v23, %v6980_v28  ;;  %v21357_v34 = vld [vmem:[#allocation22_spill] sm:$0xff] }
 0x3e6   :  { %21352 = vst [vmem:[#allocation19_spill] sm:$0xff] %v19804_v40  ;;  %v19810_v46 = vpop.f32.mrb[115].mxu0  ;;  %v10344_v30 = vcombine.low %v5751_v36, %v19794_v15  ;;  %v21355_v47 = vcombine.low %v21353_v43, %v21354_v50  ;;  %v21356_v40 = vld [vmem:[#allocation21_spill] sm:$0xff]  ;;  %v6997_v23 = vsel %vm15951_vm14, %v6990_v39, %v6995_v49  ;;  %v7003_v28 = vshll.u32 %v4843_v29, 16 }
 0x3e7   :  { %v9237_v63 = vcombine.low %v5770_v56, %v19797_v25  ;;  %v21358_v21 = vcombine.low %v21356_v40, %v21357_v34  ;;  %5837 = vst.msk [vmem:[#allocation2 + $0x180] sm:$0xff] %vm5820_vm2, %v5752_v8  ;;  %v19826_v36 = vrot.slane %v7863_v10, %v15498_v51  ;;  %v19830_v56 = vcombine.high %v19554_v55, %v19554_v55 }
 0x3e8   :  { %v9650_v35 = vrot.slane %v21355_v47, %v15498_v51  ;;  %v7937_v44 = vpop.permute.xlu1 %7936  ;;  %v6998_v47 = vshrl.u32 %v19554_v55, 16  ;;  %10425 = vrot.lane.b32.xlu0 %v10344_v30, %s14299_s0  ;;  %v7864_v50 = vcombine.low %v6989_v61, %v6997_v23  ;;  %v7006_v10 = vshrl.u32 %v4843_v29, 16 }
 0x3e9   :  { %v9657_v62 = vrot.slane %v21358_v21, %v15498_v51  ;;  %7979 = vst.msk [vmem:[#allocation2 + $0x120] sm:$0xff] %vm7966_vm3, %v7937_v44  ;;  %v9251_v21 = vrot.slane %v9237_v63, %v15498_v51  ;;  %v7011_v40 = vshll.u32 %v19830_v56, 16  ;;  %v7014_v8 = vshrl.u32 %v19830_v56, 16 }
 0x3ea   :  { %v19841_v43 = vrot.slane %v7864_v50, %v15498_v51  ;;  %v7005_v30 = vsel %vm15951_vm14, %v6998_v47, %v7003_v28  ;;  %v7022_v61 = vshrl.u32 %v19542_v59, 16  ;;  %v8819_v63 = vcombine.low %v19539_v14, %v19554_v55 }
 0x3eb   :  { %v9658_v18 = vcombine.low %v9650_v35, %v9657_v62  ;;  %v9252_v49 = vcombine.low %v9244_v58, %v9251_v21  ;;  %v7019_v62 = vshll.u32 %v19542_v59, 16  ;;  %v10698_v35 = vpop.permute.xlu0 %10697  ;;  %v7013_v29 = vsel %vm15951_vm14, %v7006_v10, %v7011_v40 }
 0x3ec   :  { %v8818_v58 = vcombine.low %v19357_v42, %v19365_v7  ;;  %v7895_v34 = vcombine.low %v19826_v36, %v19841_v43  ;;  %v13843_v23 = vcombine.high %v19539_v14, %v19554_v55  ;;  %v21359_v42 = vshll.u32 %v19557_v22, 16 }
 0x3ed   :  { %9846 = vst.msk [vmem:[#allocation2 + $0xe0] sm:$0xff] %vm5820_vm2, %v9658_v18  ;;  %9326 = vrot.lane.b32.xlu1 %v9252_v49, %s14307_s7  ;;  %v7021_v44 = vsel %vm15951_vm14, %v7014_v8, %v7019_v62  ;;  %v8835_v21 = vrot.slane %v8819_v63, %v15498_v51  ;;  %v8821_v50 = vcombine.low %v19542_v59, %v19557_v22 }
 0x3ee   :  { %10272 = vst.msk [vmem:[#allocation2 + $0xe0] sm:$0xff] %vm7966_vm3, %v19715_v54  ;;  %v7865_v54 = vcombine.low %v7005_v30, %v7013_v29  ;;  %v7029_v7 = vsel %vm15951_vm14, %v7022_v61, %v21359_v42  ;;  %v8828_v47 = vrot.slane %v8818_v58, %v15498_v51  ;;  %v19874_v18 = vpop.f32.mrb[12].mxu1  ;;  %v7903_v14 = vrot.slane %v7895_v34, %v15498_v51 }
 0x3ef   :  { %10458 = vst.msk [vmem:[#allocation2 + $0xe0] sm:$0xff] %vm8921_vm7, %v19749_v26  ;;  %v7866_v55 = vcombine.low %v7021_v44, %v7029_v7  ;;  %v8842_v28 = vrot.slane %v13843_v23, %v15498_v51  ;;  %v19881_v10 = vpop.permute.xlu0 %10415  ;;  %v11220_v40 = vpop.f32.mrb[13].mxu1  ;;  %v19885_v49 = vrot.slane %v8821_v50, %v15498_v51  ;;  %v19889_v62 = vcombine.high %v19662_v38, %v19662_v38 }
 0x3f0   :  { %10742 = vst.msk [vmem:[#allocation2 + $0xe0] sm:$0xff] %vm9348_vm8, %v10698_v35  ;;  %v19878_v26 = vrot.slane %v7865_v54, %v15498_v51  ;;  %v10151_v8 = vcombine.low %v19729_v1, %v8828_v47  ;;  %v8850_v30 = vcombine.low %v8828_v47, %v8835_v21  ;;  %v8892_v35 = vpop.permute.xlu1 %8891  ;;  %v19891_v29 = vpop.f32.mrb[14].mxu1  ;;  %v10628_v61 = vcombine.low %v19722_v11, %v7903_v14 }
 0x3f1   :  { %v19895_v58 = vrot.slane %v7866_v55, %v15498_v51  ;;  %v10152_v1 = vcombine.low %v8835_v21, %v8842_v28  ;;  %8934 = vst.msk [vmem:[#allocation2 + $0x120] sm:$0xff] %vm8921_vm7, %v8892_v35  ;;  %v11223_v34 = vpop.f32.mrb[15].mxu1  ;;  %v8851_v54 = vcombine.low %v8842_v28, %v19885_v49  ;;  %v10168_v42 = vcombine.low %v19579_v60, %v19662_v38 }
 0x3f2   :  { %v10159_v44 = vrot.slane %v10151_v8, %v15498_v51  ;;  %v8858_v23 = vrot.slane %v8850_v30, %v15498_v51  ;;  %10709 = vrot.lane.b32.xlu0 %v10628_v61, %s14307_s7  ;;  %v10169_v47 = vcombine.low %v19676_v27, %v19889_v62  ;;  %v5756_v21 = vcombine.low %v19830_v56, %v19542_v59 }
 0x3f3   :  { %v7896_v11 = vcombine.low %v19878_v26, %v19895_v58  ;;  %v10166_v7 = vrot.slane %v10152_v1, %v15498_v51  ;;  %v8865_v50 = vrot.slane %v8851_v54, %v15498_v51  ;;  %v19916_v28 = vrot.slane %v10168_v42, %v15498_v51  ;;  %v19927_v34 = vpop.permute.xlu0 %10699 }
 0x3f4   :  { %v10814_v55 = vcombine.low %v19763_v0, %v8858_v23  ;;  %v13845_v40 = vcombine.high %v19542_v59, %v19557_v22  ;;  %v9319_v8 = vpop.permute.xlu1 %9318  ;;  %v19924_v61 = vrot.slane %v10169_v47, %v15498_v51  ;;  %v5784_v56 = vrot.slane %v5756_v21, %v15498_v51  ;;  %v10928_v47 = vld [vmem:[#allocation2 + $0xd8] sm:$0xff] }
 0x3f5   :  { %v19921_v30 = vrot.slane %v7896_v11, %v15498_v51  ;;  %v10167_v35 = vcombine.low %v10159_v44, %v10166_v7  ;;  %9361 = vst.msk [vmem:[#allocation2 + $0x120] sm:$0xff] %vm9348_vm8, %v9319_v8  ;;  %v8866_v0 = vcombine.low %v8858_v23, %v8865_v50  ;;  %v9254_v22 = vcombine.low %v19662_v38, %v19676_v27 }
 0x3f6   :  { %10898 = vst.msk [vmem:[#allocation2 + $0x178] sm:$0xff] %vm5820_vm2, %v10814_v55  ;;  %v9262_v54 = vrot.slane %v13845_v40, %v15498_v51  ;;  %v13846_v44 = vcombine.high %v19662_v38, %v19676_v27  ;;  %v10815_v11 = vcombine.low %v19916_v28, %v19924_v61  ;;  %v5786_v23 = vcombine.low %v19797_v25, %v5784_v56 }
 0x3f7   :  { %v10929_v1 = vld [vmem:[#allocation2 + $0xe0] sm:$0xff]  ;;  %v7911_v42 = vcombine.low %v7903_v14, %v19921_v30  ;;  %10241 = vrot.lane.b32.xlu0 %v10167_v35, %s14308_s8  ;;  %v4844_v7 = vcombine.high %v19542_v59, %v19542_v59  ;;  %v9269_v21 = vrot.slane %v9254_v22, %v15498_v51  ;;  %v9422_v8 = vshll.u32 %v19579_v60, 16 }
 0x3f8   :  { %11264 = vmatprep.mubr.bf16.mxu1 %v10929_v1  ;;  %v19945_v55 = vrot.slane %v13846_v44, %v15498_v51  ;;  %v9277_v40 = vcombine.low %v5784_v56, %v9262_v54  ;;  %v10822_v14 = vrot.slane %v10815_v11, %v15498_v51  ;;  %v5800_v35 = vrot.slane %v5786_v23, %v15498_v51 }
 0x3f9   :  { %11265 = vmatmul.mubr.bf16.gmra.mrb[36].mxu1 %v10928_v47  ;;  %7946 = vrot.lane.b32.xlu1 %v7911_v42, %s14308_s8  ;;  %v9417_v25 = vshrl.u32 %v4844_v7, 16  ;;  %v9425_v1 = vshrl.u32 %v19579_v60, 16  ;;  %v10345_v59 = vcombine.low %v9262_v54, %v9269_v21  ;;  %v9430_v44 = vshll.u32 %v19662_v38, 16  ;;  %v19959_v47 = vpop.permute.xlu0 %10231 }
 0x3fa   :  { %v9278_v63 = vcombine.low %v9269_v21, %v19945_v55  ;;  %v9285_v22 = vrot.slane %v9277_v40, %v15498_v51  ;;  %v10823_v56 = vcombine.low %v8865_v50, %v10822_v14  ;;  %v5801_v39 = vcombine.low %v19794_v15, %v5800_v35 }
 0x3fb   :  { %v9424_v42 = vsel %vm15951_vm14, %v9417_v25, %v9422_v8  ;;  %v9433_v11 = vshrl.u32 %v19662_v38, 16  ;;  %v10352_v23 = vrot.slane %v10345_v59, %v15498_v51  ;;  %v9432_v54 = vsel %vm15951_vm14, %v9425_v1, %v9430_v44 }
 0x3fc   :  { %v9292_v60 = vrot.slane %v9278_v63, %v15498_v51  ;;  %v9438_v7 = vshll.u32 %v19676_v27, 16  ;;  %10899 = vst.msk [vmem:[#allocation2 + $0x190] sm:$0xff] %vm5820_vm2, %v10823_v56  ;;  %5838 = vst.msk [vmem:[#allocation2 + $0x198] sm:$0xff] %vm5820_vm2, %v5801_v39  ;;  %v9441_v15 = vshrl.u32 %v19676_v27, 16  ;;  %v9446_v38 = vshll.u32 %v19889_v62, 16 }
 0x3fd   :  { %8901 = vrot.lane.b32.xlu1 %v8866_v0, %s14299_s0  ;;  %v9778_v50 = vcombine.low %v9424_v42, %v9432_v54  ;;  %v21360_v63 = vcombine.low %v19695_v17, %v19665_v12  ;;  %v10353_v40 = vcombine.low %v5800_v35, %v10352_v23  ;;  %v10192_v0 = vcombine.low %v19885_v49, %v19916_v28  ;;  %v19989_v59 = vpop.permute.xlu0 %10417 }
 0x3fe   :  { %v9293_v8 = vcombine.low %v9285_v22, %v9292_v60  ;;  %v9440_v14 = vsel %vm15951_vm14, %v9433_v11, %v9438_v7  ;;  %v9448_v39 = vsel %vm15951_vm14, %v9441_v15, %v9446_v38  ;;  %v21361_v1 = vcombine.low %v19725_v52, %v19737_v24 }
 0x3ff   :  { %v10191_v21 = vrot.slane %v21360_v63, %v15498_v51  ;;  %v19982_v27 = vrot.slane %v9778_v50, %v15498_v51  ;;  %10427 = vrot.lane.b32.xlu0 %v10353_v40, %s14299_s0  ;;  %v9779_v22 = vcombine.low %v9440_v14, %v9448_v39  ;;  %v19993_v49 = vrot.slane %v10192_v0, %v15498_v51 }
 0x400   :  { %v10840_v35 = vrot.slane %v21361_v1, %v15498_v51  ;;  %v21362_v28 = vcombine.high %v19725_v52, %v19737_v24  ;;  %v21363_v11 = vcombine.low %v18568_v13, %v18725_v16  ;;  %v21364_v60 = vcombine.low %v18741_v5, %v18744_v32 }
 0x401   :  { %v10193_v25 = vcombine.low %v19924_v61, %v10191_v21  ;;  %v10848_v61 = vcombine.low %v10191_v21, %v19719_v53  ;;  %9328 = vrot.lane.b32.xlu1 %v9293_v8, %s14307_s7  ;;  %v9802_v56 = vcombine.low %v19895_v58, %v19982_v27  ;;  %v20015_v53 = vrot.slane %v9779_v22, %v15498_v51 }
 0x402   :  { %v10847_v44 = vrot.slane %v21362_v28, %v15498_v51  ;;  %v9667_v23 = vrot.slane %v21363_v11, %v15498_v51  ;;  %v9674_v54 = vrot.slane %v21364_v60, %v15498_v51  ;;  %v4895_v38 = vcombine.high %v19679_v20, %v19679_v20 }
 0x403   :  { %v20004_v42 = vrot.slane %v10193_v25, %v15498_v51  ;;  %v10856_v15 = vrot.slane %v10848_v61, %v15498_v51  ;;  %v4918_v13 = vcombine.high %v19725_v52, %v19725_v52  ;;  %v10354_v16 = vcombine.low %v19679_v20, %v19683_v6  ;;  %v20037_v25 = vpop.permute.xlu0 %10701 }
 0x404   :  { %v10849_v7 = vcombine.low %v10840_v35, %v10847_v44  ;;  %v9675_v63 = vcombine.low %v9667_v23, %v9674_v54  ;;  %v10629_v5 = vcombine.low %v19982_v27, %v20015_v53  ;;  %v10355_v21 = vcombine.low %v4895_v38, %v19725_v52 }
 0x405   :  { %v10208_v50 = vcombine.low %v19993_v49, %v20004_v42  ;;  %v4919_v40 = vcombine.high %v19737_v24, %v19737_v24  ;;  %v10356_v8 = vcombine.low %v19737_v24, %v4918_v13  ;;  %v10363_v14 = vrot.slane %v10354_v16, %v15498_v51 }
 0x406   :  { %v10863_v32 = vrot.slane %v10849_v7, %v15498_v51  ;;  %9847 = vst.msk [vmem:[#allocation2 + $0xf8] sm:$0xff] %vm5820_vm2, %v9675_v63  ;;  %v9449_v0 = vshrl.u32 %v19889_v62, 16  ;;  %v9454_v39 = vshll.u32 %v19695_v17, 16  ;;  %v10636_v1 = vrot.slane %v10629_v5, %v15498_v51 }
 0x407   :  { %10273 = vst.msk [vmem:[#allocation2 + $0xf8] sm:$0xff] %vm7966_vm3, %v19802_v45  ;;  %v10370_v22 = vrot.slane %v10355_v21, %v15498_v51  ;;  %v9457_v49 = vshrl.u32 %v19695_v17, 16  ;;  %v7939_v28 = vpop.permute.xlu1 %7938  ;;  %v10377_v44 = vrot.slane %v10356_v8, %v15498_v51  ;;  %v10378_v61 = vcombine.low %v19945_v55, %v10363_v14 }
 0x408   :  { %v10864_v35 = vcombine.low %v10856_v15, %v10863_v32  ;;  %v9456_v62 = vsel %vm15951_vm14, %v9449_v0, %v9454_v39  ;;  %v21365_v42 = vshll.u32 %v19683_v6, 16  ;;  %v21366_v11 = vshrl.u32 %v19679_v20, 16  ;;  %10459 = vst.msk [vmem:[#allocation2 + $0xf8] sm:$0xff] %vm8921_vm7, %v19881_v10 }
 0x409   :  { %7980 = vst.msk [vmem:[#allocation2 + $0x138] sm:$0xff] %vm7966_vm3, %v7939_v28  ;;  %v10637_v17 = vcombine.low %v19921_v30, %v10636_v1  ;;  %v21367_v45 = vshll.u32 %v19665_v12, 16  ;;  %v10530_v60 = vshll.u32 %v4895_v38, 16  ;;  %v10533_v54 = vshrl.u32 %v4895_v38, 16 }
 0x40a   :  { %v10524_v23 = vsel %vm15951_vm14, %v21366_v11, %v21365_v42  ;;  %10900 = vst.msk [vmem:[#allocation2 + $0x1a8] sm:$0xff] %vm5820_vm2, %v10864_v35  ;;  %v10379_v20 = vcombine.low %v10370_v22, %v10377_v44  ;;  %v10386_v7 = vrot.slane %v10378_v61, %v15498_v51  ;;  %v10538_v15 = vshll.u32 %v19725_v52, 16 }
 0x40b   :  { %v9464_v55 = vsel %vm15951_vm14, %v9457_v49, %v21367_v45  ;;  %10743 = vst.msk [vmem:[#allocation2 + $0xf8] sm:$0xff] %vm9348_vm8, %v19927_v34  ;;  %10711 = vrot.lane.b32.xlu0 %v10637_v17, %s14307_s7  ;;  %v21368_v30 = vshrl.u32 %v19683_v6, 16  ;;  %v10541_v63 = vshrl.u32 %v19725_v52, 16  ;;  %v10546_v38 = vshll.u32 %v19737_v24, 16  ;;  %v8894_v34 = vpop.permute.xlu1 %8893  ;;  %v10234_v6 = vpop.permute.xlu0 %10233 }
 0x40c   :  { %v9780_v10 = vcombine.low %v9456_v62, %v9464_v55  ;;  %v10549_v16 = vshrl.u32 %v19737_v24, 16  ;;  %v10393_v5 = vrot.slane %v10379_v20, %v15498_v51  ;;  %v10540_v21 = vsel %vm15951_vm14, %v10533_v54, %v10538_v15  ;;  %8935 = vst.msk [vmem:[#allocation2 + $0x138] sm:$0xff] %vm8921_vm7, %v8894_v34  ;;  %v20087_v24 = vld [vmem:[%s21031_s4] ss:$0 sm:$0xff]  ;;  %v20093_v28 = vpop.f32.mrb[16].mxu1  ;;  %v21373_v15 = vld [vmem:[#allocation26_spill] sm:$0xff] }
 0x40d   :  { %v10532_v12 = vsel %vm15951_vm14, %v21368_v30, %v10530_v60  ;;  %v10554_v8 = vshll.u32 %v4918_v13, 16  ;;  %v10548_v52 = vsel %vm15951_vm14, %v10541_v63, %v10546_v38  ;;  %v10557_v14 = vshrl.u32 %v4918_v13, 16  ;;  %v11228_v11 = vpop.f32.mrb[17].mxu1  ;;  %v21376_v38 = vld [vmem:[#allocation16_spill] sm:$0xff] }
 0x40e   :  { %v20077_v32 = vrot.slane %v9780_v10, %v15498_v51  ;;  %v10562_v0 = vshll.u32 %v4919_v40, 16  ;;  %v10638_v39 = vcombine.low %v10524_v23, %v10532_v12  ;;  %v10394_v1 = vcombine.low %v10386_v7, %v10393_v5  ;;  %v20109_v45 = vpop.f32.mrb[18].mxu1  ;;  %v21372_v10 = vld [vmem:[#allocation25_spill] sm:$0xff] }
 0x40f   :  { %v10556_v22 = vsel %vm15951_vm14, %v10549_v16, %v10554_v8  ;;  %v10639_v49 = vcombine.low %v10540_v21, %v10548_v52  ;;  %10243 = vrot.lane.b32.xlu0 %v10208_v50, %s14308_s8  ;;  %v21369_v44 = vcombine.low %v18752_v9, %v18835_v4  ;;  %v21370_v62 = vcombine.low %v18846_v2, %v18861_v19  ;;  %v10420_v48 = vpop.permute.xlu0 %10419  ;;  %v10931_v2 = vld [vmem:[#allocation2 + $0xf0] sm:$0xff]  ;;  %v11231_v19 = vpop.f32.mrb[19].mxu1  ;;  %v21377_v8 = vld [vmem:[#allocation28_spill] sm:$0xff] }
 0x410   :  { %v9803_v35 = vcombine.low %v20015_v53, %v20077_v32  ;;  %v10564_v13 = vsel %vm15951_vm14, %v10557_v14, %v10562_v0  ;;  %v10647_v40 = vrot.slane %v10638_v39, %v15498_v51  ;;  %v11195_v50 = vadd.f32 %v20087_v24, %v19536_v31  ;;  %v21378_v39 = vld [vmem:[#allocation10_spill] sm:$0xff]  ;;  %v20451_v53 = vld [vmem:[%s21031_s4] ss:$0 sm:$0xff] }
 0x411   :  { %v9684_v61 = vrot.slane %v21369_v44, %v15498_v51  ;;  %v9691_v42 = vrot.slane %v21370_v62, %v15498_v51  ;;  %v10640_v23 = vcombine.low %v10556_v22, %v10564_v13  ;;  %v10654_v55 = vrot.slane %v10639_v49, %v15498_v51  ;;  %v21379_v22 = vld [vmem:[#allocation27_spill] sm:$0xff]  ;;  %v21380_v49 = vld [vmem:[#allocation32_spill] sm:$0xff]  ;;  %v21383_v62 = vld [vmem:[#allocation38_spill] sm:$0xff] }
 0x412   :  { %v10932_v17 = vld [vmem:[#allocation2 + $0xf8] sm:$0xff]  ;;  %v10662_v60 = vcombine.low %v20077_v32, %v10647_v40  ;;  %v11198_v4 = vadd.f32 %v20087_v24, %v19561_v33  ;;  %v11372_v20 = vadd.f32 %v19144_v57, %v11195_v50  ;;  %v21371_v31 = vcombine.low %v18867_v37, %v19031_v3  ;;  %v21375_v33 = vld [vmem:[#allocation30_spill] sm:$0xff] }
 0x413   :  { %v9692_v9 = vcombine.low %v9684_v61, %v9691_v42  ;;  %11272 = vmatprep.mubr.bf16.mxu1 %v10932_v17  ;;  %v10661_v54 = vrot.slane %v10640_v23, %v15498_v51  ;;  %v21374_v30 = vcombine.low %v21372_v10, %v21373_v15  ;;  %10429 = vrot.lane.b32.xlu0 %v10394_v1, %s14299_s0  ;;  %vm13501_vm14 = vcmask 1044484  }
 0x414   :  { %11273 = vmatmul.mubr.bf16.gmra.mrb[40].mxu1 %v10931_v2  ;;  %v9701_v7 = vrot.slane %v21371_v31, %v15498_v51  ;;  %v11375_v63 = vadd.f32 %v21375_v33, %v11198_v4  ;;  %v11203_v57 = vadd.f32 %v20087_v24, %v21376_v38  ;;  %v11514_v37 = vmax.f32 %v11372_v20, 0.0  ;;  %v9321_v21 = vpop.permute.xlu1 %9320 }
 0x415   :  { %v9708_v12 = vrot.slane %v21374_v30, %v15498_v51  ;;  %9848 = vst.msk [vmem:[#allocation2 + $0x110] sm:$0xff] %vm5820_vm2, %v9692_v9  ;;  %v10663_v16 = vcombine.low %v10654_v55, %v10661_v54  ;;  %v10670_v34 = vrot.slane %v10662_v60, %v15498_v51 }
 0x416   :  { %10274 = vst.msk [vmem:[#allocation2 + $0x110] sm:$0xff] %vm7966_vm3, %v19959_v47  ;;  %v11515_v5 = vmax.f32 %v11375_v63, 0.0  ;;  %v11380_v52 = vadd.f32 %v21377_v8, %v11203_v57  ;;  %v11586_v0 = vcombine.high %v11514_v37, %v11514_v37  ;;  %v11593_v1 = vrot.slane %v11514_v37, %v21378_v39  ;;  %v10704_v47 = vpop.permute.xlu0 %10703  ;;  %v10934_v8 = vld [vmem:[#allocation2 + $0x108] sm:$0xff] }
 0x417   :  { %v9709_v3 = vcombine.low %v9701_v7, %v9708_v12  ;;  %10460 = vst.msk [vmem:[#allocation2 + $0x110] sm:$0xff] %vm8921_vm7, %v19989_v59  ;;  %v10677_v14 = vrot.slane %v10663_v16, %v15498_v51  ;;  %v21381_v59 = vcombine.low %v21379_v22, %v21380_v49 }
 0x418   :  { %10744 = vst.msk [vmem:[#allocation2 + $0x110] sm:$0xff] %vm9348_vm8, %v20037_v25  ;;  %9362 = vst.msk [vmem:[#allocation2 + $0x138] sm:$0xff] %vm9348_vm8, %v9321_v21  ;;  %v11603_v40 = vcombine.high %v11515_v5, %v11515_v5  ;;  %v11610_v44 = vrot.slane %v11515_v5, %v21378_v39  ;;  %v20150_v61 = vmax.f32 %v11380_v52, 0.0  ;;  %v21382_v25 = vld [vmem:[#allocation34_spill] sm:$0xff]  ;;  %v11600_v50 = vrot.slane %v11586_v0, %v21378_v39 }
 0x419   :  { %9849 = vst.msk [vmem:[#allocation2 + $0x128] sm:$0xff] %vm5820_vm2, %v9709_v3  ;;  %v20146_v13 = vrot.slane %v21381_v59, %v15498_v51  ;;  %v21384_v42 = vcombine.low %v21382_v25, %v21383_v62  ;;  %v10678_v23 = vcombine.low %v10670_v34, %v10677_v14  ;;  %v11601_v17 = vcombine.high %v11593_v1, %v11593_v1 }
 0x41a   :  { %10275 = vst.msk [vmem:[#allocation2 + $0x128] sm:$0xff] %vm7966_vm3, %v10234_v6  ;;  %v12343_v55 = vsel %vm12342_vm9, %v11593_v1, -inf  ;;  %v11617_v9 = vrot.slane %v11603_v40, %v21378_v39  ;;  %v11618_v6 = vcombine.high %v11610_v44, %v11610_v44  ;;  %v12371_v4 = vsel %vm12342_vm9, %v11610_v44, -inf }
 0x41b   :  { %v20156_v11 = vrot.slane %v21384_v42, %v15498_v51  ;;  %10461 = vst.msk [vmem:[#allocation2 + $0x128] sm:$0xff] %vm8921_vm7, %v10420_v48  ;;  %v12344_v60 = vrot.slane %v12343_v55, 4  ;;  %10713 = vrot.lane.b32.xlu0 %v10678_v23, %s14307_s7  ;;  %v11602_v2 = vcombine.high %v11600_v50, %v11600_v50  ;;  %v12350_v19 = vsel %vm12342_vm9, %v11601_v17, -inf }
 0x41c   :  { %10745 = vst.msk [vmem:[#allocation2 + $0x128] sm:$0xff] %vm9348_vm8, %v10704_v47  ;;  %v12357_v54 = vsel %vm12342_vm9, %v11600_v50, -inf  ;;  %v12372_v20 = vrot.slane %v12371_v4, 4  ;;  %v12351_v7 = vrot.slane %v12350_v19, 4  ;;  %v11619_v48 = vcombine.high %v11617_v9, %v11617_v9  ;;  %v20171_v44 = vpop.f32.mrb[20].mxu1 }
 0x41d   :  { %v12345_v31 = vmax.f32 %v12343_v55, %v12344_v60  ;;  %v12358_v10 = vrot.slane %v12357_v54, 4  ;;  %v12364_v15 = vsel %vm12342_vm9, %v11602_v2, -inf  ;;  %v12378_v12 = vsel %vm12342_vm9, %v11618_v6, -inf  ;;  %v11236_v17 = vpop.f32.mrb[21].mxu1 }
 0x41e   :  { %v12373_v30 = vmax.f32 %v12371_v4, %v12372_v20  ;;  %v12385_v33 = vsel %vm12342_vm9, %v11617_v9, -inf  ;;  %v12352_v38 = vmax.f32 %v12350_v19, %v12351_v7  ;;  %v12365_v16 = vrot.slane %v12364_v15, 4  ;;  %v10236_v4 = vpop.permute.xlu0 %10235  ;;  %v20174_v2 = vpop.f32.mrb[22].mxu1 }
 0x41f   :  { %v12346_v63 = vrot.slane %v12345_v31, 2  ;;  %v12359_v57 = vmax.f32 %v12357_v54, %v12358_v10  ;;  %v10935_v37 = vld [vmem:[#allocation2 + $0x110] sm:$0xff]  ;;  %v12379_v34 = vrot.slane %v12378_v12, 4  ;;  %v12386_v5 = vrot.slane %v12385_v33, 4  ;;  %v11239_v7 = vpop.f32.mrb[23].mxu1 }
 0x420   :  { %v12374_v3 = vrot.slane %v12373_v30, 2  ;;  %v12392_v21 = vsel %vm12342_vm9, %v11619_v48, -inf  ;;  %11280 = vmatprep.mubr.bf16.mxu1 %v10935_v37  ;;  %v12353_v14 = vrot.slane %v12352_v38, 2  ;;  %v12366_v1 = vmax.f32 %v12364_v15, %v12365_v16 }
 0x421   :  { %v12347_v52 = vmax.f32 %v12345_v31, %v12346_v63  ;;  %v12360_v0 = vrot.slane %v12359_v57, 2  ;;  %11281 = vmatmul.mubr.bf16.gmra.mrb[44].mxu1 %v10934_v8  ;;  %v12380_v22 = vmax.f32 %v12378_v12, %v12379_v34  ;;  %v12387_v49 = vmax.f32 %v12385_v33, %v12386_v5  ;;  %v7941_v50 = vpop.permute.xlu1 %7940  ;;  %v10937_v5 = vld [vmem:[#allocation2 + $0x120] sm:$0xff] }
 0x422   :  { %v12375_v47 = vmax.f32 %v12373_v30, %v12374_v3  ;;  %v12393_v59 = vrot.slane %v12392_v21, 4  ;;  %v12354_v62 = vmax.f32 %v12352_v38, %v12353_v14  ;;  %v12367_v23 = vrot.slane %v12366_v1, 2  ;;  %7981 = vst.msk [vmem:[#allocation2 + $0x150] sm:$0xff] %vm7966_vm3, %v7941_v50  ;;  %v21385_v14 = vld [vmem:[#allocation46_spill] sm:$0xff] }
 0x423   :  { %v10938_v40 = vld [vmem:[#allocation2 + $0x128] sm:$0xff]  ;;  %v12348_v25 = vrot.slane %v12347_v52, 1  ;;  %v12361_v42 = vmax.f32 %v12359_v57, %v12360_v0  ;;  %v12381_v60 = vrot.slane %v12380_v22, 2  ;;  %v12388_v9 = vrot.slane %v12387_v49, 2 }
 0x424   :  { %11288 = vmatprep.mubr.bf16.mxu1 %v10938_v40  ;;  %v12376_v55 = vrot.slane %v12375_v47, 1  ;;  %v12394_v6 = vmax.f32 %v12392_v21, %v12393_v59  ;;  %v12355_v54 = vrot.slane %v12354_v62, 1  ;;  %v12368_v31 = vmax.f32 %v12366_v1, %v12367_v23 }
 0x425   :  { %v12349_v19 = vmax.f32 %v12347_v52, %v12348_v25  ;;  %v12362_v20 = vrot.slane %v12361_v42, 1  ;;  %v12382_v48 = vmax.f32 %v12380_v22, %v12381_v60  ;;  %v12389_v15 = vmax.f32 %v12387_v49, %v12388_v9  ;;  %v8896_v57 = vpop.permute.xlu1 %8895 }
 0x426   :  { %v20176_v10 = vmax.f32 %v12375_v47, %v12376_v55  ;;  %v12395_v30 = vrot.slane %v12394_v6, 2  ;;  %v12356_v12 = vmax.f32 %v12354_v62, %v12355_v54  ;;  %v12369_v63 = vrot.slane %v12368_v31, 1  ;;  %8936 = vst.msk [vmem:[#allocation2 + $0x150] sm:$0xff] %vm8921_vm7, %v8896_v57 }
 0x427   :  { %v20178_v33 = vmax.f32 %v12361_v42, %v12362_v20  ;;  %v11620_v38 = vcombine.high %v20150_v61, %v20150_v61  ;;  %v12383_v16 = vrot.slane %v12382_v48, 1  ;;  %v12390_v37 = vrot.slane %v12389_v15, 1  ;;  %v20194_v59 = vpop.f32.mrb[116].mxu0 }
 0x428   :  { %v12396_v3 = vmax.f32 %v12394_v6, %v12395_v30  ;;  %v11627_v34 = vrot.slane %v20150_v61, %v21378_v39  ;;  %v20185_v21 = vmax.f32 %v12368_v31, %v12369_v63  ;;  %v9726_v52 = vcombine.low %v20146_v13, %v20156_v11  ;;  %v10422_v61 = vpop.permute.xlu0 %10421  ;;  %v21386_v13 = vld [vmem:[#allocation29_spill] sm:$0xff]  ;;  %v20200_v42 = vpop.f32.mrb[117].mxu0 }
 0x429   :  { %v11634_v8 = vrot.slane %v11620_v38, %v21378_v39  ;;  %v11206_v0 = vadd.f32 %v20087_v24, %v21385_v14  ;;  %11289 = vmatmul.mubr.bf16.gmra.mrb[48].mxu1 %v10937_v5  ;;  %v20192_v1 = vmax.f32 %v12382_v48, %v12383_v16  ;;  %v12391_v47 = vmax.f32 %v12389_v15, %v12390_v37  ;;  %v20204_v60 = vpop.f32.mrb[118].mxu0 }
 0x42a   :  { %v12397_v22 = vrot.slane %v12396_v3, 1  ;;  %v11635_v49 = vcombine.high %v11627_v34, %v11627_v34  ;;  %v12399_v25 = vsel %vm12342_vm9, %v11627_v34, -inf  ;;  %9850 = vst.msk [vmem:[#allocation2 + $0x140] sm:$0xff] %vm5820_vm2, %v9726_v52  ;;  %v20208_v31 = vpop.f32.mrb[119].mxu0  ;;  %v21388_v34 = vld [vmem:[#allocation35_spill] sm:$0xff] }
 0x42b   :  { %v11636_v40 = vcombine.high %v11634_v8, %v11634_v8  ;;  %v12413_v62 = vsel %vm12342_vm9, %v11634_v8, -inf  ;;  %v11383_v11 = vadd.f32 %v21386_v13, %v11206_v0  ;;  %v13351_v50 = vmax.f32 %v12349_v19, %v12391_v47  ;;  %10276 = vst.msk [vmem:[#allocation2 + $0x140] sm:$0xff] %vm7966_vm3, %v10236_v4  ;;  %v21387_v19 = vld [vmem:[#allocation12_spill] sm:$0xff] }
 0x42c   :  { %v12398_v23 = vmax.f32 %v12396_v3, %v12397_v22  ;;  %v12400_v17 = vrot.slane %v12399_v25, 4  ;;  %v12406_v55 = vsel %vm12342_vm9, %v11635_v49, -inf  ;;  %v12414_v6 = vrot.slane %v12413_v62, 4  ;;  %10462 = vst.msk [vmem:[#allocation2 + $0x140] sm:$0xff] %vm8921_vm7, %v10422_v61  ;;  %v9323_v0 = vpop.permute.xlu1 %9322 }
 0x42d   :  { %v12407_v9 = vrot.slane %v12406_v55, 4  ;;  %v12420_v54 = vsel %vm12342_vm9, %v11636_v40, -inf  ;;  %v11517_v20 = vmax.f32 %v11383_v11, 0.0  ;;  %v11211_v30 = vadd.f32 %v20087_v24, %v21387_v19  ;;  %9363 = vst.msk [vmem:[#allocation2 + $0x150] sm:$0xff] %vm9348_vm8, %v9323_v0 }
 0x42e   :  { %v13352_v7 = vmax.f32 %v12356_v12, %v12398_v23  ;;  %v12401_v48 = vmax.f32 %v12399_v25, %v12400_v17  ;;  %v12421_v15 = vrot.slane %v12420_v54, 4  ;;  %v12415_v38 = vmax.f32 %v12413_v62, %v12414_v6 }
 0x42f   :  { %v12408_v63 = vmax.f32 %v12406_v55, %v12407_v9  ;;  %v11637_v4 = vcombine.high %v11517_v20, %v11517_v20  ;;  %v11644_v57 = vrot.slane %v11517_v20, %v21378_v39  ;;  %v11388_v5 = vadd.f32 %v21388_v34, %v11211_v30  ;;  %v10706_v55 = vpop.permute.xlu0 %10705 }
 0x430   :  { %v13496_v16 = vsel %vm13495_vm10, %v13352_v7, %v13351_v50  ;;  %v12402_v37 = vrot.slane %v12401_v48, 2  ;;  %v12422_v3 = vmax.f32 %v12420_v54, %v12421_v15  ;;  %v12416_v12 = vrot.slane %v12415_v38, 2  ;;  %10746 = vst.msk [vmem:[#allocation2 + $0x140] sm:$0xff] %vm9348_vm8, %v10706_v55 }
 0x431   :  { %v12409_v8 = vrot.slane %v12408_v63, 2  ;;  %v11651_v52 = vrot.slane %v11637_v4, %v21378_v39  ;;  %v11652_v14 = vcombine.high %v11644_v57, %v11644_v57  ;;  %v12427_v49 = vsel %vm12342_vm9, %v11644_v57, -inf }
 0x432   :  { %v12403_v47 = vmax.f32 %v12401_v48, %v12402_v37  ;;  %v12423_v22 = vrot.slane %v12422_v3, 2  ;;  %v11518_v61 = vmax.f32 %v11388_v5, 0.0  ;;  %v12417_v25 = vmax.f32 %v12415_v38, %v12416_v12  ;;  %v20222_v30 = vpop.f32.mrb[24].mxu1 }
 0x433   :  { %v12410_v40 = vmax.f32 %v12408_v63, %v12409_v8  ;;  %v11653_v62 = vcombine.high %v11651_v52, %v11651_v52  ;;  %v12428_v13 = vrot.slane %v12427_v49, 4  ;;  %v12434_v50 = vsel %vm12342_vm9, %v11652_v14, -inf  ;;  %v11244_v37 = vpop.f32.mrb[25].mxu1  ;;  %v20234_v55 = vpop.permute.xlu0 %10237 }
 0x434   :  { %v12404_v11 = vrot.slane %v12403_v47, 1  ;;  %v12424_v23 = vmax.f32 %v12422_v3, %v12423_v22  ;;  %v12441_v17 = vsel %vm12342_vm9, %v11651_v52, -inf  ;;  %v12418_v6 = vrot.slane %v12417_v25, 1  ;;  %v20225_v12 = vpop.f32.mrb[26].mxu1 }
 0x435   :  { %v12411_v9 = vrot.slane %v12410_v40, 1  ;;  %v12429_v54 = vmax.f32 %v12427_v49, %v12428_v13  ;;  %v12435_v20 = vrot.slane %v12434_v50, 4  ;;  %v12442_v15 = vrot.slane %v12441_v17, 4  ;;  %v11247_v22 = vpop.f32.mrb[27].mxu1 }
 0x436   :  { %v12405_v7 = vmax.f32 %v12403_v47, %v12404_v11  ;;  %v12425_v48 = vrot.slane %v12424_v23, 1  ;;  %v12448_v19 = vsel %vm12342_vm9, %v11653_v62, -inf  ;;  %v12419_v38 = vmax.f32 %v12417_v25, %v12418_v6 }
 0x437   :  { %v12412_v63 = vmax.f32 %v12410_v40, %v12411_v9  ;;  %v12430_v4 = vrot.slane %v12429_v54, 2  ;;  %v12436_v57 = vmax.f32 %v12434_v50, %v12435_v20  ;;  %v12443_v5 = vmax.f32 %v12441_v17, %v12442_v15  ;;  %v10941_v9 = vld [vmem:[#allocation2 + $0x140] sm:$0xff] }
 0x438   :  { %v12426_v3 = vmax.f32 %v12424_v23, %v12425_v48  ;;  %v13353_v34 = vmax.f32 %v20178_v33, %v12405_v7  ;;  %v12449_v8 = vrot.slane %v12448_v19, 4  ;;  %v13355_v14 = vmax.f32 %v20176_v10, %v12419_v38  ;;  %11296 = vmatprep.mubr.bf16.mxu1 %v10941_v9  ;;  %v21394_v9 = vld [vmem:[#allocation43_spill] sm:$0xff] }
 0x439   :  { %v13354_v52 = vmax.f32 %v20185_v21, %v12412_v63  ;;  %v12431_v0 = vmax.f32 %v12429_v54, %v12430_v4  ;;  %v12437_v47 = vrot.slane %v12436_v57, 2  ;;  %v12444_v25 = vrot.slane %v12443_v5, 2  ;;  %v10940_v54 = vld [vmem:[#allocation2 + $0x138] sm:$0xff] }
 0x43a   :  { %v13356_v49 = vmax.f32 %v20192_v1, %v12426_v3  ;;  %v13498_v40 = vsel %vm13497_vm11, %v13353_v34, %v13496_v16  ;;  %v12450_v62 = vmax.f32 %v12448_v19, %v12449_v8  ;;  %v11654_v23 = vcombine.high %v11518_v61, %v11518_v61  ;;  %11297 = vmatmul.mubr.bf16.gmra.mrb[52].mxu1 %v10940_v54 }
 0x43b   :  { %v13500_v13 = vsel %vm13499_vm12, %v13354_v52, %v13498_v40  ;;  %v12432_v33 = vrot.slane %v12431_v0, 1  ;;  %v12438_v11 = vmax.f32 %v12436_v57, %v12437_v47  ;;  %v12445_v17 = vmax.f32 %v12443_v5, %v12444_v25  ;;  %v7943_v19 = vpop.permute.xlu1 %7942  ;;  %v10424_v40 = vpop.permute.xlu0 %10423 }
 0x43c   :  { %v13502_v50 = vsel %vm13501_vm14, %v13355_v14, %v13500_v13  ;;  %v12451_v21 = vrot.slane %v12450_v62, 2  ;;  %v11661_v10 = vrot.slane %v11518_v61, %v21378_v39  ;;  %v11668_v6 = vrot.slane %v11654_v23, %v21378_v39  ;;  %7982 = vst.msk [vmem:[#allocation2 + $0x168] sm:$0xff] %vm7966_vm3, %v7943_v19 }
 0x43d   :  { %v20237_v1 = vsel %vm13503_vm6, %v13356_v49, %v13502_v50  ;;  %v12439_v16 = vrot.slane %v12438_v11, 1  ;;  %v12446_v20 = vrot.slane %v12445_v17, 1  ;;  %v20243_v4 = vmax.f32 %v12431_v0, %v12432_v33  ;;  %v21390_v33 = vld [vmem:[#allocation40_spill] sm:$0xff] }
 0x43e   :  { %v12452_v7 = vmax.f32 %v12450_v62, %v12451_v21  ;;  %v11669_v48 = vcombine.high %v11661_v10, %v11661_v10  ;;  %v12455_v15 = vsel %vm12342_vm9, %v11661_v10, -inf  ;;  %v11670_v63 = vcombine.high %v11668_v6, %v11668_v6  ;;  %v21389_v62 = vld [vmem:[#allocation31_spill] sm:$0xff] }
 0x43f   :  { %v12456_v61 = vrot.slane %v12455_v15, 4  ;;  %v12469_v38 = vsel %vm12342_vm9, %v11668_v6, -inf  ;;  %v20246_v34 = vmax.f32 %v12438_v11, %v12439_v16  ;;  %v20249_v14 = vmax.f32 %v12445_v17, %v12446_v20  ;;  %v21391_v11 = vld [vmem:[#allocation23_spill] sm:$0xff]  ;;  %v21393_v17 = vld [vmem:[#allocation24_spill] sm:$0xff] }
 0x440   :  { %v12453_v57 = vrot.slane %v12452_v7, 1  ;;  %v12462_v37 = vsel %vm12342_vm9, %v11669_v48, -inf  ;;  %v12470_v3 = vrot.slane %v12469_v38, 4  ;;  %v12476_v52 = vsel %vm12342_vm9, %v11670_v63, -inf  ;;  %v8898_v54 = vpop.permute.xlu1 %8897  ;;  %v21397_v63 = vld [vmem:[#allocation44_spill] sm:$0xff] }
 0x441   :  { %v12457_v5 = vmax.f32 %v12455_v15, %v12456_v61  ;;  %v12463_v8 = vrot.slane %v12462_v37, 4  ;;  %v12477_v49 = vrot.slane %v12476_v52, 4  ;;  %v11214_v13 = vadd.f32 %v20087_v24, %v21389_v62  ;;  %v21396_v15 = vld [vmem:[#allocation37_spill] sm:$0xff]  ;;  %8937 = vst.msk [vmem:[#allocation2 + $0x168] sm:$0xff] %vm8921_vm7, %v8898_v54 }
 0x442   :  { %v20251_v47 = vmax.f32 %v12452_v7, %v12453_v57  ;;  %v12471_v22 = vmax.f32 %v12469_v38, %v12470_v3  ;;  %v21392_v23 = vcombine.low %v21390_v33, %v21391_v11  ;;  %v21395_v16 = vcombine.low %v21393_v17, %v21394_v9  ;;  %v21398_v61 = vld [vmem:[#allocation45_spill] sm:$0xff] }
 0x443   :  { %v12458_v25 = vrot.slane %v12457_v5, 2  ;;  %v12464_v0 = vmax.f32 %v12462_v37, %v12463_v8  ;;  %v12478_v10 = vmax.f32 %v12476_v52, %v12477_v49  ;;  %v11219_v20 = vadd.f32 %v20087_v24, %v19874_v18  ;;  %v21400_v52 = vld [vmem:[#allocation33_spill] sm:$0xff]  ;;  %v10708_v9 = vpop.permute.xlu0 %10707 }
 0x444   :  { %v9735_v50 = vrot.slane %v21392_v23, %v15498_v51  ;;  %v12472_v21 = vrot.slane %v12471_v22, 2  ;;  %v9742_v6 = vrot.slane %v21395_v16, %v15498_v51  ;;  %v11391_v19 = vadd.f32 %v21396_v15, %v11214_v13  ;;  %v21402_v33 = vld [vmem:[#allocation13_spill] sm:$0xff] }
 0x445   :  { %v12459_v7 = vmax.f32 %v12457_v5, %v12458_v25  ;;  %v12465_v48 = vrot.slane %v12464_v0, 2  ;;  %v21399_v38 = vcombine.low %v21397_v63, %v21398_v61  ;;  %v12479_v3 = vrot.slane %v12478_v10, 2  ;;  %v21401_v25 = vld [vmem:[#allocation14_spill] sm:$0xff] }
 0x446   :  { %v12473_v37 = vmax.f32 %v12471_v22, %v12472_v21  ;;  %v9743_v8 = vcombine.low %v9735_v50, %v9742_v6  ;;  %v11396_v49 = vadd.f32 %v21400_v52, %v11219_v20  ;;  %v11519_v5 = vmax.f32 %v11391_v19, 0.0  ;;  %v9325_v22 = vpop.permute.xlu1 %9324 }
 0x447   :  { %v20271_v57 = vrot.slane %v21399_v38, %v15498_v51  ;;  %v12460_v62 = vrot.slane %v12459_v7, 1  ;;  %v12466_v18 = vmax.f32 %v12464_v0, %v12465_v48  ;;  %v21403_v13 = vcombine.low %v21401_v25, %v21402_v33  ;;  %9364 = vst.msk [vmem:[#allocation2 + $0x168] sm:$0xff] %vm9348_vm8, %v9325_v22 }
 0x448   :  { %v12474_v23 = vrot.slane %v12473_v37, 1  ;;  %v12480_v17 = vmax.f32 %v12478_v10, %v12479_v3  ;;  %9851 = vst.msk [vmem:[#allocation2 + $0x158] sm:$0xff] %vm5820_vm2, %v9743_v8  ;;  %v11520_v16 = vmax.f32 %v11396_v49, 0.0  ;;  %v20283_v50 = vadd.f32 %v20087_v24, %v19891_v29 }
 0x449   :  { %v20278_v11 = vrot.slane %v21403_v13, %v15498_v51  ;;  %v20285_v21 = vmax.f32 %v12459_v7, %v12460_v62  ;;  %v12467_v0 = vrot.slane %v12466_v18, 1  ;;  %v11671_v6 = vcombine.high %v11519_v5, %v11519_v5  ;;  %10277 = vst.msk [vmem:[#allocation2 + $0x158] sm:$0xff] %vm7966_vm3, %v20234_v55 }
 0x44a   :  { %v11678_v54 = vrot.slane %v11519_v5, %v21378_v39  ;;  %v12475_v10 = vmax.f32 %v12473_v37, %v12474_v23  ;;  %v12481_v20 = vrot.slane %v12480_v17, 1  ;;  %10463 = vst.msk [vmem:[#allocation2 + $0x158] sm:$0xff] %vm8921_vm7, %v10424_v40  ;;  %v11688_v48 = vcombine.high %v11520_v16, %v11520_v16 }
 0x44b   :  { %v11695_v15 = vrot.slane %v11520_v16, %v21378_v39  ;;  %v20293_v29 = vmax.f32 %v12466_v18, %v12467_v0  ;;  %v11685_v7 = vrot.slane %v11671_v6, %v21378_v39  ;;  %10747 = vst.msk [vmem:[#allocation2 + $0x158] sm:$0xff] %vm9348_vm8, %v10708_v9 }
 0x44c   :  { %v11686_v19 = vcombine.high %v11678_v54, %v11678_v54  ;;  %v12483_v63 = vsel %vm12342_vm9, %v11678_v54, -inf  ;;  %v12482_v61 = vmax.f32 %v12480_v17, %v12481_v20  ;;  %v13357_v55 = vmax.f32 %v20243_v4, %v12475_v10 }
 0x44d   :  { %v12484_v38 = vrot.slane %v12483_v63, 4  ;;  %v11702_v37 = vrot.slane %v11688_v48, %v21378_v39  ;;  %v11687_v3 = vcombine.high %v11685_v7, %v11685_v7  ;;  %v12497_v8 = vsel %vm12342_vm9, %v11685_v7, -inf }
 0x44e   :  { %v12490_v40 = vsel %vm12342_vm9, %v11686_v19, -inf  ;;  %v11703_v52 = vcombine.high %v11695_v15, %v11695_v15  ;;  %v13358_v49 = vmax.f32 %v20246_v34, %v12482_v61  ;;  %v13506_v62 = vsel %vm13505_vm13, %v13357_v55, %v20237_v1  ;;  %v10943_v61 = vld [vmem:[#allocation2 + $0x150] sm:$0xff] }
 0x44f   :  { %v12485_v18 = vmax.f32 %v12483_v63, %v12484_v38  ;;  %v12491_v5 = vrot.slane %v12490_v40, 4  ;;  %v12498_v25 = vrot.slane %v12497_v8, 4  ;;  %v12504_v33 = vsel %vm12342_vm9, %v11687_v3, -inf }
 0x450   :  { %v11704_v4 = vcombine.high %v11702_v37, %v11702_v37  ;;  %v12511_v13 = vsel %vm12342_vm9, %v11695_v15, -inf  ;;  %v13508_v23 = vsel %vm13507_vm15, %v13358_v49, %v13506_v62  ;;  %v12505_v16 = vrot.slane %v12504_v33, 4 }
 0x451   :  { %v12486_v17 = vrot.slane %v12485_v18, 2  ;;  %v12492_v9 = vmax.f32 %v12490_v40, %v12491_v5  ;;  %13574 = vst [vmem:[%s21032_s5] sm:$0xff] %v13508_v23  ;;  %v12499_v34 = vmax.f32 %v12497_v8, %v12498_v25  ;;  %v12512_v22 = vrot.slane %v12511_v13, 4 }
 0x452   :  { %v12518_v1 = vsel %vm12342_vm9, %v11703_v52, -inf  ;;  %v12525_v0 = vsel %vm12342_vm9, %v11702_v37, -inf  ;;  %v12506_v10 = vmax.f32 %v12504_v33, %v12505_v16  ;;  %v10944_v48 = vld [vmem:[#allocation2 + $0x158] sm:$0xff]  ;;  %v12532_v63 = vsel %vm12342_vm9, %v11704_v4, -inf  ;;  %v7945_v62 = vpop.permute.xlu1 %7944 }
 0x453   :  { %v12487_v6 = vmax.f32 %v12485_v18, %v12486_v17  ;;  %v12493_v54 = vrot.slane %v12492_v9, 2  ;;  %v12519_v20 = vrot.slane %v12518_v1, 4  ;;  %v12500_v15 = vrot.slane %v12499_v34, 2  ;;  %11304 = vmatprep.mubr.bf16.mxu1 %v10944_v48  ;;  %7983 = vst.msk [vmem:[#allocation2 + $0x180] sm:$0xff] %vm7966_vm3, %v7945_v62 }
 0x454   :  { %v12513_v7 = vmax.f32 %v12511_v13, %v12512_v22  ;;  %v12526_v19 = vrot.slane %v12525_v0, 4  ;;  %v12507_v3 = vrot.slane %v12506_v10, 2  ;;  %11305 = vmatmul.mubr.bf16.gmra.mrb[56].mxu1 %v10943_v61  ;;  %v12533_v49 = vrot.slane %v12532_v63, 4  ;;  %v20315_v16 = vpop.f32.mrb[28].mxu1 }
 0x455   :  { %v12488_v55 = vrot.slane %v12487_v6, 1  ;;  %v12494_v38 = vmax.f32 %v12492_v9, %v12493_v54  ;;  %v12520_v40 = vmax.f32 %v12518_v1, %v12519_v20  ;;  %v12501_v8 = vmax.f32 %v12499_v34, %v12500_v15 }
 0x456   :  { %v12514_v52 = vrot.slane %v12513_v7, 2  ;;  %v12527_v37 = vmax.f32 %v12525_v0, %v12526_v19  ;;  %v12508_v25 = vmax.f32 %v12506_v10, %v12507_v3  ;;  %v12534_v17 = vmax.f32 %v12532_v63, %v12533_v49  ;;  %v11252_v0 = vpop.f32.mrb[29].mxu1  ;;  %v10240_v10 = vpop.permute.xlu0 %10239 }
 0x457   :  { %v12489_v18 = vmax.f32 %v12487_v6, %v12488_v55  ;;  %v12495_v5 = vrot.slane %v12494_v38, 1  ;;  %v12521_v33 = vrot.slane %v12520_v40, 2  ;;  %v12502_v13 = vrot.slane %v12501_v8, 1  ;;  %v20318_v15 = vpop.f32.mrb[30].mxu1  ;;  %v8900_v55 = vpop.permute.xlu1 %8899 }
 0x458   :  { %v12515_v4 = vmax.f32 %v12513_v7, %v12514_v52  ;;  %v12528_v23 = vrot.slane %v12527_v37, 2  ;;  %v12509_v22 = vrot.slane %v12508_v25, 1  ;;  %v12535_v48 = vrot.slane %v12534_v17, 2  ;;  %8938 = vst.msk [vmem:[#allocation2 + $0x180] sm:$0xff] %vm8921_vm7, %v8900_v55 }
 0x459   :  { %v12496_v9 = vmax.f32 %v12494_v38, %v12495_v5  ;;  %v13359_v34 = vmax.f32 %v20249_v14, %v12489_v18  ;;  %v12522_v1 = vmax.f32 %v12520_v40, %v12521_v33  ;;  %v12503_v54 = vmax.f32 %v12501_v8, %v12502_v13  ;;  %v11255_v38 = vpop.f32.mrb[31].mxu1 }
 0x45a   :  { %v12516_v20 = vrot.slane %v12515_v4, 1  ;;  %v12529_v6 = vmax.f32 %v12527_v37, %v12528_v23  ;;  %v12510_v19 = vmax.f32 %v12508_v25, %v12509_v22  ;;  %v9760_v63 = vcombine.low %v20271_v57, %v20278_v11  ;;  %v10426_v25 = vpop.permute.xlu0 %10425  ;;  %v21406_v23 = vld [vmem:[#allocation41_spill] sm:$0xff] }
 0x45b   :  { %v13360_v7 = vmax.f32 %v20251_v47, %v12496_v9  ;;  %v12523_v61 = vrot.slane %v12522_v1, 1  ;;  %v13361_v14 = vmax.f32 %v20285_v21, %v12503_v54  ;;  %v12536_v8 = vmax.f32 %v12534_v17, %v12535_v48  ;;  %v21404_v47 = vld [vmem:[#allocation36_spill] sm:$0xff] }
 0x45c   :  { %v20324_v3 = vmax.f32 %v12515_v4, %v12516_v20  ;;  %v12530_v40 = vrot.slane %v12529_v6, 1  ;;  %v13362_v52 = vmax.f32 %v20293_v29, %v12510_v19  ;;  %9852 = vst.msk [vmem:[#allocation2 + $0x170] sm:$0xff] %vm5820_vm2, %v9760_v63  ;;  %v11399_v57 = vadd.f32 %v21404_v47, %v20283_v50  ;;  %v21409_v20 = vld [vmem:[#allocation39_spill] sm:$0xff] }
 0x45d   :  { %v13509_v37 = vsel %vm13495_vm10, %v13360_v7, %v13359_v34  ;;  %v20329_v49 = vmax.f32 %v12522_v1, %v12523_v61  ;;  %v12537_v62 = vrot.slane %v12536_v8, 1  ;;  %10278 = vst.msk [vmem:[#allocation2 + $0x170] sm:$0xff] %vm7966_vm3, %v10240_v10  ;;  %v11227_v18 = vadd.f32 %v20087_v24, %v20093_v28  ;;  %v21408_v1 = vld [vmem:[#allocation15_spill] sm:$0xff] }
 0x45e   :  { %v13510_v11 = vsel %vm13497_vm11, %v13361_v14, %v13509_v37  ;;  %v20335_v21 = vmax.f32 %v12529_v6, %v12530_v40  ;;  %v11521_v5 = vmax.f32 %v11399_v57, 0.0  ;;  %v11230_v33 = vadd.f32 %v20087_v24, %v20109_v45  ;;  %10464 = vst.msk [vmem:[#allocation2 + $0x170] sm:$0xff] %vm8921_vm7, %v10426_v25 }
 0x45f   :  { %v20341_v29 = vsel %vm13499_vm12, %v13362_v52, %v13510_v11  ;;  %v21405_v50 = vcombine.low %v19688_v41, %v19826_v36  ;;  %v20349_v4 = vmax.f32 %v12536_v8, %v12537_v62  ;;  %v11404_v17 = vadd.f32 %v21406_v23, %v11227_v18  ;;  %v9327_v10 = vpop.permute.xlu1 %9326 }
 0x460   :  { %v21407_v28 = vcombine.low %v19841_v43, %v19878_v26  ;;  %v11235_v22 = vadd.f32 %v20087_v24, %v20171_v44  ;;  %v11705_v45 = vcombine.high %v11521_v5, %v11521_v5  ;;  %v11712_v34 = vrot.slane %v11521_v5, %v21378_v39  ;;  %9365 = vst.msk [vmem:[#allocation2 + $0x180] sm:$0xff] %vm9348_vm8, %v9327_v10 }
 0x461   :  { %v9769_v13 = vrot.slane %v21405_v50, %v15498_v51  ;;  %v11407_v41 = vadd.f32 %v21408_v1, %v11230_v33  ;;  %v20363_v36 = vadd.f32 %v20087_v24, %v20174_v2  ;;  %v11522_v0 = vmax.f32 %v11404_v17, 0.0 }
 0x462   :  { %v9776_v9 = vrot.slane %v21407_v28, %v15498_v51  ;;  %v11412_v6 = vadd.f32 %v21409_v20, %v11235_v22  ;;  %v20370_v43 = vrot.slane %v9802_v56, %v15498_v51  ;;  %v11719_v26 = vrot.slane %v11705_v45, %v21378_v39 }
 0x463   :  { %v11720_v44 = vcombine.high %v11712_v34, %v11712_v34  ;;  %v12539_v48 = vsel %vm12342_vm9, %v11712_v34, -inf  ;;  %v11523_v19 = vmax.f32 %v11407_v41, 0.0  ;;  %v11722_v24 = vcombine.high %v11522_v0, %v11522_v0 }
 0x464   :  { %v9777_v54 = vcombine.low %v9769_v13, %v9776_v9  ;;  %v12540_v7 = vrot.slane %v12539_v48, 4  ;;  %v11729_v2 = vrot.slane %v11522_v0, %v21378_v39  ;;  %v20377_v61 = vmax.f32 %v11412_v6, 0.0  ;;  %v10710_v13 = vpop.permute.xlu0 %10709 }
 0x465   :  { %v11721_v58 = vcombine.high %v11719_v26, %v11719_v26  ;;  %v12546_v27 = vsel %vm12342_vm9, %v11720_v44, -inf  ;;  %v12553_v56 = vsel %vm12342_vm9, %v11719_v26, -inf  ;;  %v11739_v63 = vcombine.high %v11523_v19, %v11523_v19  ;;  %10748 = vst.msk [vmem:[#allocation2 + $0x170] sm:$0xff] %vm9348_vm8, %v10710_v13  ;;  %v10946_v13 = vld [vmem:[#allocation2 + $0x168] sm:$0xff] }
 0x466   :  { %9853 = vst.msk [vmem:[#allocation2 + $0x188] sm:$0xff] %vm5820_vm2, %v9777_v54  ;;  %v12541_v55 = vmax.f32 %v12539_v48, %v12540_v7  ;;  %v12547_v38 = vrot.slane %v12546_v27, 4  ;;  %v12554_v14 = vrot.slane %v12553_v56, 4  ;;  %v11736_v40 = vrot.slane %v11722_v24, %v21378_v39 }
 0x467   :  { %v12560_v8 = vsel %vm12342_vm9, %v11721_v58, -inf  ;;  %v11737_v52 = vcombine.high %v11729_v2, %v11729_v2  ;;  %v12567_v37 = vsel %vm12342_vm9, %v11729_v2, -inf  ;;  %v20385_v47 = vrot.slane %v11523_v19, %v21378_v39 }
 0x468   :  { %v12542_v57 = vrot.slane %v12541_v55, 2  ;;  %v12548_v11 = vmax.f32 %v12546_v27, %v12547_v38  ;;  %v12555_v62 = vmax.f32 %v12553_v56, %v12554_v14  ;;  %v12561_v18 = vrot.slane %v12560_v8, 4 }
 0x469   :  { %v11738_v5 = vcombine.high %v11736_v40, %v11736_v40  ;;  %v12568_v25 = vrot.slane %v12567_v37, 4  ;;  %v12574_v33 = vsel %vm12342_vm9, %v11737_v52, -inf  ;;  %v12581_v50 = vsel %vm12342_vm9, %v11736_v40, -inf  ;;  %v10242_v10 = vpop.permute.xlu0 %10241 }
 0x46a   :  { %v12543_v23 = vmax.f32 %v12541_v55, %v12542_v57  ;;  %v12549_v17 = vrot.slane %v12548_v11, 2  ;;  %v12556_v28 = vrot.slane %v12555_v62, 2  ;;  %v12562_v9 = vmax.f32 %v12560_v8, %v12561_v18  ;;  %10279 = vst.msk [vmem:[#allocation2 + $0x188] sm:$0xff] %vm7966_vm3, %v10242_v10 }
 0x46b   :  { %v12569_v22 = vmax.f32 %v12567_v37, %v12568_v25  ;;  %v12575_v45 = vrot.slane %v12574_v33, 4  ;;  %v12582_v34 = vrot.slane %v12581_v50, 4  ;;  %v12588_v1 = vsel %vm12342_vm9, %v11738_v5, -inf  ;;  %v7947_v38 = vpop.permute.xlu1 %7946 }
 0x46c   :  { %v12544_v41 = vrot.slane %v12543_v23, 1  ;;  %v12550_v0 = vmax.f32 %v12548_v11, %v12549_v17  ;;  %v12557_v54 = vmax.f32 %v12555_v62, %v12556_v28  ;;  %v12563_v20 = vrot.slane %v12562_v9, 2  ;;  %7984 = vst.msk [vmem:[#allocation2 + $0x198] sm:$0xff] %vm7966_vm3, %v7947_v38  ;;  %v10947_v18 = vld [vmem:[#allocation2 + $0x170] sm:$0xff] }
 0x46d   :  { %v12570_v6 = vrot.slane %v12569_v22, 2  ;;  %v12576_v26 = vmax.f32 %v12574_v33, %v12575_v45  ;;  %v12583_v44 = vmax.f32 %v12581_v50, %v12582_v34  ;;  %v12589_v48 = vrot.slane %v12588_v1, 4  ;;  %11312 = vmatprep.mubr.bf16.mxu1 %v10947_v18 }
 0x46e   :  { %v20391_v19 = vmax.f32 %v12543_v23, %v12544_v41  ;;  %v12551_v7 = vrot.slane %v12550_v0, 1  ;;  %v12558_v24 = vrot.slane %v12557_v54, 1  ;;  %v12564_v2 = vmax.f32 %v12562_v9, %v12563_v20  ;;  %11313 = vmatmul.mubr.bf16.gmra.mrb[60].mxu1 %v10946_v13 }
 0x46f   :  { %v12571_v58 = vmax.f32 %v12569_v22, %v12570_v6  ;;  %v12577_v27 = vrot.slane %v12576_v26, 2  ;;  %v12584_v56 = vrot.slane %v12583_v44, 2  ;;  %v12590_v55 = vmax.f32 %v12588_v1, %v12589_v48  ;;  %v8902_v9 = vpop.permute.xlu1 %8901 }
 0x470   :  { %v12552_v14 = vmax.f32 %v12550_v0, %v12551_v7  ;;  %v12559_v40 = vmax.f32 %v12557_v54, %v12558_v24  ;;  %v12565_v8 = vrot.slane %v12564_v2, 1  ;;  %v11753_v52 = vrot.slane %v11739_v63, %v21378_v39  ;;  %8939 = vst.msk [vmem:[#allocation2 + $0x198] sm:$0xff] %vm8921_vm7, %v8902_v9 }
 0x471   :  { %v12572_v37 = vrot.slane %v12571_v58, 1  ;;  %v12578_v57 = vmax.f32 %v12576_v26, %v12577_v27  ;;  %v12585_v11 = vmax.f32 %v12583_v44, %v12584_v56  ;;  %v12591_v62 = vrot.slane %v12590_v55, 2  ;;  %v10428_v44 = vpop.permute.xlu0 %10427 }
 0x472   :  { %v12566_v5 = vmax.f32 %v12564_v2, %v12565_v8  ;;  %v13363_v25 = vmax.f32 %v20324_v3, %v12559_v40  ;;  %v11754_v33 = vcombine.high %v20385_v47, %v20385_v47  ;;  %v11755_v50 = vcombine.high %v11753_v52, %v11753_v52  ;;  %10465 = vst.msk [vmem:[#allocation2 + $0x188] sm:$0xff] %vm8921_vm7, %v10428_v44 }
 0x473   :  { %v12573_v23 = vmax.f32 %v12571_v58, %v12572_v37  ;;  %v12579_v17 = vrot.slane %v12578_v57, 1  ;;  %v12586_v28 = vrot.slane %v12585_v11, 1  ;;  %v12592_v63 = vmax.f32 %v12590_v55, %v12591_v62  ;;  %v9329_v7 = vpop.permute.xlu1 %9328 }
 0x474   :  { %v13364_v22 = vmax.f32 %v20329_v49, %v12566_v5  ;;  %v13512_v45 = vsel %vm13501_vm14, %v13363_v25, %v20341_v29  ;;  %v12595_v3 = vsel %vm12342_vm9, %v20385_v47, -inf  ;;  %v12602_v34 = vsel %vm12342_vm9, %v11754_v33, -inf  ;;  %9366 = vst.msk [vmem:[#allocation2 + $0x198] sm:$0xff] %vm9348_vm8, %v9329_v7 }
 0x475   :  { %v12580_v1 = vmax.f32 %v12578_v57, %v12579_v17  ;;  %v12587_v41 = vmax.f32 %v12585_v11, %v12586_v28  ;;  %v12593_v0 = vrot.slane %v12592_v63, 1  ;;  %v13365_v54 = vmax.f32 %v20335_v21, %v12573_v23  ;;  %v21410_v57 = vld [vmem:[#allocation42_spill] sm:$0xff] }
 0x476   :  { %v13513_v20 = vsel %vm13503_vm6, %v13364_v22, %v13512_v45  ;;  %v12596_v6 = vrot.slane %v12595_v3, 4  ;;  %v12603_v26 = vrot.slane %v12602_v34, 4  ;;  %v12609_v49 = vsel %vm12342_vm9, %v11753_v52, -inf }
 0x477   :  { %v12594_v29 = vmax.f32 %v12592_v63, %v12593_v0  ;;  %v13366_v48 = vmax.f32 %v20349_v4, %v12580_v1  ;;  %v13367_v47 = vmax.f32 %v20391_v19, %v12587_v41  ;;  %v13514_v10 = vsel %vm13505_vm13, %v13365_v54, %v13513_v20 }
 0x478   :  { %v12597_v24 = vmax.f32 %v12595_v3, %v12596_v6  ;;  %v12604_v2 = vmax.f32 %v12602_v34, %v12603_v26  ;;  %v12610_v21 = vrot.slane %v12609_v49, 4  ;;  %v12616_v58 = vsel %vm12342_vm9, %v11755_v50, -inf }
 0x479   :  { %v13368_v27 = vmax.f32 %v12552_v14, %v12594_v29  ;;  %v13515_v56 = vsel %vm13507_vm15, %v13366_v48, %v13514_v10  ;;  %v12617_v55 = vrot.slane %v12616_v58, 4  ;;  %v11756_v4 = vcombine.high %v20377_v61, %v20377_v61 }
 0x47a   :  { %13575 = vst [vmem:[%s21032_s5 + $0x8] sm:$0xff] %v13515_v56  ;;  %v12598_v19 = vrot.slane %v12597_v24, 2  ;;  %v12605_v38 = vrot.slane %v12604_v2, 2  ;;  %v12611_v40 = vmax.f32 %v12609_v49, %v12610_v21  ;;  %v11763_v8 = vrot.slane %v20377_v61, %v21378_v39 }
 0x47b   :  { %v20424_v52 = vsel %vm13495_vm10, %v13368_v27, %v13367_v47  ;;  %v12618_v14 = vmax.f32 %v12616_v58, %v12617_v55  ;;  %v11770_v37 = vrot.slane %v11756_v4, %v21378_v39  ;;  %v11415_v11 = vadd.f32 %v21410_v57, %v20363_v36 }
 0x47c   :  { %v12599_v62 = vmax.f32 %v12597_v24, %v12598_v19  ;;  %v12606_v18 = vmax.f32 %v12604_v2, %v12605_v38  ;;  %v12612_v5 = vrot.slane %v12611_v40, 2  ;;  %v11771_v25 = vcombine.high %v11763_v8, %v11763_v8 }
 0x47d   :  { %v12619_v33 = vrot.slane %v12618_v14, 2  ;;  %v11772_v50 = vcombine.high %v11770_v37, %v11770_v37  ;;  %v12623_v13 = vsel %vm12342_vm9, %v11763_v8, -inf  ;;  %v12637_v23 = vsel %vm12342_vm9, %v11770_v37, -inf  ;;  %v10712_v0 = vpop.permute.xlu0 %10711 }
 0x47e   :  { %v12600_v61 = vrot.slane %v12599_v62, 1  ;;  %v12607_v17 = vrot.slane %v12606_v18, 1  ;;  %v12613_v28 = vmax.f32 %v12611_v40, %v12612_v5  ;;  %v12624_v63 = vrot.slane %v12623_v13, 4  ;;  %10749 = vst.msk [vmem:[#allocation2 + $0x188] sm:$0xff] %vm9348_vm8, %v10712_v0 }
 0x47f   :  { %v12620_v9 = vmax.f32 %v12618_v14, %v12619_v33  ;;  %v12630_v22 = vsel %vm12342_vm9, %v11771_v25, -inf  ;;  %v12638_v45 = vrot.slane %v12637_v23, 4  ;;  %v12644_v36 = vsel %vm12342_vm9, %v11772_v50, -inf }
 0x480   :  { %v20433_v3 = vmax.f32 %v12599_v62, %v12600_v61  ;;  %v20435_v34 = vmax.f32 %v12606_v18, %v12607_v17  ;;  %v12614_v1 = vrot.slane %v12613_v28, 1  ;;  %v12625_v41 = vmax.f32 %v12623_v13, %v12624_v63  ;;  %v21411_v63 = vld [vmem:[#allocation18_spill] sm:$0xff] }
 0x481   :  { %v12621_v54 = vrot.slane %v12620_v9, 1  ;;  %v12631_v20 = vrot.slane %v12630_v22, 4  ;;  %v12639_v6 = vmax.f32 %v12637_v23, %v12638_v45  ;;  %v12645_v26 = vrot.slane %v12644_v36, 4  ;;  %v10244_v56 = vpop.permute.xlu0 %10243  ;;  %v10949_v23 = vld [vmem:[#allocation2 + $0x180] sm:$0xff] }
 0x482   :  { %v20438_v49 = vmax.f32 %v12613_v28, %v12614_v1  ;;  %v12626_v44 = vrot.slane %v12625_v41, 2  ;;  %v11525_v29 = vmax.f32 %v11415_v11, 0.0  ;;  %v9817_v48 = vrot.slane %v9803_v35, %v15498_v51 }
 0x483   :  { %v20444_v47 = vmax.f32 %v12620_v9, %v12621_v54  ;;  %v12632_v10 = vmax.f32 %v12630_v22, %v12631_v20  ;;  %v12640_v7 = vrot.slane %v12639_v6, 2  ;;  %v12646_v24 = vmax.f32 %v12644_v36, %v12645_v26 }
 0x484   :  { %v12627_v2 = vmax.f32 %v12625_v41, %v12626_v44  ;;  %v11773_v21 = vcombine.high %v11525_v29, %v11525_v29  ;;  %v11780_v58 = vrot.slane %v11525_v29, %v21378_v39  ;;  %v9818_v27 = vcombine.low %v20370_v43, %v9817_v48 }
 0x485   :  { %v12633_v55 = vrot.slane %v12632_v10, 2  ;;  %v12641_v4 = vmax.f32 %v12639_v6, %v12640_v7  ;;  %v12647_v19 = vrot.slane %v12646_v24, 2  ;;  %v11243_v51 = vadd.f32 %v20451_v53, %v20222_v30  ;;  %v10430_v18 = vpop.permute.xlu0 %10429  ;;  %v10950_v5 = vld [vmem:[#allocation2 + $0x188] sm:$0xff] }
 0x486   :  { %v12628_v32 = vrot.slane %v12627_v2, 1  ;;  %v11787_v35 = vrot.slane %v11773_v21, %v21378_v39  ;;  %v11788_v38 = vcombine.high %v11780_v58, %v11780_v58  ;;  %v12651_v40 = vsel %vm12342_vm9, %v11780_v58, -inf  ;;  %9854 = vst.msk [vmem:[#allocation2 + $0x1a0] sm:$0xff] %vm5820_vm2, %v9818_v27  ;;  %11320 = vmatprep.mubr.bf16.mxu1 %v10950_v5 }
 0x487   :  { %v12634_v43 = vmax.f32 %v12632_v10, %v12633_v55  ;;  %v12642_v8 = vrot.slane %v12641_v4, 1  ;;  %v12648_v14 = vmax.f32 %v12646_v24, %v12647_v19  ;;  %v12652_v37 = vrot.slane %v12651_v40, 4  ;;  %10280 = vst.msk [vmem:[#allocation2 + $0x1a0] sm:$0xff] %vm7966_vm3, %v10244_v56  ;;  %11321 = vmatmul.mubr.bf16.gmra.mrb[64].mxu1 %v10949_v23 }
 0x488   :  { %v20459_v57 = vmax.f32 %v12627_v2, %v12628_v32  ;;  %v11789_v11 = vcombine.high %v11787_v35, %v11787_v35  ;;  %v12658_v62 = vsel %vm12342_vm9, %v11788_v38, -inf  ;;  %v12665_v30 = vsel %vm12342_vm9, %v11787_v35, -inf  ;;  %10466 = vst.msk [vmem:[#allocation2 + $0x1a0] sm:$0xff] %vm8921_vm7, %v10430_v18 }
 0x489   :  { %v12635_v25 = vrot.slane %v12634_v43, 1  ;;  %v12643_v33 = vmax.f32 %v12641_v4, %v12642_v8  ;;  %v12649_v50 = vrot.slane %v12648_v14, 1  ;;  %v12653_v13 = vmax.f32 %v12651_v40, %v12652_v37 }
 0x48a   :  { %v12659_v61 = vrot.slane %v12658_v62, 4  ;;  %v12666_v17 = vrot.slane %v12665_v30, 4  ;;  %v12672_v28 = vsel %vm12342_vm9, %v11789_v11, -inf  ;;  %v11420_v9 = vadd.f32 %v21411_v63, %v11243_v51  ;;  %v20469_v6 = vpop.f32.mrb[32].mxu1 }
 0x48b   :  { %v20466_v22 = vmax.f32 %v12634_v43, %v12635_v25  ;;  %v12650_v45 = vmax.f32 %v12648_v14, %v12649_v50  ;;  %v13369_v36 = vmax.f32 %v20433_v3, %v12643_v33  ;;  %v12654_v1 = vrot.slane %v12653_v13, 2  ;;  %v11260_v10 = vpop.f32.mrb[33].mxu1 }
 0x48c   :  { %v12660_v41 = vmax.f32 %v12658_v62, %v12659_v61  ;;  %v12667_v0 = vmax.f32 %v12665_v30, %v12666_v17  ;;  %v12673_v54 = vrot.slane %v12672_v28, 4  ;;  %v11526_v20 = vmax.f32 %v11420_v9, 0.0  ;;  %v20476_v21 = vpop.f32.mrb[34].mxu1  ;;  %v10933_v10 = vld [vmem:[#allocation2 + $0x100] sm:$0xff] }
 0x48d   :  { %v13370_v26 = vmax.f32 %v20435_v34, %v12650_v45  ;;  %v13517_v44 = vsel %vm13497_vm11, %v13369_v36, %v20424_v52  ;;  %v12655_v29 = vmax.f32 %v12653_v13, %v12654_v1  ;;  %v11246_v48 = vadd.f32 %v20451_v53, %v20225_v12  ;;  %v10714_v55 = vpop.permute.xlu0 %10713  ;;  %v11263_v52 = vpop.f32.mrb[35].mxu1 }
 0x48e   :  { %v12661_v7 = vrot.slane %v12660_v41, 2  ;;  %v12668_v24 = vrot.slane %v12667_v0, 2  ;;  %v12674_v3 = vmax.f32 %v12672_v28, %v12673_v54  ;;  %v11790_v2 = vcombine.high %v11526_v20, %v11526_v20  ;;  %10750 = vst.msk [vmem:[#allocation2 + $0x1a0] sm:$0xff] %vm9348_vm8, %v10714_v55 }
 0x48f   :  { %v12656_v58 = vrot.slane %v12655_v29, 1  ;;  %v13518_v27 = vsel %vm13499_vm12, %v13370_v26, %v13517_v44  ;;  %v11797_v56 = vrot.slane %v11526_v20, %v21378_v39  ;;  %v11423_v34 = vadd.f32 %v19810_v46, %v11246_v48  ;;  %v10952_v44 = vld [vmem:[#allocation2 + $0x198] sm:$0xff] }
 0x490   :  { %v12662_v4 = vmax.f32 %v12660_v41, %v12661_v7  ;;  %v12669_v19 = vmax.f32 %v12667_v0, %v12668_v24  ;;  %v12675_v51 = vrot.slane %v12674_v3, 2  ;;  %v11804_v12 = vrot.slane %v11790_v2, %v21378_v39 }
 0x491   :  { %v12657_v32 = vmax.f32 %v12655_v29, %v12656_v58  ;;  %v11805_v35 = vcombine.high %v11797_v56, %v11797_v56  ;;  %v12679_v38 = vsel %vm12342_vm9, %v11797_v56, -inf  ;;  %v11527_v40 = vmax.f32 %v11423_v34, 0.0 }
 0x492   :  { %v12663_v43 = vrot.slane %v12662_v4, 1  ;;  %v12670_v8 = vrot.slane %v12669_v19, 1  ;;  %v12676_v14 = vmax.f32 %v12674_v3, %v12675_v51  ;;  %v11806_v37 = vcombine.high %v11804_v12, %v11804_v12 }
 0x493   :  { %v13371_v46 = vmax.f32 %v20438_v49, %v12657_v32  ;;  %v12680_v11 = vrot.slane %v12679_v38, 4  ;;  %v12686_v62 = vsel %vm12342_vm9, %v11805_v35, -inf  ;;  %v12693_v30 = vsel %vm12342_vm9, %v11804_v12, -inf }
 0x494   :  { %v12664_v18 = vmax.f32 %v12662_v4, %v12663_v43  ;;  %v12671_v5 = vmax.f32 %v12669_v19, %v12670_v8  ;;  %v12677_v25 = vrot.slane %v12676_v14, 1  ;;  %v12687_v33 = vrot.slane %v12686_v62, 4  ;;  %v10936_v43 = vld [vmem:[#allocation2 + $0x118] sm:$0xff] }
 0x495   :  { %v13519_v50 = vsel %vm13501_vm14, %v13371_v46, %v13518_v27  ;;  %v12681_v13 = vmax.f32 %v12679_v38, %v12680_v11  ;;  %v12694_v23 = vrot.slane %v12693_v30, 4  ;;  %v12700_v61 = vsel %vm12342_vm9, %v11806_v37, -inf  ;;  %v10953_v41 = vld [vmem:[#allocation2 + $0x1a0] sm:$0xff] }
 0x496   :  { %v12678_v17 = vmax.f32 %v12676_v14, %v12677_v25  ;;  %v13372_v28 = vmax.f32 %v20444_v47, %v12664_v18  ;;  %v13373_v49 = vmax.f32 %v20459_v57, %v12671_v5  ;;  %v12688_v63 = vmax.f32 %v12686_v62, %v12687_v33  ;;  %11328 = vmatprep.mubr.bf16.mxu1 %v10953_v41  ;;  %v10939_v62 = vld [vmem:[#allocation2 + $0x130] sm:$0xff]  ;;  %v21412_v25 = vld [vmem:[#allocation11_spill] sm:$0xff] }
 0x497   :  { %v12682_v9 = vrot.slane %v12681_v13, 2  ;;  %v12695_v45 = vmax.f32 %v12693_v30, %v12694_v23  ;;  %v12701_v36 = vrot.slane %v12700_v61, 4  ;;  %v11807_v1 = vcombine.high %v11527_v40, %v11527_v40  ;;  %11329 = vmatmul.mubr.bf16.gmra.mrb[68].mxu1 %v10952_v44 }
 0x498   :  { %v13374_v0 = vmax.f32 %v20466_v22, %v12678_v17  ;;  %v13520_v54 = vsel %vm13503_vm6, %v13372_v28, %v13519_v50  ;;  %v12689_v20 = vrot.slane %v12688_v63, 2  ;;  %v11814_v26 = vrot.slane %v11527_v40, %v21378_v39  ;;  %14157 = vmatprep.mubr.msk.bf16.mxu1 %vm5820_vm2, %v10933_v10 }
 0x499   :  { %v13521_v29 = vsel %vm13505_vm13, %v13373_v49, %v13520_v54  ;;  %v12683_v47 = vmax.f32 %v12681_v13, %v12682_v9  ;;  %v12696_v48 = vrot.slane %v12695_v45, 2  ;;  %v12702_v57 = vmax.f32 %v12700_v61, %v12701_v36 }
 0x49a   :  { %v13522_v7 = vsel %vm13507_vm15, %v13374_v0, %v13521_v29  ;;  %v11821_v24 = vrot.slane %v11807_v1, %v21378_v39  ;;  %v11822_v3 = vcombine.high %v11814_v26, %v11814_v26  ;;  %v12690_v22 = vmax.f32 %v12688_v63, %v12689_v20  ;;  %v10942_v29 = vld [vmem:[#allocation2 + $0x148] sm:$0xff] }
 0x49b   :  { %13576 = vst [vmem:[%s21032_s5 + $0x10] sm:$0xff] %v13522_v7  ;;  %v12707_v2 = vsel %vm12342_vm9, %v11814_v26, -inf  ;;  %v12684_v58 = vrot.slane %v12683_v47, 1  ;;  %v12697_v55 = vmax.f32 %v12695_v45, %v12696_v48  ;;  %v12703_v52 = vrot.slane %v12702_v57, 2 }
 0x49c   :  { %v11823_v27 = vcombine.high %v11821_v24, %v11821_v24  ;;  %v12708_v56 = vrot.slane %v12707_v2, 4  ;;  %v12714_v34 = vsel %vm12342_vm9, %v11822_v3, -inf  ;;  %v12721_v19 = vsel %vm12342_vm9, %v11821_v24, -inf }
 0x49d   :  { %v12715_v4 = vrot.slane %v12714_v34, 4  ;;  %v12691_v12 = vrot.slane %v12690_v22, 1  ;;  %v12722_v35 = vrot.slane %v12721_v19, 4  ;;  %v20505_v38 = vmax.f32 %v12683_v47, %v12684_v58 }
 0x49e   :  { %v12728_v51 = vsel %vm12342_vm9, %v11823_v27, -inf  ;;  %v12709_v32 = vmax.f32 %v12707_v2, %v12708_v56  ;;  %v11251_v8 = vadd.f32 %v20451_v53, %v20315_v16  ;;  %v11254_v14 = vadd.f32 %v20451_v53, %v20318_v15  ;;  %v21413_v16 = vld [vmem:[#allocation19_spill] sm:$0xff] }
 0x49f   :  { %v12729_v40 = vrot.slane %v12728_v51, 4  ;;  %v12698_v37 = vrot.slane %v12697_v55, 1  ;;  %v20511_v46 = vmax.f32 %v12702_v57, %v12703_v52  ;;  %v12723_v11 = vmax.f32 %v12721_v19, %v12722_v35  ;;  %14158 = vmatmul.mubr.msk.bf16.vlgmr.msra.gmra.mrb[72].mxu1 %vm5820_vm2, %v10936_v43 }
 0x4a0   :  { %v11259_v30 = vadd.f32 %v20451_v53, %v20469_v6  ;;  %v12716_v18 = vmax.f32 %v12714_v34, %v12715_v4  ;;  %14161 = vmatprep.mubr.msk.bf16.mxu1 %vm5820_vm2, %v10939_v62  ;;  %v11428_v33 = vadd.f32 %v21412_v25, %v11251_v8  ;;  %v11431_v50 = vadd.f32 %v21413_v16, %v11254_v14  ;;  %v10948_v25 = vld [vmem:[#allocation2 + $0x178] sm:$0xff] }
 0x4a1   :  { %v12730_v5 = vmax.f32 %v12728_v51, %v12729_v40  ;;  %v12710_v13 = vrot.slane %v12709_v32, 2  ;;  %v12724_v15 = vrot.slane %v12723_v11, 2  ;;  %v11262_v61 = vadd.f32 %v20451_v53, %v20476_v21 }
 0x4a2   :  { %v20520_v23 = vadd.f32 %v20200_v42, %v11259_v30  ;;  %v12692_v17 = vmax.f32 %v12690_v22, %v12691_v12  ;;  %v11528_v49 = vmax.f32 %v11428_v33, 0.0  ;;  %v11529_v6 = vmax.f32 %v11431_v50, 0.0 }
 0x4a3   :  { %v12731_v28 = vrot.slane %v12730_v5, 2  ;;  %v20524_v63 = vmax.f32 %v12697_v55, %v12698_v37  ;;  %v12705_v9 = vrot.slane %v20511_v46, 1  ;;  %v12725_v45 = vmax.f32 %v12723_v11, %v12724_v15 }
 0x4a4   :  { %v20528_v36 = vadd.f32 %v20208_v31, %v11262_v61  ;;  %v12717_v1 = vrot.slane %v12716_v18, 2  ;;  %v11824_v0 = vcombine.high %v11528_v49, %v11528_v49  ;;  %v11831_v42 = vrot.slane %v11528_v49, %v21378_v39  ;;  %v10945_v31 = vld [vmem:[#allocation2 + $0x160] sm:$0xff] }
 0x4a5   :  { %v12732_v41 = vmax.f32 %v12730_v5, %v12731_v28  ;;  %v12711_v54 = vmax.f32 %v12709_v32, %v12710_v13  ;;  %v12726_v20 = vrot.slane %v12725_v45, 1  ;;  %v11841_v21 = vcombine.high %v11529_v6, %v11529_v6  ;;  %v10951_v13 = vld [vmem:[#allocation2 + $0x190] sm:$0xff] }
 0x4a6   :  { %v11848_v26 = vrot.slane %v11529_v6, %v21378_v39  ;;  %v11838_v47 = vrot.slane %v11824_v0, %v21378_v39  ;;  %v11839_v48 = vcombine.high %v11831_v42, %v11831_v42  ;;  %v12735_v57 = vsel %vm12342_vm9, %v11831_v42, -inf }
 0x4a7   :  { %v12733_v44 = vrot.slane %v12732_v41, 1  ;;  %v12727_v10 = vmax.f32 %v12725_v45, %v12726_v20  ;;  %14162 = vmatmul.mubr.msk.bf16.gmra.mrb[76].mxu1 %vm5820_vm2, %v10942_v29  ;;  %v12736_v7 = vrot.slane %v12735_v57, 4  ;;  %v11855_v24 = vrot.slane %v11841_v21, %v21378_v39 }
 0x4a8   :  { %v11856_v3 = vcombine.high %v11848_v26, %v11848_v26  ;;  %14165 = vmatprep.mubr.msk.bf16.mxu1 %vm5820_vm2, %v10945_v31  ;;  %v11840_v2 = vcombine.high %v11838_v47, %v11838_v47  ;;  %v12742_v58 = vsel %vm12342_vm9, %v11839_v48, -inf  ;;  %v12749_v27 = vsel %vm12342_vm9, %v11838_v47, -inf }
 0x4a9   :  { %v12734_v22 = vmax.f32 %v12732_v41, %v12733_v44  ;;  %v13375_v56 = vmax.f32 %v20505_v38, %v12727_v10  ;;  %v12737_v34 = vmax.f32 %v12735_v57, %v12736_v7  ;;  %v12743_v55 = vrot.slane %v12742_v58, 4 }
 0x4aa   :  { %v12750_v52 = vrot.slane %v12749_v27, 4  ;;  %v12718_v4 = vmax.f32 %v12716_v18, %v12717_v1  ;;  %v12756_v51 = vsel %vm12342_vm9, %v11840_v2, -inf  ;;  %v12763_v12 = vsel %vm12342_vm9, %v11848_v26, -inf }
 0x4ab   :  { %v13376_v19 = vmax.f32 %v12692_v17, %v12734_v22  ;;  %v12738_v32 = vrot.slane %v12737_v34, 2  ;;  %v12744_v35 = vmax.f32 %v12742_v58, %v12743_v55  ;;  %v12757_v43 = vrot.slane %v12756_v51, 4 }
 0x4ac   :  { %v12751_v40 = vmax.f32 %v12749_v27, %v12750_v52  ;;  %v12764_v14 = vrot.slane %v12763_v12, 4  ;;  %v12770_v37 = vsel %vm12342_vm9, %v11856_v3, -inf  ;;  %v12777_v38 = vsel %vm12342_vm9, %v11855_v24, -inf }
 0x4ad   :  { %v13523_v8 = vsel %vm13495_vm10, %v13376_v19, %v13375_v56  ;;  %v12739_v11 = vmax.f32 %v12737_v34, %v12738_v32  ;;  %v12745_v62 = vrot.slane %v12744_v35, 2  ;;  %v12758_v18 = vmax.f32 %v12756_v51, %v12757_v43 }
 0x4ae   :  { %v12752_v30 = vrot.slane %v12751_v40, 2  ;;  %v12712_v5 = vrot.slane %v12711_v54, 1  ;;  %v11857_v33 = vcombine.high %v11855_v24, %v11855_v24  ;;  %v12765_v16 = vmax.f32 %v12763_v12, %v12764_v14 }
 0x4af   :  { %v12771_v50 = vrot.slane %v12770_v37, 4  ;;  %14166 = vmatmul.mubr.msk.bf16.gmra.mrb[80].mxu1 %vm5820_vm2, %v10948_v25  ;;  %v12740_v15 = vrot.slane %v12739_v11, 1  ;;  %v12746_v61 = vmax.f32 %v12744_v35, %v12745_v62  ;;  %v12759_v28 = vrot.slane %v12758_v18, 2 }
 0x4b0   :  { %v12753_v17 = vmax.f32 %v12751_v40, %v12752_v30  ;;  %v12706_v49 = vmax.f32 %v20511_v46, %v12705_v9  ;;  %v12719_v6 = vrot.slane %v12718_v4, 1  ;;  %14169 = vmatprep.mubr.msk.bf16.mxu1 %vm5820_vm2, %v10951_v13  ;;  %v12778_v45 = vrot.slane %v12777_v38, 4 }
 0x4b1   :  { %v11530_v1 = vmax.f32 %v20520_v23, 0.0  ;;  %v12741_v41 = vmax.f32 %v12739_v11, %v12740_v15  ;;  %v12747_v0 = vrot.slane %v12746_v61, 1  ;;  %v12760_v20 = vmax.f32 %v12758_v18, %v12759_v28 }
 0x4b2   :  { %v12754_v42 = vrot.slane %v12753_v17, 1  ;;  %v12713_v21 = vmax.f32 %v12711_v54, %v12712_v5  ;;  %v12766_v26 = vrot.slane %v12765_v16, 2  ;;  %v12772_v44 = vmax.f32 %v12770_v37, %v12771_v50  ;;  %v10954_v54 = vld [vmem:[#allocation2 + $0x1a8] sm:$0xff] }
 0x4b3   :  { %v12784_v29 = vsel %vm12342_vm9, %v11857_v33, -inf  ;;  %v12748_v47 = vmax.f32 %v12746_v61, %v12747_v0  ;;  %v12761_v57 = vrot.slane %v12760_v20, 1  ;;  %v13377_v46 = vmax.f32 %v20524_v63, %v12741_v41 }
 0x4b4   :  { %v12755_v48 = vmax.f32 %v12753_v17, %v12754_v42  ;;  %v12720_v9 = vmax.f32 %v12718_v4, %v12719_v6  ;;  %v12779_v10 = vmax.f32 %v12777_v38, %v12778_v45  ;;  %v12767_v3 = vmax.f32 %v12765_v16, %v12766_v26 }
 0x4b5   :  { %v12762_v31 = vmax.f32 %v12760_v20, %v12761_v57  ;;  %v13378_v7 = vmax.f32 %v12706_v49, %v12748_v47  ;;  %v13524_v23 = vsel %vm13497_vm11, %v13377_v46, %v13523_v8  ;;  %v12773_v22 = vrot.slane %v12772_v44, 2 }
 0x4b6   :  { %v13379_v24 = vmax.f32 %v12713_v21, %v12755_v48  ;;  %v12785_v2 = vrot.slane %v12784_v29, 4  ;;  %v11858_v56 = vcombine.high %v11530_v1, %v11530_v1  ;;  %v11865_v34 = vrot.slane %v11530_v1, %v21378_v39 }
 0x4b7   :  { %v13380_v58 = vmax.f32 %v12720_v9, %v12762_v31  ;;  %v13525_v27 = vsel %vm13499_vm12, %v13378_v7, %v13524_v23  ;;  %14170 = vmatmul.mubr.msk.bf16.gmra.mrb[84].mxu1 %vm5820_vm2, %v10954_v54  ;;  %v12780_v55 = vrot.slane %v12779_v10, 2  ;;  %v12768_v12 = vrot.slane %v12767_v3, 1 }
 0x4b8   :  { %v13526_v63 = vsel %vm13501_vm14, %v13379_v24, %v13525_v27  ;;  %v11872_v4 = vrot.slane %v11858_v56, %v21378_v39  ;;  %v11873_v19 = vcombine.high %v11865_v34, %v11865_v34  ;;  %v12791_v51 = vsel %vm12342_vm9, %v11865_v34, -inf }
 0x4b9   :  { %v20557_v52 = vsel %vm13503_vm6, %v13380_v58, %v13526_v63  ;;  %v12786_v32 = vmax.f32 %v12784_v29, %v12785_v2  ;;  %v12792_v35 = vrot.slane %v12791_v51, 4  ;;  %v11531_v40 = vmax.f32 %v20528_v36, 0.0 }
 0x4ba   :  { %v12774_v43 = vmax.f32 %v12772_v44, %v12773_v22  ;;  %v11874_v8 = vcombine.high %v11872_v4, %v11872_v4  ;;  %v12798_v14 = vsel %vm12342_vm9, %v11873_v19, -inf  ;;  %v12805_v37 = vsel %vm12342_vm9, %v11872_v4, -inf }
 0x4bb   :  { %v12793_v38 = vmax.f32 %v12791_v51, %v12792_v35  ;;  %v12799_v11 = vrot.slane %v12798_v14, 4  ;;  %v12806_v62 = vrot.slane %v12805_v37, 4  ;;  %v11875_v30 = vcombine.high %v11531_v40, %v11531_v40 }
 0x4bc   :  { %v12781_v18 = vmax.f32 %v12779_v10, %v12780_v55  ;;  %v12812_v5 = vsel %vm12342_vm9, %v11874_v8, -inf  ;;  %v11882_v25 = vrot.slane %v11531_v40, %v21378_v39  ;;  %v12787_v33 = vrot.slane %v12786_v32, 2 }
 0x4bd   :  { %v12800_v16 = vmax.f32 %v12798_v14, %v12799_v11  ;;  %v12807_v50 = vmax.f32 %v12805_v37, %v12806_v62  ;;  %v12813_v13 = vrot.slane %v12812_v5, 4  ;;  %v12769_v36 = vmax.f32 %v12767_v3, %v12768_v12 }
 0x4be   :  { %v11889_v15 = vrot.slane %v11875_v30, %v21378_v39  ;;  %v11890_v61 = vcombine.high %v11882_v25, %v11882_v25  ;;  %v12819_v17 = vsel %vm12342_vm9, %v11882_v25, -inf  ;;  %v12775_v28 = vrot.slane %v12774_v43, 1 }
 0x4bf   :  { %v12794_v49 = vrot.slane %v12793_v38, 2  ;;  %v12808_v6 = vrot.slane %v12807_v50, 2  ;;  %v12814_v45 = vmax.f32 %v12812_v5, %v12813_v13  ;;  %v12820_v41 = vrot.slane %v12819_v17, 4 }
 0x4c0   :  { %v11891_v1 = vcombine.high %v11889_v15, %v11889_v15  ;;  %v12826_v0 = vsel %vm12342_vm9, %v11890_v61, -inf  ;;  %v12833_v42 = vsel %vm12342_vm9, %v11889_v15, -inf  ;;  %v12782_v20 = vrot.slane %v12781_v18, 1 }
 0x4c1   :  { %v12801_v21 = vrot.slane %v12800_v16, 2  ;;  %v12809_v26 = vmax.f32 %v12807_v50, %v12808_v6  ;;  %v12815_v44 = vrot.slane %v12814_v45, 2  ;;  %v12821_v29 = vmax.f32 %v12819_v17, %v12820_v41 }
 0x4c2   :  { %v12827_v47 = vrot.slane %v12826_v0, 4  ;;  %v12834_v48 = vrot.slane %v12833_v42, 4  ;;  %v12840_v57 = vsel %vm12342_vm9, %v11891_v1, -inf  ;;  %v12788_v46 = vmax.f32 %v12786_v32, %v12787_v33 }
 0x4c3   :  { %v12795_v9 = vmax.f32 %v12793_v38, %v12794_v49  ;;  %v12810_v10 = vrot.slane %v12809_v26, 1  ;;  %v12816_v31 = vmax.f32 %v12814_v45, %v12815_v44  ;;  %v12822_v7 = vrot.slane %v12821_v29, 2 }
 0x4c4   :  { %v12828_v24 = vmax.f32 %v12826_v0, %v12827_v47  ;;  %v12835_v23 = vmax.f32 %v12833_v42, %v12834_v48  ;;  %v12841_v3 = vrot.slane %v12840_v57, 4  ;;  %v12776_v22 = vmax.f32 %v12774_v43, %v12775_v28 }
 0x4c5   :  { %v12802_v2 = vmax.f32 %v12800_v16, %v12801_v21  ;;  %v12811_v54 = vmax.f32 %v12809_v26, %v12810_v10  ;;  %v12817_v58 = vrot.slane %v12816_v31, 1  ;;  %v12823_v27 = vmax.f32 %v12821_v29, %v12822_v7 }
 0x4c6   :  { %v12829_v56 = vrot.slane %v12828_v24, 2  ;;  %v12836_v34 = vrot.slane %v12835_v23, 2  ;;  %v12842_v63 = vmax.f32 %v12840_v57, %v12841_v3  ;;  %v12789_v55 = vrot.slane %v12788_v46, 1 }
 0x4c7   :  { %v12796_v4 = vrot.slane %v12795_v9, 1  ;;  %v12818_v19 = vmax.f32 %v12816_v31, %v12817_v58  ;;  %v13381_v51 = vmax.f32 %v12769_v36, %v12811_v54  ;;  %v12824_v12 = vrot.slane %v12823_v27, 1 }
 0x4c8   :  { %v12830_v32 = vmax.f32 %v12828_v24, %v12829_v56  ;;  %v12837_v35 = vmax.f32 %v12835_v23, %v12836_v34  ;;  %v12843_v40 = vrot.slane %v12842_v63, 2  ;;  %v12783_v8 = vmax.f32 %v12781_v18, %v12782_v20 }
 0x4c9   :  { %v12803_v14 = vrot.slane %v12802_v2, 1  ;;  %v13382_v37 = vmax.f32 %v12776_v22, %v12818_v19  ;;  %v13528_v43 = vsel %vm13505_vm13, %v13381_v51, %v20557_v52  ;;  %v12825_v38 = vmax.f32 %v12823_v27, %v12824_v12 }
 0x4ca   :  { %v12831_v11 = vrot.slane %v12830_v32, 1  ;;  %v12838_v62 = vrot.slane %v12837_v35, 1  ;;  %v12844_v30 = vmax.f32 %v12842_v63, %v12843_v40  ;;  %v12790_v5 = vmax.f32 %v12788_v46, %v12789_v55 }
 0x4cb   :  { %v12797_v25 = vmax.f32 %v12795_v9, %v12796_v4  ;;  %v13529_v33 = vsel %vm13507_vm15, %v13382_v37, %v13528_v43  ;;  %v13383_v13 = vmax.f32 %v12783_v8, %v12825_v38  ;;  %v12804_v61 = vmax.f32 %v12802_v2, %v12803_v14 }
 0x4cc   :  { %13577 = vst [vmem:[%s21032_s5 + $0x18] sm:$0xff] %v13529_v33  ;;  %v12832_v16 = vmax.f32 %v12830_v32, %v12831_v11  ;;  %v12839_v50 = vmax.f32 %v12837_v35, %v12838_v62  ;;  %v12845_v18 = vrot.slane %v12844_v30, 1  ;;  %v11266_v36 = vpop.f32.mrb[36].mxu1 }
 0x4cd   :  { %v11267_v15 = vadd.f32 %v20451_v53, %v11266_v36  ;;  %v11268_v52 = vpop.f32.mrb[37].mxu1 }
 0x4ce   :  { %v12846_v17 = vmax.f32 %v12844_v30, %v12845_v18  ;;  %v13384_v28 = vmax.f32 %v12790_v5, %v12832_v16  ;;  %v13385_v49 = vmax.f32 %v12797_v25, %v12839_v50  ;;  %v11269_v6 = vpop.f32.mrb[38].mxu1 }
 0x4cf   :  { %v11444_v45 = vadd.f32 %v20194_v59, %v11267_v15  ;;  %v11270_v1 = vadd.f32 %v20451_v53, %v11269_v6  ;;  %v11271_v41 = vpop.f32.mrb[39].mxu1 }
 0x4d0   :  { %v13386_v0 = vmax.f32 %v12804_v61, %v12846_v17  ;;  %v13530_v42 = vsel %vm13495_vm10, %v13384_v28, %v13383_v13 }
 0x4d1   :  { %v13531_v20 = vsel %vm13497_vm11, %v13385_v49, %v13530_v42  ;;  %v20582_v21 = vmax.f32 %v11444_v45, 0.0  ;;  %v11447_v26 = vadd.f32 %v20204_v60, %v11270_v1 }
 0x4d2   :  { %v13532_v44 = vsel %vm13499_vm12, %v13386_v0, %v13531_v20 }
 0x4d3   :  { %v11899_v29 = vrot.slane %v20582_v21, %v21378_v39  ;;  %v11533_v47 = vmax.f32 %v11447_v26, 0.0 }
 0x4d5   :  { %v11907_v48 = vcombine.high %v11899_v29, %v11899_v29  ;;  %v12847_v59 = vsel %vm12342_vm9, %v11899_v29, -inf  ;;  %v11909_v57 = vcombine.high %v11533_v47, %v11533_v47 }
 0x4d6   :  { %v12848_v46 = vrot.slane %v12847_v59, 4 }
 0x4d7   :  { %v12854_v9 = vsel %vm12342_vm9, %v11907_v48, -inf  ;;  %v11923_v10 = vrot.slane %v11909_v57, %v21378_v39  ;;  %v11892_v48 = vcombine.high %v20582_v21, %v20582_v21 }
 0x4d8   :  { %v12849_v31 = vmax.f32 %v12847_v59, %v12848_v46  ;;  %v12855_v7 = vrot.slane %v12854_v9, 4  ;;  %v11916_v59 = vrot.slane %v11533_v47, %v21378_v39 }
 0x4d9   :  { %v11925_v24 = vcombine.high %v11923_v10, %v11923_v10  ;;  %v12889_v60 = vsel %vm12342_vm9, %v11923_v10, -inf  ;;  %v11906_v57 = vrot.slane %v11892_v48, %v21378_v39 }
 0x4da   :  { %v12850_v23 = vrot.slane %v12849_v31, 2  ;;  %v12856_v3 = vmax.f32 %v12854_v9, %v12855_v7  ;;  %v12890_v22 = vrot.slane %v12889_v60, 4  ;;  %v11924_v46 = vcombine.high %v11916_v59, %v11916_v59 }
 0x4db   :  { %v12896_v2 = vsel %vm12342_vm9, %v11925_v24, -inf  ;;  %v11908_v10 = vcombine.high %v11906_v57, %v11906_v57  ;;  %v12875_v24 = vsel %vm12342_vm9, %v11916_v59, -inf }
 0x4dc   :  { %v12857_v54 = vrot.slane %v12856_v3, 2  ;;  %v12851_v58 = vmax.f32 %v12849_v31, %v12850_v23  ;;  %v12891_v27 = vmax.f32 %v12889_v60, %v12890_v22  ;;  %v12897_v56 = vrot.slane %v12896_v2, 4 }
 0x4dd   :  { %v12882_v23 = vsel %vm12342_vm9, %v11924_v46, -inf  ;;  %v12868_v21 = vsel %vm12342_vm9, %v11908_v10, -inf  ;;  %v12876_v22 = vrot.slane %v12875_v24, 4 }
 0x4de   :  { %v12858_v34 = vmax.f32 %v12856_v3, %v12857_v54  ;;  %v12892_v63 = vrot.slane %v12891_v27, 2  ;;  %v12898_v55 = vmax.f32 %v12896_v2, %v12897_v56  ;;  %v12852_v4 = vrot.slane %v12851_v58, 1 }
 0x4df   :  { %v12861_v3 = vsel %vm12342_vm9, %v11906_v57, -inf  ;;  %v12883_v47 = vrot.slane %v12882_v23, 4  ;;  %v12869_v54 = vrot.slane %v12868_v21, 4 }
 0x4e0   :  { %v12893_v19 = vmax.f32 %v12891_v27, %v12892_v63  ;;  %v12899_v51 = vrot.slane %v12898_v55, 2  ;;  %v12859_v12 = vrot.slane %v12858_v34, 1  ;;  %v12853_v40 = vmax.f32 %v12851_v58, %v12852_v4 }
 0x4e1   :  { %v12862_v2 = vrot.slane %v12861_v3, 4  ;;  %v12877_v58 = vmax.f32 %v12875_v24, %v12876_v22  ;;  %v12884_v27 = vmax.f32 %v12882_v23, %v12883_v47 }
 0x4e2   :  { %v12894_v32 = vrot.slane %v12893_v19, 1  ;;  %v12900_v35 = vmax.f32 %v12898_v55, %v12899_v51  ;;  %v12860_v38 = vmax.f32 %v12858_v34, %v12859_v12  ;;  %v12870_v34 = vmax.f32 %v12868_v21, %v12869_v54 }
 0x4e3   :  { %v12863_v56 = vmax.f32 %v12861_v3, %v12862_v2  ;;  %v12878_v63 = vrot.slane %v12877_v58, 2  ;;  %v12885_v55 = vrot.slane %v12884_v27, 2 }
 0x4e4   :  { %v12895_v8 = vmax.f32 %v12893_v19, %v12894_v32  ;;  %v12901_v14 = vrot.slane %v12900_v35, 1  ;;  %v12871_v51 = vrot.slane %v12870_v34, 2 }
 0x4e5   :  { %v12864_v19 = vrot.slane %v12863_v56, 2 }
 0x4e6   :  { %v12902_v11 = vmax.f32 %v12900_v35, %v12901_v14  ;;  %v13387_v62 = vmax.f32 %v12853_v40, %v12895_v8  ;;  %v12879_v35 = vmax.f32 %v12877_v58, %v12878_v63  ;;  %v12886_v8 = vmax.f32 %v12884_v27, %v12885_v55 }
 0x4e7   :  { %v20593_v37 = vpop.f32.mrb[40].mxu1  ;;  %v12865_v14 = vmax.f32 %v12863_v56, %v12864_v19 }
 0x4e8   :  { %v11276_v43 = vpop.f32.mrb[41].mxu1  ;;  %v13388_v25 = vmax.f32 %v12860_v38, %v12902_v11  ;;  %v13533_v33 = vsel %vm13501_vm14, %v13387_v62, %v13532_v44  ;;  %v12880_v38 = vrot.slane %v12879_v35, 1  ;;  %v12887_v62 = vrot.slane %v12886_v8, 1 }
 0x4e9   :  { %v20595_v30 = vpop.f32.mrb[42].mxu1  ;;  %v12872_v43 = vmax.f32 %v12870_v34, %v12871_v51 }
 0x4ea   :  { %v11279_v5 = vpop.f32.mrb[43].mxu1  ;;  %v20603_v17 = vsel %vm13503_vm6, %v13388_v25, %v13533_v33  ;;  %v12866_v33 = vrot.slane %v12865_v14, 1  ;;  %v20641_v48 = vmax.f32 %v12886_v8, %v12887_v62 }
 0x4eb   :  { %v11275_v5 = vadd.f32 %v20451_v53, %v20593_v37 }
 0x4ec   :  { %v20648_v10 = vmax.f32 %v12865_v14, %v12866_v33 }
 0x4f4   :  { %v11282_v16 = vpop.f32.mrb[44].mxu1 }
 0x4f5   :  { %v11284_v50 = vpop.f32.mrb[45].mxu1  ;;  %v11283_v11 = vadd.f32 %v20451_v53, %v11282_v16 }
 0x4f6   :  { %v11285_v18 = vpop.f32.mrb[46].mxu1  ;;  %v12873_v50 = vrot.slane %v12872_v43, 1 }
 0x4f7   :  { %v11287_v13 = vpop.f32.mrb[47].mxu1 }
 0x4f8   :  { %v11286_v13 = vadd.f32 %v20451_v53, %v11285_v18 }
 0x4fc   :  { %v20598_v36 = vpop.f32.mrb[48].mxu1 }
 0x4fd   :  { %v11292_v15 = vpop.f32.mrb[49].mxu1  ;;  %v20645_v37 = vadd.f32 %v20451_v53, %v20598_v36 }
 0x4fe   :  { %v20600_v52 = vpop.f32.mrb[50].mxu1 }
 0x4ff   :  { %v11295_v61 = vpop.f32.mrb[51].mxu1 }
 0x50d   :  { %v20605_v28 = vpop.f32.mrb[52].mxu1 }
 0x50e   :  { %v11300_v49 = vpop.f32.mrb[53].mxu1 }
 0x50f   :  { %v20607_v6 = vpop.f32.mrb[54].mxu1  ;;  %v11278_v49 = vadd.f32 %v20451_v53, %v20595_v30  ;;  %v20650_v30 = vmax.f32 %v12872_v43, %v12873_v50 }
 0x510   :  { %v11303_v45 = vpop.f32.mrb[55].mxu1 }
 0x527   :  { %v20609_v1 = vpop.f32.mrb[56].mxu1 }
 0x528   :  { %v11308_v41 = vpop.f32.mrb[57].mxu1 }
 0x529   :  { %v20611_v0 = vpop.f32.mrb[58].mxu1 }
 0x52a   :  { %v11311_v42 = vpop.f32.mrb[59].mxu1 }
 0x52b   :  { %v20639_v42 = vmax.f32 %v12879_v35, %v12880_v38 }
 0x541   :  { %v20613_v20 = vpop.f32.mrb[60].mxu1 }
 0x542   :  { %v11316_v26 = vpop.f32.mrb[61].mxu1 }
 0x543   :  { %v20615_v44 = vpop.f32.mrb[62].mxu1 }
 0x544   :  { %v11319_v29 = vpop.f32.mrb[63].mxu1 }
 0x55a   :  { %v20621_v9 = vpop.f32.mrb[64].mxu1 }
 0x55b   :  { %v11324_v31 = vpop.f32.mrb[65].mxu1 }
 0x55c   :  { %v20623_v7 = vpop.f32.mrb[66].mxu1  ;;  %v20654_v31 = vadd.f32 %v20451_v53, %v20605_v28 }
 0x55d   :  { %v11327_v60 = vpop.f32.mrb[67].mxu1 }
 0x56a   :  { %v20629_v4 = vpop.f32.mrb[68].mxu1 }
 0x56b   :  { %v11332_v12 = vpop.f32.mrb[69].mxu1 }
 0x56c   :  { %v20631_v32 = vpop.f32.mrb[70].mxu1 }
 0x56d   :  { %v11335_v40 = vpop.f32.mrb[71].mxu1 }
 0x572   :  { %v14159_v25 = vpop.f32.mrb[72].mxu1 }
 0x573   :  { %v11460_v15 = vadd.f32 %v14159_v25, %v11283_v11  ;;  %v11451_v61 = vpop.f32.mrb[73].mxu1 }
 0x574   :  { %v11452_v45 = vadd.f32 %v11451_v61, %v11275_v5  ;;  %v14160_v41 = vpop.f32.mrb[74].mxu1 }
 0x575   :  { %v11536_v26 = vmax.f32 %v11460_v15, 0.0  ;;  %v11463_v16 = vadd.f32 %v14160_v41, %v11286_v13  ;;  %v11454_v29 = vpop.f32.mrb[75].mxu1 }
 0x576   :  { %v11534_v59 = vmax.f32 %v11452_v45, 0.0  ;;  %v11455_v18 = vadd.f32 %v11454_v29, %v11278_v49 }
 0x577   :  { %v11960_v57 = vcombine.high %v11536_v26, %v11536_v26  ;;  %v11967_v46 = vrot.slane %v11536_v26, %v21378_v39  ;;  %v20657_v23 = vmax.f32 %v11463_v16, 0.0 }
 0x578   :  { %v11926_v24 = vcombine.high %v11534_v59, %v11534_v59  ;;  %v11933_v60 = vrot.slane %v11534_v59, %v21378_v39  ;;  %v20661_v22 = vmax.f32 %v11455_v18, 0.0 }
 0x579   :  { %v11974_v36 = vrot.slane %v11960_v57, %v21378_v39  ;;  %v11975_v3 = vcombine.high %v11967_v46, %v11967_v46  ;;  %v12959_v21 = vsel %vm12342_vm9, %v11967_v46, -inf }
 0x57a   :  { %v12960_v47 = vrot.slane %v12959_v21, 4  ;;  %v11940_v2 = vrot.slane %v11926_v24, %v21378_v39  ;;  %v11941_v54 = vcombine.high %v11933_v60, %v11933_v60  ;;  %v12903_v58 = vsel %vm12342_vm9, %v11933_v60, -inf  ;;  %v20665_v53 = vpop.f32.mrb[76].mxu1 }
 0x57b   :  { %v11976_v28 = vcombine.high %v11974_v36, %v11974_v36  ;;  %v12966_v27 = vsel %vm12342_vm9, %v11975_v3, -inf  ;;  %v12973_v56 = vsel %vm12342_vm9, %v11974_v36, -inf  ;;  %v12904_v34 = vrot.slane %v12903_v58, 4  ;;  %v20669_v63 = vpop.f32.mrb[77].mxu1 }
 0x57c   :  { %v12961_v55 = vmax.f32 %v12959_v21, %v12960_v47  ;;  %v12967_v19 = vrot.slane %v12966_v27, 4  ;;  %v12974_v51 = vrot.slane %v12973_v56, 4  ;;  %v11942_v12 = vcombine.high %v11940_v2, %v11940_v2  ;;  %v20671_v35 = vpop.f32.mrb[78].mxu1 }
 0x57d   :  { %v12980_v40 = vsel %vm12342_vm9, %v11976_v28, -inf  ;;  %v12905_v8 = vmax.f32 %v12903_v58, %v12904_v34  ;;  %v12910_v14 = vsel %vm12342_vm9, %v11941_v54, -inf  ;;  %v12917_v43 = vsel %vm12342_vm9, %v11940_v2, -inf  ;;  %v20676_v38 = vpop.f32.mrb[79].mxu1 }
 0x57e   :  { %v12962_v11 = vrot.slane %v12961_v55, 2  ;;  %v12968_v62 = vmax.f32 %v12966_v27, %v12967_v19  ;;  %v12975_v5 = vmax.f32 %v12973_v56, %v12974_v51  ;;  %v12981_v25 = vrot.slane %v12980_v40, 4 }
 0x57f   :  { %v12906_v33 = vrot.slane %v12905_v8, 2  ;;  %v12911_v50 = vrot.slane %v12910_v14, 4  ;;  %v12918_v13 = vrot.slane %v12917_v43, 4  ;;  %v12924_v15 = vsel %vm12342_vm9, %v11942_v12, -inf }
 0x580   :  { %v12963_v61 = vmax.f32 %v12961_v55, %v12962_v11  ;;  %v12969_v49 = vrot.slane %v12968_v62, 2  ;;  %v12976_v45 = vrot.slane %v12975_v5, 2  ;;  %v12982_v41 = vmax.f32 %v12980_v40, %v12981_v25 }
 0x581   :  { %v12907_v26 = vmax.f32 %v12905_v8, %v12906_v33  ;;  %v12912_v16 = vmax.f32 %v12910_v14, %v12911_v50  ;;  %v12919_v29 = vmax.f32 %v12917_v43, %v12918_v13  ;;  %v12925_v59 = vrot.slane %v12924_v15, 4 }
 0x582   :  { %v12964_v18 = vrot.slane %v12963_v61, 1  ;;  %v12970_v57 = vmax.f32 %v12968_v62, %v12969_v49  ;;  %v12977_v46 = vmax.f32 %v12975_v5, %v12976_v45  ;;  %v12983_v24 = vrot.slane %v12982_v41, 2  ;;  %v20679_v60 = vpop.f32.mrb[80].mxu1 }
 0x583   :  { %v12908_v36 = vrot.slane %v12907_v26, 1  ;;  %v12913_v3 = vrot.slane %v12912_v16, 2  ;;  %v12920_v21 = vrot.slane %v12919_v29, 2  ;;  %v12926_v47 = vmax.f32 %v12924_v15, %v12925_v59  ;;  %v20681_v2 = vpop.f32.mrb[81].mxu1 }
 0x584   :  { %v12971_v54 = vrot.slane %v12970_v57, 1  ;;  %v12978_v58 = vrot.slane %v12977_v46, 1  ;;  %v20683_v28 = vmax.f32 %v12982_v41, %v12983_v24  ;;  %v11977_v27 = vcombine.high %v20657_v23, %v20657_v23  ;;  %v20687_v56 = vpop.f32.mrb[82].mxu1 }
 0x585   :  { %v12909_v34 = vmax.f32 %v12907_v26, %v12908_v36  ;;  %v12914_v55 = vmax.f32 %v12912_v16, %v12913_v3  ;;  %v12921_v19 = vmax.f32 %v12919_v29, %v12920_v21  ;;  %v12927_v51 = vrot.slane %v12926_v47, 2  ;;  %v20689_v12 = vpop.f32.mrb[83].mxu1 }
 0x586   :  { %v20691_v40 = vmax.f32 %v12963_v61, %v12964_v18  ;;  %v20693_v8 = vmax.f32 %v12970_v57, %v12971_v54  ;;  %v20695_v14 = vmax.f32 %v12977_v46, %v12978_v58  ;;  %v11984_v43 = vrot.slane %v20657_v23, %v21378_v39 }
 0x587   :  { %v12915_v11 = vrot.slane %v12914_v55, 1  ;;  %v12922_v62 = vrot.slane %v12921_v19, 1  ;;  %v12928_v5 = vmax.f32 %v12926_v47, %v12927_v51  ;;  %v13389_v25 = vmax.f32 %v20648_v10, %v12909_v34 }
 0x588   :  { %v12985_v33 = vrot.slane %v20683_v28, 1  ;;  %v11991_v50 = vrot.slane %v11977_v27, %v21378_v39  ;;  %v11992_v13 = vcombine.high %v11984_v43, %v11984_v43  ;;  %v12987_v15 = vsel %vm12342_vm9, %v11984_v43, -inf }
 0x589   :  { %v12916_v61 = vmax.f32 %v12914_v55, %v12915_v11  ;;  %v12923_v49 = vmax.f32 %v12921_v19, %v12922_v62  ;;  %v12929_v45 = vrot.slane %v12928_v5, 1  ;;  %v13535_v41 = vsel %vm13505_vm13, %v13389_v25, %v20603_v17 }
 0x58a   :  { %v11993_v26 = vcombine.high %v11991_v50, %v11991_v50  ;;  %v12988_v23 = vrot.slane %v12987_v15, 4  ;;  %v12994_v16 = vsel %vm12342_vm9, %v11992_v13, -inf  ;;  %v13001_v29 = vsel %vm12342_vm9, %v11991_v50, -inf  ;;  %v20707_v10 = vpop.f32.mrb[84].mxu1 }
 0x58b   :  { %v12930_v59 = vmax.f32 %v12928_v5, %v12929_v45  ;;  %v13390_v18 = vmax.f32 %v20650_v30, %v12916_v61  ;;  %v13391_v57 = vmax.f32 %v20639_v42, %v12923_v49  ;;  %v12995_v46 = vrot.slane %v12994_v16, 4  ;;  %v20711_v24 = vpop.f32.mrb[85].mxu1 }
 0x58c   :  { %v12989_v36 = vmax.f32 %v12987_v15, %v12988_v23  ;;  %v13002_v3 = vrot.slane %v13001_v29, 4  ;;  %v13008_v17 = vsel %vm12342_vm9, %v11993_v26, -inf  ;;  %v11943_v21 = vcombine.high %v20661_v22, %v20661_v22  ;;  %v20716_v47 = vpop.f32.mrb[86].mxu1 }
 0x58d   :  { %v13392_v54 = vmax.f32 %v20641_v48, %v12930_v59  ;;  %v13536_v58 = vsel %vm13507_vm15, %v13390_v18, %v13535_v41  ;;  %v12996_v27 = vmax.f32 %v12994_v16, %v12995_v46  ;;  %v13009_v30 = vrot.slane %v13008_v17, 4  ;;  %v20720_v34 = vpop.f32.mrb[87].mxu1 }
 0x58e   :  { %13578 = vst [vmem:[%s21032_s5 + $0x20] sm:$0xff] %v13536_v58  ;;  %v12990_v42 = vrot.slane %v12989_v36, 2  ;;  %v13003_v55 = vmax.f32 %v13001_v29, %v13002_v3  ;;  %v11950_v19 = vrot.slane %v20661_v22, %v21378_v39  ;;  %v11957_v51 = vrot.slane %v11943_v21, %v21378_v39 }
 0x58f   :  { %v20729_v43 = vsel %vm13495_vm10, %v13392_v54, %v13391_v57  ;;  %v12997_v48 = vrot.slane %v12996_v27, 2  ;;  %v13010_v11 = vmax.f32 %v13008_v17, %v13009_v30  ;;  %v11476_v62 = vadd.f32 %v20665_v53, %v20654_v31 }
 0x590   :  { %v12991_v5 = vmax.f32 %v12989_v36, %v12990_v42  ;;  %v13004_v25 = vrot.slane %v13003_v55, 2  ;;  %v11958_v50 = vcombine.high %v11950_v19, %v11950_v19  ;;  %v11959_v13 = vcombine.high %v11957_v51, %v11957_v51 }
 0x591   :  { %v12998_v15 = vmax.f32 %v12996_v27, %v12997_v48  ;;  %v13011_v61 = vrot.slane %v13010_v11, 2  ;;  %v12931_v49 = vsel %vm12342_vm9, %v11950_v19, -inf  ;;  %v12945_v22 = vsel %vm12342_vm9, %v11957_v51, -inf }
 0x592   :  { %v12992_v45 = vrot.slane %v12991_v5, 1  ;;  %v13005_v41 = vmax.f32 %v13003_v55, %v13004_v25  ;;  %v12932_v26 = vrot.slane %v12931_v49, 4  ;;  %v12938_v23 = vsel %vm12342_vm9, %v11958_v50, -inf }
 0x593   :  { %v12986_v16 = vmax.f32 %v20683_v28, %v12985_v33  ;;  %v13012_v29 = vmax.f32 %v13010_v11, %v13011_v61  ;;  %v12939_v59 = vrot.slane %v12938_v23, 4  ;;  %v12946_v31 = vrot.slane %v12945_v22, 4 }
 0x594   :  { %v12999_v53 = vrot.slane %v12998_v15, 1  ;;  %v13006_v18 = vrot.slane %v13005_v41, 1  ;;  %v12933_v57 = vmax.f32 %v12931_v49, %v12932_v26  ;;  %v12952_v46 = vsel %vm12342_vm9, %v11959_v13, -inf }
 0x595   :  { %v12993_v36 = vmax.f32 %v12991_v5, %v12992_v45  ;;  %v13013_v3 = vrot.slane %v13012_v29, 1  ;;  %v12940_v17 = vmax.f32 %v12938_v23, %v12939_v59  ;;  %v12947_v21 = vmax.f32 %v12945_v22, %v12946_v31 }
 0x596   :  { %v20738_v54 = vmax.f32 %v13005_v41, %v13006_v18  ;;  %v12934_v58 = vrot.slane %v12933_v57, 2  ;;  %v12953_v27 = vrot.slane %v12952_v46, 4  ;;  %v11540_v30 = vmax.f32 %v11476_v62, 0.0 }
 0x597   :  { %v20740_v42 = vmax.f32 %v13012_v29, %v13013_v3  ;;  %v12941_v28 = vrot.slane %v12940_v17, 2  ;;  %v12948_v33 = vrot.slane %v12947_v21, 2  ;;  %v11468_v55 = vadd.f32 %v20669_v63, %v20645_v37 }
 0x598   :  { %v13397_v19 = vmax.f32 %v20691_v40, %v20738_v54  ;;  %v12935_v51 = vmax.f32 %v12933_v57, %v12934_v58  ;;  %v12954_v48 = vmax.f32 %v12952_v46, %v12953_v27  ;;  %v12028_v11 = vcombine.high %v11540_v30, %v11540_v30 }
 0x599   :  { %v13398_v5 = vmax.f32 %v20693_v8, %v20740_v42  ;;  %v12942_v25 = vmax.f32 %v12940_v17, %v12941_v28  ;;  %v12949_v50 = vmax.f32 %v12947_v21, %v12948_v33  ;;  %v12035_v62 = vrot.slane %v11540_v30, %v21378_v39  ;;  %v20757_v21 = vld [vmem:[%s21031_s4] ss:$0 sm:$0xff] }
 0x59a   :  { %v12936_v13 = vrot.slane %v12935_v51, 1  ;;  %v12955_v61 = vrot.slane %v12954_v48, 2  ;;  %v12042_v49 = vrot.slane %v12028_v11, %v21378_v39  ;;  %v11538_v22 = vmax.f32 %v11468_v55, 0.0 }
 0x59b   :  { %v12943_v45 = vrot.slane %v12942_v25, 1  ;;  %v12950_v37 = vrot.slane %v12949_v50, 1  ;;  %v12043_v63 = vcombine.high %v12035_v62, %v12035_v62  ;;  %v13071_v40 = vsel %vm12342_vm9, %v12035_v62, -inf }
 0x59c   :  { %v12937_v41 = vmax.f32 %v12935_v51, %v12936_v13  ;;  %v12956_v26 = vmax.f32 %v12954_v48, %v12955_v61  ;;  %v12044_v23 = vcombine.high %v12042_v49, %v12042_v49  ;;  %v13072_v29 = vrot.slane %v13071_v40, 4 }
 0x59d   :  { %v12944_v59 = vmax.f32 %v12942_v25, %v12943_v45  ;;  %v12951_v8 = vmax.f32 %v12949_v50, %v12950_v37  ;;  %v13078_v31 = vsel %vm12342_vm9, %v12043_v63, -inf  ;;  %v13085_v18 = vsel %vm12342_vm9, %v12042_v49, -inf }
 0x59e   :  { %v12957_v57 = vrot.slane %v12956_v26, 1  ;;  %v13393_v46 = vmax.f32 %v12937_v41, %v20695_v14  ;;  %v13073_v3 = vmax.f32 %v13071_v40, %v13072_v29  ;;  %v13079_v17 = vrot.slane %v13078_v31, 4 }
 0x59f   :  { %v11294_v54 = vadd.f32 %v20757_v21, %v20600_v52  ;;  %v13394_v58 = vmax.f32 %v12944_v59, %v12986_v16  ;;  %v13395_v27 = vmax.f32 %v12951_v8, %v12993_v36  ;;  %v13086_v30 = vrot.slane %v13085_v18, 4 }
 0x5a0   :  { %v11302_v42 = vadd.f32 %v20757_v21, %v20607_v6  ;;  %v13000_v28 = vmax.f32 %v12998_v15, %v12999_v53  ;;  %v12958_v33 = vmax.f32 %v12956_v26, %v12957_v57  ;;  %v13538_v14 = vsel %vm13497_vm11, %v13393_v46, %v20729_v43 }
 0x5a1   :  { %v13539_v55 = vsel %vm13499_vm12, %v13394_v58, %v13538_v14  ;;  %v13074_v51 = vrot.slane %v13073_v3, 2  ;;  %v13092_v48 = vsel %vm12342_vm9, %v12044_v23, -inf  ;;  %v11994_v11 = vcombine.high %v11538_v22, %v11538_v22 }
 0x5a2   :  { %v20769_v52 = vadd.f32 %v20757_v21, %v20609_v1  ;;  %v13396_v16 = vmax.f32 %v12958_v33, %v13000_v28  ;;  %v13540_v36 = vsel %vm13501_vm14, %v13395_v27, %v13539_v55  ;;  %v13080_v25 = vmax.f32 %v13078_v31, %v13079_v17 }
 0x5a3   :  { %v20774_v6 = vadd.f32 %v20757_v21, %v20611_v0  ;;  %v13087_v15 = vmax.f32 %v13085_v18, %v13086_v30  ;;  %v12001_v43 = vrot.slane %v11538_v22, %v21378_v39  ;;  %v12008_v53 = vrot.slane %v11994_v11, %v21378_v39 }
 0x5a4   :  { %v11315_v50 = vadd.f32 %v20757_v21, %v20613_v20  ;;  %v13541_v62 = vsel %vm13503_vm6, %v13396_v16, %v13540_v36  ;;  %v13093_v1 = vrot.slane %v13092_v48, 4  ;;  %v11479_v13 = vadd.f32 %v20671_v35, %v11302_v42 }
 0x5a5   :  { %v20784_v61 = vadd.f32 %v20757_v21, %v20615_v44  ;;  %v13542_v0 = vsel %vm13505_vm13, %v13397_v19, %v13541_v62  ;;  %v13075_v49 = vmax.f32 %v13073_v3, %v13074_v51  ;;  %v12009_v45 = vcombine.high %v12001_v43, %v12001_v43 }
 0x5a6   :  { %v20789_v22 = vadd.f32 %v20757_v21, %v20621_v9  ;;  %v13543_v37 = vsel %vm13507_vm15, %v13398_v5, %v13542_v0  ;;  %v13081_v20 = vrot.slane %v13080_v25, 2  ;;  %v12010_v63 = vcombine.high %v12008_v53, %v12008_v53 }
 0x5a7   :  { %v20794_v40 = vadd.f32 %v20757_v21, %v20623_v7  ;;  %13579 = vst [vmem:[%s21032_s5 + $0x28] sm:$0xff] %v13543_v37  ;;  %v13088_v44 = vrot.slane %v13087_v15, 2  ;;  %v13015_v35 = vsel %vm12342_vm9, %v12001_v43, -inf  ;;  %v13022_v19 = vsel %vm12342_vm9, %v12009_v45, -inf }
 0x5a8   :  { %v13094_v41 = vmax.f32 %v13092_v48, %v13093_v1  ;;  %v13016_v9 = vrot.slane %v13015_v35, 4  ;;  %v13023_v26 = vrot.slane %v13022_v19, 4  ;;  %v13029_v5 = vsel %vm12342_vm9, %v12008_v53, -inf }
 0x5a9   :  { %v20804_v23 = vadd.f32 %v20757_v21, %v20629_v4  ;;  %v13076_v7 = vrot.slane %v13075_v49, 1  ;;  %v13030_v29 = vrot.slane %v13029_v5, 4  ;;  %v13036_v59 = vsel %vm12342_vm9, %v12010_v63, -inf }
 0x5aa   :  { %v13082_v8 = vmax.f32 %v13080_v25, %v13081_v20  ;;  %v13017_v31 = vmax.f32 %v13015_v35, %v13016_v9  ;;  %v13037_v18 = vrot.slane %v13036_v59, 4  ;;  %v11541_v57 = vmax.f32 %v11479_v13, 0.0 }
 0x5ab   :  { %v13024_v46 = vmax.f32 %v13022_v19, %v13023_v26  ;;  %v13031_v3 = vmax.f32 %v13029_v5, %v13030_v29  ;;  %v11471_v17 = vadd.f32 %v20676_v38, %v11294_v54  ;;  %v11492_v58 = vadd.f32 %v20679_v60, %v11315_v50 }
 0x5ac   :  { %v13089_v27 = vmax.f32 %v13087_v15, %v13088_v44  ;;  %v13095_v30 = vrot.slane %v13094_v41, 2  ;;  %v13038_v42 = vmax.f32 %v13036_v59, %v13037_v18  ;;  %v12045_v28 = vcombine.high %v11541_v57, %v11541_v57 }
 0x5ad   :  { %v20809_v4 = vmax.f32 %v13075_v49, %v13076_v7  ;;  %v13032_v33 = vrot.slane %v13031_v3, 2  ;;  %v12052_v14 = vrot.slane %v11541_v57, %v21378_v39  ;;  %v11539_v55 = vmax.f32 %v11471_v17, 0.0 }
 0x5ae   :  { %v13083_v51 = vrot.slane %v13082_v8, 1  ;;  %v13018_v48 = vrot.slane %v13017_v31, 2  ;;  %v13039_v11 = vrot.slane %v13038_v42, 2  ;;  %v12059_v16 = vrot.slane %v12045_v28, %v21378_v39 }
 0x5af   :  { %v13025_v36 = vrot.slane %v13024_v46, 2  ;;  %v13033_v25 = vmax.f32 %v13031_v3, %v13032_v33  ;;  %v12060_v38 = vcombine.high %v12052_v14, %v12052_v14  ;;  %v13099_v60 = vsel %vm12342_vm9, %v12052_v14, -inf }
 0x5b0   :  { %v13090_v54 = vrot.slane %v13089_v27, 1  ;;  %v13040_v15 = vmax.f32 %v13038_v42, %v13039_v11  ;;  %v12061_v43 = vcombine.high %v12059_v16, %v12059_v16  ;;  %v12011_v53 = vcombine.high %v11539_v55, %v11539_v55 }
 0x5b1   :  { %v13034_v50 = vrot.slane %v13033_v25, 1  ;;  %v13100_v62 = vrot.slane %v13099_v60, 4  ;;  %v13106_v1 = vsel %vm12342_vm9, %v12060_v38, -inf  ;;  %v13113_v13 = vsel %vm12342_vm9, %v12059_v16, -inf }
 0x5b2   :  { %v20816_v0 = vmax.f32 %v13082_v8, %v13083_v51  ;;  %v13096_v49 = vmax.f32 %v13094_v41, %v13095_v30  ;;  %v13041_v45 = vrot.slane %v13040_v15, 1  ;;  %v13107_v37 = vrot.slane %v13106_v1, 4 }
 0x5b3   :  { %v13019_v20 = vmax.f32 %v13017_v31, %v13018_v48  ;;  %v13026_v63 = vmax.f32 %v13024_v46, %v13025_v36  ;;  %v20818_v44 = vmax.f32 %v13033_v25, %v13034_v50  ;;  %v13120_v35 = vsel %vm12342_vm9, %v12061_v43, -inf }
 0x5b4   :  { %v20821_v19 = vmax.f32 %v13040_v15, %v13041_v45  ;;  %v13101_v9 = vmax.f32 %v13099_v60, %v13100_v62  ;;  %v13114_v26 = vrot.slane %v13113_v13, 4  ;;  %v12018_v5 = vrot.slane %v11539_v55, %v21378_v39 }
 0x5b5   :  { %v20824_v7 = vmax.f32 %v13089_v27, %v13090_v54  ;;  %v13401_v29 = vmax.f32 %v20818_v44, %v20809_v4  ;;  %v13108_v41 = vmax.f32 %v13106_v1, %v13107_v37  ;;  %v12025_v59 = vrot.slane %v12011_v53, %v21378_v39 }
 0x5b6   :  { %v13097_v8 = vrot.slane %v13096_v49, 1  ;;  %v13402_v31 = vmax.f32 %v20821_v19, %v20816_v0  ;;  %v13121_v18 = vrot.slane %v13120_v35, 4  ;;  %v12026_v57 = vcombine.high %v12018_v5, %v12018_v5 }
 0x5b7   :  { %v13020_v46 = vrot.slane %v13019_v20, 1  ;;  %v13027_v3 = vrot.slane %v13026_v63, 1  ;;  %v12027_v17 = vcombine.high %v12025_v59, %v12025_v59  ;;  %v13043_v30 = vsel %vm12342_vm9, %v12018_v5, -inf }
 0x5b8   :  { %v13102_v42 = vrot.slane %v13101_v9, 2  ;;  %v13115_v27 = vmax.f32 %v13113_v13, %v13114_v26  ;;  %v13044_v28 = vrot.slane %v13043_v30, 4  ;;  %v13050_v33 = vsel %vm12342_vm9, %v12026_v57, -inf }
 0x5b9   :  { %v13109_v14 = vrot.slane %v13108_v41, 2  ;;  %v13051_v55 = vrot.slane %v13050_v33, 4  ;;  %v13057_v51 = vsel %vm12342_vm9, %v12025_v59, -inf  ;;  %v11544_v48 = vmax.f32 %v11492_v58, 0.0 }
 0x5ba   :  { %v20834_v11 = vmax.f32 %v13096_v49, %v13097_v8  ;;  %v13122_v16 = vmax.f32 %v13120_v35, %v13121_v18  ;;  %v13045_v36 = vmax.f32 %v13043_v30, %v13044_v28  ;;  %v13058_v25 = vrot.slane %v13057_v51, 4 }
 0x5bb   :  { %v20836_v38 = vmax.f32 %v13019_v20, %v13020_v46  ;;  %v20838_v60 = vmax.f32 %v13026_v63, %v13027_v3  ;;  %v13052_v54 = vmax.f32 %v13050_v33, %v13051_v55  ;;  %v13064_v15 = vsel %vm12342_vm9, %v12027_v17, -inf }
 0x5bc   :  { %v13103_v43 = vmax.f32 %v13101_v9, %v13102_v42  ;;  %v13116_v53 = vrot.slane %v13115_v27, 2  ;;  %v13046_v50 = vrot.slane %v13045_v36, 2  ;;  %v13059_v62 = vmax.f32 %v13057_v51, %v13058_v25 }
 0x5bd   :  { %v13110_v1 = vmax.f32 %v13108_v41, %v13109_v14  ;;  %v13053_v13 = vrot.slane %v13052_v54, 2  ;;  %v13065_v45 = vrot.slane %v13064_v15, 4  ;;  %v12096_v58 = vcombine.high %v11544_v48, %v11544_v48 }
 0x5be   :  { %v13123_v49 = vrot.slane %v13122_v16, 2  ;;  %v13047_v37 = vmax.f32 %v13045_v36, %v13046_v50  ;;  %v13060_v35 = vrot.slane %v13059_v62, 2  ;;  %v12103_v26 = vrot.slane %v11544_v48, %v21378_v39 }
 0x5bf   :  { %v13054_v20 = vmax.f32 %v13052_v54, %v13053_v13  ;;  %v13066_v5 = vmax.f32 %v13064_v15, %v13065_v45  ;;  %v12110_v63 = vrot.slane %v12096_v58, %v21378_v39  ;;  %v11484_v59 = vadd.f32 %v20681_v2, %v20769_v52 }
 0x5c0   :  { %v13048_v9 = vrot.slane %v13047_v37, 1  ;;  %v13061_v8 = vmax.f32 %v13059_v62, %v13060_v35  ;;  %v12111_v18 = vcombine.high %v12103_v26, %v12103_v26  ;;  %v13183_v41 = vsel %vm12342_vm9, %v12103_v26, -inf }
 0x5c1   :  { %v13055_v57 = vrot.slane %v13054_v20, 1  ;;  %v13067_v46 = vrot.slane %v13066_v5, 2  ;;  %v12112_v3 = vcombine.high %v12110_v63, %v12110_v63  ;;  %v13184_v17 = vrot.slane %v13183_v41, 4 }
 0x5c2   :  { %v13117_v30 = vmax.f32 %v13115_v27, %v13116_v53  ;;  %v13049_v42 = vmax.f32 %v13047_v37, %v13048_v9  ;;  %v13062_v28 = vrot.slane %v13061_v8, 1  ;;  %v13190_v33 = vsel %vm12342_vm9, %v12111_v18, -inf }
 0x5c3   :  { %v13056_v14 = vmax.f32 %v13054_v20, %v13055_v57  ;;  %v13068_v55 = vmax.f32 %v13066_v5, %v13067_v46  ;;  %v13191_v51 = vrot.slane %v13190_v33, 4  ;;  %v13197_v48 = vsel %vm12342_vm9, %v12110_v63, -inf }
 0x5c4   :  { %v13104_v2 = vrot.slane %v13103_v43, 1  ;;  %v13063_v52 = vmax.f32 %v13061_v8, %v13062_v28  ;;  %v13403_v36 = vmax.f32 %v13049_v42, %v20824_v7  ;;  %v13185_v25 = vmax.f32 %v13183_v41, %v13184_v17 }
 0x5c5   :  { %v13111_v54 = vrot.slane %v13110_v1, 1  ;;  %v13069_v15 = vrot.slane %v13068_v55, 1  ;;  %v13404_v50 = vmax.f32 %v13056_v14, %v20834_v11  ;;  %v13204_v27 = vsel %vm12342_vm9, %v12112_v3, -inf }
 0x5c6   :  { %v13399_v53 = vmax.f32 %v20836_v38, %v13063_v52  ;;  %v13192_v62 = vmax.f32 %v13190_v33, %v13191_v51  ;;  %v13198_v13 = vrot.slane %v13197_v48, 4  ;;  %v11542_v45 = vmax.f32 %v11484_v59, 0.0 }
 0x5c7   :  { %v13118_v58 = vrot.slane %v13117_v30, 1  ;;  %v13124_v37 = vmax.f32 %v13122_v16, %v13123_v49  ;;  %v13070_v35 = vmax.f32 %v13068_v55, %v13069_v15  ;;  %v11495_v26 = vadd.f32 %v20687_v56, %v20784_v61 }
 0x5c8   :  { %v13186_v20 = vrot.slane %v13185_v25, 2  ;;  %v13205_v7 = vrot.slane %v13204_v27, 4  ;;  %v12062_v5 = vcombine.high %v11542_v45, %v11542_v45  ;;  %v12069_v63 = vrot.slane %v11542_v45, %v21378_v39 }
 0x5c9   :  { %v20857_v11 = vadd.f32 %v20757_v21, %v20631_v32  ;;  %v20859_v9 = vmax.f32 %v13103_v43, %v13104_v2  ;;  %v20861_v38 = vmax.f32 %v13110_v1, %v13111_v54  ;;  %v13400_v59 = vmax.f32 %v20838_v60, %v13070_v35 }
 0x5ca   :  { %v13193_v16 = vrot.slane %v13192_v62, 2  ;;  %v13199_v49 = vmax.f32 %v13197_v48, %v13198_v13  ;;  %v12076_v8 = vrot.slane %v12062_v5, %v21378_v39  ;;  %v12077_v56 = vcombine.high %v12069_v63, %v12069_v63 }
 0x5cb   :  { %v20865_v61 = vmax.f32 %v13117_v30, %v13118_v58  ;;  %v13125_v18 = vrot.slane %v13124_v37, 1  ;;  %v13544_v41 = vsel %vm13495_vm10, %v13400_v59, %v13399_v53  ;;  %v13127_v57 = vsel %vm12342_vm9, %v12069_v63, -inf }
 0x5cc   :  { %v13545_v32 = vsel %vm13497_vm11, %v13401_v29, %v13544_v41  ;;  %v13187_v21 = vmax.f32 %v13185_v25, %v13186_v20  ;;  %v13206_v43 = vmax.f32 %v13204_v27, %v13205_v7  ;;  %v12078_v60 = vcombine.high %v12076_v8, %v12076_v8 }
 0x5cd   :  { %v13546_v1 = vsel %vm13499_vm12, %v13402_v31, %v13545_v32  ;;  %v13128_v46 = vrot.slane %v13127_v57, 4  ;;  %v13134_v3 = vsel %vm12342_vm9, %v12077_v56, -inf  ;;  %v11545_v17 = vmax.f32 %v11495_v26, 0.0 }
 0x5ce   :  { %v13547_v30 = vsel %vm13501_vm14, %v13403_v36, %v13546_v1  ;;  %v13194_v42 = vmax.f32 %v13192_v62, %v13193_v16  ;;  %v13200_v28 = vrot.slane %v13199_v49, 2  ;;  %v13135_v33 = vrot.slane %v13134_v3, 4 }
 0x5cf   :  { %v13548_v4 = vsel %vm13503_vm6, %v13404_v50, %v13547_v30  ;;  %v13129_v44 = vmax.f32 %v13127_v57, %v13128_v46  ;;  %v13141_v29 = vsel %vm12342_vm9, %v12076_v8, -inf  ;;  %v13148_v14 = vsel %vm12342_vm9, %v12078_v60, -inf }
 0x5d0   :  { %v13188_v55 = vrot.slane %v13187_v21, 1  ;;  %v13136_v0 = vmax.f32 %v13134_v3, %v13135_v33  ;;  %v13142_v19 = vrot.slane %v13141_v29, 4  ;;  %v13149_v31 = vrot.slane %v13148_v14, 4 }
 0x5d1   :  { %v13207_v51 = vrot.slane %v13206_v43, 2  ;;  %v12113_v48 = vcombine.high %v11545_v17, %v11545_v17  ;;  %v12120_v2 = vrot.slane %v11545_v17, %v21378_v39  ;;  %v11487_v52 = vadd.f32 %v20689_v12, %v20774_v6 }
 0x5d2   :  { %v13130_v36 = vrot.slane %v13129_v44, 2  ;;  %v13143_v25 = vmax.f32 %v13141_v29, %v13142_v19  ;;  %v13150_v54 = vmax.f32 %v13148_v14, %v13149_v31  ;;  %v11508_v15 = vadd.f32 %v20707_v10, %v20804_v23 }
 0x5d3   :  { %v20887_v50 = vmax.f32 %v13124_v37, %v13125_v18  ;;  %v13195_v27 = vrot.slane %v13194_v42, 1  ;;  %v20889_v53 = vmax.f32 %v13199_v49, %v13200_v28  ;;  %v12127_v62 = vrot.slane %v12113_v48, %v21378_v39 }
 0x5d4   :  { %v13137_v13 = vrot.slane %v13136_v0, 2  ;;  %v13144_v45 = vrot.slane %v13143_v25, 2  ;;  %v13151_v58 = vrot.slane %v13150_v54, 2  ;;  %v13211_v35 = vsel %vm12342_vm9, %v12120_v2, -inf }
 0x5d5   :  { %v20893_v26 = vmax.f32 %v13187_v21, %v13188_v55  ;;  %v20895_v12 = vmax.f32 %v13206_v43, %v13207_v51  ;;  %v12129_v6 = vcombine.high %v12127_v62, %v12127_v62  ;;  %v13225_v20 = vsel %vm12342_vm9, %v12127_v62, -inf }
 0x5d6   :  { %v20898_v10 = vmax.f32 %v13129_v44, %v13130_v36  ;;  %v13145_v23 = vmax.f32 %v13143_v25, %v13144_v45  ;;  %v13152_v37 = vmax.f32 %v13150_v54, %v13151_v58  ;;  %v12128_v7 = vcombine.high %v12120_v2, %v12120_v2 }
 0x5d7   :  { %v13202_v5 = vrot.slane %v20889_v53, 1  ;;  %v13212_v63 = vrot.slane %v13211_v35, 4  ;;  %v13226_v59 = vrot.slane %v13225_v20, 4  ;;  %v13232_v16 = vsel %vm12342_vm9, %v12129_v6, -inf }
 0x5d8   :  { %v20902_v49 = vmax.f32 %v13194_v42, %v13195_v27  ;;  %v20904_v8 = vmax.f32 %v13136_v0, %v13137_v13  ;;  %v13146_v56 = vrot.slane %v13145_v23, 1  ;;  %v13153_v18 = vrot.slane %v13152_v37, 1 }
 0x5d9   :  { %v13209_v41 = vrot.slane %v20895_v12, 1  ;;  %v13227_v57 = vmax.f32 %v13225_v20, %v13226_v59  ;;  %v13233_v32 = vrot.slane %v13232_v16, 4  ;;  %v11543_v21 = vmax.f32 %v11487_v52, 0.0 }
 0x5da   :  { %v13132_v43 = vrot.slane %v20898_v10, 1  ;;  %v13147_v60 = vmax.f32 %v13145_v23, %v13146_v56  ;;  %v13154_v1 = vmax.f32 %v13152_v37, %v13153_v18  ;;  %v13218_v46 = vsel %vm12342_vm9, %v12128_v7, -inf }
 0x5db   :  { %v13213_v3 = vmax.f32 %v13211_v35, %v13212_v63  ;;  %v13228_v17 = vrot.slane %v13227_v57, 2  ;;  %v13234_v30 = vmax.f32 %v13232_v16, %v13233_v32  ;;  %v12079_v42 = vcombine.high %v11543_v21, %v11543_v21 }
 0x5dc   :  { %v13139_v28 = vrot.slane %v20904_v8, 1  ;;  %v13405_v33 = vmax.f32 %v20859_v9, %v13147_v60  ;;  %v13406_v44 = vmax.f32 %v20861_v38, %v13154_v1  ;;  %v12086_v29 = vrot.slane %v11543_v21, %v21378_v39 }
 0x5dd   :  { %v13219_v14 = vrot.slane %v13218_v46, 4  ;;  %v13229_v55 = vmax.f32 %v13227_v57, %v13228_v17  ;;  %v13235_v0 = vrot.slane %v13234_v30, 2  ;;  %v12093_v19 = vrot.slane %v12079_v42, %v21378_v39 }
 0x5de   :  { %v13549_v31 = vsel %vm13505_vm13, %v13405_v33, %v13548_v4  ;;  %v12094_v51 = vcombine.high %v12086_v29, %v12086_v29  ;;  %v13155_v48 = vsel %vm12342_vm9, %v12086_v29, -inf  ;;  %v11548_v2 = vmax.f32 %v11508_v15, 0.0 }
 0x5df   :  { %v13550_v52 = vsel %vm13507_vm15, %v13406_v44, %v13549_v31  ;;  %v13214_v36 = vrot.slane %v13213_v3, 2  ;;  %v13230_v25 = vrot.slane %v13229_v55, 1  ;;  %v13236_v9 = vmax.f32 %v13234_v30, %v13235_v0 }
 0x5e0   :  { %13580 = vst [vmem:[%s21032_s5 + $0x30] sm:$0xff] %v13550_v52  ;;  %v12095_v38 = vcombine.high %v12093_v19, %v12093_v19  ;;  %v13156_v54 = vrot.slane %v13155_v48, 4  ;;  %v13162_v27 = vsel %vm12342_vm9, %v12094_v51, -inf  ;;  %v13169_v62 = vsel %vm12342_vm9, %v12093_v19, -inf }
 0x5e1   :  { %v13220_v4 = vmax.f32 %v13218_v46, %v13219_v14  ;;  %v20922_v13 = vmax.f32 %v13229_v55, %v13230_v25  ;;  %v13237_v45 = vrot.slane %v13236_v9, 1  ;;  %v13163_v15 = vrot.slane %v13162_v27, 4 }
 0x5e2   :  { %v13157_v58 = vmax.f32 %v13155_v48, %v13156_v54  ;;  %v13170_v35 = vrot.slane %v13169_v62, 4  ;;  %v13176_v6 = vsel %vm12342_vm9, %v12095_v38, -inf  ;;  %v12164_v20 = vcombine.high %v11548_v2, %v11548_v2 }
 0x5e3   :  { %v20925_v23 = vmax.f32 %v13236_v9, %v13237_v45  ;;  %v13411_v37 = vmax.f32 %v20893_v26, %v20922_v13  ;;  %v13164_v7 = vmax.f32 %v13162_v27, %v13163_v15  ;;  %v13177_v63 = vrot.slane %v13176_v6, 4 }
 0x5e4   :  { %v13158_v59 = vrot.slane %v13157_v58, 2  ;;  %v13171_v16 = vmax.f32 %v13169_v62, %v13170_v35  ;;  %v12171_v56 = vrot.slane %v11548_v2, %v21378_v39  ;;  %v12178_v18 = vrot.slane %v12164_v20, %v21378_v39 }
 0x5e5   :  { %v13412_v57 = vmax.f32 %v20902_v49, %v20925_v23  ;;  %v13165_v32 = vrot.slane %v13164_v7, 2  ;;  %v13178_v21 = vmax.f32 %v13176_v6, %v13177_v63  ;;  %v11500_v60 = vadd.f32 %v20711_v24, %v20789_v22 }
 0x5e6   :  { %v13221_v1 = vrot.slane %v13220_v4, 2  ;;  %v13159_v46 = vmax.f32 %v13157_v58, %v13158_v59  ;;  %v13172_v17 = vrot.slane %v13171_v16, 2  ;;  %v12179_v30 = vcombine.high %v12171_v56, %v12171_v56 }
 0x5e7   :  { %v13166_v42 = vmax.f32 %v13164_v7, %v13165_v32  ;;  %v13179_v33 = vrot.slane %v13178_v21, 2  ;;  %v13295_v44 = vsel %vm12342_vm9, %v12171_v56, -inf  ;;  %v13309_v29 = vsel %vm12342_vm9, %v12178_v18, -inf }
 0x5e8   :  { %v13160_v14 = vrot.slane %v13159_v46, 1  ;;  %v13173_v55 = vmax.f32 %v13171_v16, %v13172_v17  ;;  %v13296_v0 = vrot.slane %v13295_v44, 4  ;;  %v13302_v19 = vsel %vm12342_vm9, %v12179_v30, -inf }
 0x5e9   :  { %v13215_v31 = vmax.f32 %v13213_v3, %v13214_v36  ;;  %v13167_v51 = vrot.slane %v13166_v42, 1  ;;  %v13180_v48 = vmax.f32 %v13178_v21, %v13179_v33  ;;  %v12180_v2 = vcombine.high %v12178_v18, %v12178_v18 }
 0x5ea   :  { %v13222_v24 = vmax.f32 %v13220_v4, %v13221_v1  ;;  %v13161_v22 = vmax.f32 %v13159_v46, %v13160_v14  ;;  %v13174_v52 = vrot.slane %v13173_v55, 1  ;;  %v13303_v25 = vrot.slane %v13302_v19, 4 }
 0x5eb   :  { %v13168_v9 = vmax.f32 %v13166_v42, %v13167_v51  ;;  %v13181_v38 = vrot.slane %v13180_v48, 1  ;;  %v13297_v54 = vmax.f32 %v13295_v44, %v13296_v0  ;;  %v13310_v27 = vrot.slane %v13309_v29, 4 }
 0x5ec   :  { %v13133_v62 = vmax.f32 %v20898_v10, %v13132_v43  ;;  %v13140_v45 = vmax.f32 %v20904_v8, %v13139_v28  ;;  %v13175_v3 = vmax.f32 %v13173_v55, %v13174_v52  ;;  %v13407_v36 = vmax.f32 %v20865_v61, %v13161_v22 }
 0x5ed   :  { %v13216_v15 = vrot.slane %v13215_v31, 1  ;;  %v13182_v4 = vmax.f32 %v13180_v48, %v13181_v38  ;;  %v13408_v58 = vmax.f32 %v20887_v50, %v13168_v9  ;;  %v13316_v35 = vsel %vm12342_vm9, %v12180_v2, -inf }
 0x5ee   :  { %v13223_v6 = vrot.slane %v13222_v24, 1  ;;  %v13409_v20 = vmax.f32 %v13133_v62, %v13175_v3  ;;  %v13304_v7 = vmax.f32 %v13302_v19, %v13303_v25  ;;  %v11546_v63 = vmax.f32 %v11500_v60, 0.0 }
 0x5ef   :  { %v13410_v59 = vmax.f32 %v13140_v45, %v13182_v4  ;;  %v13551_v10 = vsel %vm13495_vm10, %v13408_v58, %v13407_v36  ;;  %v13298_v43 = vrot.slane %v13297_v54, 2  ;;  %v13311_v16 = vmax.f32 %v13309_v29, %v13310_v27 }
 0x5f0   :  { %v20951_v8 = vmax.f32 %v20889_v53, %v13202_v5  ;;  %v13552_v61 = vsel %vm13497_vm11, %v13409_v20, %v13551_v10  ;;  %v13317_v28 = vrot.slane %v13316_v35, 4  ;;  %v12130_v50 = vcombine.high %v11546_v63, %v11546_v63 }
 0x5f1   :  { %v20957_v56 = vmax.f32 %v20895_v12, %v13209_v41  ;;  %v20959_v18 = vmax.f32 %v13215_v31, %v13216_v15  ;;  %v13553_v32 = vsel %vm13499_vm12, %v13410_v59, %v13552_v61  ;;  %v12137_v21 = vrot.slane %v11546_v63, %v21378_v39 }
 0x5f2   :  { %v20963_v60 = vmax.f32 %v13222_v24, %v13223_v6  ;;  %v13305_v1 = vrot.slane %v13304_v7, 2  ;;  %v12144_v53 = vrot.slane %v12130_v50, %v21378_v39  ;;  %v13554_v5 = vsel %vm13501_vm14, %v13411_v37, %v13553_v32 }
 0x5f3   :  { %v13299_v46 = vmax.f32 %v13297_v54, %v13298_v43  ;;  %v13312_v17 = vrot.slane %v13311_v16, 2  ;;  %v12145_v12 = vcombine.high %v12137_v21, %v12137_v21  ;;  %v13239_v41 = vsel %vm12342_vm9, %v12137_v21, -inf }
 0x5f4   :  { %v20971_v30 = vmax.f32 %v13316_v35, %v13317_v28  ;;  %v12146_v42 = vcombine.high %v12144_v53, %v12144_v53  ;;  %v13240_v33 = vrot.slane %v13239_v41, 4  ;;  %v13253_v44 = vsel %vm12342_vm9, %v12144_v53, -inf }
 0x5f5   :  { %v13246_v29 = vsel %vm12342_vm9, %v12145_v12, -inf  ;;  %v13254_v14 = vrot.slane %v13253_v44, 4  ;;  %v13555_v26 = vsel %vm13503_vm6, %v13412_v57, %v13554_v5  ;;  %v11511_v13 = vadd.f32 %v20716_v47, %v20857_v11 }
 0x5f6   :  { %v13306_v37 = vmax.f32 %v13304_v7, %v13305_v1  ;;  %v13241_v55 = vmax.f32 %v13239_v41, %v13240_v33  ;;  %v13247_v0 = vrot.slane %v13246_v29, 4  ;;  %v13260_v19 = vsel %vm12342_vm9, %v12146_v42, -inf }
 0x5f7   :  { %v13255_v31 = vmax.f32 %v13253_v44, %v13254_v14  ;;  %v13261_v51 = vrot.slane %v13260_v19, 4  ;;  %v11549_v48 = vmax.f32 %v11511_v13, 0.0  ;;  %v11503_v2 = vadd.f32 %v20720_v34, %v20794_v40 }
 0x5f8   :  { %v13300_v24 = vrot.slane %v13299_v46, 1  ;;  %v20984_v22 = vmax.f32 %v13311_v16, %v13312_v17  ;;  %v13242_v49 = vrot.slane %v13241_v55, 2  ;;  %v13248_v23 = vmax.f32 %v13246_v29, %v13247_v0 }
 0x5f9   :  { %v13256_v57 = vrot.slane %v13255_v31, 2  ;;  %v13262_v52 = vmax.f32 %v13260_v19, %v13261_v51  ;;  %v12181_v25 = vcombine.high %v11549_v48, %v11549_v48  ;;  %v12188_v47 = vrot.slane %v11549_v48, %v21378_v39 }
 0x5fa   :  { %v13319_v11 = vrot.slane %v20971_v30, 2  ;;  %v13243_v9 = vmax.f32 %v13241_v55, %v13242_v49  ;;  %v13249_v38 = vrot.slane %v13248_v23, 2  ;;  %v11547_v54 = vmax.f32 %v11503_v2, 0.0 }
 0x5fb   :  { %v13257_v27 = vmax.f32 %v13255_v31, %v13256_v57  ;;  %v13263_v62 = vrot.slane %v13262_v52, 2  ;;  %v12195_v45 = vrot.slane %v12181_v25, %v21378_v39  ;;  %v12196_v34 = vcombine.high %v12188_v47, %v12188_v47 }
 0x5fc   :  { %v13307_v40 = vrot.slane %v13306_v37, 1  ;;  %v13244_v3 = vrot.slane %v13243_v9, 1  ;;  %v13250_v36 = vmax.f32 %v13248_v23, %v13249_v38  ;;  %v13323_v15 = vsel %vm12342_vm9, %v12188_v47, -inf }
 0x5fd   :  { %v13258_v4 = vrot.slane %v13257_v27, 1  ;;  %v13264_v58 = vmax.f32 %v13262_v52, %v13263_v62  ;;  %v12197_v35 = vcombine.high %v12195_v45, %v12195_v45  ;;  %v12147_v6 = vcombine.high %v11547_v54, %v11547_v54 }
 0x5fe   :  { %v13245_v20 = vmax.f32 %v13243_v9, %v13244_v3  ;;  %v13251_v7 = vrot.slane %v13250_v36, 1  ;;  %v13330_v63 = vsel %vm12342_vm9, %v12196_v34, -inf  ;;  %v13337_v59 = vsel %vm12342_vm9, %v12195_v45, -inf }
 0x5ff   :  { %v13259_v10 = vmax.f32 %v13257_v27, %v13258_v4  ;;  %v13265_v43 = vrot.slane %v13264_v58, 1  ;;  %v13324_v16 = vrot.slane %v13323_v15, 4  ;;  %v13331_v61 = vrot.slane %v13330_v63, 4 }
 0x600   :  { %v13252_v28 = vmax.f32 %v13250_v36, %v13251_v7  ;;  %v13413_v50 = vmax.f32 %v20951_v8, %v13245_v20  ;;  %v13338_v32 = vrot.slane %v13337_v59, 4  ;;  %v13344_v21 = vsel %vm12342_vm9, %v12197_v35, -inf }
 0x601   :  { %v20994_v1 = vmax.f32 %v13299_v46, %v13300_v24  ;;  %v13314_v53 = vrot.slane %v20984_v22, 1  ;;  %v13266_v5 = vmax.f32 %v13264_v58, %v13265_v43  ;;  %v13415_v17 = vmax.f32 %v20959_v18, %v13259_v10 }
 0x602   :  { %v13414_v12 = vmax.f32 %v20957_v56, %v13252_v28  ;;  %v13556_v41 = vsel %vm13505_vm13, %v13413_v50, %v13555_v26  ;;  %v13339_v42 = vmax.f32 %v13337_v59, %v13338_v32  ;;  %v13345_v33 = vrot.slane %v13344_v21, 4 }
 0x603   :  { %v13416_v44 = vmax.f32 %v20963_v60, %v13266_v5  ;;  %v13325_v29 = vmax.f32 %v13323_v15, %v13324_v16  ;;  %v13332_v8 = vmax.f32 %v13330_v63, %v13331_v61  ;;  %v12154_v14 = vrot.slane %v11547_v54, %v21378_v39 }
 0x604   :  { %v13557_v46 = vsel %vm13507_vm15, %v13414_v12, %v13556_v41  ;;  %v13340_v13 = vrot.slane %v13339_v42, 2  ;;  %v13346_v55 = vmax.f32 %v13344_v21, %v13345_v33  ;;  %v12161_v0 = vrot.slane %v12147_v6, %v21378_v39 }
 0x605   :  { %v21004_v19 = vmax.f32 %v13306_v37, %v13307_v40  ;;  %v13320_v56 = vmax.f32 %v20971_v30, %v13319_v11  ;;  %v13558_v18 = vsel %vm13495_vm10, %v13416_v44, %v13415_v17  ;;  %13581 = vst [vmem:[%s21032_s5 + $0x38] sm:$0xff] %v13557_v46  ;;  %v12162_v60 = vcombine.high %v12154_v14, %v12154_v14 }
 0x606   :  { %v13341_v26 = vmax.f32 %v13339_v42, %v13340_v13  ;;  %v13347_v31 = vrot.slane %v13346_v55, 2  ;;  %v12163_v51 = vcombine.high %v12161_v0, %v12161_v0  ;;  %v13267_v48 = vsel %vm12342_vm9, %v12154_v14, -inf }
 0x607   :  { %v13326_v2 = vrot.slane %v13325_v29, 2  ;;  %v13333_v24 = vrot.slane %v13332_v8, 2  ;;  %v13268_v49 = vrot.slane %v13267_v48, 4  ;;  %v13274_v39 = vsel %vm12342_vm9, %v12162_v60, -inf }
 0x608   :  { %v13342_v37 = vrot.slane %v13341_v26, 1  ;;  %v13348_v23 = vmax.f32 %v13346_v55, %v13347_v31  ;;  %v13275_v30 = vrot.slane %v13274_v39, 4  ;;  %v13281_v57 = vsel %vm12342_vm9, %v12161_v0, -inf }
 0x609   :  { %v13321_v52 = vrot.slane %v13320_v56, 1  ;;  %v13269_v25 = vmax.f32 %v13267_v48, %v13268_v49  ;;  %v13282_v47 = vrot.slane %v13281_v57, 4  ;;  %v13288_v11 = vsel %vm12342_vm9, %v12163_v51, -inf }
 0x60a   :  { %v13343_v9 = vmax.f32 %v13341_v26, %v13342_v37  ;;  %v13349_v38 = vrot.slane %v13348_v23, 1  ;;  %v13276_v54 = vmax.f32 %v13274_v39, %v13275_v30  ;;  %v13289_v27 = vrot.slane %v13288_v11, 4 }
 0x60b   :  { %v13327_v62 = vmax.f32 %v13325_v29, %v13326_v2  ;;  %v13334_v45 = vmax.f32 %v13332_v8, %v13333_v24  ;;  %v13270_v34 = vrot.slane %v13269_v25, 2  ;;  %v13283_v40 = vmax.f32 %v13281_v57, %v13282_v47 }
 0x60c   :  { %v13350_v3 = vmax.f32 %v13348_v23, %v13349_v38  ;;  %v13421_v36 = vmax.f32 %v20994_v1, %v13343_v9  ;;  %v13277_v15 = vrot.slane %v13276_v54, 2  ;;  %v13290_v4 = vmax.f32 %v13288_v11, %v13289_v27 }
 0x60d   :  { %v13271_v58 = vmax.f32 %v13269_v25, %v13270_v34  ;;  %v13284_v35 = vrot.slane %v13283_v40, 2  ;;  %v13315_v63 = vmax.f32 %v20984_v22, %v13314_v53  ;;  %v13328_v59 = vrot.slane %v13327_v62, 1 }
 0x60e   :  { %v13422_v6 = vmax.f32 %v21004_v19, %v13350_v3  ;;  %v13278_v20 = vmax.f32 %v13276_v54, %v13277_v15  ;;  %v13291_v7 = vrot.slane %v13290_v4, 2  ;;  %v13322_v16 = vmax.f32 %v13320_v56, %v13321_v52 }
 0x60f   :  { %v13272_v10 = vrot.slane %v13271_v58, 1  ;;  %v13285_v43 = vmax.f32 %v13283_v40, %v13284_v35  ;;  %v13335_v61 = vrot.slane %v13334_v45, 1  ;;  %v13329_v17 = vmax.f32 %v13327_v62, %v13328_v59 }
 0x610   :  { %v13279_v28 = vrot.slane %v13278_v20, 1  ;;  %v13292_v50 = vmax.f32 %v13290_v4, %v13291_v7 }
 0x611   :  { %v13273_v32 = vmax.f32 %v13271_v58, %v13272_v10  ;;  %v13286_v21 = vrot.slane %v13285_v43, 1  ;;  %v13336_v42 = vmax.f32 %v13334_v45, %v13335_v61 }
 0x612   :  { %v13280_v1 = vmax.f32 %v13278_v20, %v13279_v28  ;;  %v13293_v5 = vrot.slane %v13292_v50, 1 }
 0x613   :  { %v13287_v12 = vmax.f32 %v13285_v43, %v13286_v21  ;;  %v13417_v41 = vmax.f32 %v13273_v32, %v13315_v63 }
 0x614   :  { %v13294_v33 = vmax.f32 %v13292_v50, %v13293_v5  ;;  %v13418_v44 = vmax.f32 %v13280_v1, %v13322_v16 }
 0x615   :  { %v13419_v29 = vmax.f32 %v13287_v12, %v13329_v17  ;;  %v13559_v22 = vsel %vm13497_vm11, %v13417_v41, %v13558_v18 }
 0x616   :  { %v13420_v53 = vmax.f32 %v13294_v33, %v13336_v42  ;;  %v13560_v8 = vsel %vm13499_vm12, %v13418_v44, %v13559_v22 }
 0x617   :  { %v13561_v14 = vsel %vm13501_vm14, %v13419_v29, %v13560_v8 }
 0x618   :  { %v13562_v46 = vsel %vm13503_vm6, %v13420_v53, %v13561_v14 }
 0x619   :  { %v13563_v13 = vsel %vm13505_vm13, %v13421_v36, %v13562_v46 }
 0x61a   :  { %v13564_v55 = vsel %vm13507_vm15, %v13422_v6, %v13563_v13 }
 0x61b   :  { %13582 = vst [vmem:[%s21032_s5 + $0x40] sm:$0xff] %v13564_v55 }
 0x61c   :  { %13587 = vsyncpa [#allocation4], 1 }
 0x61d   :  { %13588 = vsyncpa [#allocation6], 1 }

</bundles_post_ra>
